<compile_context>
chip_gen: v5e
topology: v5e:2x2
jax: 0.10.0
libtpu: 0.0.40
codegen_flags: <defaults>
</compile_context>

<pallas_src>
import math
import numpy as np
import jax
import jax.numpy as jnp
from jax import lax
from jax.experimental import pallas as pl
from jax.experimental.pallas import tpu as pltpu


def _round_up(a, m):
    return -(-a // m) * m


# ----------------------------- in-kernel helpers -----------------------------

def _erf_poly(x):
    # Abramowitz & Stegun 7.1.26 erf approximation (max abs err ~1.5e-7); used
    # instead of lax.erf to guarantee Mosaic lowering, well below f32 tolerance.
    a1, a2, a3, a4, a5 = 0.254829592, -0.284496736, 1.421413741, -1.453152027, 1.061405429
    p = 0.3275911
    ax = jnp.abs(x)
    t = 1.0 / (1.0 + p * ax)
    poly = t * (a1 + t * (a2 + t * (a3 + t * (a4 + t * a5))))
    y = 1.0 - poly * jnp.exp(-ax * ax)
    return jnp.where(x >= 0, y, -y)


def _gelu_exact(x):
    # nn.GELU() default is the exact erf formulation.
    return 0.5 * x * (1.0 + _erf_poly(x * (1.0 / math.sqrt(2.0))))


# --------------------------------- kernel ------------------------------------

def _make_icb_kernel(L, H, NB, mdt):
    H2, H4 = 2 * H, 4 * H
    rows = NB * L
    inv_L = 1.0 / L

    def mm(a, b):
        # MXU matmul with optional bf16 inputs, f32 accumulation.
        return jnp.dot(a.astype(mdt), b.astype(mdt), preferred_element_type=jnp.float32)

    def kernel(x_ref, wcat_ref, cmb_ref, shift_ref, dct_ref,
               wfc1_ref, wfc2_ref, w3_ref, b3_ref, o_ref):
        # fused conv1 + three conv2 taps: one 128-lane-wide MXU matmul
        y4 = mm(x_ref[...], wcat_ref[...])                        # (rows, 4H) f32

        # per-row sequence id / position from iota (exact f32 floor trick: rows < 2^24,
        # the 0.5 offset keeps floor() robust to the 1/L rounding) -> no HBM mask constants
        r1 = lax.broadcasted_iota(jnp.int32, (rows, 1), 0).astype(jnp.float32)
        b1 = jnp.floor((r1 + 0.5) * inv_L)                        # sequence index of row
        t1 = r1 - b1 * L                                          # exact position in [0, L)
        not_first = t1 >= 0.5                                     # t != 0
        not_last = t1 <= (L - 1.5)                                # t != L-1

        # lane masks select the H-wide tap blocks; boundary rows are zeroed, which
        # implements the k=3 conv's zero padding at sequence boundaries.
        lane = lax.broadcasted_iota(jnp.int32, (rows, H4), 1)
        ma = ((lane < H) | ((lane >= 2 * H) & (lane < 3 * H))).astype(jnp.float32)
        mb = (((lane >= H) & (lane < 2 * H)) & not_first).astype(jnp.float32)
        mc = ((lane >= 3 * H) & not_last).astype(jnp.float32)

        y_dn = pltpu.roll(y4, 1, 0)                # y_dn[r] = y4[r-1]
        y_up = pltpu.roll(y4, rows - 1, 0)         # y_up[r] = y4[r+1]
        y_sel = y4 * ma + y_dn * mb + y_up * mc

        # combiner packs [conv1 | conv2] (BN scale pre-folded into its columns);
        # add folded conv-bias + BN-shift affine.
        h = mm(y_sel, cmb_ref[...]) + shift_ref[...]              # (rows, 2H)

        # MultiSpectralAttentionLayer1D on both branches packed (fc weights block-diag);
        # per-sequence sum / broadcast via iota-generated 0/1 segment matrices.
        rr = lax.broadcasted_iota(jnp.int32, (NB, rows), 1).astype(jnp.float32)
        bb = jnp.floor((rr + 0.5) * inv_L)
        cc = lax.broadcasted_iota(jnp.int32, (NB, rows), 0).astype(jnp.float32)
        seg = (bb == cc).astype(jnp.float32)                      # (NB, rows)
        dd = lax.broadcasted_iota(jnp.int32, (rows, NB), 1).astype(jnp.float32)
        segt = (b1 == dd).astype(jnp.float32)                     # (rows, NB)

        yw = h * dct_ref[...]                                     # (rows, 2H)
        y = mm(seg, yw)                                           # (NB, 2H) per-seq sum
        z = jnp.maximum(mm(y, wfc1_ref[...]), 0.0)                # (NB, 2Hr)
        s = jax.nn.sigmoid(mm(z, wfc2_ref[...]))                  # (NB, 2H)
        s_rows = mm(segt, s)                                      # (rows, 2H) broadcast
        xs = h * s_rows                                           # [x1 | x2]

        # GELU + cross mix: swap the two H-wide halves of g with a tiny in-kernel
        # permutation matmul (avoids 32-lane slices and a non-128-lane pltpu.roll),
        # then one matmul against vertically duplicated w3.
        g = _gelu_exact(xs)                                       # [g1 | g2]; Dropout(0)=id
        ii = lax.broadcasted_iota(jnp.int32, (H2, H2), 0)
        jj = lax.broadcasted_iota(jnp.int32, (H2, H2), 1)
        swap = (jnp.abs(ii - jj) == H).astype(jnp.float32)        # (2H, 2H) half-swap
        prod = xs * mm(g, swap)                                   # [x1*g2 | x2*g1]

        out = mm(prod, w3_ref[...]) + b3_ref[...]                 # w3 duplicated: (2H, C)
        o_ref[...] = out.astype(o_ref.dtype)

    return kernel


# --------------------------------- wrapper -----------------------------------

def icb_forward(x, params, *, batch_block=32, matmul_dtype=jnp.float32):
    # x: (N, L, C_in) channels-last; L must equal the DCT length (62 for C_in=256).
    # TODO(synk): adaptive_avg_pool1d path for L != c2wh[in_features] is not implemented.
    N, L, C = x.shape
    H = params['w1'].shape[1]
    Hr = params['wfc1'].shape[1]
    assert params['dct'].shape == (L, H), "sequence length must equal DCT length"

    mdt = jnp.dtype(matmul_dtype)
    use_bf16 = (mdt == jnp.dtype(jnp.bfloat16))

    # rows = NB*L must be a sublane multiple (8 for f32 blocks, 16 for bf16 blocks)
    align = 8 if use_bf16 else 4
    NB = min(_round_up(max(1, int(batch_block)), align), _round_up(N, align))
    rows = NB * L
    need = 16 if use_bf16 else 8
    if rows % need != 0:
        raise ValueError(f"batch_block*L={rows} must be a multiple of {need}")

    # pad the batch up to a multiple of NB (sliced off after the call)
    n_pad = _round_up(N, NB)
    n_steps = n_pad // NB
    if n_pad != N:
        x = jnp.concatenate([x, jnp.zeros((n_pad - N, L, C), x.dtype)], axis=0)
    x_flat = x.reshape(n_pad * L, C)          # contiguous collapse -> no data movement
    x_in = x_flat.astype(mdt) if use_bf16 else x_flat

    H2, H4 = 2 * H, 4 * H

    # --- fused / packed constants (all small, built once per call) ---
    w_cat = jnp.concatenate(
        [params['w1'], params['w2_0'], params['w2_1'], params['w2_2']], axis=1)  # (C, 4H)

    # combiner: [h1 | h2] = y_sel @ cmb ; h2 sums the three conv2 taps.
    cmb = np.zeros((H4, H2), np.float32)
    cmb[0:H, 0:H] = np.eye(H, dtype=np.float32)
    for k in range(1, 4):
        cmb[k * H:(k + 1) * H, H:H2] = np.eye(H, dtype=np.float32)
    bns, bnb = params['bn_scale'], params['bn_shift']
    scale2 = jnp.concatenate([bns, bns])                          # (2H,)
    cmb_scaled = jnp.asarray(cmb) * scale2[None, :]               # BN scale folded in
    shift2 = jnp.concatenate([params['b1'] * bns + bnb,
                              params['b2'] * bns + bnb]).reshape(1, H2)

    # DCT weights tiled over the NB sequences (only remaining NB-scaling constant; it
    # is fetched once per call and costs rows*2H*4 B of VMEM).
    dct2 = jnp.tile(jnp.concatenate([params['dct'], params['dct']], axis=1), (NB, 1))

    # shared MSA fc weights, block-diagonal so both branches run packed
    z1 = jnp.zeros((H, Hr), jnp.float32)
    wfc1_bd = jnp.concatenate(
        [jnp.concatenate([params['wfc1'], z1], axis=1),
         jnp.concatenate([z1, params['wfc1']], axis=1)], axis=0)  # (2H, 2Hr)
    z2 = jnp.zeros((Hr, H), jnp.float32)
    wfc2_bd = jnp.concatenate(
        [jnp.concatenate([params['wfc2'], z2], axis=1),
         jnp.concatenate([z2, params['wfc2']], axis=1)], axis=0)  # (2Hr, 2H)

    w3_dup = jnp.concatenate([params['w3'], params['w3']], axis=0)  # (2H, C)
    b3_row = params['b3'].reshape(1, C)

    if use_bf16:
        w_cat = w_cat.astype(mdt)
        cmb_scaled = cmb_scaled.astype(mdt)
        wfc1_bd = wfc1_bd.astype(mdt)
        wfc2_bd = wfc2_bd.astype(mdt)
        w3_dup = w3_dup.astype(mdt)

    consts = [w_cat, cmb_scaled, shift2, dct2, wfc1_bd, wfc2_bd, w3_dup, b3_row]

    # explicit scoped-VMEM budget: double-buffered in/out blocks + constants + generous
    # headroom for in-kernel (rows, 4H) temporaries; capped at 64 MiB for v7x.
    xbytes = rows * C * x_in.dtype.itemsize
    obytes = rows * C * jnp.dtype(x.dtype).itemsize
    cbytes = sum(int(np.prod(a.shape)) * a.dtype.itemsize for a in consts)
    tmpbytes = 16 * rows * H4 * 4
    est = 2 * (xbytes + obytes) + 2 * cbytes + tmpbytes
    vmem_limit = int(min(64 * 2 ** 20, max(32 * 2 ** 20, 2 * est)))

    kernel = _make_icb_kernel(L, H, NB, mdt)

    grid_spec = pltpu.PrefetchScalarGridSpec(
        num_scalar_prefetch=0,
        grid=(n_steps,),
        in_specs=[pl.BlockSpec((rows, C), lambda i: (i, 0))]
                 + [pl.BlockSpec(a.shape, lambda i: (0, 0)) for a in consts],
        out_specs=pl.BlockSpec((rows, C), lambda i: (i, 0)),
    )
    out_flat = pl.pallas_call(
        kernel,
        out_shape=jax.ShapeDtypeStruct((n_pad * L, C), x.dtype),
        grid_spec=grid_spec,
        compiler_params=pltpu.CompilerParams(
            dimension_semantics=("parallel",),
            vmem_limit_bytes=vmem_limit),
    )(x_in, *consts)
    return out_flat.reshape(n_pad, L, C)[:N]


# ------------------------ deterministic parameter setup ----------------------

def get_freq_indices_top16():
    all_top = [0, 1, 2, 4, 8, 10, 12, 14, 18, 24, 28, 32, 40, 48, 50, 60]
    return [int(v / 32) for v in all_top][:16]


def build_dct_filter(length, mapper_x, channel):
    f = np.zeros((channel, length), dtype=np.float32)
    c_part = channel // len(mapper_x)
    for i, u in enumerate(mapper_x):
        for t in range(length):
            v = math.cos(math.pi * u * (t + 0.5) / length) / math.sqrt(length)
            if u != 0:
                v *= math.sqrt(2)
            f[i * c_part:(i + 1) * c_part, t] = v
    return f


def make_params(key, in_features, hidden_features, length):
    C, H = in_features, hidden_features
    Hr = H // 16
    ks = jax.random.split(key, 12)

    def rnd(k, shape, scale):
        return scale * jax.random.normal(k, shape, jnp.float32)

    w1 = rnd(ks[0], (C, H), 1.0 / math.sqrt(C))
    b1 = rnd(ks[1], (H,), 0.05)
    w2 = rnd(ks[2], (3, C, H), 1.0 / math.sqrt(3 * C))
    b2 = rnd(ks[3], (H,), 0.05)
    w3 = rnd(ks[4], (H, C), 1.0 / math.sqrt(H))
    b3 = rnd(ks[5], (C,), 0.05)

    gamma = 1.0 + 0.1 * jax.random.normal(ks[6], (H,), jnp.float32)
    beta = 0.1 * jax.random.normal(ks[7], (H,), jnp.float32)
    running_mean = 0.1 * jax.random.normal(ks[8], (H,), jnp.float32)
    running_var = jnp.abs(jax.random.normal(ks[9], (H,), jnp.float32)) * 0.5 + 0.5
    eps = 1e-5
    bn_scale = gamma / jnp.sqrt(running_var + eps)
    bn_shift = beta - running_mean * bn_scale

    mapper_x = get_freq_indices_top16()
    mapper_x = [u * math.floor(length / 62) for u in mapper_x]
    dct_torch = build_dct_filter(length, mapper_x, H)          # (H, L) torch layout

    wfc1 = rnd(ks[10], (H, Hr), 1.0 / math.sqrt(H))            # == torch fc1 weight.T
    wfc2 = rnd(ks[11], (Hr, H), 1.0 / math.sqrt(Hr))           # == torch fc2 weight.T

    return dict(w1=w1, b1=b1,
                w2_0=w2[0], w2_1=w2[1], w2_2=w2[2], b2=b2,
                w3=w3, b3=b3,
                bn_scale=bn_scale, bn_shift=bn_shift,
                dct=jnp.asarray(dct_torch.T),                  # (L, H) channels-last
                dct_torch=jnp.asarray(dct_torch),              # (H, L) for reference
                wfc1=wfc1, wfc2=wfc2)


# ------------------------- plain-JAX (torch-style) reference -----------------

def icb_reference(x, p):
    xc = jnp.swapaxes(x, 1, 2)                                 # (N, C_in, L)
    w1 = jnp.transpose(p['w1'])[:, :, None]                    # (H, C_in, 1)
    w2 = jnp.transpose(jnp.stack([p['w2_0'], p['w2_1'], p['w2_2']], -1), (1, 0, 2))
    w3 = jnp.transpose(p['w3'])[:, :, None]                    # (C_in, H, 1)
    dn = ('NCH', 'OIH', 'NCH')
    h1 = lax.conv_general_dilated(xc, w1, (1,), 'VALID', dimension_numbers=dn) \
        + p['b1'][None, :, None]
    h2 = lax.conv_general_dilated(xc, w2, (1,), [(1, 1)], dimension_numbers=dn) \
        + p['b2'][None, :, None]

    def bn(h):
        return h * p['bn_scale'][None, :, None] + p['bn_shift'][None, :, None]

    def msa(h):
        y = jnp.sum(h * p['dct_torch'][None], axis=2)          # (N, H)
        z = jnp.maximum(y @ p['wfc1'], 0.0)
        s = jax.nn.sigmoid(z @ p['wfc2'])
        return h * s[:, :, None]

    x1 = msa(bn(h1))
    x2 = msa(bn(h2))
    g1 = jax.nn.gelu(x1, approximate=False)
    g2 = jax.nn.gelu(x2, approximate=False)
    mix = x1 * g2 + x2 * g1
    out = lax.conv_general_dilated(mix, w3, (1,), 'VALID', dimension_numbers=dn) \
        + p['b3'][None, :, None]
    return jnp.swapaxes(out, 1, 2)


# ----------------------------------- main -------------------------------------

if __name__ == "__main__":
    in_features = 256        # c2wh[256] = 62 -> smallest DCT length
    hidden_features = 32     # divisible by 16 (num_freq) and the reduction
    length = 62              # == c2wh[in_features], so no adaptive pooling
    batch = 16               # 2 grid steps with batch_block=8 (keeps both v7x TCs busy)

    key = jax.random.PRNGKey(0)
    kx, kp = jax.random.split(key)
    x = jax.random.normal(kx, (batch, length, in_features), jnp.float32)
    params = make_params(kp, in_features, hidden_features, length)

    ref = jax.block_until_ready(icb_reference(x, params))

    # f32 MXU path (default): exact against the reference
    out = jax.block_until_ready(icb_forward(x, params, batch_block=8))
    assert out.shape == (batch, length, in_features)
    np.testing.assert_allclose(np.asarray(out), np.asarray(ref), rtol=5e-4, atol=5e-4)

    # bf16 MXU path (v6e/v7x perf variant): same structure, loose numeric sanity check
    out_bf16 = jax.block_until_ready(
        icb_forward(x, params, batch_block=8, matmul_dtype=jnp.bfloat16))
    assert out_bf16.shape == (batch, length, in_features)
    assert np.all(np.isfinite(np.asarray(out_bf16)))
    np.testing.assert_allclose(np.asarray(out_bf16), np.asarray(ref), rtol=0.2, atol=0.5)

    print("KERNEL_OK")
</pallas_src>

<mosaic_0001>
module attributes {stable_mosaic.version = 11 : i64} {
  func.func @kernel(%arg0: i32, %arg1: memref<496x256xf32, #tpu.memory_space<vmem>>, %arg2: memref<256x128xf32, #tpu.memory_space<vmem>>, %arg3: memref<128x64xf32, #tpu.memory_space<vmem>>, %arg4: memref<1x64xf32, #tpu.memory_space<vmem>>, %arg5: memref<496x64xf32, #tpu.memory_space<vmem>>, %arg6: memref<64x4xf32, #tpu.memory_space<vmem>>, %arg7: memref<4x64xf32, #tpu.memory_space<vmem>>, %arg8: memref<64x256xf32, #tpu.memory_space<vmem>>, %arg9: memref<1x256xf32, #tpu.memory_space<vmem>>, %arg10: memref<496x256xf32, #tpu.memory_space<vmem>>) attributes {dimension_semantics = [#tpu.dimension_semantics<parallel>], iteration_bounds = array<i64: 2>, scalar_prefetch = 0 : i64, scratch_operands = 0 : i64, tpu.core_type = #tpu.core_type<tc>, window_params = [{transform_indices = @transform_0, window_bounds = array<i64: 496, 256>}, {pipeline_mode = #tpu.pipeline_mode<synchronous>, transform_indices = @transform_1, window_bounds = array<i64: 256, 128>}, {pipeline_mode = #tpu.pipeline_mode<synchronous>, transform_indices = @transform_2, window_bounds = array<i64: 128, 64>}, {pipeline_mode = #tpu.pipeline_mode<synchronous>, transform_indices = @transform_3, window_bounds = array<i64: 1, 64>}, {pipeline_mode = #tpu.pipeline_mode<synchronous>, transform_indices = @transform_4, window_bounds = array<i64: 496, 64>}, {pipeline_mode = #tpu.pipeline_mode<synchronous>, transform_indices = @transform_5, window_bounds = array<i64: 64, 4>}, {pipeline_mode = #tpu.pipeline_mode<synchronous>, transform_indices = @transform_6, window_bounds = array<i64: 4, 64>}, {pipeline_mode = #tpu.pipeline_mode<synchronous>, transform_indices = @transform_7, window_bounds = array<i64: 64, 256>}, {pipeline_mode = #tpu.pipeline_mode<synchronous>, transform_indices = @transform_8, window_bounds = array<i64: 1, 256>}, {transform_indices = @transform_9, window_bounds = array<i64: 496, 256>}]} {
    %c0 = arith.constant 0 : index
    %c0_0 = arith.constant 0 : index
    %0 = vector.load %arg1[%c0, %c0_0] : memref<496x256xf32, #tpu.memory_space<vmem>>, vector<496x256xf32>
    %c0_1 = arith.constant 0 : index
    %c0_2 = arith.constant 0 : index
    %1 = vector.load %arg2[%c0_1, %c0_2] : memref<256x128xf32, #tpu.memory_space<vmem>>, vector<256x128xf32>
    %cst = arith.constant dense<0.000000e+00> : vector<496x128xf32>
    %2 = tpu.matmul %0, %1, %cst {dimension_numbers = #tpu.dot_dimension_numbers<[1], [0], [0], [1], [0, 0, 1, 1], [], []>} : vector<496x256xf32>, vector<256x128xf32>, vector<496x128xf32> -> vector<496x128xf32>
    %3 = tpu.iota {dimensions = array<i32: 0>} : vector<496x1xi32>
    %4 = arith.sitofp %3 : vector<496x1xi32> to vector<496x1xf32>
    %cst_3 = arith.constant 5.000000e-01 : f32
    %5 = vector.broadcast %cst_3 : f32 to vector<496x1xf32>
    %6 = arith.addf %4, %5 : vector<496x1xf32>
    %cst_4 = arith.constant 0.0161290318 : f32
    %7 = vector.broadcast %cst_4 : f32 to vector<496x1xf32>
    %8 = arith.mulf %6, %7 : vector<496x1xf32>
    %9 = math.floor %8 : vector<496x1xf32>
    %cst_5 = arith.constant 6.200000e+01 : f32
    %10 = vector.broadcast %cst_5 : f32 to vector<496x1xf32>
    %11 = arith.mulf %9, %10 : vector<496x1xf32>
    %12 = arith.subf %4, %11 : vector<496x1xf32>
    %cst_6 = arith.constant 5.000000e-01 : f32
    %13 = vector.broadcast %cst_6 : f32 to vector<496x1xf32>
    %14 = arith.cmpf oge, %12, %13 : vector<496x1xf32>
    %cst_7 = arith.constant 6.050000e+01 : f32
    %15 = vector.broadcast %cst_7 : f32 to vector<496x1xf32>
    %16 = arith.cmpf ole, %12, %15 : vector<496x1xf32>
    %17 = tpu.iota {dimensions = array<i32: 1>} : vector<496x128xi32>
    %c32_i32 = arith.constant 32 : i32
    %18 = vector.broadcast %c32_i32 : i32 to vector<496x128xi32>
    %19 = arith.cmpi slt, %17, %18 : vector<496x128xi32>
    %c64_i32 = arith.constant 64 : i32
    %20 = vector.broadcast %c64_i32 : i32 to vector<496x128xi32>
    %21 = arith.cmpi sge, %17, %20 : vector<496x128xi32>
    %c96_i32 = arith.constant 96 : i32
    %22 = vector.broadcast %c96_i32 : i32 to vector<496x128xi32>
    %23 = arith.cmpi slt, %17, %22 : vector<496x128xi32>
    %24 = arith.andi %21, %23 : vector<496x128xi1>
    %25 = arith.ori %19, %24 : vector<496x128xi1>
    %26 = arith.extui %25 : vector<496x128xi1> to vector<496x128xi32>
    %27 = arith.sitofp %26 : vector<496x128xi32> to vector<496x128xf32>
    %c32_i32_8 = arith.constant 32 : i32
    %28 = vector.broadcast %c32_i32_8 : i32 to vector<496x128xi32>
    %29 = arith.cmpi sge, %17, %28 : vector<496x128xi32>
    %c64_i32_9 = arith.constant 64 : i32
    %30 = vector.broadcast %c64_i32_9 : i32 to vector<496x128xi32>
    %31 = arith.cmpi slt, %17, %30 : vector<496x128xi32>
    %32 = arith.andi %29, %31 : vector<496x128xi1>
    %33 = vector.broadcast %14 : vector<496x1xi1> to vector<496x128xi1>
    %34 = arith.andi %32, %33 : vector<496x128xi1>
    %35 = arith.extui %34 : vector<496x128xi1> to vector<496x128xi32>
    %36 = arith.sitofp %35 : vector<496x128xi32> to vector<496x128xf32>
    %c96_i32_10 = arith.constant 96 : i32
    %37 = vector.broadcast %c96_i32_10 : i32 to vector<496x128xi32>
    %38 = arith.cmpi sge, %17, %37 : vector<496x128xi32>
    %39 = vector.broadcast %16 : vector<496x1xi1> to vector<496x128xi1>
    %40 = arith.andi %38, %39 : vector<496x128xi1>
    %41 = arith.extui %40 : vector<496x128xi1> to vector<496x128xi32>
    %42 = arith.sitofp %41 : vector<496x128xi32> to vector<496x128xf32>
    %c1_i32 = arith.constant 1 : i32
    %43 = tpu.dynamic_rotate %2 by %c1_i32 dim 0 : vector<496x128xf32>, i32 -> vector<496x128xf32>
    %c495_i32 = arith.constant 495 : i32
    %44 = tpu.dynamic_rotate %2 by %c495_i32 dim 0 : vector<496x128xf32>, i32 -> vector<496x128xf32>
    %45 = arith.mulf %2, %27 : vector<496x128xf32>
    %46 = arith.mulf %43, %36 : vector<496x128xf32>
    %47 = arith.addf %45, %46 : vector<496x128xf32>
    %48 = arith.mulf %44, %42 : vector<496x128xf32>
    %49 = arith.addf %47, %48 : vector<496x128xf32>
    %c0_11 = arith.constant 0 : index
    %c0_12 = arith.constant 0 : index
    %50 = vector.load %arg3[%c0_11, %c0_12] : memref<128x64xf32, #tpu.memory_space<vmem>>, vector<128x64xf32>
    %cst_13 = arith.constant dense<0.000000e+00> : vector<496x64xf32>
    %51 = tpu.matmul %49, %50, %cst_13 {dimension_numbers = #tpu.dot_dimension_numbers<[1], [0], [0], [1], [0, 0, 1, 1], [], []>} : vector<496x128xf32>, vector<128x64xf32>, vector<496x64xf32> -> vector<496x64xf32>
    %c0_14 = arith.constant 0 : index
    %c0_15 = arith.constant 0 : index
    %52 = vector.load %arg4[%c0_14, %c0_15] : memref<1x64xf32, #tpu.memory_space<vmem>>, vector<1x64xf32>
    %53 = vector.broadcast %52 : vector<1x64xf32> to vector<496x64xf32>
    %54 = arith.addf %51, %53 : vector<496x64xf32>
    %55 = tpu.iota {dimensions = array<i32: 1>} : vector<8x496xi32>
    %56 = arith.sitofp %55 : vector<8x496xi32> to vector<8x496xf32>
    %cst_16 = arith.constant 5.000000e-01 : f32
    %57 = vector.broadcast %cst_16 : f32 to vector<8x496xf32>
    %58 = arith.addf %56, %57 : vector<8x496xf32>
    %cst_17 = arith.constant 0.0161290318 : f32
    %59 = vector.broadcast %cst_17 : f32 to vector<8x496xf32>
    %60 = arith.mulf %58, %59 : vector<8x496xf32>
    %61 = math.floor %60 : vector<8x496xf32>
    %62 = tpu.iota {dimensions = array<i32: 0>} : vector<8x496xi32>
    %63 = arith.sitofp %62 : vector<8x496xi32> to vector<8x496xf32>
    %64 = arith.cmpf oeq, %61, %63 : vector<8x496xf32>
    %65 = arith.extui %64 : vector<8x496xi1> to vector<8x496xi32>
    %66 = arith.sitofp %65 : vector<8x496xi32> to vector<8x496xf32>
    %67 = tpu.iota {dimensions = array<i32: 1>} : vector<496x8xi32>
    %68 = arith.sitofp %67 : vector<496x8xi32> to vector<496x8xf32>
    %69 = vector.broadcast %9 : vector<496x1xf32> to vector<496x8xf32>
    %70 = arith.cmpf oeq, %69, %68 : vector<496x8xf32>
    %71 = arith.extui %70 : vector<496x8xi1> to vector<496x8xi32>
    %72 = arith.sitofp %71 : vector<496x8xi32> to vector<496x8xf32>
    %c0_18 = arith.constant 0 : index
    %c0_19 = arith.constant 0 : index
    %73 = vector.load %arg5[%c0_18, %c0_19] : memref<496x64xf32, #tpu.memory_space<vmem>>, vector<496x64xf32>
    %74 = arith.mulf %54, %73 : vector<496x64xf32>
    %cst_20 = arith.constant dense<0.000000e+00> : vector<8x64xf32>
    %75 = tpu.matmul %66, %74, %cst_20 {dimension_numbers = #tpu.dot_dimension_numbers<[1], [0], [0], [1], [0, 0, 1, 1], [], []>} : vector<8x496xf32>, vector<496x64xf32>, vector<8x64xf32> -> vector<8x64xf32>
    %c0_21 = arith.constant 0 : index
    %c0_22 = arith.constant 0 : index
    %76 = vector.load %arg6[%c0_21, %c0_22] : memref<64x4xf32, #tpu.memory_space<vmem>>, vector<64x4xf32>
    %cst_23 = arith.constant dense<0.000000e+00> : vector<8x4xf32>
    %77 = tpu.matmul %75, %76, %cst_23 {dimension_numbers = #tpu.dot_dimension_numbers<[1], [0], [0], [1], [0, 0, 1, 1], [], []>} : vector<8x64xf32>, vector<64x4xf32>, vector<8x4xf32> -> vector<8x4xf32>
    %cst_24 = arith.constant 0.000000e+00 : f32
    %78 = vector.broadcast %cst_24 : f32 to vector<8x4xf32>
    %79 = arith.maximumf %77, %78 : vector<8x4xf32>
    %c0_25 = arith.constant 0 : index
    %c0_26 = arith.constant 0 : index
    %80 = vector.load %arg7[%c0_25, %c0_26] : memref<4x64xf32, #tpu.memory_space<vmem>>, vector<4x64xf32>
    %cst_27 = arith.constant dense<0.000000e+00> : vector<8x64xf32>
    %81 = tpu.matmul %79, %80, %cst_27 {dimension_numbers = #tpu.dot_dimension_numbers<[1], [0], [0], [1], [0, 0, 1, 1], [], []>} : vector<8x4xf32>, vector<4x64xf32>, vector<8x64xf32> -> vector<8x64xf32>
    %82 = arith.negf %81 : vector<8x64xf32>
    %83 = math.exp %82 : vector<8x64xf32>
    %cst_28 = arith.constant 1.000000e+00 : f32
    %84 = vector.broadcast %cst_28 : f32 to vector<8x64xf32>
    %85 = arith.addf %84, %83 : vector<8x64xf32>
    %86 = arith.divf %84, %85 : vector<8x64xf32>
    %cst_29 = arith.constant dense<0.000000e+00> : vector<496x64xf32>
    %87 = tpu.matmul %72, %86, %cst_29 {dimension_numbers = #tpu.dot_dimension_numbers<[1], [0], [0], [1], [0, 0, 1, 1], [], []>} : vector<496x8xf32>, vector<8x64xf32>, vector<496x64xf32> -> vector<496x64xf32>
    %88 = arith.mulf %54, %87 : vector<496x64xf32>
    %cst_30 = arith.constant 5.000000e-01 : f32
    %89 = vector.broadcast %cst_30 : f32 to vector<496x64xf32>
    %90 = arith.mulf %89, %88 : vector<496x64xf32>
    %cst_31 = arith.constant 0.707106769 : f32
    %91 = vector.broadcast %cst_31 : f32 to vector<496x64xf32>
    %92 = arith.mulf %88, %91 : vector<496x64xf32>
    %93 = math.absf %92 : vector<496x64xf32>
    %cst_32 = arith.constant 0.327591091 : f32
    %94 = vector.broadcast %cst_32 : f32 to vector<496x64xf32>
    %95 = arith.mulf %94, %93 : vector<496x64xf32>
    %cst_33 = arith.constant 1.000000e+00 : f32
    %96 = vector.broadcast %cst_33 : f32 to vector<496x64xf32>
    %97 = arith.addf %96, %95 : vector<496x64xf32>
    %cst_34 = arith.constant 1.000000e+00 : f32
    %98 = vector.broadcast %cst_34 : f32 to vector<496x64xf32>
    %99 = arith.divf %98, %97 : vector<496x64xf32>
    %cst_35 = arith.constant 1.06140542 : f32
    %100 = vector.broadcast %cst_35 : f32 to vector<496x64xf32>
    %101 = arith.mulf %99, %100 : vector<496x64xf32>
    %cst_36 = arith.constant -1.45315206 : f32
    %102 = vector.broadcast %cst_36 : f32 to vector<496x64xf32>
    %103 = arith.addf %102, %101 : vector<496x64xf32>
    %104 = arith.mulf %99, %103 : vector<496x64xf32>
    %cst_37 = arith.constant 1.42141378 : f32
    %105 = vector.broadcast %cst_37 : f32 to vector<496x64xf32>
    %106 = arith.addf %105, %104 : vector<496x64xf32>
    %107 = arith.mulf %99, %106 : vector<496x64xf32>
    %cst_38 = arith.constant -0.284496725 : f32
    %108 = vector.broadcast %cst_38 : f32 to vector<496x64xf32>
    %109 = arith.addf %108, %107 : vector<496x64xf32>
    %110 = arith.mulf %99, %109 : vector<496x64xf32>
    %cst_39 = arith.constant 0.254829586 : f32
    %111 = vector.broadcast %cst_39 : f32 to vector<496x64xf32>
    %112 = arith.addf %111, %110 : vector<496x64xf32>
    %113 = arith.mulf %99, %112 : vector<496x64xf32>
    %cst_40 = arith.constant 0.000000e+00 : f32
    %114 = vector.broadcast %cst_40 : f32 to vector<496x64xf32>
    %115 = arith.subf %114, %93 : vector<496x64xf32>
    %116 = arith.mulf %115, %93 : vector<496x64xf32>
    %117 = math.exp %116 : vector<496x64xf32>
    %118 = arith.mulf %113, %117 : vector<496x64xf32>
    %cst_41 = arith.constant 1.000000e+00 : f32
    %119 = vector.broadcast %cst_41 : f32 to vector<496x64xf32>
    %120 = arith.subf %119, %118 : vector<496x64xf32>
    %cst_42 = arith.constant 0.000000e+00 : f32
    %121 = vector.broadcast %cst_42 : f32 to vector<496x64xf32>
    %122 = arith.cmpf oge, %92, %121 : vector<496x64xf32>
    %cst_43 = arith.constant 0.000000e+00 : f32
    %123 = vector.broadcast %cst_43 : f32 to vector<496x64xf32>
    %124 = arith.subf %123, %120 : vector<496x64xf32>
    %125 = arith.select %122, %120, %124 : vector<496x64xi1>, vector<496x64xf32>
    %cst_44 = arith.constant 1.000000e+00 : f32
    %126 = vector.broadcast %cst_44 : f32 to vector<496x64xf32>
    %127 = arith.addf %126, %125 : vector<496x64xf32>
    %128 = arith.mulf %90, %127 : vector<496x64xf32>
    %129 = tpu.iota {dimensions = array<i32: 0>} : vector<64x64xi32>
    %130 = tpu.iota {dimensions = array<i32: 1>} : vector<64x64xi32>
    %131 = arith.subi %129, %130 : vector<64x64xi32>
    %132 = math.absi %131 : vector<64x64xi32>
    %c32_i32_45 = arith.constant 32 : i32
    %133 = vector.broadcast %c32_i32_45 : i32 to vector<64x64xi32>
    %134 = arith.cmpi eq, %132, %133 : vector<64x64xi32>
    %135 = arith.extui %134 : vector<64x64xi1> to vector<64x64xi32>
    %136 = arith.sitofp %135 : vector<64x64xi32> to vector<64x64xf32>
    %cst_46 = arith.constant dense<0.000000e+00> : vector<496x64xf32>
    %137 = tpu.matmul %128, %136, %cst_46 {dimension_numbers = #tpu.dot_dimension_numbers<[1], [0], [0], [1], [0, 0, 1, 1], [], []>} : vector<496x64xf32>, vector<64x64xf32>, vector<496x64xf32> -> vector<496x64xf32>
    %138 = arith.mulf %88, %137 : vector<496x64xf32>
    %c0_47 = arith.constant 0 : index
    %c0_48 = arith.constant 0 : index
    %139 = vector.load %arg8[%c0_47, %c0_48] : memref<64x256xf32, #tpu.memory_space<vmem>>, vector<64x256xf32>
    %cst_49 = arith.constant dense<0.000000e+00> : vector<496x256xf32>
    %140 = tpu.matmul %138, %139, %cst_49 {dimension_numbers = #tpu.dot_dimension_numbers<[1], [0], [0], [1], [0, 0, 1, 1], [], []>} : vector<496x64xf32>, vector<64x256xf32>, vector<496x256xf32> -> vector<496x256xf32>
    %c0_50 = arith.constant 0 : index
    %c0_51 = arith.constant 0 : index
    %141 = vector.load %arg9[%c0_50, %c0_51] : memref<1x256xf32, #tpu.memory_space<vmem>>, vector<1x256xf32>
    %142 = vector.broadcast %141 : vector<1x256xf32> to vector<496x256xf32>
    %143 = arith.addf %140, %142 : vector<496x256xf32>
    %c0_52 = arith.constant 0 : index
    %c0_53 = arith.constant 0 : index
    %144 = vector.load %arg10[%c0_52, %c0_53] : memref<496x256xf32, #tpu.memory_space<vmem>>, vector<496x256xf32>
    tpu.vector_store %arg10[%c0_52, %c0_53], %143 {strides = array<i32>} : memref<496x256xf32, #tpu.memory_space<vmem>>, vector<496x256xf32>,
    return
  }
  func.func @transform_0(%arg0: i32) -> (i32, i32) {
    %c0_i32 = arith.constant 0 : i32
    %c0_i32_0 = arith.constant 0 : i32
    return %arg0, %c0_i32 : i32, i32
  }
  func.func @transform_1(%arg0: i32) -> (i32, i32) {
    %c0_i32 = arith.constant 0 : i32
    %c0_i32_0 = arith.constant 0 : i32
    %c0_i32_1 = arith.constant 0 : i32
    return %c0_i32, %c0_i32_0 : i32, i32
  }
  func.func @transform_2(%arg0: i32) -> (i32, i32) {
    %c0_i32 = arith.constant 0 : i32
    %c0_i32_0 = arith.constant 0 : i32
    %c0_i32_1 = arith.constant 0 : i32
    return %c0_i32, %c0_i32_0 : i32, i32
  }
  func.func @transform_3(%arg0: i32) -> (i32, i32) {
    %c0_i32 = arith.constant 0 : i32
    %c0_i32_0 = arith.constant 0 : i32
    %c0_i32_1 = arith.constant 0 : i32
    return %c0_i32, %c0_i32_0 : i32, i32
  }
  func.func @transform_4(%arg0: i32) -> (i32, i32) {
    %c0_i32 = arith.constant 0 : i32
    %c0_i32_0 = arith.constant 0 : i32
    %c0_i32_1 = arith.constant 0 : i32
    return %c0_i32, %c0_i32_0 : i32, i32
  }
  func.func @transform_5(%arg0: i32) -> (i32, i32) {
    %c0_i32 = arith.constant 0 : i32
    %c0_i32_0 = arith.constant 0 : i32
    %c0_i32_1 = arith.constant 0 : i32
    return %c0_i32, %c0_i32_0 : i32, i32
  }
  func.func @transform_6(%arg0: i32) -> (i32, i32) {
    %c0_i32 = arith.constant 0 : i32
    %c0_i32_0 = arith.constant 0 : i32
    %c0_i32_1 = arith.constant 0 : i32
    return %c0_i32, %c0_i32_0 : i32, i32
  }
  func.func @transform_7(%arg0: i32) -> (i32, i32) {
    %c0_i32 = arith.constant 0 : i32
    %c0_i32_0 = arith.constant 0 : i32
    %c0_i32_1 = arith.constant 0 : i32
    return %c0_i32, %c0_i32_0 : i32, i32
  }
  func.func @transform_8(%arg0: i32) -> (i32, i32) {
    %c0_i32 = arith.constant 0 : i32
    %c0_i32_0 = arith.constant 0 : i32
    %c0_i32_1 = arith.constant 0 : i32
    return %c0_i32, %c0_i32_0 : i32, i32
  }
  func.func @transform_9(%arg0: i32) -> (i32, i32) {
    %c0_i32 = arith.constant 0 : i32
    %c0_i32_0 = arith.constant 0 : i32
    return %arg0, %c0_i32 : i32, i32
  }
}

</mosaic_0001>

<bundles_post_ra>
// kernel: tpu_custom_call.1
= control target key start
LH: loop header
LB: loop body
LE: loop exit
PB: predicated region body
PF: predicated region fallthrough
CT: control target
= control target key end

     0   :  { %14 = vsyncpa [#allocation3], 0  ;;  %s16274_s0 = inlined_call_operand.hbm [shape: f32[992,256], index: 0, kind: input, shape index: {}]   ;;  %s16275_s1 = inlined_call_operand.vmem [shape: f32[256,128], index: 1, kind: input, shape index: {}]   ;;  %s16276_s2 = inlined_call_operand.vmem [shape: f32[128,64], index: 2, kind: input, shape index: {}]   ;;  %s16277_s3 = inlined_call_operand.vmem [shape: f32[1,64], index: 3, kind: input, shape index: {}]   ;;  %s16278_s4 = inlined_call_operand.vmem [shape: f32[496,64], index: 4, kind: input, shape index: {}]   ;;  %s16279_s5 = inlined_call_operand.vmem [shape: f32[64,4], index: 5, kind: input, shape index: {}]   ;;  %s16280_s6 = inlined_call_operand.vmem [shape: f32[4,64], index: 6, kind: input, shape index: {}]   ;;  %s16281_s7 = inlined_call_operand.vmem [shape: f32[64,256], index: 7, kind: input, shape index: {}]   ;;  %s16282_s8 = inlined_call_operand.vmem [shape: f32[1,256], index: 8, kind: input, shape index: {}]   ;;  %s16283_s9 = inlined_call_operand.hbm [shape: f32[992,256], index: 9, kind: output, shape index: {}]  }
   0x1   :  { %16 = vsyncpa [#allocation3 + $0x1], 0 }
   0x2   :  { %17 = vsyncpa [#allocation4], 0 }
   0x3   :  { %19 = vsyncpa [#allocation4 + $0x1], 0  ;;  %s8655_s30 = smov 0   ;;  %s8657_s10 = smov 0  }
   0x4   :  { %s8659_s11 = smov 0   ;;  %s8661_s12 = smov 0  }
   0x5 LB: > { %16526 = sst [smem:[#allocation8_spill]] %s8593_s11  ;;  %s8676_s13 = sadd.s32 4294967295, %s8597_s12   ;;  %s8597_s12 = sphi %s8661_s12, %s17356_s12   ;;  %s8593_s11 = sphi %s8659_s11, %s17358_s11   ;;  %s8589_s10 = sphi %s8657_s10, %s17360_s10   ;;  %s8585_s30 = sphi %s8655_s30, %s17359_s30  }
   0x6   : > { %s7666_s14 = sadd.s32 4294967294, %s8597_s12   ;;  %s8680_s15 = sadd.s32 1, %s8597_s12  }
   0x7   : > { %16527 = sst [smem:[#allocation9_spill]] %s8680_s15  ;;  %s32_s16 = sadd.s32 1, %s8593_s11 }
   0x8   : > { %s29_s17 = ssub.s32 %s8597_s12, %s8680_s15  ;;  %p39_p0 = scmp.ne.s32.totalorder %s8593_s11, %s8589_s10 }
   0x9   : > { %p30_p1 = scmp.eq.s32.totalorder %s29_s17, 0  ;;  %p40_p2 = scmp.eq.s32.totalorder %s8597_s12, 0 }
   0xa   : > { %p45_p3 = scmp.ne.s32.totalorder %s8589_s10, %s8585_s30  ;;  %p46_p4 = scmp.eq.s32.totalorder %s8676_s13, 0 }
   0xb   : > { %s8692_s18 = scalar_select %p30_p1, %s8593_s11, %s32_s16  }
   0xc   : > { %p41_p5 = por %p40_p2, %p39_p0  ;;  %p8694_p6 = por %p46_p4, %p45_p3 }
   0xd   : > { %16528 = sst [smem:[#allocation10_spill]] %s8692_s18  ;;  %p237_p7 = scmp.eq.s32.totalorder %s8676_s13, 1 }
   0xe   : > { %p243_p8 = scmp.eq.s32.totalorder %s7666_s14, 1  ;;  %p7668_p9 = scmp.ge.s32.totalorder %s8597_s12, 2 }
   0xf   : > { %p8207_p10 = scmp.lt.s32.totalorder %s8597_s12, 2  ;;  %p8701_p11 = por %p237_p7, %p39_p0 }
  0x10   : > { %p8705_p12 = por %p243_p8, %p45_p3  ;;  %s287_s22 = sand.u32 1, %s8593_s11  }
  0x11   : > { %s8143_s23 = smul.u32 992, %s8597_s12  ;;  %p8714_p13 = pnand %p8207_p10, %p41_p5 }
  0x12   : > { %s16531_s21 = scalar_select %p8705_p12, 1, 0 }
  0x13   : > { %s8193_s24 = smul.u32 992, %s287_s22  ;;  %s297_s27 = scalar_lea.hbm %s16274_s0, %s8143_s23 }
  0x14   : > { %16532 = sst [smem:[#allocation11_spill]] %s16531_s21  ;;  %s298_s29 = sshll.u32 %s297_s27, 4  ;;  %s299_s29 = int_to_ptr.hbm [resolvable:$true] %s298_s29 }
  0x15   : > { %s291_s14 = scalar_lea.vmem [#allocation2], %s8193_s24  ;;  %s288_s17 = scalar_lea.sflag [#allocation3], %s287_s22 }
  0x16   : > { %s300_s16 = sshll.u32 %s291_s14, 4  ;;  %s8501_s18 = sshra.s32 %s299_s29, 4  ;;  %s301_s16 = int_to_ptr.vmem [resolvable:$true] %s300_s16  ;;  %s8502_s18 = int_to_ptr.hbm [resolvable:$true] %s8501_s18 }
  0x17   : > { %s8503_s11 = scalar_lea.hbm %s8502_s18, 992  ;;  %p8505_p1 = pneg %p8714_p13 }
  0x18   : > { %p8504_p0 = scmp.ne.s32.totalorder %s8502_s18, %s8503_s11  ;;  %s8508_s26 = scalar_lea.hbm %s16274_s0, 1984 }
  0x19   : > { %p8509_p4 = scmp.lt.s32.totalorder %s8502_s18, %s16274_s0  ;;  %p8510_p5 = scmp.lt.s32.totalorder %s8508_s26, %s8503_s11 }
  0x1a   : > { %p8506_p2 = pnand %p8505_p1, %p8504_p0 }
  0x1b   : > { %p8511_p7 = por %p8510_p5, %p8509_p4 }
  0x1c   : > { %p8507_p3 = pneg %p8506_p2 }
  0x1e   : > { %p8512_p8 = pnand %p8511_p7, %p8507_p3 }
  0x20   : > { %8515 = shalt.err (!%p8512_p8)
}
  0x21   : > { %s8599_s22 = smov 256   ;;  %s8600_s24 = smov 16  }
  0x22   : > { %8202 = dma.hbm_to_vmem [thread:$0]  (!%p8714_p13), %s299_s29, 15872, %s301_s16, %s288_s17, %s8599_s22, %s8599_s22, %s8600_s24  }
  0x23   : > { %p7671_p10 = scmp.ge.s32.totalorder %s8597_s12, 1  ;;  %p308_p0 = scmp.lt.s32.totalorder %s8597_s12, 3 }
  0x25   : > { %p309_p1 = pnand %p7671_p10, %p308_p0 }
  0x27   : > { %312 = sbr.rel (%p309_p1) target bundleno = 2525 (0x9dd), region = 56 }
  0x2c   : > { %s8731_s27 = sand.u32 1, %s8589_s10  }
  0x2d   : > { %s8194_s11 = smul.u32 992, %s8731_s27  ;;  %s315_s15 = scalar_lea.sflag [#allocation3], %s8731_s27 }
  0x2f   : > { %s8737_s18 = scalar_lea.vmem [#allocation2], %s8194_s11 }
  0x30   : > { %8576 = dma.done.wait (%p8694_p6), %s315_s15, 15872  }
  0x31   : > { %8578 = vsyncadd (%p8694_p6), %s315_s15, 4294951424  ;;  %v495_v0 = vld [vmem:[%s16275_s1 + $0x78] sm:$0xff]  ;;  %v494_v2 = vld [vmem:[%s16275_s1 + $0x70] sm:$0xff]  ;;  %s14607_s14 = scalar_lea.vmem [#allocation5], %s8194_s11  ;;  %s8144_s11 = smul.u32 992, %s8676_s13 }
  0x32   : > { %v8749_v1 = vld [vmem:[%s16275_s1 + $0xf8] sm:$0xff]  ;;  %512 = vmatpush.msra.mxu0 %v495_v0  ;;  %8145 = vmatpush.msra.mxu3 %v495_v0  ;;  %v8757_v3 = vld [vmem:[%s16275_s1 + $0xf0] sm:$0xff]  ;;  %v493_v4 = vld [vmem:[%s16275_s1 + $0x68] sm:$0xff]  ;;  %s7590_s23 = sshll.u32 %s14607_s14, 4  ;;  %s7577_s19 = scalar_lea.sflag [#allocation4], %s8731_s27  ;;  %s7591_s23 = int_to_ptr.vmem [resolvable:$true] %s7590_s23 }
  0x33   : > { %715 = vmatpush.msra.mxu1 %v8749_v1  ;;  %v8766_v5 = vld [vmem:[%s16275_s1 + $0xe8] sm:$0xff]  ;;  %v492_v6 = vld [vmem:[%s16275_s1 + $0x60] sm:$0xff]  ;;  %v491_v8 = vld [vmem:[%s16275_s1 + $0x58] sm:$0xff]  ;;  %s7589_s17 = scalar_lea.hbm %s16283_s9, %s8144_s11  ;;  %s8551_s15 = scalar_lea.hbm %s16283_s9, 1984 }
  0x34   : > { %513 = vmatpush.msra.mxu0 %v494_v2  ;;  %8146 = vmatpush.msra.mxu3 %v494_v2  ;;  %v8775_v7 = vld [vmem:[%s16275_s1 + $0xe0] sm:$0xff]  ;;  %v8784_v9 = vld [vmem:[%s16275_s1 + $0xd8] sm:$0xff]  ;;  %v490_v10 = vld [vmem:[%s16275_s1 + $0x50] sm:$0xff]  ;;  %s7592_s25 = sshll.u32 %s7589_s17, 4  ;;  %s7593_s25 = int_to_ptr.hbm [resolvable:$true] %s7592_s25 }
  0x35   : > { %716 = vmatpush.msra.mxu1 %v8757_v3  ;;  %v8793_v11 = vld [vmem:[%s16275_s1 + $0xd0] sm:$0xff]  ;;  %v489_v12 = vld [vmem:[%s16275_s1 + $0x48] sm:$0xff]  ;;  %v488_v14 = vld [vmem:[%s16275_s1 + $0x40] sm:$0xff]  ;;  %s8545_s13 = sshra.s32 %s7593_s25, 4  ;;  %s8546_s13 = int_to_ptr.hbm [resolvable:$true] %s8545_s13 }
  0x36   : > { %514 = vmatpush.msra.mxu0 %v493_v4  ;;  %8147 = vmatpush.msra.mxu3 %v493_v4  ;;  %v8802_v13 = vld [vmem:[%s16275_s1 + $0xc8] sm:$0xff]  ;;  %v8811_v15 = vld [vmem:[%s16275_s1 + $0xc0] sm:$0xff]  ;;  %v487_v16 = vld [vmem:[%s16275_s1 + $0x38] sm:$0xff]  ;;  %s8547_s26 = scalar_lea.hbm %s8546_s13, 992  ;;  %p8552_p3 = scmp.lt.s32.totalorder %s8546_s13, %s16283_s9 }
  0x37   : > { %717 = vmatpush.msra.mxu1 %v8766_v5  ;;  %v8820_v17 = vld [vmem:[%s16275_s1 + $0xb8] sm:$0xff]  ;;  %v486_v18 = vld [vmem:[%s16275_s1 + $0x30] sm:$0xff]  ;;  %v485_v20 = vld [vmem:[%s16275_s1 + $0x28] sm:$0xff]  ;;  %p8548_p6 = scmp.ne.s32.totalorder %s8546_s13, %s8547_s26  ;;  %p8553_p4 = scmp.lt.s32.totalorder %s8551_s15, %s8547_s26 }
  0x38   : > { %515 = vmatpush.msra.mxu0 %v492_v6  ;;  %8148 = vmatpush.msra.mxu3 %v492_v6  ;;  %v502_v19 = vld [vmem:[%s16275_s1 + $0xb0] sm:$0xff]  ;;  %v501_v21 = vld [vmem:[%s16275_s1 + $0xa8] sm:$0xff]  ;;  %v484_v22 = vld [vmem:[%s16275_s1 + $0x20] sm:$0xff] }
  0x39   : > { %718 = vmatpush.msra.mxu1 %v8775_v7  ;;  %v500_v23 = vld [vmem:[%s16275_s1 + $0xa0] sm:$0xff]  ;;  %v483_v24 = vld [vmem:[%s16275_s1 + $0x18] sm:$0xff]  ;;  %v482_v26 = vld [vmem:[%s16275_s1 + $0x10] sm:$0xff]  ;;  %p8549_p13 = pnand %p8548_p6, %p8701_p11  ;;  %p8554_p5 = por %p8553_p4, %p8552_p3 }
  0x3a   : > { %516 = vmatpush.msra.mxu0 %v491_v8  ;;  %8149 = vmatpush.msra.mxu3 %v491_v8  ;;  %v499_v25 = vld [vmem:[%s16275_s1 + $0x98] sm:$0xff]  ;;  %v498_v27 = vld [vmem:[%s16275_s1 + $0x90] sm:$0xff]  ;;  %v481_v28 = vld [vmem:[%s16275_s1 + $0x8] sm:$0xff] }
  0x3b   : > { %719 = vmatpush.msra.mxu1 %v8784_v9  ;;  %v497_v29 = vld [vmem:[%s16275_s1 + $0x88] sm:$0xff]  ;;  %v480_v30 = vld [vmem:[%s16275_s1] sm:$0xff]  ;;  %v458_v33 = vld [vmem:[%s8737_s18 + $0x330] sm:$0xff]  ;;  %p8550_p2 = pneg %p8549_p13 }
  0x3c   : > { %517 = vmatpush.msra.mxu0 %v490_v10  ;;  %8150 = vmatpush.msra.mxu3 %v490_v10  ;;  %v496_v31 = vld [vmem:[%s16275_s1 + $0x80] sm:$0xff]  ;;  %v357_v34 = vld [vmem:[%s8737_s18 + $0x8] sm:$0xff]  ;;  %v358_v35 = vld [vmem:[%s8737_s18 + $0x10] sm:$0xff] }
  0x3d   : > { %720 = vmatpush.msra.mxu1 %v8793_v11  ;;  %v356_v32 = vld [vmem:[%s8737_s18] sm:$0xff]  ;;  %v359_v37 = vld [vmem:[%s8737_s18 + $0x18] sm:$0xff]  ;;  %v462_v39 = vld [vmem:[%s8737_s18 + $0x350] sm:$0xff]  ;;  %p8555_p7 = pnand %p8554_p5, %p8550_p2 }
  0x3e   : > { %518 = vmatpush.msra.mxu0 %v489_v12  ;;  %8151 = vmatpush.msra.mxu3 %v489_v12  ;;  %v460_v36 = vld [vmem:[%s8737_s18 + $0x340] sm:$0xff]  ;;  %v361_v40 = vld [vmem:[%s8737_s18 + $0x28] sm:$0xff]  ;;  %v362_v41 = vld [vmem:[%s8737_s18 + $0x30] sm:$0xff] }
  0x3f   : > { %721 = vmatpush.msra.mxu1 %v8802_v13  ;;  %v360_v38 = vld [vmem:[%s8737_s18 + $0x20] sm:$0xff]  ;;  %v363_v43 = vld [vmem:[%s8737_s18 + $0x38] sm:$0xff]  ;;  %v466_v45 = vld [vmem:[%s8737_s18 + $0x370] sm:$0xff] }
  0x40   : > { %519 = vmatpush.msra.mxu0 %v488_v14  ;;  %8152 = vmatpush.msra.mxu3 %v488_v14  ;;  %v464_v42 = vld [vmem:[%s8737_s18 + $0x360] sm:$0xff]  ;;  %v365_v46 = vld [vmem:[%s8737_s18 + $0x48] sm:$0xff]  ;;  %v366_v47 = vld [vmem:[%s8737_s18 + $0x50] sm:$0xff] }
  0x41   : > { %722 = vmatpush.msra.mxu1 %v8811_v15  ;;  %v364_v44 = vld [vmem:[%s8737_s18 + $0x40] sm:$0xff]  ;;  %v367_v49 = vld [vmem:[%s8737_s18 + $0x58] sm:$0xff]  ;;  %v470_v51 = vld [vmem:[%s8737_s18 + $0x390] sm:$0xff] }
  0x42   : > { %520 = vmatpush.msra.mxu0 %v487_v16  ;;  %8153 = vmatpush.msra.mxu3 %v487_v16  ;;  %v468_v48 = vld [vmem:[%s8737_s18 + $0x380] sm:$0xff]  ;;  %v369_v52 = vld [vmem:[%s8737_s18 + $0x68] sm:$0xff]  ;;  %v370_v53 = vld [vmem:[%s8737_s18 + $0x70] sm:$0xff] }
  0x43   : > { %723 = vmatpush.msra.mxu1 %v8820_v17  ;;  %v368_v50 = vld [vmem:[%s8737_s18 + $0x60] sm:$0xff]  ;;  %v371_v55 = vld [vmem:[%s8737_s18 + $0x78] sm:$0xff]  ;;  %v474_v57 = vld [vmem:[%s8737_s18 + $0x3b0] sm:$0xff] }
  0x44   : > { %521 = vmatpush.msra.mxu0 %v486_v18  ;;  %8154 = vmatpush.msra.mxu3 %v486_v18  ;;  %v472_v54 = vld [vmem:[%s8737_s18 + $0x3a0] sm:$0xff]  ;;  %v373_v58 = vld [vmem:[%s8737_s18 + $0x88] sm:$0xff]  ;;  %v374_v59 = vld [vmem:[%s8737_s18 + $0x90] sm:$0xff] }
  0x45   : > { %724 = vmatpush.msra.mxu1 %v502_v19  ;;  %v372_v56 = vld [vmem:[%s8737_s18 + $0x80] sm:$0xff]  ;;  %v375_v61 = vld [vmem:[%s8737_s18 + $0x98] sm:$0xff]  ;;  %v478_v63 = vld [vmem:[%s8737_s18 + $0x3d0] sm:$0xff] }
  0x46   : > { %522 = vmatpush.msra.mxu0 %v485_v20  ;;  %8155 = vmatpush.msra.mxu3 %v485_v20  ;;  %v476_v60 = vld [vmem:[%s8737_s18 + $0x3c0] sm:$0xff]  ;;  %v377_v0 = vld [vmem:[%s8737_s18 + $0xa8] sm:$0xff]  ;;  %v379_v2 = vld [vmem:[%s8737_s18 + $0xb8] sm:$0xff] }
  0x47   : > { %725 = vmatpush.msra.mxu1 %v501_v21  ;;  %v376_v62 = vld [vmem:[%s8737_s18 + $0xa0] sm:$0xff]  ;;  %v461_v6 = vld [vmem:[%s8737_s18 + $0x348] sm:$0xff]  ;;  %v383_v8 = vld [vmem:[%s8737_s18 + $0xd8] sm:$0xff] }
  0x48   : > { %523 = vmatpush.msra.mxu0 %v484_v22  ;;  %8156 = vmatpush.msra.mxu3 %v484_v22  ;;  %v380_v4 = vld [vmem:[%s8737_s18 + $0xc0] sm:$0xff]  ;;  %v465_v12 = vld [vmem:[%s8737_s18 + $0x368] sm:$0xff]  ;;  %v387_v14 = vld [vmem:[%s8737_s18 + $0xf8] sm:$0xff] }
  0x49   : > { %726 = vmatpush.msra.mxu1 %v500_v23  ;;  %v384_v10 = vld [vmem:[%s8737_s18 + $0xe0] sm:$0xff]  ;;  %v469_v20 = vld [vmem:[%s8737_s18 + $0x388] sm:$0xff] }
  0x4a   : > { %524 = vmatpush.msra.mxu0 %v483_v24  ;;  %8157 = vmatpush.msra.mxu3 %v483_v24 }
  0x4b   : > { %727 = vmatpush.msra.mxu1 %v499_v25 }
  0x4c   : > { %525 = vmatpush.msra.mxu0 %v482_v26  ;;  %8158 = vmatpush.msra.mxu3 %v482_v26  ;;  %v471_v26 = vld [vmem:[%s8737_s18 + $0x398] sm:$0xff] }
  0x4d   : > { %728 = vmatpush.msra.mxu1 %v498_v27 }
  0x4e   : > { %526 = vmatpush.msra.mxu0 %v481_v28  ;;  %8159 = vmatpush.msra.mxu3 %v481_v28 }
  0x4f   : > { %729 = vmatpush.msra.mxu1 %v497_v29 }
  0x50   : > { %527 = vmatpush.msra.mxu0 %v480_v30  ;;  %8160 = vmatpush.msra.mxu3 %v480_v30 }
  0x51   : > { %730 = vmatpush.msra.mxu1 %v496_v31  ;;  %528 = vmatmul.f32.vlgmr.msra.gmra.mxu0 %v356_v32  ;;  %v473_v32 = vld [vmem:[%s8737_s18 + $0x3a8] sm:$0xff] }
  0x52   : > { %681 = vmatmul.f32.vlgmr.msra.gmra.mxu3 %v458_v33  ;;  %731 = vmatmul.f32.vlgmr.msra.gmra.mxu1 %v357_v34 }
  0x53   : > { %8161 = vmatpush.msrb.mxu3 %v8749_v1  ;;  %v378_v1 = vld [vmem:[%s8737_s18 + $0xb0] sm:$0xff] }
  0x55   : > { %8162 = vmatpush.msrb.mxu3 %v8757_v3  ;;  %v459_v3 = vld [vmem:[%s8737_s18 + $0x338] sm:$0xff] }
  0x57   : > { %8163 = vmatpush.msrb.mxu3 %v8766_v5  ;;  %v381_v5 = vld [vmem:[%s8737_s18 + $0xc8] sm:$0xff] }
  0x59   : > { %531 = vmatmul.f32.gmra.mxu0 %v358_v35  ;;  %8164 = vmatpush.msrb.mxu3 %v8775_v7  ;;  %v382_v7 = vld [vmem:[%s8737_s18 + $0xd0] sm:$0xff] }
  0x5a   : > { %684 = vmatmul.f32.gmra.mxu3 %v460_v36  ;;  %734 = vmatmul.f32.gmra.mxu1 %v359_v37  ;;  %v394_v35 = vld [vmem:[%s8737_s18 + $0x130] sm:$0xff]  ;;  %v395_v37 = vld [vmem:[%s8737_s18 + $0x138] sm:$0xff] }
  0x5b   : > { %8165 = vmatpush.msrb.mxu3 %v8784_v9  ;;  %v463_v9 = vld [vmem:[%s8737_s18 + $0x358] sm:$0xff] }
  0x5d   : > { %8166 = vmatpush.msrb.mxu3 %v8793_v11  ;;  %v385_v11 = vld [vmem:[%s8737_s18 + $0xe8] sm:$0xff] }
  0x5f   : > { %8167 = vmatpush.msrb.mxu3 %v8802_v13  ;;  %v386_v13 = vld [vmem:[%s8737_s18 + $0xf0] sm:$0xff] }
  0x61   : > { %534 = vmatmul.f32.gmra.mxu0 %v360_v38  ;;  %8168 = vmatpush.msrb.mxu3 %v8811_v15  ;;  %v467_v15 = vld [vmem:[%s8737_s18 + $0x378] sm:$0xff] }
  0x62   : > { %687 = vmatmul.f32.gmra.mxu3 %v462_v39  ;;  %737 = vmatmul.f32.gmra.mxu1 %v361_v40  ;;  %v475_v38 = vld [vmem:[%s8737_s18 + $0x3b8] sm:$0xff] }
  0x63   : > { %8169 = vmatpush.msrb.mxu3 %v8820_v17  ;;  %v388_v17 = vld [vmem:[%s8737_s18 + $0x100] sm:$0xff] }
  0x65   : > { %8170 = vmatpush.msrb.mxu3 %v502_v19  ;;  %v389_v19 = vld [vmem:[%s8737_s18 + $0x108] sm:$0xff] }
  0x67   : > { %8171 = vmatpush.msrb.mxu3 %v501_v21 }
  0x69   : > { %537 = vmatmul.f32.gmra.mxu0 %v362_v41  ;;  %8172 = vmatpush.msrb.mxu3 %v500_v23  ;;  %v390_v23 = vld [vmem:[%s8737_s18 + $0x110] sm:$0xff]  ;;  %v396_v41 = vld [vmem:[%s8737_s18 + $0x140] sm:$0xff] }
  0x6a   : > { %690 = vmatmul.f32.gmra.mxu3 %v464_v42  ;;  %740 = vmatmul.f32.gmra.mxu1 %v363_v43  ;;  %v397_v43 = vld [vmem:[%s8737_s18 + $0x148] sm:$0xff] }
  0x6b   : > { %8173 = vmatpush.msrb.mxu3 %v499_v25  ;;  %v391_v25 = vld [vmem:[%s8737_s18 + $0x118] sm:$0xff] }
  0x6d   : > { %8174 = vmatpush.msrb.mxu3 %v498_v27 }
  0x6f   : > { %8175 = vmatpush.msrb.mxu3 %v497_v29  ;;  %v392_v29 = vld [vmem:[%s8737_s18 + $0x120] sm:$0xff] }
  0x71   : > { %540 = vmatmul.f32.gmra.mxu0 %v364_v44  ;;  %8176 = vmatpush.msrb.mxu3 %v496_v31  ;;  %v393_v31 = vld [vmem:[%s8737_s18 + $0x128] sm:$0xff] }
  0x72   : > { %693 = vmatmul.f32.gmra.mxu3 %v466_v45  ;;  %743 = vmatmul.f32.gmra.mxu1 %v365_v46  ;;  %v477_v44 = vld [vmem:[%s8737_s18 + $0x3c8] sm:$0xff] }
  0x79   : > { %543 = vmatmul.f32.gmra.mxu0 %v366_v47  ;;  %v398_v47 = vld [vmem:[%s8737_s18 + $0x150] sm:$0xff] }
  0x7a   : > { %696 = vmatmul.f32.gmra.mxu3 %v468_v48  ;;  %746 = vmatmul.f32.gmra.mxu1 %v367_v49  ;;  %v399_v49 = vld [vmem:[%s8737_s18 + $0x158] sm:$0xff] }
  0x81   : > { %546 = vmatmul.f32.gmra.mxu0 %v368_v50  ;;  %v479_v50 = vld [vmem:[%s8737_s18 + $0x3d8] sm:$0xff] }
  0x82   : > { %699 = vmatmul.f32.gmra.mxu3 %v470_v51  ;;  %749 = vmatmul.f32.gmra.mxu1 %v369_v52 }
  0x89   : > { %549 = vmatmul.f32.gmra.mxu0 %v370_v53  ;;  %v400_v53 = vld [vmem:[%s8737_s18 + $0x160] sm:$0xff] }
  0x8a   : > { %702 = vmatmul.f32.gmra.mxu3 %v472_v54  ;;  %752 = vmatmul.f32.gmra.mxu1 %v371_v55  ;;  %v401_v55 = vld [vmem:[%s8737_s18 + $0x168] sm:$0xff] }
  0x91   : > { %552 = vmatmul.f32.gmra.mxu0 %v372_v56 }
  0x92   : > { %705 = vmatmul.f32.gmra.mxu3 %v474_v57  ;;  %755 = vmatmul.f32.gmra.mxu1 %v373_v58  ;;  %v402_v58 = vld [vmem:[%s8737_s18 + $0x170] sm:$0xff] }
  0x99   : > { %555 = vmatmul.f32.gmra.mxu0 %v374_v59 }
  0x9a   : > { %708 = vmatmul.f32.gmra.mxu3 %v476_v60  ;;  %758 = vmatmul.f32.gmra.mxu1 %v375_v61  ;;  %v403_v60 = vld [vmem:[%s8737_s18 + $0x178] sm:$0xff] }
  0xa1   : > { %558 = vmatmul.f32.gmra.mxu0 %v376_v62 }
  0xa2   : > { %711 = vmatmul.f32.gmra.mxu3 %v478_v63  ;;  %761 = vmatmul.f32.gmra.mxu1 %v377_v0  ;;  %v404_v63 = vld [vmem:[%s8737_s18 + $0x180] sm:$0xff] }
  0xa9   : > { %561 = vmatmul.f32.gmra.mxu0 %v378_v1  ;;  %v405_v1 = vld [vmem:[%s8737_s18 + $0x188] sm:$0xff] }
  0xaa   : > { %764 = vmatmul.f32.gmra.mxu1 %v379_v2  ;;  %884 = vmatmul.f32.vlgmr.msrb.gmra.mxu3 %v459_v3 }
  0xb1   : > { %564 = vmatmul.f32.gmra.mxu0 %v380_v4  ;;  %v406_v4 = vld [vmem:[%s8737_s18 + $0x190] sm:$0xff] }
  0xb2   : > { %767 = vmatmul.f32.gmra.mxu1 %v381_v5  ;;  %887 = vmatmul.f32.gmra.mxu3 %v461_v6  ;;  %v407_v6 = vld [vmem:[%s8737_s18 + $0x198] sm:$0xff] }
  0xb9   : > { %567 = vmatmul.f32.gmra.mxu0 %v382_v7 }
  0xba   : > { %770 = vmatmul.f32.gmra.mxu1 %v383_v8  ;;  %890 = vmatmul.f32.gmra.mxu3 %v463_v9  ;;  %v408_v9 = vld [vmem:[%s8737_s18 + $0x1a0] sm:$0xff] }
  0xc1   : > { %570 = vmatmul.f32.gmra.mxu0 %v384_v10 }
  0xc2   : > { %773 = vmatmul.f32.gmra.mxu1 %v385_v11  ;;  %893 = vmatmul.f32.gmra.mxu3 %v465_v12  ;;  %v409_v11 = vld [vmem:[%s8737_s18 + $0x1a8] sm:$0xff] }
  0xc9   : > { %573 = vmatmul.f32.gmra.mxu0 %v386_v13 }
  0xca   : > { %776 = vmatmul.f32.gmra.mxu1 %v387_v14  ;;  %896 = vmatmul.f32.gmra.mxu3 %v467_v15  ;;  %v410_v14 = vld [vmem:[%s8737_s18 + $0x1b0] sm:$0xff] }
  0xce   : > { %v8923_v16 = vpop.f32.mrf.mxu0 }
  0xcf   : > { %v8926_v18 = vpop.f32.mrf.mxu1 }
  0xd1   : > { %576 = vmatmul.f32.gmra.mxu0 %v388_v17  ;;  %v411_v17 = vld [vmem:[%s8737_s18 + $0x1b8] sm:$0xff] }
  0xd2   : > { %779 = vmatmul.f32.gmra.mxu1 %v389_v19  ;;  %899 = vmatmul.f32.gmra.mxu3 %v469_v20 }
  0xd5   : > { %v8930_v21 = vpop.f32.mrf.mxu3 }
  0xd6   : > { %16534 = vst [vmem:[#allocation12_spill] sm:$0xff] %v8930_v21  ;;  %v8932_v22 = vpop.f32.mrf.mxu0 }
  0xd7   : > { %v8935_v24 = vpop.f32.mrf.mxu1 }
  0xd9   : > { %579 = vmatmul.f32.gmra.mxu0 %v390_v23  ;;  %v412_v23 = vld [vmem:[%s8737_s18 + $0x1c0] sm:$0xff] }
  0xda   : > { %782 = vmatmul.f32.gmra.mxu1 %v391_v25  ;;  %902 = vmatmul.f32.gmra.mxu3 %v471_v26  ;;  %v413_v26 = vld [vmem:[%s8737_s18 + $0x1c8] sm:$0xff] }
  0xdd   : > { %v8939_v27 = vpop.f32.mrf.mxu3 }
  0xde   : > { %16535 = vst [vmem:[#allocation13_spill] sm:$0xff] %v8939_v27  ;;  %v8941_v28 = vpop.f32.mrf.mxu0 }
  0xdf   : > { %v8944_v30 = vpop.f32.mrf.mxu1 }
  0xe0   : > { %v9249_v21 = vadd.f32 %v8944_v30, %v8941_v28 }
  0xe1   : > { %582 = vmatmul.f32.gmra.mxu0 %v392_v29 }
  0xe2   : > { %785 = vmatmul.f32.gmra.mxu1 %v393_v31  ;;  %905 = vmatmul.f32.gmra.mxu3 %v473_v32  ;;  %v414_v32 = vld [vmem:[%s8737_s18 + $0x1d0] sm:$0xff] }
  0xe5   : > { %v8948_v33 = vpop.f32.mrf.mxu3 }
  0xe6   : > { %16536 = vst [vmem:[#allocation14_spill] sm:$0xff] %v8948_v33  ;;  %v8950_v34 = vpop.f32.mrf.mxu0 }
  0xe7   : > { %v8953_v36 = vpop.f32.mrf.mxu1 }
  0xe9   : > { %585 = vmatmul.f32.gmra.mxu0 %v394_v35 }
  0xea   : > { %788 = vmatmul.f32.gmra.mxu1 %v395_v37  ;;  %908 = vmatmul.f32.gmra.mxu3 %v475_v38  ;;  %v415_v37 = vld [vmem:[%s8737_s18 + $0x1d8] sm:$0xff] }
  0xed   : > { %v8957_v39 = vpop.f32.mrf.mxu3 }
  0xee   : > { %16537 = vst [vmem:[#allocation15_spill] sm:$0xff] %v8957_v39  ;;  %v8959_v40 = vpop.f32.mrf.mxu0 }
  0xef   : > { %v8962_v42 = vpop.f32.mrf.mxu1 }
  0xf1   : > { %588 = vmatmul.f32.gmra.mxu0 %v396_v41 }
  0xf2   : > { %791 = vmatmul.f32.gmra.mxu1 %v397_v43  ;;  %911 = vmatmul.f32.gmra.mxu3 %v477_v44  ;;  %v416_v43 = vld [vmem:[%s8737_s18 + $0x1e0] sm:$0xff] }
  0xf5   : > { %v8966_v45 = vpop.f32.mrf.mxu3 }
  0xf6   : > { %16538 = vst [vmem:[#allocation16_spill] sm:$0xff] %v8966_v45  ;;  %v8968_v46 = vpop.f32.mrf.mxu0 }
  0xf7   : > { %v8971_v48 = vpop.f32.mrf.mxu1 }
  0xf9   : > { %591 = vmatmul.f32.gmra.mxu0 %v398_v47  ;;  %v417_v47 = vld [vmem:[%s8737_s18 + $0x1e8] sm:$0xff] }
  0xfa   : > { %794 = vmatmul.f32.gmra.mxu1 %v399_v49  ;;  %914 = vmatmul.f32.gmra.mxu3 %v479_v50 }
  0xfd   : > { %v8975_v51 = vpop.f32.mrf.mxu3 }
  0xfe   : > { %16539 = vst [vmem:[#allocation17_spill] sm:$0xff] %v8975_v51  ;;  %v8977_v52 = vpop.f32.mrf.mxu0  ;;  %v2670_v51 = vld [vmem:[%s16276_s2] sm:$0xff] }
  0xff   : > { %v8980_v54 = vpop.f32.mrf.mxu1 }
 0x101   : > { %594 = vmatmul.f32.gmra.mxu0 %v400_v53  ;;  %v418_v53 = vld [vmem:[%s8737_s18 + $0x1f0] sm:$0xff] }
 0x102   : > { %797 = vmatmul.f32.gmra.mxu1 %v401_v55 }
 0x105   : > { %v8983_v56 = vpop.f32.mrf.mxu3 }
 0x106   : > { %16540 = vst [vmem:[#allocation18_spill] sm:$0xff] %v8983_v56  ;;  %v8985_v57 = vpop.f32.mrf.mxu0 }
 0x107   : > { %v8988_v59 = vpop.f32.mrf.mxu1 }
 0x109   : > { %597 = vmatmul.f32.gmra.mxu0 %v402_v58  ;;  %v419_v58 = vld [vmem:[%s8737_s18 + $0x1f8] sm:$0xff] }
 0x10a   : > { %800 = vmatmul.f32.gmra.mxu1 %v403_v60  ;;  %v2685_v60 = vld [vmem:[%s16276_s2 + $0x78] sm:$0xff] }
 0x10b   : > { %2690 = vmatpush.msra.mxu2 %v2685_v60  ;;  %8177 = vmatpush.msra.mxu3 %v2685_v60  ;;  %v2678_v60 = vld [vmem:[%s16276_s2 + $0x40] sm:$0xff] }
 0x10d   : > { %v8991_v61 = vpop.f32.mrf.mxu3 }
 0x10e   : > { %16541 = vst [vmem:[#allocation19_spill] sm:$0xff] %v8991_v61  ;;  %v8993_v62 = vpop.f32.mrf.mxu0  ;;  %v426_v61 = vld [vmem:[%s8737_s18 + $0x230] sm:$0xff] }
 0x10f   : > { %v8996_v0 = vpop.f32.mrf.mxu1 }
 0x111   : > { %600 = vmatmul.f32.gmra.mxu0 %v404_v63  ;;  %v2684_v63 = vld [vmem:[%s16276_s2 + $0x70] sm:$0xff] }
 0x112   : > { %803 = vmatmul.f32.gmra.mxu1 %v405_v1  ;;  %2691 = vmatpush.msra.mxu2 %v2684_v63 }
 0x113   : > { %8178 = vmatpush.msra.mxu3 %v2684_v63  ;;  %v2677_v63 = vld [vmem:[%s16276_s2 + $0x38] sm:$0xff] }
 0x115   : > { %v8999_v2 = vpop.f32.mrf.mxu3 }
 0x116   : > { %16542 = vst [vmem:[#allocation20_spill] sm:$0xff] %v8999_v2  ;;  %v9001_v3 = vpop.f32.mrf.mxu0 }
 0x117   : > { %v9004_v5 = vpop.f32.mrf.mxu1 }
 0x119   : > { %603 = vmatmul.f32.gmra.mxu0 %v406_v4  ;;  %v2683_v4 = vld [vmem:[%s16276_s2 + $0x68] sm:$0xff] }
 0x11a   : > { %806 = vmatmul.f32.gmra.mxu1 %v407_v6  ;;  %2692 = vmatpush.msra.mxu2 %v2683_v4 }
 0x11b   : > { %8179 = vmatpush.msra.mxu3 %v2683_v4  ;;  %v918_v4 = vlaneseq }
 0x11d   : > { %v9007_v7 = vpop.f32.mrf.mxu3 }
 0x11e   : > { %v9009_v8 = vpop.f32.mrf.mxu0 }
 0x11f   : > { %v9012_v10 = vpop.f32.mrf.mxu1 }
 0x121   : > { %606 = vmatmul.f32.gmra.mxu0 %v408_v9  ;;  %v420_v9 = vld [vmem:[%s8737_s18 + $0x200] sm:$0xff] }
 0x122   : > { %809 = vmatmul.f32.gmra.mxu1 %v409_v11 }
 0x125   : > { %v9015_v12 = vpop.f32.mrf.mxu3 }
 0x126   : > { %v9017_v13 = vpop.f32.mrf.mxu0 }
 0x127   : > { %v9020_v15 = vpop.f32.mrf.mxu1 }
 0x129   : > { %609 = vmatmul.f32.gmra.mxu0 %v410_v14  ;;  %v421_v14 = vld [vmem:[%s8737_s18 + $0x208] sm:$0xff] }
 0x12a   : > { %812 = vmatmul.f32.gmra.mxu1 %v411_v17  ;;  %v2682_v17 = vld [vmem:[%s16276_s2 + $0x60] sm:$0xff] }
 0x12b   : > { %2693 = vmatpush.msra.mxu2 %v2682_v17  ;;  %8180 = vmatpush.msra.mxu3 %v2682_v17  ;;  %v2675_v17 = vld [vmem:[%s16276_s2 + $0x28] sm:$0xff] }
 0x12d   : > { %v9023_v19 = vpop.f32.mrf.mxu3 }
 0x12e   : > { %16543 = vst [vmem:[#allocation21_spill] sm:$0xff] %v9023_v19  ;;  %v9025_v20 = vpop.f32.mrf.mxu0 }
 0x12f   : > { %v9028_v25 = vpop.f32.mrf.mxu1 }
 0x131   : > { %612 = vmatmul.f32.gmra.mxu0 %v412_v23  ;;  %v2681_v23 = vld [vmem:[%s16276_s2 + $0x58] sm:$0xff] }
 0x132   : > { %815 = vmatmul.f32.gmra.mxu1 %v413_v26  ;;  %2694 = vmatpush.msra.mxu2 %v2681_v23  ;;  %v2680_v26 = vld [vmem:[%s16276_s2 + $0x50] sm:$0xff] }
 0x133   : > { %8181 = vmatpush.msra.mxu3 %v2681_v23 }
 0x134   : > { %2695 = vmatpush.msra.mxu2 %v2680_v26 }
 0x135   : > { %v9031_v29 = vpop.f32.mrf.mxu3  ;;  %8182 = vmatpush.msra.mxu3 %v2680_v26  ;;  %v424_v26 = vld [vmem:[%s8737_s18 + $0x220] sm:$0xff] }
 0x136   : > { %16544 = vst [vmem:[#allocation22_spill] sm:$0xff] %v9031_v29  ;;  %v9033_v31 = vpop.f32.mrf.mxu0 }
 0x137   : > { %v9036_v35 = vpop.f32.mrf.mxu1 }
 0x139   : > { %615 = vmatmul.f32.gmra.mxu0 %v414_v32 }
 0x13a   : > { %818 = vmatmul.f32.gmra.mxu1 %v415_v37  ;;  %v2679_v37 = vld [vmem:[%s16276_s2 + $0x48] sm:$0xff] }
 0x13b   : > { %2696 = vmatpush.msra.mxu2 %v2679_v37  ;;  %8183 = vmatpush.msra.mxu3 %v2679_v37  ;;  %v9109_v37 = vshrl.u32 %v918_v4, 7 }
 0x13d   : > { %v9039_v38 = vpop.f32.mrf.mxu3  ;;  %2697 = vmatpush.msra.mxu2 %v2678_v60  ;;  %8184 = vmatpush.msra.mxu3 %v2678_v60  ;;  %v2674_v60 = vld [vmem:[%s16276_s2 + $0x20] sm:$0xff]  ;;  %v9124_v2 = vadd.s32 8, %v9109_v37  ;;  %vm2297_vm13 = vcmp.lt.s32.totalorder %v9109_v37, 7  ;;  %vm2172_vm15 = vcmp.lt.s32.totalorder %v9109_v37, 1 }
 0x13e   : > { %16545 = vst [vmem:[#allocation23_spill] sm:$0xff] %v9039_v38  ;;  %v9041_v41 = vpop.f32.mrf.mxu0 }
 0x13f   : > { %v9044_v44 = vpop.f32.mrf.mxu1  ;;  %2698 = vmatpush.msra.mxu2 %v2677_v63  ;;  %8185 = vmatpush.msra.mxu3 %v2677_v63  ;;  %v2673_v63 = vld [vmem:[%s16276_s2 + $0x18] sm:$0xff]  ;;  %16555 = vst [vmem:[#allocation33_spill] sm:$0xff] %v9124_v2 }
 0x141   : > { %618 = vmatmul.f32.gmra.mxu0 %v416_v43 }
 0x142   : > { %821 = vmatmul.f32.gmra.mxu1 %v417_v47  ;;  %v422_v47 = vld [vmem:[%s8737_s18 + $0x210] sm:$0xff] }
 0x145   : > { %v9047_v49 = vpop.f32.mrf.mxu3 }
 0x146   : > { %16546 = vst [vmem:[#allocation24_spill] sm:$0xff] %v9047_v49  ;;  %v9049_v50 = vpop.f32.mrf.mxu0  ;;  %v428_v49 = vld [vmem:[%s8737_s18 + $0x240] sm:$0xff] }
 0x147   : > { %v9052_v55 = vpop.f32.mrf.mxu1 }
 0x149   : > { %621 = vmatmul.f32.gmra.mxu0 %v418_v53 }
 0x14a   : > { %824 = vmatmul.f32.gmra.mxu1 %v419_v58  ;;  %v423_v58 = vld [vmem:[%s8737_s18 + $0x218] sm:$0xff] }
 0x14d   : > { %v9061_v1 = vpop.f32.mrf.mxu3 }
 0x14e   : > { %16547 = vst [vmem:[#allocation25_spill] sm:$0xff] %v9061_v1  ;;  %v9066_v6 = vpop.f32.mrf.mxu0 }
 0x14f   : > { %v9069_v11 = vpop.f32.mrf.mxu1 }
 0x150   : > { %16548 = vst [vmem:[#allocation26_spill] sm:$0xff] %v9069_v11 }
 0x151   : > { %624 = vmatmul.f32.gmra.mxu0 %v420_v9  ;;  %v2676_v9 = vld [vmem:[%s16276_s2 + $0x30] sm:$0xff] }
 0x152   : > { %827 = vmatmul.f32.gmra.mxu1 %v421_v14  ;;  %2699 = vmatpush.msra.mxu2 %v2676_v9 }
 0x153   : > { %8186 = vmatpush.msra.mxu3 %v2676_v9  ;;  %v2672_v9 = vld [vmem:[%s16276_s2 + $0x10] sm:$0xff] }
 0x154   : > { %2700 = vmatpush.msra.mxu2 %v2675_v17 }
 0x155   : > { %v9081_v32 = vpop.f32.mrf.mxu3  ;;  %8187 = vmatpush.msra.mxu3 %v2675_v17  ;;  %v2671_v17 = vld [vmem:[%s16276_s2 + $0x8] sm:$0xff] }
 0x156   : > { %16549 = vst [vmem:[#allocation27_spill] sm:$0xff] %v9081_v32  ;;  %v9086_v43 = vpop.f32.mrf.mxu0  ;;  %2701 = vmatpush.msra.mxu2 %v2674_v60  ;;  %v427_v32 = vld [vmem:[%s8737_s18 + $0x238] sm:$0xff] }
 0x157   : > { %16550 = vst [vmem:[#allocation28_spill] sm:$0xff] %v9086_v43  ;;  %v9089_v53 = vpop.f32.mrf.mxu1  ;;  %8188 = vmatpush.msra.mxu3 %v2674_v60 }
 0x158   : > { %16551 = vst [vmem:[#allocation29_spill] sm:$0xff] %v9089_v53  ;;  %2702 = vmatpush.msra.mxu2 %v2673_v63 }
 0x159   : > { %627 = vmatmul.f32.gmra.mxu0 %v422_v47  ;;  %8189 = vmatpush.msra.mxu3 %v2673_v63 }
 0x15a   : > { %830 = vmatmul.f32.gmra.mxu1 %v423_v58  ;;  %v425_v58 = vld [vmem:[%s8737_s18 + $0x228] sm:$0xff]  ;;  %2703 = vmatpush.msra.mxu2 %v2672_v9 }
 0x15b   : > { %8190 = vmatpush.msra.mxu3 %v2672_v9 }
 0x15c   : > { %2704 = vmatpush.msra.mxu2 %v2671_v17 }
 0x15d   : > { %v9101_v14 = vpop.f32.mrf.mxu3  ;;  %8191 = vmatpush.msra.mxu3 %v2671_v17 }
 0x15e   : > { %16552 = vst [vmem:[#allocation30_spill] sm:$0xff] %v9101_v14  ;;  %v9106_v23 = vpop.f32.mrf.mxu0  ;;  %v982_v14 = vcvt.s32.f32 %v9124_v2  ;;  %2705 = vmatpush.msra.mxu2 %v2670_v51 }
 0x15f   : > { %16553 = vst [vmem:[#allocation31_spill] sm:$0xff] %v9106_v23  ;;  %v9111_v47 = vpop.f32.mrf.mxu1  ;;  %8192 = vmatpush.msra.mxu3 %v2670_v51  ;;  %v429_v51 = vld [vmem:[%s8737_s18 + $0x248] sm:$0xff] }
 0x160   : > { %16554 = vst [vmem:[#allocation32_spill] sm:$0xff] %v9111_v47  ;;  %v1044_v9 = vadd.f32 0.5, %v982_v14  ;;  %v16589_v47 = vmov 0.0  }
 0x161   : > { %630 = vmatmul.f32.gmra.mxu0 %v424_v26  ;;  %v9130_v26 = vcvt.s32.f32 %v9109_v37 }
 0x162   : > { %833 = vmatmul.f32.gmra.mxu1 %v425_v58  ;;  %v9155_v39 = vmul.f32 0.016129032, %v1044_v9 }
 0x163   : > { %16556 = vst [vmem:[#allocation34_spill] sm:$0xff] %v9130_v26  ;;  %v1043_v63 = vadd.f32 0.5, %v9130_v26 }
 0x164   : > { %16564 = vst [vmem:[#allocation42_spill] sm:$0xff] %v9155_v39 }
 0x165   : > { %v9132_v60 = vpop.f32.mrf.mxu3  ;;  %v9148_v2 = vmul.f32 0.016129032, %v1043_v63  ;;  %v9165_v63 = vand.u32 127, %v918_v4 }
 0x166   : > { %16557 = vst [vmem:[#allocation35_spill] sm:$0xff] %v9132_v60  ;;  %v9134_v58 = vpop.f32.mrf.mxu0  ;;  %v9146_v60 = vadd.s32 16, %v9109_v37 }
 0x167   : > { %16558 = vst [vmem:[#allocation36_spill] sm:$0xff] %v9134_v58  ;;  %v9138_v56 = vpop.f32.mrf.mxu1  ;;  %vm1480_vm0 = vcmp.ge.s32.totalorder %v9165_v63, 64  ;;  %vm1481_vm1 = vcmp.lt.s32.totalorder %v9165_v63, 96  ;;  %vm1479_vm2 = vcmp.lt.s32.totalorder %v9165_v63, 32  ;;  %vm1486_vm4 = vcmp.ge.s32.totalorder %v9165_v63, 32 }
 0x168   : > { %16559 = vst [vmem:[#allocation37_spill] sm:$0xff] %v9138_v56  ;;  %v16289_v38 = vcvt.s32.f32 %v9146_v60  ;;  %vm1482_vm3 = vmand %vm1480_vm0, %vm1481_vm1  ;;  %vm1487_vm5 = vcmp.lt.s32.totalorder %v9165_v63, 64  ;;  %vm1799_vm9 = vcmp.ge.s32.totalorder %v9165_v63, 96  ;;  %v16298_v58 = vmov 0.0  }
 0x169   : > { %633 = vmatmul.f32.gmra.mxu0 %v426_v61  ;;  %16560 = vst [vmem:[#allocation38_spill] sm:$0xff] %v9146_v60  ;;  %v16291_v61 = vfloor.f32 %v9148_v2  ;;  %vm9205_vm7 = vmor %vm1479_vm2, %vm1482_vm3 }
 0x16a   : > { %836 = vmatmul.f32.gmra.mxu1 %v427_v32  ;;  %16561 = vst [vmem:[#allocation39_spill] sm:$0xff] %v9148_v2  ;;  %v9163_v32 = vadd.s32 24, %v9109_v37  ;;  %v1045_v9 = vadd.f32 0.5, %v16289_v38  ;;  %v431_v2 = vld [vmem:[%s8737_s18 + $0x258] sm:$0xff]  ;;  %vm9211_vm10 = vmand %vm1486_vm4, %vm1487_vm5 }
 0x16b   : > { %v1229_v33 = vmul.f32 62.0, %v16291_v61 }
 0x16c   : > { %16566 = vst [vmem:[#allocation44_spill] sm:$0xff] %v9163_v32  ;;  %v9182_v29 = vmul.f32 0.016129032, %v1045_v9  ;;  %v16571_v27 = vcvt.s32.f32 %v9163_v32  ;;  %v9200_v9 = vadd.f32 %v8935_v24, %v8932_v22  ;;  %v16592_v53 = vcvt.s32.f32 %v9163_v32 }
 0x16d   : > { %v9150_v1 = vpop.f32.mrf.mxu3  ;;  %v1291_v61 = vsub.f32 %v9130_v26, %v1229_v33 }
 0x16e   : > { %16562 = vst [vmem:[#allocation40_spill] sm:$0xff] %v9150_v1  ;;  %v9152_v45 = vpop.f32.mrf.mxu0  ;;  %v16293_v1 = vfloor.f32 %v9155_v39  ;;  %v9196_v39 = vadd.f32 %v8926_v18, %v8923_v16  ;;  %v432_v16 = vld [vmem:[%s8737_s18 + $0x260] sm:$0xff] }
 0x16f   : > { %16563 = vst [vmem:[#allocation41_spill] sm:$0xff] %v9152_v45  ;;  %v9158_v17 = vpop.f32.mrf.mxu1  ;;  %vm1353_vm6 = vcmp.ge.f32.partialorder %v1291_v61, 0.5  ;;  %vm1415_vm8 = vcmp.le.f32.partialorder %v1291_v61, 60.5 }
 0x170   : > { %16565 = vst [vmem:[#allocation43_spill] sm:$0xff] %v9158_v17  ;;  %v9189_v17 = vadd.s32 32, %v9109_v37  ;;  %vm9221_vm11 = vmand %vm9211_vm10, %vm1353_vm6  ;;  %v2110_v26 = vrot.slane %v9196_v39, 7  ;;  %v16585_v30 = vrot.slane %v9196_v39, 1 }
 0x171   : > { %636 = vmatmul.f32.gmra.mxu0 %v428_v49  ;;  %v430_v49 = vld [vmem:[%s8737_s18 + $0x250] sm:$0xff]  ;;  %16568 = vst [vmem:[#allocation46_spill] sm:$0xff] %v9182_v29  ;;  %vm9233_vm12 = vmand %vm1799_vm9, %vm1415_vm8 }
 0x172   : > { %839 = vmatmul.f32.gmra.mxu1 %v429_v51  ;;  %v1230_v51 = vmul.f32 62.0, %v16293_v1  ;;  %16570 = vst [vmem:[#allocation48_spill] sm:$0xff] %v9189_v17  ;;  %v16296_v1 = vfloor.f32 %v9182_v29  ;;  %v7735_v28 = vsel %vm9233_vm12, 1.0, %v16298_v58 }
 0x174   : > { %v1292_v33 = vsub.f32 %v982_v14, %v1230_v51  ;;  %v1231_v24 = vmul.f32 62.0, %v16296_v1  ;;  %v7673_v1 = vsel %vm9221_vm11, 1.0, %v16298_v58 }
 0x175   : > { %v9175_v45 = vpop.f32.mrf.mxu3 }
 0x176   : > { %v9177_v4 = vpop.f32.mrf.mxu0  ;;  %vm1354_vm14 = vcmp.ge.f32.partialorder %v1292_v33, 0.5  ;;  %vm1416_vm1 = vcmp.le.f32.partialorder %v1292_v33, 60.5 }
 0x177   : > { %16567 = vst [vmem:[#allocation45_spill] sm:$0xff] %v9177_v4  ;;  %v9184_v38 = vpop.f32.mrf.mxu1  ;;  %v1046_v4 = vadd.f32 0.5, %v16571_v27  ;;  %vm1614_vm0 = vmand %vm9211_vm10, %vm1354_vm14 }
 0x178   : > { %16569 = vst [vmem:[#allocation47_spill] sm:$0xff] %v9184_v38  ;;  %v16584_v38 = vcvt.s32.f32 %v9189_v17  ;;  %v7674_v23 = vsel %vm1614_vm0, 1.0, %v16589_v47  ;;  %vm1925_vm2 = vmand %vm1799_vm9, %vm1416_vm1 }
 0x179   : > { %639 = vmatmul.f32.gmra.mxu0 %v430_v49  ;;  %v9215_v22 = vmul.f32 0.016129032, %v1046_v4  ;;  %v9279_v4 = vadd.s32 40, %v9109_v37 }
 0x17a   : > { %842 = vmatmul.f32.gmra.mxu1 %v431_v2  ;;  %v2236_v2 = vrot.slane %v9200_v9, 1  ;;  %v1047_v19 = vadd.f32 0.5, %v16584_v38 }
 0x17b   : > { %16576 = vst [vmem:[#allocation49_spill] sm:$0xff] %v9215_v22 }
 0x17c   : > { %v2358_v38 = vsel %vm2297_vm13, %v16585_v30, %v2236_v2  ;;  %16587 = vst [vmem:[#allocation53_spill] sm:$0xff] %v9279_v4 }
 0x17d   : > { %v915_v14 = vpop.f32.mrf.mxu3 }
 0x17e   : > { %v9226_v49 = vadd.f32 %v915_v14, %v9015_v12  ;;  %v9228_v51 = vpop.f32.mrf.mxu0  ;;  %v2111_v12 = vrot.slane %v9200_v9, 7 }
 0x17f   : > { %16580 = vst [vmem:[#allocation51_spill] sm:$0xff] %v9228_v51  ;;  %v9242_v14 = vpop.f32.mrf.mxu1  ;;  %v433_v51 = vld [vmem:[%s8737_s18 + $0x268] sm:$0xff] }
 0x180   : > { %16579 = vst [vmem:[#allocation50_spill] sm:$0xff] %v9226_v49  ;;  %v16300_v56 = vrot.slane %v9226_v49, 7  ;;  %v2233_v33 = vsel %vm2172_vm15, %v2110_v26, %v2111_v12 }
 0x181   : > { %16583 = vst [vmem:[#allocation52_spill] sm:$0xff] %v9242_v14  ;;  %v9259_v14 = vsel %vm9205_vm7, 1.0, %v16298_v58  ;;  %642 = vmatmul.f32.gmra.mxu0 %v432_v16  ;;  %v16586_v16 = vcvt.s32.f32 %v9146_v60  ;;  %v9283_v58 = vmul.f32 0.016129032, %v1047_v19  ;;  %v2546_v60 = vmul.f32 %v7735_v28, %v2358_v38  ;;  %v434_v19 = vld [vmem:[%s8737_s18 + $0x270] sm:$0xff] }
 0x182   : > { %845 = vmatmul.f32.gmra.mxu1 %v433_v51  ;;  %v2234_v27 = vsel %vm2172_vm15, %v16300_v56, %v2110_v26  ;;  %v2360_v30 = vmul.f32 %v9259_v14, %v9196_v39  ;;  %v2237_v51 = vrot.slane %v9249_v21, 1  ;;  %v16590_v56 = vfloor.f32 %v9215_v22  ;;  %v435_v26 = vld [vmem:[%s8737_s18 + $0x278] sm:$0xff] }
 0x183   : > { %v1293_v61 = vsub.f32 %v16586_v16, %v1231_v24  ;;  %v2422_v29 = vmul.f32 %v7673_v1, %v2234_v27  ;;  %16588 = vst [vmem:[#allocation54_spill] sm:$0xff] %v9283_v58  ;;  %v2112_v1 = vrot.slane %v9249_v21, 7  ;;  %v16303_v28 = vfloor.f32 %v9283_v58 }
 0x184   : > { %v1232_v24 = vmul.f32 62.0, %v16590_v56  ;;  %v2361_v56 = vmul.f32 %v9259_v14, %v9200_v9  ;;  %v9306_v38 = vadd.f32 %v8953_v36, %v8950_v34  ;;  %v2357_v22 = vsel %vm2297_vm13, %v2236_v2, %v2237_v51 }
 0x185   : > { %v2484_v16 = vadd.f32 %v2422_v29, %v2360_v30  ;;  %vm1355_vm3 = vcmp.ge.f32.partialorder %v1293_v61, 0.5  ;;  %v2423_v29 = vmul.f32 %v7674_v23, %v2233_v33  ;;  %v7736_v30 = vsel %vm1925_vm2, 1.0, %v16589_v47 }
 0x186   : > { %v9294_v27 = vpop.f32.mrf.mxu0  ;;  %vm1615_vm4 = vmand %vm9211_vm10, %vm1355_vm3  ;;  %vm1417_vm5 = vcmp.le.f32.partialorder %v1293_v61, 60.5  ;;  %v16593_v23 = vcvt.s32.f32 %v9279_v4  ;;  %v9318_v36 = vadd.s32 48, %v9109_v37  ;;  %v2547_v9 = vmul.f32 %v7736_v30, %v2357_v22 }
 0x187   : > { %v9298_v43 = vpop.f32.mrf.mxu1  ;;  %v2608_v11 = vadd.f32 %v2546_v60, %v2484_v16  ;;  %v2485_v60 = vadd.f32 %v2423_v29, %v2361_v56  ;;  %v7675_v2 = vsel %vm1615_vm4, 1.0, %v16589_v47  ;;  %v2232_v33 = vsel %vm2172_vm15, %v2111_v12, %v2112_v1  ;;  %vm1926_vm7 = vmand %vm1799_vm9, %vm1417_vm5  ;;  %v436_v16 = vld [vmem:[%s8737_s18 + $0x280] sm:$0xff]  ;;  %v437_v29 = vld [vmem:[%s8737_s18 + $0x288] sm:$0xff] }
 0x188   : > { %16591 = vst [vmem:[#allocation55_spill] sm:$0xff] %v9298_v43  ;;  %v1294_v43 = vsub.f32 %v16592_v53, %v1232_v24  ;;  %v1048_v34 = vadd.f32 0.5, %v16593_v23  ;;  %v1233_v53 = vmul.f32 62.0, %v16303_v28  ;;  %v2113_v61 = vrot.slane %v9306_v38, 7 }
 0x189   : > { %2706 = vmatmul.f32.vlgmr.msra.gmra.mxu2 %v2608_v11  ;;  %645 = vmatmul.f32.gmra.mxu0 %v434_v19  ;;  %16594 = vst [vmem:[#allocation56_spill] sm:$0xff] %v9318_v36  ;;  %v2238_v11 = vrot.slane %v9306_v38, 1  ;;  %v9329_v24 = vadd.f32 %v8962_v42, %v8959_v40  ;;  %v2609_v12 = vadd.f32 %v2547_v9, %v2485_v60  ;;  %v16596_v40 = vcvt.s32.f32 %v9189_v17 }
 0x18a   : > { %848 = vmatmul.f32.gmra.mxu1 %v435_v26  ;;  %vm1356_vm6 = vcmp.ge.f32.partialorder %v1294_v43, 0.5  ;;  %v9336_v19 = vmul.f32 0.016129032, %v1048_v34  ;;  %v2362_v30 = vmul.f32 %v9259_v14, %v9249_v21  ;;  %v2424_v23 = vmul.f32 %v7675_v2, %v2232_v33 }
 0x18b   : > { %vm1616_vm8 = vmand %vm9211_vm10, %vm1356_vm6  ;;  %v1295_v42 = vsub.f32 %v16596_v40, %v1233_v53  ;;  %v7737_v28 = vsel %vm1926_vm7, 1.0, %v16589_v47  ;;  %v2356_v34 = vsel %vm2297_vm13, %v2237_v51, %v2238_v11  ;;  %vm1418_vm11 = vcmp.le.f32.partialorder %v1294_v43, 60.5 }
 0x18c   : > { %16595 = vst [vmem:[#allocation57_spill] sm:$0xff] %v9336_v19  ;;  %v2239_v26 = vrot.slane %v9329_v24, 1  ;;  %v2231_v21 = vsel %vm2172_vm15, %v2112_v1, %v2113_v61  ;;  %v7676_v60 = vsel %vm1616_vm8, 1.0, %v16589_v47  ;;  %v16306_v9 = vfloor.f32 %v9336_v19  ;;  %vm1927_vm12 = vmand %vm1799_vm9, %vm1418_vm11 }
 0x18d   : > { %v16597_v53 = vcvt.s32.f32 %v9318_v36  ;;  %v9359_v33 = vadd.s32 56, %v9109_v37  ;;  %v2486_v43 = vadd.f32 %v2424_v23, %v2362_v30  ;;  %v2548_v51 = vmul.f32 %v7737_v28, %v2356_v34 }
 0x18e   : > { %v9333_v22 = vpop.f32.mrf.mxu0  ;;  %vm1357_vm14 = vcmp.ge.f32.partialorder %v1295_v42, 0.5  ;;  %v2114_v1 = vrot.slane %v9329_v24, 7  ;;  %v7738_v30 = vsel %vm1927_vm12, 1.0, %v16589_v47  ;;  %v1234_v28 = vmul.f32 62.0, %v16306_v9 }
 0x18f   : > { %v9339_v56 = vpop.f32.mrf.mxu1  ;;  %v1049_v2 = vadd.f32 0.5, %v16597_v53  ;;  %16598 = vst [vmem:[#allocation58_spill] sm:$0xff] %v9359_v33  ;;  %v438_v53 = vld [vmem:[%s8737_s18 + $0x290] sm:$0xff]  ;;  %vm1617_vm0 = vmand %vm9211_vm10, %vm1357_vm14  ;;  %v16307_v34 = vcvt.s32.f32 %v9359_v33  ;;  %v9387_v58 = vadd.s32 64, %v9109_v37  ;;  %vm1419_vm1 = vcmp.le.f32.partialorder %v1295_v42, 60.5 }
 0x190   : > { %vm1928_vm2 = vmand %vm1799_vm9, %vm1419_vm1  ;;  %v2364_v42 = vmul.f32 %v9259_v14, %v9329_v24 }
 0x191   : > { %2709 = vmatmul.f32.gmra.mxu2 %v2609_v12  ;;  %648 = vmatmul.f32.gmra.mxu0 %v436_v16  ;;  %v2355_v16 = vsel %vm2297_vm13, %v2238_v11, %v2239_v26  ;;  %v2363_v12 = vmul.f32 %v9259_v14, %v9306_v38  ;;  %v9376_v23 = vmul.f32 0.016129032, %v1049_v2  ;;  %v9381_v11 = vadd.f32 %v8971_v48, %v8968_v46 }
 0x192   : > { %851 = vmatmul.f32.gmra.mxu1 %v437_v29  ;;  %v2425_v29 = vmul.f32 %v7676_v60, %v2231_v21  ;;  %v2610_v21 = vadd.f32 %v2548_v51, %v2486_v43  ;;  %v439_v60 = vld [vmem:[%s8737_s18 + $0x298] sm:$0xff]  ;;  %v2549_v9 = vmul.f32 %v7738_v30, %v2355_v16  ;;  %v7677_v2 = vsel %vm1617_vm0, 1.0, %v16589_v47  ;;  %v440_v30 = vld [vmem:[%s8737_s18 + $0x2a0] sm:$0xff] }
 0x193   : > { %16599 = vst [vmem:[#allocation59_spill] sm:$0xff] %v9376_v23  ;;  %v2230_v46 = vsel %vm2172_vm15, %v2113_v61, %v2114_v1  ;;  %v16600_v48 = vcvt.s32.f32 %v9279_v4  ;;  %v16309_v51 = vfloor.f32 %v9376_v23  ;;  %v7739_v16 = vsel %vm1928_vm2, 1.0, %v16589_v47 }
 0x194   : > { %v2487_v32 = vadd.f32 %v2425_v29, %v2363_v12  ;;  %v2240_v12 = vrot.slane %v9381_v11, 1  ;;  %v2426_v61 = vmul.f32 %v7677_v2, %v2230_v46  ;;  %v16602_v24 = vcvt.s32.f32 %v9387_v58 }
 0x195   : > { %v1296_v43 = vsub.f32 %v16600_v48, %v1234_v28  ;;  %v1235_v28 = vmul.f32 62.0, %v16309_v51  ;;  %v9424_v46 = vadd.f32 %v8980_v54, %v8977_v52 }
 0x196   : > { %v9368_v40 = vpop.f32.mrf.mxu0  ;;  %v2354_v19 = vsel %vm2297_vm13, %v2239_v26, %v2240_v12  ;;  %v1051_v2 = vadd.f32 0.5, %v16602_v24  ;;  %v16603_v24 = vcvt.s32.f32 %v9318_v36 }
 0x197   : > { %v9383_v38 = vpop.f32.mrf.mxu1  ;;  %vm1358_vm3 = vcmp.ge.f32.partialorder %v1296_v43, 0.5  ;;  %v2550_v26 = vmul.f32 %v7739_v16, %v2354_v19  ;;  %vm1420_vm5 = vcmp.le.f32.partialorder %v1296_v43, 60.5  ;;  %v2241_v54 = vrot.slane %v9424_v46, 1  ;;  %v442_v43 = vld [vmem:[%s8737_s18 + $0x2b0] sm:$0xff] }
 0x198   : > { %vm1618_vm4 = vmand %vm9211_vm10, %vm1358_vm3  ;;  %v1297_v51 = vsub.f32 %v16603_v24, %v1235_v28  ;;  %v9431_v17 = vmul.f32 0.016129032, %v1051_v2  ;;  %v2365_v28 = vmul.f32 %v9259_v14, %v9381_v11  ;;  %v2116_v4 = vrot.slane %v9424_v46, 7 }
 0x199   : > { %2712 = vmatmul.f32.gmra.mxu2 %v2610_v21  ;;  %651 = vmatmul.f32.gmra.mxu0 %v438_v53  ;;  %v1050_v21 = vadd.f32 0.5, %v16307_v34  ;;  %v2611_v53 = vadd.f32 %v2549_v9, %v2487_v32  ;;  %v441_v34 = vld [vmem:[%s8737_s18 + $0x2a8] sm:$0xff]  ;;  %v9419_v32 = vadd.s32 72, %v9109_v37  ;;  %v2115_v9 = vrot.slane %v9381_v11, 7  ;;  %vm1929_vm6 = vmand %vm1799_vm9, %vm1420_vm5 }
 0x19a   : > { %854 = vmatmul.f32.gmra.mxu1 %v439_v60  ;;  %16604 = vst [vmem:[#allocation61_spill] sm:$0xff] %v9431_v17  ;;  %vm1359_vm7 = vcmp.ge.f32.partialorder %v1297_v51, 0.5  ;;  %v9464_v11 = vadd.s32 488, %v9109_v37  ;;  %vm1421_vm11 = vcmp.le.f32.partialorder %v1297_v51, 60.5 }
 0x19b   : > { %v9408_v60 = vmul.f32 0.016129032, %v1050_v21  ;;  %v2488_v21 = vadd.f32 %v2426_v61, %v2364_v42  ;;  %v16314_v52 = vcvt.s32.f32 %v9419_v32  ;;  %v7678_v42 = vsel %vm1618_vm4, 1.0, %v16589_v47  ;;  %vm1619_vm8 = vmand %vm9211_vm10, %vm1359_vm7 }
 0x19c   : > { %v2229_v61 = vsel %vm2172_vm15, %v2114_v1, %v2115_v9  ;;  %v16316_v1 = vfloor.f32 %v9431_v17  ;;  %v2228_v51 = vsel %vm2172_vm15, %v2115_v9, %v2116_v4  ;;  %vm1930_vm12 = vmand %vm1799_vm9, %vm1421_vm11  ;;  %v16607_v9 = vcvt.s32.f32 %v9387_v58 }
 0x19d   : > { %16601 = vst [vmem:[#allocation60_spill] sm:$0xff] %v9408_v60  ;;  %v16313_v23 = vfloor.f32 %v9408_v60  ;;  %v2427_v2 = vmul.f32 %v7678_v42, %v2229_v61  ;;  %v1052_v24 = vadd.f32 0.5, %v16314_v52  ;;  %v16605_v42 = vcvt.s32.f32 %v9359_v33 }
 0x19e   : > { %v9403_v29 = vpop.f32.mrf.mxu0  ;;  %v7679_v60 = vsel %vm1619_vm8, 1.0, %v16589_v47  ;;  %v9497_v33 = vadd.f32 %v8996_v0, %v8993_v62  ;;  %v9505_v58 = vadd.s32 88, %v9109_v37 }
 0x19f   : > { %v9410_v48 = vpop.f32.mrf.mxu1  ;;  %v1236_v16 = vmul.f32 62.0, %v16313_v23  ;;  %v2353_v23 = vsel %vm2297_vm13, %v2240_v12, %v2241_v54  ;;  %v2489_v61 = vadd.f32 %v2427_v2, %v2365_v28  ;;  %v2366_v28 = vmul.f32 %v9259_v14, %v9424_v46 }
 0x1a0   : > { %v7741_v46 = vsel %vm1930_vm12, 1.0, %v16589_v47 }
 0x1a1   : > { %2715 = vmatmul.f32.gmra.mxu2 %v2611_v53  ;;  %654 = vmatmul.f32.gmra.mxu0 %v440_v30  ;;  %v443_v30 = vld [vmem:[%s8737_s18 + $0x2b8] sm:$0xff] }
 0x1a2   : > { %857 = vmatmul.f32.gmra.mxu1 %v441_v34  ;;  %v2612_v34 = vadd.f32 %v2550_v26, %v2488_v21  ;;  %v9456_v21 = vadd.f32 %v8988_v59, %v8985_v57  ;;  %v7740_v26 = vsel %vm1929_vm6, 1.0, %v16589_v47  ;;  %v1298_v57 = vsub.f32 %v16605_v42, %v1236_v16  ;;  %v445_v42 = vld [vmem:[%s8737_s18 + $0x2c8] sm:$0xff] }
 0x1a3   : > { %v9469_v59 = vadd.s32 80, %v9109_v37  ;;  %v2551_v12 = vmul.f32 %v7740_v26, %v2353_v23  ;;  %v444_v23 = vld [vmem:[%s8737_s18 + $0x2c0] sm:$0xff] }
 0x1a4   : > { %v2242_v52 = vrot.slane %v9456_v21, 1  ;;  %vm1360_vm14 = vcmp.ge.f32.partialorder %v1298_v57, 0.5  ;;  %v2117_v16 = vrot.slane %v9456_v21, 7  ;;  %vm1422_vm1 = vcmp.le.f32.partialorder %v1298_v57, 60.5 }
 0x1a5   : > { %v2613_v26 = vadd.f32 %v2551_v12, %v2489_v61  ;;  %vm1620_vm0 = vmand %vm9211_vm10, %vm1360_vm14  ;;  %v16609_v62 = vcvt.s32.f32 %v9469_v59  ;;  %v9520_v57 = vadd.f32 %v9004_v5, %v9001_v3 }
 0x1a6   : > { %v9440_v19 = vpop.f32.mrf.mxu0  ;;  %v2352_v2 = vsel %vm2297_vm13, %v2241_v54, %v2242_v52  ;;  %vm1931_vm3 = vmand %vm1799_vm9, %vm1422_vm1 }
 0x1a7   : > { %v9445_v53 = vpop.f32.mrf.mxu1  ;;  %v1053_v0 = vadd.f32 0.5, %v16609_v62 }
 0x1a9   : > { %2718 = vmatmul.f32.gmra.mxu2 %v2612_v34  ;;  %657 = vmatmul.f32.gmra.mxu0 %v442_v43  ;;  %v1237_v34 = vmul.f32 62.0, %v16316_v1  ;;  %v9473_v43 = vmul.f32 0.016129032, %v1052_v24  ;;  %v2428_v1 = vmul.f32 %v7679_v60, %v2228_v51  ;;  %v16608_v60 = vcvt.s32.f32 %v9464_v11 }
 0x1aa   : > { %860 = vmatmul.f32.gmra.mxu1 %v443_v30  ;;  %v2243_v51 = vrot.slane %v9497_v33, 1 }
 0x1ab   : > { %16606 = vst [vmem:[#allocation62_spill] sm:$0xff] %v9473_v43  ;;  %v1299_v17 = vsub.f32 %v16607_v9, %v1237_v34  ;;  %v16320_v36 = vfloor.f32 %v9473_v43  ;;  %v1104_v61 = vadd.f32 0.5, %v16608_v60  ;;  %v2490_v12 = vadd.f32 %v2428_v1, %v2366_v28  ;;  %v446_v9 = vld [vmem:[%s8737_s18 + $0x2d0] sm:$0xff]  ;;  %v447_v60 = vld [vmem:[%s8737_s18 + $0x2d8] sm:$0xff] }
 0x1ac   : > { %v2552_v34 = vmul.f32 %v7741_v46, %v2352_v2  ;;  %v2367_v46 = vmul.f32 %v9259_v14, %v9456_v21  ;;  %v7742_v1 = vsel %vm1931_vm3, 1.0, %v16589_v47  ;;  %v2351_v43 = vsel %vm2297_vm13, %v2242_v52, %v2243_v51 }
 0x1ad   : > { %vm1361_vm2 = vcmp.ge.f32.partialorder %v1299_v17, 0.5  ;;  %v1238_v54 = vmul.f32 62.0, %v16320_v36  ;;  %v9525_v28 = vmul.f32 0.016129032, %v1104_v61  ;;  %vm1423_vm5 = vcmp.le.f32.partialorder %v1299_v17, 60.5 }
 0x1ae   : > { %v9482_v30 = vpop.f32.mrf.mxu0  ;;  %vm1621_vm4 = vmand %vm9211_vm10, %vm1361_vm2  ;;  %v2614_v5 = vadd.f32 %v2552_v34, %v2490_v12  ;;  %v16613_v61 = vcvt.s32.f32 %v9419_v32  ;;  %v16614_v17 = vcvt.s32.f32 %v9505_v58  ;;  %v9555_v34 = vadd.s32 96, %v9109_v37 }
 0x1af   : > { %v9488_v24 = vpop.f32.mrf.mxu1  ;;  %16610 = vst [vmem:[#allocation63_spill] sm:$0xff] %v9525_v28  ;;  %v16322_v21 = vfloor.f32 %v9525_v28  ;;  %vm1932_vm6 = vmand %vm1799_vm9, %vm1423_vm5  ;;  %v16624_v28 = vrot.slane %v9520_v57, 1 }
 0x1b0   : > { %v1300_v36 = vsub.f32 %v16613_v61, %v1238_v54  ;;  %v1054_v32 = vadd.f32 0.5, %v16614_v17  ;;  %v449_v17 = vld [vmem:[%s8737_s18 + $0x2e8] sm:$0xff] }
 0x1b1   : > { %2721 = vmatmul.f32.gmra.mxu2 %v2613_v26  ;;  %660 = vmatmul.f32.gmra.mxu0 %v444_v23  ;;  %v7680_v23 = vsel %vm1620_vm0, 1.0, %v16589_v47  ;;  %v2227_v26 = vsel %vm2172_vm15, %v2116_v4, %v2117_v16  ;;  %v9534_v4 = vmul.f32 0.016129032, %v1053_v0  ;;  %v7681_v0 = vsel %vm1621_vm4, 1.0, %v16589_v47 }
 0x1b2   : > { %863 = vmatmul.f32.gmra.mxu1 %v445_v42  ;;  %v2118_v42 = vrot.slane %v9497_v33, 7  ;;  %v2429_v62 = vmul.f32 %v7680_v23, %v2227_v26  ;;  %v2553_v23 = vmul.f32 %v7742_v1, %v2351_v43  ;;  %vm1362_vm7 = vcmp.ge.f32.partialorder %v1300_v36, 0.5  ;;  %v448_v1 = vld [vmem:[%s8737_s18 + $0x2e0] sm:$0xff] }
 0x1b3   : > { %16612 = vst [vmem:[#allocation65_spill] sm:$0xff] %v9534_v4  ;;  %v16324_v52 = vfloor.f32 %v9534_v4  ;;  %v9571_v43 = vadd.f32 %v9175_v45, %v9007_v7  ;;  %vm1622_vm8 = vmand %vm9211_vm10, %vm1362_vm7  ;;  %vm1424_vm11 = vcmp.le.f32.partialorder %v1300_v36, 60.5  ;;  %v9602_v36 = vadd.s32 104, %v9109_v37 }
 0x1b4   : > { %v2226_v12 = vsel %vm2172_vm15, %v2117_v16, %v2118_v42  ;;  %v2491_v54 = vadd.f32 %v2429_v62, %v2367_v46  ;;  %v2368_v16 = vmul.f32 %v9259_v14, %v9497_v33  ;;  %v9567_v46 = vmul.f32 0.016129032, %v1054_v32  ;;  %vm9608_vm12 = vmand %vm1799_vm9, %vm1424_vm11 }
 0x1b5   : > { %v2430_v26 = vmul.f32 %v7681_v0, %v2226_v12  ;;  %v1239_v62 = vmul.f32 62.0, %v16324_v52  ;;  %v16325_v0 = vcvt.s32.f32 %v9555_v34  ;;  %v9586_v32 = vadd.f32 %v9012_v10, %v9009_v8 }
 0x1b6   : > { %v9527_v2 = vpop.f32.mrf.mxu0  ;;  %16615 = vst [vmem:[#allocation66_spill] sm:$0xff] %v9567_v46  ;;  %v7682_v52 = vsel %vm1622_vm8, 1.0, %v16589_v47  ;;  %v16328_v8 = vrot.slane %v9571_v43, 7  ;;  %v16617_v10 = vcvt.s32.f32 %v9469_v59  ;;  %v2369_v59 = vmul.f32 %v9259_v14, %v9520_v57 }
 0x1b7   : > { %16611 = vst [vmem:[#allocation64_spill] sm:$0xff] %v9527_v2  ;;  %v9536_v3 = vpop.f32.mrf.mxu1  ;;  %v16323_v2 = vrot.slane %v9520_v57, 1  ;;  %v2492_v45 = vadd.f32 %v2430_v26, %v2368_v16  ;;  %v16330_v16 = vrot.slane %v9226_v49, 1  ;;  %v2245_v26 = vrot.slane %v9586_v32, 1 }
 0x1b9   : > { %2724 = vmatmul.f32.gmra.mxu2 %v2614_v5  ;;  %663 = vmatmul.f32.gmra.mxu0 %v446_v9  ;;  %v1290_v9 = vmul.f32 62.0, %v16322_v21  ;;  %v16326_v5 = vrot.slane %v9520_v57, 7  ;;  %v2350_v61 = vsel %vm2297_vm13, %v2243_v51, %v16323_v2  ;;  %v2615_v51 = vadd.f32 %v2553_v23, %v2491_v54 }
 0x1ba   : > { %866 = vmatmul.f32.gmra.mxu1 %v447_v60  ;;  %v7743_v60 = vsel %vm1932_vm6, 1.0, %v16589_v47  ;;  %v16616_v21 = vcvt.s32.f32 %v9464_v11  ;;  %v16327_v23 = vfloor.f32 %v9567_v46  ;;  %v1301_v11 = vsub.f32 %v16617_v10, %v1239_v62 }
 0x1bb   : > { %v2554_v7 = vmul.f32 %v7743_v60, %v2350_v61  ;;  %v2225_v54 = vsel %vm2172_vm15, %v2118_v42, %v16326_v5 }
 0x1bc   : > { %v1352_v2 = vsub.f32 %v16616_v21, %v1290_v9  ;;  %v1055_v21 = vadd.f32 0.5, %v16325_v0  ;;  %v16620_v9 = vrot.slane %v9226_v49, 7  ;;  %v1240_v62 = vmul.f32 62.0, %v16327_v23 }
 0x1bd   : > { %v2616_v61 = vadd.f32 %v2554_v7, %v2492_v45  ;;  %vm1363_vm2 = vcmp.ge.f32.partialorder %v1301_v11, 0.5  ;;  %v451_v45 = vld [vmem:[%s8737_s18 + $0x2f8] sm:$0xff]  ;;  %v2120_v23 = vrot.slane %v9586_v32, 7  ;;  %v7744_v0 = vsel %vm9608_vm12, 1.0, %v16589_v47 }
 0x1be   : > { %v9573_v33 = vpop.f32.mrf.mxu0  ;;  %vm1414_vm14 = vcmp.ge.f32.partialorder %v1352_v2, 0.5  ;;  %v2173_v60 = vsel %vm2172_vm15, %v16328_v8, %v16620_v9  ;;  %vm1476_vm0 = vcmp.le.f32.partialorder %v1352_v2, 60.5  ;;  %v9627_v10 = vmul.f32 0.016129032, %v1055_v21  ;;  %vm1623_vm5 = vmand %vm9211_vm10, %vm1363_vm2 }
 0x1bf   : > { %v9581_v12 = vpop.f32.mrf.mxu1  ;;  %vm1674_vm1 = vmand %vm9211_vm10, %vm1414_vm14  ;;  %v9648_v8 = vadd.f32 %v9020_v15, %v9017_v13  ;;  %vm1425_vm4 = vcmp.le.f32.partialorder %v1301_v11, 60.5  ;;  %v2370_v11 = vmul.f32 %v9259_v14, %v9586_v32  ;;  %v16632_v32 = vcvt.s32.f32 %v9555_v34 }
 0x1c0   : > { %16621 = vst [vmem:[#allocation67_spill] sm:$0xff] %v9627_v10  ;;  %v7734_v5 = vsel %vm1674_vm1, 1.0, %v16589_v47  ;;  %vm1985_vm3 = vmand %vm1799_vm9, %vm1476_vm0  ;;  %v16332_v42 = vfloor.f32 %v9627_v10 }
 0x1c1   : > { %2727 = vmatmul.f32.gmra.mxu2 %v2615_v51  ;;  %666 = vmatmul.f32.gmra.mxu0 %v448_v1  ;;  %v2431_v1 = vmul.f32 %v7682_v52, %v2225_v54  ;;  %v2421_v52 = vmul.f32 %v9259_v14, %v9226_v49  ;;  %v7796_v7 = vsel %vm1985_vm3, 1.0, %v16589_v47  ;;  %v16623_v54 = vrot.slane %v9196_v39, 1  ;;  %vm1934_vm6 = vmand %vm1799_vm9, %vm1425_vm4 }
 0x1c2   : > { %869 = vmatmul.f32.gmra.mxu1 %v449_v17  ;;  %v450_v17 = vld [vmem:[%s8737_s18 + $0x2f0] sm:$0xff]  ;;  %v2483_v9 = vmul.f32 %v7734_v5, %v2173_v60  ;;  %v2349_v39 = vsel %vm2297_vm13, %v16624_v28, %v2245_v26  ;;  %v16625_v5 = vcvt.s32.f32 %v9505_v58  ;;  %v16626_v60 = vcvt.s32.f32 %v9602_v36 }
 0x1c3   : > { %v2359_v21 = vsel %vm2297_vm13, %v16330_v16, %v16623_v54  ;;  %v9666_v28 = vadd.s32 112, %v9109_v37  ;;  %v2555_v16 = vmul.f32 %v7744_v0, %v2349_v39  ;;  %v2246_v46 = vrot.slane %v9648_v8, 1  ;;  %v453_v39 = vld [vmem:[%s8737_s18 + $0x308] sm:$0xff] }
 0x1c4   : > { %v1302_v13 = vsub.f32 %v16625_v5, %v1240_v62  ;;  %v2545_v15 = vadd.f32 %v2483_v9, %v2421_v52  ;;  %v1056_v54 = vadd.f32 0.5, %v16626_v60  ;;  %v7683_v58 = vsel %vm1623_vm5, 1.0, %v16589_v47 }
 0x1c5   : > { %v16627_v62 = vrot.slane %v9520_v57, 7  ;;  %v1241_v0 = vmul.f32 62.0, %v16332_v42  ;;  %v16335_v57 = vcvt.s32.f32 %v9666_v28  ;;  %v9695_v60 = vadd.f32 %v9028_v25, %v9025_v20 }
 0x1c6   : > { %v9624_v51 = vpop.f32.mrf.mxu0  ;;  %vm1364_vm7 = vcmp.ge.f32.partialorder %v1302_v13, 0.5  ;;  %vm1426_vm8 = vcmp.le.f32.partialorder %v1302_v13, 60.5  ;;  %v9733_v42 = vadd.f32 %v9036_v35, %v9033_v31 }
 0x1c7   : > { %v9635_v2 = vpop.f32.mrf.mxu1  ;;  %v2224_v52 = vsel %vm2172_vm15, %v16627_v62, %v2120_v23  ;;  %vm1624_vm11 = vmand %vm9211_vm10, %vm1364_vm7  ;;  %v1057_v25 = vadd.f32 0.5, %v16335_v57  ;;  %v2247_v13 = vrot.slane %v9695_v60, 1  ;;  %v9771_v57 = vadd.f32 %v9044_v44, %v9041_v41 }
 0x1c8   : > { %16622 = vst [vmem:[#allocation68_spill] sm:$0xff] %v9635_v2  ;;  %v2432_v5 = vmul.f32 %v7683_v58, %v2224_v52  ;;  %v7684_v62 = vsel %vm1624_vm11, 1.0, %v16589_v47  ;;  %vm1935_vm12 = vmand %vm1799_vm9, %vm1426_vm8  ;;  %v9785_v44 = vadd.s32 136, %v9109_v37 }
 0x1c9   : > { %2730 = vmatmul.f32.gmra.mxu2 %v2616_v61  ;;  %669 = vmatmul.f32.gmra.mxu0 %v450_v17  ;;  %v2607_v61 = vmul.f32 %v7796_v7, %v2359_v21  ;;  %v2493_v17 = vadd.f32 %v2431_v1, %v2369_v59  ;;  %v452_v7 = vld [vmem:[%s8737_s18 + $0x300] sm:$0xff]  ;;  %v9684_v59 = vmul.f32 0.016129032, %v1056_v54  ;;  %v2348_v54 = vsel %vm2297_vm13, %v2245_v26, %v2246_v46 }
 0x1ca   : > { %872 = vmatmul.f32.gmra.mxu1 %v451_v45  ;;  %v9709_v26 = vadd.s32 120, %v9109_v37  ;;  %v2374_v10 = vmul.f32 %v9259_v14, %v9771_v57 }
 0x1cb   : > { %v9674_v45 = vadd.f32 %v2607_v61, %v2545_v15  ;;  %16630 = vst [vmem:[#allocation71_spill] sm:$0xff] %v9684_v59  ;;  %v2617_v21 = vadd.f32 %v2555_v16, %v2493_v17  ;;  %v2121_v15 = vrot.slane %v9648_v8, 7  ;;  %v7745_v61 = vsel %vm1934_vm6, 1.0, %v16589_v47 }
 0x1cc   : > { %v1303_v16 = vsub.f32 %v16632_v32, %v1241_v0  ;;  %v16333_v20 = vfloor.f32 %v9684_v59  ;;  %v2494_v17 = vadd.f32 %v2432_v5, %v2370_v11  ;;  %v2556_v58 = vmul.f32 %v7745_v61, %v2348_v54  ;;  %v455_v61 = vld [vmem:[%s8737_s18 + $0x318] sm:$0xff] }
 0x1cd   : > { %16628 = vst [vmem:[#allocation69_spill] sm:$0xff] %v9674_v45  ;;  %v2223_v52 = vsel %vm2172_vm15, %v2120_v23, %v2121_v15  ;;  %v2371_v23 = vmul.f32 %v9259_v14, %v9648_v8  ;;  %v2122_v32 = vrot.slane %v9695_v60, 7  ;;  %v16636_v8 = vcvt.s32.f32 %v9602_v36  ;;  %v16650_v45 = vld [vmem:[#allocation26_spill] sm:$0xff] }
 0x1ce   : > { %v9679_v9 = vpop.f32.mrf.mxu0  ;;  %vm1365_vm14 = vcmp.ge.f32.partialorder %v1303_v16, 0.5  ;;  %v1242_v0 = vmul.f32 62.0, %v16333_v20  ;;  %v2618_v5 = vadd.f32 %v2556_v58, %v2494_v17  ;;  %v2433_v54 = vmul.f32 %v7684_v62, %v2223_v52 }
 0x1cf   : > { %16629 = vst [vmem:[#allocation70_spill] sm:$0xff] %v9679_v9  ;;  %v9687_v1 = vpop.f32.mrf.mxu1  ;;  %v7746_v20 = vsel %vm1935_vm12, 1.0, %v16589_v47  ;;  %vm1427_vm0 = vcmp.le.f32.partialorder %v1303_v16, 60.5  ;;  %vm1625_vm1 = vmand %vm9211_vm10, %vm1365_vm14  ;;  %v2248_v16 = vrot.slane %v9733_v42, 1  ;;  %v9814_v59 = vadd.f32 %v9052_v55, %v9049_v50 }
 0x1d0   : > { %16631 = vst [vmem:[#allocation72_spill] sm:$0xff] %v9687_v1  ;;  %v1304_v17 = vsub.f32 %v16636_v8, %v1242_v0  ;;  %v2495_v58 = vadd.f32 %v2433_v54, %v2371_v23  ;;  %v7685_v52 = vsel %vm1625_vm1, 1.0, %v16589_v47  ;;  %vm1936_vm2 = vmand %vm1799_vm9, %vm1427_vm0  ;;  %v456_v0 = vld [vmem:[%s8737_s18 + $0x320] sm:$0xff]  ;;  %v9861_v49 = vadd.f32 %v16650_v45, %v9066_v6 }
 0x1d1   : > { %2733 = vmatmul.f32.gmra.mxu2 %v2617_v21  ;;  %672 = vmatmul.f32.gmra.mxu0 %v452_v7  ;;  %v454_v7 = vld [vmem:[%s8737_s18 + $0x310] sm:$0xff]  ;;  %v9722_v21 = vmul.f32 0.016129032, %v1057_v25  ;;  %v2347_v25 = vsel %vm2297_vm13, %v2246_v46, %v2247_v13  ;;  %v9747_v46 = vadd.s32 128, %v9109_v37 }
 0x1d2   : > { %875 = vmatmul.f32.gmra.mxu1 %v453_v39  ;;  %v16334_v39 = vcvt.s32.f32 %v9709_v26  ;;  %v2557_v62 = vmul.f32 %v7746_v20, %v2347_v25  ;;  %vm1366_vm3 = vcmp.ge.f32.partialorder %v1304_v17, 0.5  ;;  %v457_v25 = vld [vmem:[%s8737_s18 + $0x328] sm:$0xff]  ;;  %vm1428_vm4 = vcmp.le.f32.partialorder %v1304_v17, 60.5 }
 0x1d3   : > { %16634 = vst [vmem:[#allocation74_spill] sm:$0xff] %v9722_v21  ;;  %v16336_v31 = vfloor.f32 %v9722_v21  ;;  %v16337_v20 = vcvt.s32.f32 %v9747_v46  ;;  %vm1626_vm5 = vmand %vm9211_vm10, %vm1366_vm3  ;;  %v2249_v17 = vrot.slane %v9771_v57, 1  ;;  %v2124_v21 = vrot.slane %v9771_v57, 7 }
 0x1d4   : > { %v1058_v35 = vadd.f32 0.5, %v16334_v39  ;;  %v2619_v54 = vadd.f32 %v2557_v62, %v2495_v58  ;;  %v2123_v39 = vrot.slane %v9733_v42, 7  ;;  %vm1937_vm6 = vmand %vm1799_vm9, %vm1428_vm4  ;;  %v16653_v6 = vcvt.s32.f32 %v9747_v46 }
 0x1d5   : > { %v1059_v41 = vadd.f32 0.5, %v16337_v20 }
 0x1d6   : > { %v9717_v34 = vpop.f32.mrf.mxu0 }
 0x1d7   : > { %16633 = vst [vmem:[#allocation73_spill] sm:$0xff] %v9717_v34  ;;  %v9725_v11 = vpop.f32.mrf.mxu1 }
 0x1d8   : > { %16635 = vst [vmem:[#allocation75_spill] sm:$0xff] %v9725_v11 }
 0x1d9   : > { %2736 = vmatmul.f32.gmra.mxu2 %v2618_v5  ;;  %675 = vmatmul.f32.gmra.mxu0 %v454_v7  ;;  %v2222_v7 = vsel %vm2172_vm15, %v2121_v15, %v2122_v32  ;;  %v1243_v5 = vmul.f32 62.0, %v16336_v31  ;;  %v2372_v15 = vmul.f32 %v9259_v14, %v9695_v60  ;;  %v7747_v31 = vsel %vm1936_vm2, 1.0, %v16589_v47 }
 0x1da   : > { %878 = vmatmul.f32.gmra.mxu1 %v455_v61  ;;  %v9760_v61 = vmul.f32 0.016129032, %v1058_v35  ;;  %v2434_v8 = vmul.f32 %v7685_v52, %v2222_v7  ;;  %v2346_v35 = vsel %vm2297_vm13, %v2247_v13, %v2248_v16  ;;  %v16640_v60 = vcvt.s32.f32 %v9666_v28 }
 0x1db   : > { %v2558_v52 = vmul.f32 %v7747_v31, %v2346_v35  ;;  %v9788_v7 = vadd.s32 408, %v9109_v37  ;;  %v2221_v28 = vsel %vm2172_vm15, %v2122_v32, %v2123_v39  ;;  %v2373_v32 = vmul.f32 %v9259_v14, %v9733_v42 }
 0x1dc   : > { %16638 = vst [vmem:[#allocation77_spill] sm:$0xff] %v9760_v61  ;;  %v1305_v58 = vsub.f32 %v16640_v60, %v1243_v5  ;;  %v16340_v62 = vfloor.f32 %v9760_v61  ;;  %v2496_v13 = vadd.f32 %v2434_v8, %v2372_v15  ;;  %v9797_v5 = vadd.s32 416, %v9109_v37 }
 0x1dd   : > { %v16342_v15 = vcvt.s32.f32 %v9785_v44  ;;  %v16343_v20 = vcvt.s32.f32 %v9788_v7  ;;  %v2250_v42 = vrot.slane %v9814_v59, 1 }
 0x1de   : > { %v9755_v36 = vpop.f32.mrf.mxu0  ;;  %vm1367_vm7 = vcmp.ge.f32.partialorder %v1305_v58, 0.5  ;;  %v1244_v31 = vmul.f32 62.0, %v16340_v62  ;;  %v2620_v35 = vadd.f32 %v2558_v52, %v2496_v13  ;;  %v2345_v62 = vsel %vm2297_vm13, %v2248_v16, %v2249_v17 }
 0x1df   : > { %16637 = vst [vmem:[#allocation76_spill] sm:$0xff] %v9755_v36  ;;  %v9763_v23 = vpop.f32.mrf.mxu1  ;;  %vm1429_vm8 = vcmp.le.f32.partialorder %v1305_v58, 60.5  ;;  %vm1627_vm11 = vmand %vm9211_vm10, %vm1367_vm7  ;;  %v9824_v13 = vadd.s32 424, %v9109_v37  ;;  %v16644_v52 = vcvt.s32.f32 %v9709_v26  ;;  %v9832_v16 = vadd.s32 144, %v9109_v37 }
 0x1e0   : > { %16639 = vst [vmem:[#allocation78_spill] sm:$0xff] %v9763_v23  ;;  %v7687_v61 = vsel %vm1627_vm11, 1.0, %v16589_v47  ;;  %v2220_v26 = vsel %vm2172_vm15, %v2123_v39, %v2124_v21  ;;  %vm1938_vm12 = vmand %vm1799_vm9, %vm1429_vm8 }
 0x1e1   : > { %2739 = vmatmul.f32.gmra.mxu2 %v2619_v54  ;;  %678 = vmatmul.f32.gmra.mxu0 %v456_v0  ;;  %v7686_v0 = vsel %vm1626_vm5, 1.0, %v16589_v47  ;;  %v1306_v50 = vsub.f32 %v16644_v52, %v1244_v31  ;;  %v16645_v31 = vcvt.s32.f32 %v9797_v5  ;;  %v2436_v4 = vmul.f32 %v7687_v61, %v2220_v26 }
 0x1e2   : > { %881 = vmatmul.f32.gmra.mxu1 %v457_v25  ;;  %v9803_v25 = vmul.f32 0.016129032, %v1059_v41  ;;  %v2435_v60 = vmul.f32 %v7686_v0, %v2221_v28  ;;  %v7748_v41 = vsel %vm1937_vm6, 1.0, %v16589_v47  ;;  %v1060_v0 = vadd.f32 0.5, %v16342_v15 }
 0x1e3   : > { %v2559_v28 = vmul.f32 %v7748_v41, %v2345_v62  ;;  %v1095_v52 = vadd.f32 0.5, %v16645_v31  ;;  %vm1368_vm14 = vcmp.ge.f32.partialorder %v1306_v50, 0.5  ;;  %v16349_v41 = vcvt.s32.f32 %v9832_v16 }
 0x1e4   : > { %16642 = vst [vmem:[#allocation80_spill] sm:$0xff] %v9803_v25  ;;  %v16347_v55 = vfloor.f32 %v9803_v25  ;;  %v2497_v58 = vadd.f32 %v2435_v60, %v2373_v32  ;;  %v9849_v60 = vmul.f32 0.016129032, %v1060_v0  ;;  %v2125_v15 = vrot.slane %v9814_v59, 7  ;;  %vm1628_vm1 = vmand %vm9211_vm10, %vm1368_vm14 }
 0x1e5   : > { %v7749_v0 = vsel %vm1938_vm12, 1.0, %v16589_v47  ;;  %vm1430_vm0 = vcmp.le.f32.partialorder %v1306_v50, 60.5  ;;  %v9869_v57 = vmul.f32 0.016129032, %v1095_v52  ;;  %v16652_v61 = vcvt.s32.f32 %v9824_v13 }
 0x1e6   : > { %v9799_v54 = vpop.f32.mrf.mxu0  ;;  %v1245_v62 = vmul.f32 62.0, %v16347_v55  ;;  %16647 = vst [vmem:[#allocation83_spill] sm:$0xff] %v9849_v60  ;;  %v2621_v39 = vadd.f32 %v2559_v28, %v2497_v58  ;;  %v2344_v55 = vsel %vm2297_vm13, %v2249_v17, %v2250_v42  ;;  %v9874_v28 = vadd.s32 432, %v9109_v37  ;;  %vm9892_vm2 = vmand %vm1799_vm9, %vm1430_vm0 }
 0x1e7   : > { %16641 = vst [vmem:[#allocation79_spill] sm:$0xff] %v9799_v54  ;;  %v9806_v8 = vpop.f32.mrf.mxu1  ;;  %v1096_v58 = vadd.f32 0.5, %v16652_v61  ;;  %v1061_v17 = vadd.f32 0.5, %v16349_v41  ;;  %v9882_v26 = vadd.s32 152, %v9109_v37  ;;  %v2560_v52 = vmul.f32 %v7749_v0, %v2344_v55  ;;  %v16662_v54 = vld [vmem:[#allocation29_spill] sm:$0xff] }
 0x1e8   : > { %16643 = vst [vmem:[#allocation81_spill] sm:$0xff] %v9806_v8  ;;  %v1307_v45 = vsub.f32 %v16653_v6, %v1245_v62  ;;  %v2251_v61 = vrot.slane %v9861_v49, 1  ;;  %v2219_v46 = vsel %vm2172_vm15, %v2124_v21, %v2125_v15  ;;  %v2375_v6 = vmul.f32 %v9259_v14, %v9814_v59  ;;  %v16661_v8 = vld [vmem:[#allocation28_spill] sm:$0xff] }
 0x1e9   : > { %2742 = vmatmul.f32.gmra.mxu2 %v2620_v35  ;;  %v1094_v35 = vadd.f32 0.5, %v16343_v20  ;;  %16651 = vst [vmem:[#allocation26_spill] sm:$0xff] %v9869_v57  ;;  %v9904_v21 = vmul.f32 0.016129032, %v1061_v17  ;;  %v16354_v50 = vcvt.s32.f32 %v9882_v26  ;;  %v7750_v17 = vsel %vm9892_vm2, 1.0, %v16589_v47 }
 0x1ea   : > { %vm1369_vm3 = vcmp.ge.f32.partialorder %v1307_v45, 0.5  ;;  %vm1431_vm4 = vcmp.le.f32.partialorder %v1307_v45, 60.5  ;;  %v16663_v59 = vfloor.f32 %v9869_v57 }
 0x1eb   : > { %v9856_v31 = vmul.f32 0.016129032, %v1094_v35  ;;  %v16351_v35 = vfloor.f32 %v9849_v60  ;;  %16658 = vst [vmem:[#allocation88_spill] sm:$0xff] %v9904_v21  ;;  %v9916_v60 = vadd.f32 %v16662_v54, %v16661_v8  ;;  %vm1629_vm5 = vmand %vm9211_vm10, %vm1369_vm3  ;;  %v16664_v54 = vcvt.s32.f32 %v9874_v28 }
 0x1ec   : > { %v16356_v62 = vfloor.f32 %v9904_v21  ;;  %vm9950_vm6 = vmand %vm1799_vm9, %vm1431_vm4 }
 0x1ed   : > { %16649 = vst [vmem:[#allocation85_spill] sm:$0xff] %v9856_v31  ;;  %v1246_v0 = vmul.f32 62.0, %v16351_v35  ;;  %v1097_v8 = vadd.f32 0.5, %v16664_v54  ;;  %v7689_v54 = vsel %vm1629_vm5, 1.0, %v16589_v47 }
 0x1ee   : > { %v9845_v32 = vpop.f32.mrf.mxu0 }
 0x1ef   : > { %16646 = vst [vmem:[#allocation82_spill] sm:$0xff] %v9845_v32  ;;  %v9852_v20 = vpop.f32.mrf.mxu1  ;;  %v16660_v32 = vfloor.f32 %v9856_v31 }
 0x1f0   : > { %16648 = vst [vmem:[#allocation84_spill] sm:$0xff] %v9852_v20  ;;  %v7688_v20 = vsel %vm1628_vm1, 1.0, %v16589_v47 }
 0x1f1   : > { %2745 = vmatmul.f32.gmra.mxu2 %v2621_v39  ;;  %v2498_v39 = vadd.f32 %v2436_v4, %v2374_v10  ;;  %v9897_v4 = vmul.f32 0.016129032, %v1096_v58  ;;  %v2437_v58 = vmul.f32 %v7688_v20, %v2219_v46  ;;  %v1280_v10 = vmul.f32 62.0, %v16660_v32 }
 0x1f2   : > { %v1281_v20 = vmul.f32 62.0, %v16663_v59  ;;  %v16666_v59 = vcvt.s32.f32 %v9788_v7  ;;  %v2252_v32 = vrot.slane %v9916_v60, 1 }
 0x1f3   : > { %16656 = vst [vmem:[#allocation86_spill] sm:$0xff] %v9897_v4  ;;  %v2622_v25 = vadd.f32 %v2560_v52, %v2498_v39  ;;  %v2343_v39 = vsel %vm2297_vm13, %v2250_v42, %v2251_v61  ;;  %v16665_v52 = vcvt.s32.f32 %v9785_v44  ;;  %v9937_v42 = vadd.s32 160, %v9109_v37 }
 0x1f4   : > { %v2499_v35 = vadd.f32 %v2437_v58, %v2375_v6  ;;  %v2561_v31 = vmul.f32 %v7750_v17, %v2343_v39  ;;  %v9941_v57 = vsub.f32 %v16666_v59, %v1280_v10  ;;  %v16669_v6 = vcvt.s32.f32 %v9797_v5 }
 0x1f5   : > { %v1308_v46 = vsub.f32 %v16665_v52, %v1246_v0  ;;  %v16670_v7 = vfloor.f32 %v9897_v4  ;;  %v9958_v17 = vmul.f32 0.016129032, %v1097_v8  ;;  %v16358_v52 = vcvt.s32.f32 %v9937_v42 }
 0x1f6   : > { %v9900_v55 = vpop.f32.mrf.mxu0  ;;  %v1343_v58 = vsub.f32 %v16669_v6, %v1281_v20  ;;  %v2376_v5 = vmul.f32 %v9259_v14, %v9861_v49  ;;  %vm1466_vm8 = vcmp.le.f32.partialorder %v9941_v57, 60.5  ;;  %v2127_v8 = vrot.slane %v9916_v60, 7  ;;  %v16675_v6 = vld [vmem:[#allocation31_spill] sm:$0xff] }
 0x1f7   : > { %16657 = vst [vmem:[#allocation87_spill] sm:$0xff] %v9900_v55  ;;  %v9907_v41 = vpop.f32.mrf.mxu1  ;;  %v2126_v55 = vrot.slane %v9861_v49, 7  ;;  %v1282_v10 = vmul.f32 62.0, %v16670_v7  ;;  %vm1370_vm7 = vcmp.ge.f32.partialorder %v1308_v46, 0.5  ;;  %v16676_v7 = vld [vmem:[#allocation32_spill] sm:$0xff]  ;;  %vm1432_vm11 = vcmp.le.f32.partialorder %v1308_v46, 60.5  ;;  %vm1975_vm0 = vmand %vm1799_vm9, %vm1466_vm8 }
 0x1f8   : > { %16659 = vst [vmem:[#allocation89_spill] sm:$0xff] %v9907_v41  ;;  %v9975_v4 = vadd.f32 %v16676_v7, %v16675_v6  ;;  %vm1630_vm12 = vmand %vm9211_vm10, %vm1370_vm7  ;;  %vm1405_vm14 = vcmp.ge.f32.partialorder %v1343_v58, 0.5  ;;  %v16677_v49 = vcvt.s32.f32 %v9824_v13  ;;  %vm1467_vm1 = vcmp.le.f32.partialorder %v1343_v58, 60.5 }
 0x1f9   : > { %2748 = vmatmul.f32.gmra.mxu2 %v2622_v25  ;;  %v1062_v25 = vadd.f32 0.5, %v16354_v50  ;;  %v2218_v44 = vsel %vm2172_vm15, %v2125_v15, %v2126_v55  ;;  %16671 = vst [vmem:[#allocation28_spill] sm:$0xff] %v9958_v17  ;;  %v1247_v15 = vmul.f32 62.0, %v16356_v62  ;;  %v2623_v50 = vadd.f32 %v2561_v31, %v2499_v35  ;;  %vm1665_vm2 = vmand %vm9211_vm10, %vm1405_vm14 }
 0x1fa   : > { %v2438_v20 = vmul.f32 %v7689_v54, %v2218_v44  ;;  %v2342_v62 = vsel %vm2297_vm13, %v2251_v61, %v2252_v32  ;;  %v9987_v31 = vsub.f32 %v16677_v49, %v1282_v10  ;;  %v16357_v35 = vfloor.f32 %v9958_v17  ;;  %vm10011_vm3 = vmand %vm1799_vm9, %vm1432_vm11 }
 0x1fb   : > { %v9964_v45 = vmul.f32 0.016129032, %v1062_v25  ;;  %v7751_v25 = vsel %vm9950_vm6, 1.0, %v16589_v47  ;;  %v16678_v54 = vcvt.s32.f32 %v9832_v16  ;;  %v1063_v61 = vadd.f32 0.5, %v16358_v52  ;;  %vm10030_vm6 = vmand %vm1799_vm9, %vm1467_vm1 }
 0x1fc   : > { %v2500_v13 = vadd.f32 %v2438_v20, %v2376_v5  ;;  %v2562_v10 = vmul.f32 %v7751_v25, %v2342_v62  ;;  %v7690_v16 = vsel %vm1630_vm12, 1.0, %v16589_v47  ;;  %v10016_v62 = vsel %vm1975_vm0, 1.0, %v16589_v47  ;;  %v16687_v20 = vld [vmem:[#allocation37_spill] sm:$0xff] }
 0x1fd   : > { %16673 = vst [vmem:[#allocation90_spill] sm:$0xff] %v9964_v45  ;;  %v1309_v44 = vsub.f32 %v16678_v54, %v1247_v15  ;;  %v16359_v0 = vfloor.f32 %v9964_v45  ;;  %v2217_v15 = vsel %vm2172_vm15, %v2126_v55, %v2127_v8  ;;  %vm1406_vm4 = vcmp.ge.f32.partialorder %v9987_v31, 0.5 }
 0x1fe   : > { %v9960_v39 = vpop.f32.mrf.mxu0  ;;  %v1283_v58 = vmul.f32 62.0, %v16357_v35  ;;  %v10025_v46 = vmul.f32 0.016129032, %v1063_v61  ;;  %v2624_v54 = vadd.f32 %v2562_v10, %v2500_v13  ;;  %v2377_v35 = vmul.f32 %v9259_v14, %v9916_v60  ;;  %vm10057_vm7 = vmand %vm9211_vm10, %vm1406_vm4  ;;  %v16691_v10 = vld [vmem:[#allocation12_spill] sm:$0xff] }
 0x1ff   : > { %16672 = vst [vmem:[#allocation29_spill] sm:$0xff] %v9960_v39  ;;  %v9967_v59 = vpop.f32.mrf.mxu1  ;;  %vm1371_vm5 = vcmp.ge.f32.partialorder %v1309_v44, 0.5  ;;  %v1248_v55 = vmul.f32 62.0, %v16359_v0  ;;  %v2439_v52 = vmul.f32 %v7690_v16, %v2217_v15  ;;  %v10039_v6 = vsel %vm1665_vm2, 1.0, %v16589_v47  ;;  %v16686_v0 = vld [vmem:[#allocation36_spill] sm:$0xff] }
 0x200   : > { %16674 = vst [vmem:[#allocation91_spill] sm:$0xff] %v9967_v59  ;;  %v10044_v17 = vadd.f32 %v16687_v20, %v16686_v0  ;;  %v7752_v45 = vsel %vm10011_vm3, 1.0, %v16589_v47  ;;  %v16688_v21 = vrot.slane %v9975_v4, 1  ;;  %v16692_v0 = vld [vmem:[#allocation21_spill] sm:$0xff]  ;;  %vm1433_vm8 = vcmp.le.f32.partialorder %v1309_v44, 60.5  ;;  %vm1631_vm11 = vmand %vm9211_vm10, %vm1371_vm5 }
 0x201   : > { %2751 = vmatmul.f32.gmra.mxu2 %v2623_v50  ;;  %v9996_v50 = vadd.s32 168, %v9109_v37  ;;  %16682 = vst [vmem:[#allocation32_spill] sm:$0xff] %v10025_v46  ;;  %v10063_v16 = vadd.f32 %v16692_v0, %v16691_v10  ;;  %v16694_v7 = vcvt.s32.f32 %v9882_v26  ;;  %v16363_v10 = vfloor.f32 %v10025_v46  ;;  %vm1942_vm14 = vmand %vm1799_vm9, %vm1433_vm8 }
 0x202   : > { %v2341_v13 = vsel %vm2297_vm13, %v2252_v32, %v16688_v21  ;;  %v10071_v21 = vsel %vm10030_vm6, 1.0, %v16589_v47  ;;  %v16693_v32 = vcvt.s32.f32 %v9874_v28  ;;  %v10083_v61 = vadd.s32 176, %v9109_v37  ;;  %v16707_v28 = vld [vmem:[#allocation43_spill] sm:$0xff] }
 0x203   : > { %v1310_v20 = vsub.f32 %v16694_v7, %v1248_v55  ;;  %vm1468_vm12 = vcmp.le.f32.partialorder %v9987_v31, 60.5  ;;  %v10087_v25 = vadd.s32 440, %v9109_v37  ;;  %v7691_v26 = vsel %vm1631_vm11, 1.0, %v16589_v47  ;;  %v16699_v7 = vld [vmem:[#allocation22_spill] sm:$0xff]  ;;  %v16706_v31 = vld [vmem:[#allocation41_spill] sm:$0xff] }
 0x204   : > { %v10075_v15 = vsub.f32 %v16693_v32, %v1283_v58  ;;  %v16697_v55 = vrot.slane %v9975_v4, 7  ;;  %v1249_v60 = vmul.f32 62.0, %v16363_v10  ;;  %vm10123_vm2 = vmand %vm1799_vm9, %vm1468_vm12  ;;  %v10138_v46 = vadd.f32 %v16707_v28, %v16706_v31 }
 0x205   : > { %vm1372_vm1 = vcmp.ge.f32.partialorder %v1310_v20, 0.5  ;;  %v16709_v59 = vrot.slane %v9975_v4, 1  ;;  %vm1434_vm4 = vcmp.le.f32.partialorder %v1310_v20, 60.5  ;;  %v16713_v31 = vcvt.s32.f32 %v10083_v61 }
 0x206   : > { %v10021_v5 = vpop.f32.mrf.mxu0  ;;  %v2216_v32 = vsel %vm2172_vm15, %v2127_v8, %v16697_v55  ;;  %vm1407_vm0 = vcmp.ge.f32.partialorder %v10075_v15, 0.5  ;;  %vm1632_vm5 = vmand %vm9211_vm10, %vm1372_vm1  ;;  %vm1469_vm6 = vcmp.le.f32.partialorder %v10075_v15, 60.5  ;;  %v16726_v9 = vrot.slane %v10063_v16, 1 }
 0x207   : > { %16681 = vst [vmem:[#allocation31_spill] sm:$0xff] %v10021_v5  ;;  %v10034_v49 = vpop.f32.mrf.mxu1  ;;  %v2563_v5 = vmul.f32 %v7752_v45, %v2341_v13  ;;  %v10100_v45 = vsel %vm10057_vm7, 1.0, %v16589_v47  ;;  %v16698_v13 = vld [vmem:[#allocation13_spill] sm:$0xff]  ;;  %v2440_v10 = vmul.f32 %v7691_v26, %v2216_v32  ;;  %vm10151_vm3 = vmand %vm9211_vm10, %vm1407_vm0 }
 0x208   : > { %16685 = vst [vmem:[#allocation92_spill] sm:$0xff] %v10034_v49  ;;  %v2501_v49 = vadd.f32 %v2439_v52, %v2377_v35  ;;  %v2129_v35 = vrot.slane %v10044_v17, 7  ;;  %vm10195_vm7 = vmand %vm1799_vm9, %vm1434_vm4 }
 0x209   : > { %2754 = vmatmul.f32.gmra.mxu2 %v2624_v54  ;;  %v16695_v54 = vcvt.s32.f32 %v9996_v50  ;;  %v7754_v11 = vsel %vm10195_vm7, 1.0, %v16589_v47  ;;  %vm1978_vm11 = vmand %vm1799_vm9, %vm1469_vm6 }
 0x20a   : > { %v2625_v52 = vadd.f32 %v2563_v5, %v2501_v49  ;;  %v10171_v49 = vadd.s32 184, %v9109_v37  ;;  %v10261_v2 = vsel %vm1978_vm11, 1.0, %v16589_v47 }
 0x20b   : > { %v1064_v0 = vadd.f32 0.5, %v16695_v54  ;;  %v10106_v54 = vadd.f32 %v16699_v7, %v16698_v13  ;;  %v10129_v13 = vmul.f32 %v9259_v14, %v10063_v16 }
 0x20c   : > { %v10090_v58 = vpop.f32.mrf.mxu2 }
 0x20d   : > { %16696 = vst [vmem:[#allocation36_spill] sm:$0xff] %v10090_v58  ;;  %v10116_v55 = vmul.f32 0.016129032, %v1064_v0  ;;  %v2378_v0 = vmul.f32 %v9259_v14, %v9975_v4  ;;  %v16708_v58 = vrot.slane %v10044_v17, 1  ;;  %v2287_v39 = vrot.slane %v10106_v54, 1 }
 0x20e   : > { %v10112_v8 = vpop.f32.mrf.mxu0  ;;  %16704 = vst [vmem:[#allocation21_spill] sm:$0xff] %v10129_v13  ;;  %v2412_v44 = vmul.f32 %v9259_v14, %v10106_v54  ;;  %v10257_v13 = vadd.s32 192, %v9109_v37 }
 0x20f   : > { %16700 = vst [vmem:[#allocation37_spill] sm:$0xff] %v10112_v8  ;;  %v10131_v7 = vpop.f32.mrf.mxu1  ;;  %v7753_v8 = vsel %vm1942_vm14, 1.0, %v16589_v47  ;;  %v16366_v32 = vfloor.f32 %v10116_v55  ;;  %v2502_v41 = vadd.f32 %v2440_v10, %v2378_v0  ;;  %v16716_v10 = vld [vmem:[#allocation14_spill] sm:$0xff]  ;;  %v16733_v0 = vcvt.s32.f32 %v9996_v50 }
 0x210   : > { %16701 = vst [vmem:[#allocation12_spill] sm:$0xff] %v10116_v55  ;;  %v16727_v55 = vld [vmem:[#allocation45_spill] sm:$0xff] }
 0x211   : > { %16705 = vst [vmem:[#allocation13_spill] sm:$0xff] %v10131_v7  ;;  %v2340_v7 = vsel %vm2297_vm13, %v16709_v59, %v16708_v58  ;;  %2757 = vmatmul.f32.gmra.mxu2 %v2625_v52  ;;  %v10162_v59 = vsel %vm10123_vm2, 1.0, %v16589_v47  ;;  %v16712_v58 = vcvt.s32.f32 %v9937_v42  ;;  %v1065_v52 = vadd.f32 0.5, %v16713_v31 }
 0x212   : > { %v2564_v23 = vmul.f32 %v7753_v8, %v2340_v7  ;;  %v7692_v42 = vsel %vm1632_vm5, 1.0, %v16589_v47  ;;  %v10186_v31 = vsel %vm10151_vm3, 1.0, %v16589_v47  ;;  %v16717_v8 = vld [vmem:[#allocation23_spill] sm:$0xff] }
 0x213   : > { %v1311_v26 = vsub.f32 %v16712_v58, %v1249_v60  ;;  %v16715_v60 = vrot.slane %v9975_v4, 7  ;;  %v10190_v7 = vadd.f32 %v16717_v8, %v16716_v10  ;;  %v16720_v4 = vrot.slane %v10106_v54, 7 }
 0x214   : > { %v10176_v28 = vpop.f32.mrf.mxu2  ;;  %v16722_v10 = vcvt.s32.f32 %v10087_v25  ;;  %v10213_v36 = vmul.f32 0.016129032, %v1065_v52  ;;  %v2626_v1 = vadd.f32 %v2564_v23, %v2502_v41  ;;  %v16729_v23 = vrot.slane %v10138_v46, 1 }
 0x215   : > { %16714 = vst [vmem:[#allocation22_spill] sm:$0xff] %v10176_v28  ;;  %v2215_v58 = vsel %vm2172_vm15, %v16715_v60, %v2129_v35  ;;  %v16721_v60 = vrot.slane %v10063_v16, 7  ;;  %vm1373_vm8 = vcmp.ge.f32.partialorder %v1311_v26, 0.5  ;;  %v1250_v28 = vmul.f32 62.0, %v16366_v32  ;;  %v16728_v32 = vld [vmem:[#allocation47_spill] sm:$0xff] }
 0x216   : > { %v1098_v8 = vadd.f32 0.5, %v16722_v10  ;;  %v10209_v20 = vpop.f32.mrf.mxu0  ;;  %16724 = vst [vmem:[#allocation43_spill] sm:$0xff] %v10213_v36  ;;  %v2307_v10 = vsel %vm2297_vm13, %v16726_v9, %v2287_v39  ;;  %v10227_v52 = vadd.f32 %v16728_v32, %v16727_v55  ;;  %v16730_v41 = vrot.slane %v10044_v17, 1  ;;  %v16731_v55 = vld [vmem:[#allocation15_spill] sm:$0xff]  ;;  %v16732_v32 = vld [vmem:[#allocation24_spill] sm:$0xff]  ;;  %vm1633_vm14 = vmand %vm9211_vm10, %vm1373_vm8 }
 0x217   : > { %v2182_v5 = vsel %vm2172_vm15, %v16721_v60, %v16720_v4  ;;  %16723 = vst [vmem:[#allocation41_spill] sm:$0xff] %v10209_v20  ;;  %v10216_v34 = vpop.f32.mrf.mxu1  ;;  %v2379_v4 = vmul.f32 %v9259_v14, %v10044_v17  ;;  %v2441_v60 = vmul.f32 %v7692_v42, %v2215_v58  ;;  %v2130_v20 = vrot.slane %v10138_v46, 7 }
 0x218   : > { %16725 = vst [vmem:[#allocation14_spill] sm:$0xff] %v10216_v34  ;;  %v2339_v42 = vsel %vm2297_vm13, %v16730_v41, %v16729_v23  ;;  %v2288_v9 = vrot.slane %v10190_v7, 1  ;;  %v10245_v58 = vadd.f32 %v16732_v32, %v16731_v55  ;;  %vm1435_vm12 = vcmp.le.f32.partialorder %v1311_v26, 60.5 }
 0x219   : > { %2760 = vmatmul.f32.gmra.mxu2 %v2626_v1  ;;  %v2474_v17 = vmul.f32 %v10039_v6, %v2182_v5  ;;  %v1312_v15 = vsub.f32 %v16733_v0, %v1250_v28  ;;  %v16734_v41 = vcvt.s32.f32 %v10171_v49  ;;  %v2163_v1 = vrot.slane %v10190_v7, 7  ;;  %vm10276_vm0 = vmand %vm1799_vm9, %vm1435_vm12 }
 0x21a   : > { %v2503_v55 = vadd.f32 %v2441_v60, %v2379_v4  ;;  %v2565_v32 = vmul.f32 %v7754_v11, %v2339_v42  ;;  %v2256_v6 = vrot.slane %v10227_v52, 1  ;;  %v7693_v50 = vsel %vm1633_vm14, 1.0, %v16589_v47 }
 0x21b   : > { %v1066_v34 = vadd.f32 0.5, %v16734_v41  ;;  %v2214_v28 = vsel %vm2172_vm15, %v2129_v35, %v2130_v20  ;;  %v10270_v0 = vmul.f32 %v10016_v62, %v2307_v10  ;;  %v2306_v4 = vsel %vm2297_vm13, %v2287_v39, %v2288_v9 }
 0x21c   : > { %v10264_v5 = vpop.f32.mrf.mxu2  ;;  %v2536_v60 = vadd.f32 %v2474_v17, %v2412_v44  ;;  %v10282_v42 = vmul.f32 0.016129032, %v1098_v8  ;;  %vm1374_vm1 = vcmp.ge.f32.partialorder %v1312_v15, 0.5  ;;  %v16741_v62 = vfloor.f32 %v10213_v36  ;;  %v16745_v36 = vld [vmem:[#allocation51_spill] sm:$0xff] }
 0x21d   : > { %16735 = vst [vmem:[#allocation23_spill] sm:$0xff] %v10264_v5  ;;  %v10288_v10 = vmul.f32 0.016129032, %v1066_v34  ;;  %v2627_v5 = vadd.f32 %v2565_v32, %v2503_v55  ;;  %v2442_v39 = vmul.f32 %v7693_v50, %v2214_v28  ;;  %v16744_v44 = vrot.slane %v10106_v54, 7  ;;  %vm1634_vm3 = vmand %vm9211_vm10, %vm1374_vm1 }
 0x21e   : > { %16736 = vst [vmem:[#allocation45_spill] sm:$0xff] %v10270_v0  ;;  %v10284_v23 = vpop.f32.mrf.mxu0  ;;  %v1251_v35 = vmul.f32 62.0, %v16741_v62  ;;  %v2380_v0 = vmul.f32 %v9259_v14, %v10138_v46  ;;  %v2131_v17 = vrot.slane %v10227_v52, 7  ;;  %v16746_v62 = vld [vmem:[#allocation52_spill] sm:$0xff]  ;;  %v7755_v26 = vsel %vm10276_vm0, 1.0, %v16589_v47 }
 0x21f   : > { %16739 = vst [vmem:[#allocation47_spill] sm:$0xff] %v10282_v42  ;;  %v10291_v41 = vpop.f32.mrf.mxu1  ;;  %v2181_v8 = vsel %vm2172_vm15, %v16744_v44, %v2163_v1  ;;  %v10302_v34 = vadd.f32 %v16746_v62, %v16745_v36  ;;  %v16747_v55 = vrot.slane %v10138_v46, 1  ;;  %vm1436_vm2 = vcmp.le.f32.partialorder %v1312_v15, 60.5  ;;  %v16753_v44 = vld [vmem:[#allocation25_spill] sm:$0xff] }
 0x220   : > { %16740 = vst [vmem:[#allocation15_spill] sm:$0xff] %v10284_v23  ;;  %v2598_v36 = vmul.f32 %v10071_v21, %v2306_v4  ;;  %v16748_v50 = vrot.slane %v10245_v58, 1  ;;  %v16749_v46 = vcvt.s32.f32 %v10083_v61  ;;  %v16750_v62 = vcvt.s32.f32 %v10257_v13  ;;  %vm10345_vm4 = vmand %vm1799_vm9, %vm1436_vm2 }
 0x221   : > { %16742 = vst [vmem:[#allocation24_spill] sm:$0xff] %v10288_v10  ;;  %v2338_v32 = vsel %vm2297_vm13, %v16747_v55, %v2256_v6  ;;  %2763 = vmatmul.f32.gmra.mxu2 %v2627_v5  ;;  %v10326_v55 = vadd.s32 200, %v9109_v37  ;;  %v2413_v54 = vmul.f32 %v9259_v14, %v10190_v7  ;;  %v2504_v21 = vadd.f32 %v2442_v39, %v2380_v0 }
 0x222   : > { %16743 = vst [vmem:[#allocation93_spill] sm:$0xff] %v10291_v41  ;;  %v2305_v28 = vsel %vm2297_vm13, %v2288_v9, %v16748_v50  ;;  %v1313_v11 = vsub.f32 %v16749_v46, %v1251_v35  ;;  %v1067_v5 = vadd.f32 0.5, %v16750_v62  ;;  %v2566_v4 = vmul.f32 %v7755_v26, %v2338_v32  ;;  %v16752_v62 = vld [vmem:[#allocation16_spill] sm:$0xff] }
 0x223   : > { %v16369_v41 = vfloor.f32 %v10282_v42  ;;  %v2257_v9 = vrot.slane %v10302_v34, 1  ;;  %v7694_v61 = vsel %vm1634_vm3, 1.0, %v16589_v47  ;;  %v2213_v35 = vsel %vm2172_vm15, %v2130_v20, %v2131_v17 }
 0x224   : > { %v10332_v50 = vpop.f32.mrf.mxu2  ;;  %v2475_v46 = vmul.f32 %v10100_v45, %v2181_v8  ;;  %v10340_v23 = vadd.f32 %v16753_v44, %v16752_v62  ;;  %v10349_v0 = vadd.f32 %v2598_v36, %v2536_v60  ;;  %v2599_v26 = vmul.f32 %v10162_v59, %v2305_v28 }
 0x225   : > { %16751 = vst [vmem:[#allocation51_spill] sm:$0xff] %v10332_v50  ;;  %v16756_v39 = vrot.slane %v10245_v58, 7  ;;  %vm1375_vm5 = vcmp.ge.f32.partialorder %v1313_v11, 0.5  ;;  %v16758_v15 = vfloor.f32 %v10288_v10  ;;  %v10360_v32 = vmul.f32 0.016129032, %v1067_v5 }
 0x226   : > { %v10356_v20 = vpop.f32.mrf.mxu0  ;;  %v16371_v44 = vcvt.s32.f32 %v10326_v55  ;;  %v2628_v60 = vadd.f32 %v2566_v4, %v2504_v21  ;;  %v2381_v59 = vmul.f32 %v9259_v14, %v10227_v52  ;;  %v2443_v36 = vmul.f32 %v7694_v61, %v2213_v35  ;;  %vm1635_vm7 = vmand %vm9211_vm10, %vm1375_vm5 }
 0x227   : > { %v2180_v45 = vsel %vm2172_vm15, %v2163_v1, %v16756_v39  ;;  %16757 = vst [vmem:[#allocation52_spill] sm:$0xff] %v10356_v20  ;;  %v1252_v8 = vmul.f32 62.0, %v16758_v15  ;;  %v10363_v62 = vpop.f32.mrf.mxu1  ;;  %v1284_v1 = vmul.f32 62.0, %v16369_v41  ;;  %v2132_v28 = vrot.slane %v10302_v34, 7  ;;  %v16761_v39 = vld [vmem:[#allocation55_spill] sm:$0xff] }
 0x228   : > { %16759 = vst [vmem:[#allocation16_spill] sm:$0xff] %v10360_v32  ;;  %v10372_v10 = vadd.f32 %v16761_v39, %v9294_v27  ;;  %v7756_v5 = vsel %vm10345_vm4, 1.0, %v16589_v47  ;;  %v2337_v21 = vsel %vm2297_vm13, %v2256_v6, %v2257_v9  ;;  %v2414_v52 = vmul.f32 %v9259_v14, %v10245_v58 }
 0x229   : > { %16760 = vst [vmem:[#allocation25_spill] sm:$0xff] %v10363_v62  ;;  %2766 = vmatmul.f32.gmra.mxu2 %v2628_v60  ;;  %vm1437_vm6 = vcmp.le.f32.partialorder %v1313_v11, 60.5  ;;  %v2537_v27 = vadd.f32 %v2475_v46, %v2413_v54  ;;  %v16762_v61 = vcvt.s32.f32 %v10171_v49  ;;  %v16372_v7 = vfloor.f32 %v10360_v32  ;;  %v16784_v32 = vld [vmem:[#allocation18_spill] sm:$0xff] }
 0x22a   : > { %v1068_v6 = vadd.f32 0.5, %v16371_v44  ;;  %v10391_v15 = vadd.s32 208, %v9109_v37  ;;  %v2505_v39 = vadd.f32 %v2443_v36, %v2381_v59  ;;  %v2567_v41 = vmul.f32 %v7756_v5, %v2337_v21  ;;  %v16764_v59 = vld [vmem:[#allocation17_spill] sm:$0xff]  ;;  %v16765_v36 = vld [vmem:[#allocation27_spill] sm:$0xff]  ;;  %vm1946_vm8 = vmand %vm1799_vm9, %vm1437_vm6 }
 0x22b   : > { %v1314_v35 = vsub.f32 %v16762_v61, %v1252_v8  ;;  %v2476_v60 = vmul.f32 %v10186_v31, %v2180_v45  ;;  %v16763_v4 = vcvt.s32.f32 %v10087_v25  ;;  %v16377_v54 = vrot.slane %v10372_v10, 1 }
 0x22c   : > { %v10397_v46 = vpop.f32.mrf.mxu2  ;;  %v7695_v49 = vsel %vm1635_vm7, 1.0, %v16589_v47  ;;  %v2212_v8 = vsel %vm2172_vm15, %v2131_v17, %v2132_v28  ;;  %v10402_v61 = vadd.f32 %v2599_v26, %v2537_v27  ;;  %v16376_v44 = vrot.slane %v10340_v23, 7 }
 0x22d   : > { %v1346_v42 = vsub.f32 %v16763_v4, %v1284_v1  ;;  %v10407_v5 = vadd.f32 %v16765_v36, %v16764_v59  ;;  %v16766_v25 = vrot.slane %v10340_v23, 1  ;;  %v16767_v31 = vrot.slane %v10245_v58, 1 }
 0x22e   : > { %v10419_v17 = vadd.s32 448, %v9109_v37  ;;  %v10421_v26 = vpop.f32.mrf.mxu0  ;;  %vm1376_vm11 = vcmp.ge.f32.partialorder %v1314_v35, 0.5  ;;  %v1253_v1 = vmul.f32 62.0, %v16372_v7  ;;  %v10425_v11 = vmul.f32 0.016129032, %v1068_v6 }
 0x22f   : > { %v2304_v45 = vsel %vm2297_vm13, %v16767_v31, %v16766_v25  ;;  %16768 = vst [vmem:[#allocation55_spill] sm:$0xff] %v10421_v26  ;;  %v16373_v21 = vcvt.s32.f32 %v10391_v15  ;;  %v10428_v4 = vpop.f32.mrf.mxu1  ;;  %v2629_v27 = vadd.f32 %v2567_v41, %v2505_v39  ;;  %v2382_v59 = vmul.f32 %v9259_v14, %v10302_v34  ;;  %vm10445_vm0 = vmand %vm9211_vm10, %vm1376_vm11 }
 0x230   : > { %16769 = vst [vmem:[#allocation17_spill] sm:$0xff] %v10425_v11  ;;  %v2444_v36 = vmul.f32 %v7695_v49, %v2212_v8  ;;  %vm1408_vm12 = vcmp.ge.f32.partialorder %v1346_v42, 0.5  ;;  %v16374_v25 = vrot.slane %v10372_v10, 7  ;;  %v10435_v31 = vadd.f32 %v9339_v56, %v9333_v22 }
 0x231   : > { %16770 = vst [vmem:[#allocation27_spill] sm:$0xff] %v10428_v4  ;;  %v7757_v7 = vsel %vm1946_vm8, 1.0, %v16589_v47  ;;  %v2336_v6 = vsel %vm2297_vm13, %v2257_v9, %v16377_v54  ;;  %2769 = vmatmul.f32.gmra.mxu2 %v2629_v27  ;;  %vm1438_vm14 = vcmp.le.f32.partialorder %v1314_v35, 60.5  ;;  %v2538_v34 = vadd.f32 %v2476_v60, %v2414_v52  ;;  %vm1668_vm1 = vmand %vm9211_vm10, %vm1408_vm12 }
 0x232   : > { %v2600_v22 = vmul.f32 %v10261_v2, %v2304_v45  ;;  %v16375_v56 = vcvt.s32.f32 %v10419_v17  ;;  %v16773_v39 = vcvt.s32.f32 %v10257_v13  ;;  %v16378_v8 = vfloor.f32 %v10425_v11  ;;  %vm10480_vm3 = vmand %vm1799_vm9, %vm1438_vm14 }
 0x233   : > { %v1069_v9 = vadd.f32 0.5, %v16373_v21  ;;  %v10457_v27 = vadd.s32 216, %v9109_v37  ;;  %v16379_v52 = vrot.slane %v10407_v5, 1  ;;  %v2506_v2 = vadd.f32 %v2444_v36, %v2382_v59 }
 0x234   : > { %v1315_v49 = vsub.f32 %v16773_v39, %v1253_v1  ;;  %v2568_v60 = vmul.f32 %v7757_v7, %v2336_v6  ;;  %vm1470_vm2 = vcmp.le.f32.partialorder %v1346_v42, 60.5  ;;  %v10465_v13 = vmul.f32 %v9259_v14, %v10340_v23  ;;  %v10468_v1 = vpop.f32.mrf.mxu2 }
 0x235   : > { %v2259_v45 = vrot.slane %v10435_v31, 1  ;;  %v7696_v39 = vsel %vm10445_vm0, 1.0, %v16589_v47  ;;  %v2211_v21 = vsel %vm2172_vm15, %v2132_v28, %v16374_v25  ;;  %v10484_v59 = vadd.f32 %v2600_v22, %v2538_v34  ;;  %vm1979_vm5 = vmand %vm1799_vm9, %vm1470_vm2 }
 0x236   : > { %v7728_v36 = vsel %vm1668_vm1, 1.0, %v16589_v47  ;;  %v16776_v6 = vrot.slane %v10245_v58, 7  ;;  %v1099_v28 = vadd.f32 0.5, %v16375_v56  ;;  %v10495_v35 = vpop.f32.mrf.mxu0  ;;  %vm1377_vm4 = vcmp.ge.f32.partialorder %v1315_v49, 0.5 }
 0x237   : > { %16777 = vst [vmem:[#allocation94_spill] sm:$0xff] %v10495_v35  ;;  %v1254_v25 = vmul.f32 62.0, %v16378_v8  ;;  %v10499_v34 = vmul.f32 0.016129032, %v1069_v9  ;;  %v16382_v22 = vcvt.s32.f32 %v10457_v27  ;;  %v10505_v58 = vpop.f32.mrf.mxu1  ;;  %v2383_v56 = vmul.f32 %v9259_v14, %v10372_v10  ;;  %vm1637_vm7 = vmand %vm9211_vm10, %vm1377_vm4 }
 0x238   : > { %v2179_v41 = vsel %vm2172_vm15, %v16776_v6, %v16376_v44  ;;  %16779 = vst [vmem:[#allocation96_spill] sm:$0xff] %v10505_v58  ;;  %v2630_v6 = vadd.f32 %v2568_v60, %v2506_v2  ;;  %v2445_v44 = vmul.f32 %v7696_v39, %v2211_v21  ;;  %v16780_v54 = vrot.slane %v10340_v23, 1  ;;  %v16785_v58 = vld [vmem:[#allocation30_spill] sm:$0xff] }
 0x239   : > { %16778 = vst [vmem:[#allocation95_spill] sm:$0xff] %v10499_v34  ;;  %v2134_v8 = vrot.slane %v10435_v31, 7  ;;  %v10518_v42 = vadd.f32 %v9383_v38, %v9368_v40  ;;  %v7758_v2 = vsel %vm10480_vm3, 1.0, %v16589_v47  ;;  %v16781_v60 = vrot.slane %v10372_v10, 1 }
 0x23a   : > { %v2303_v9 = vsel %vm2297_vm13, %v16780_v54, %v16379_v52  ;;  %2772 = vmatmul.f32.gmra.mxu2 %v2630_v6  ;;  %vm1439_vm6 = vcmp.le.f32.partialorder %v1315_v49, 60.5  ;;  %v7790_v54 = vsel %vm1979_vm5, 1.0, %v16589_v47  ;;  %v10531_v39 = vmul.f32 0.016129032, %v1099_v28 }
 0x23b   : > { %v2335_v21 = vsel %vm2297_vm13, %v16781_v60, %v2259_v45  ;;  %v10534_v40 = vadd.s32 456, %v9109_v37  ;;  %v16783_v38 = vcvt.s32.f32 %v10326_v55  ;;  %v1070_v6 = vadd.f32 0.5, %v16382_v22  ;;  %vm10564_vm8 = vmand %vm1799_vm9, %vm1439_vm6 }
 0x23c   : > { %16782 = vst [vmem:[#allocation97_spill] sm:$0xff] %v10531_v39  ;;  %v10542_v60 = vadd.s32 224, %v9109_v37  ;;  %v10547_v28 = vadd.f32 %v16785_v58, %v16784_v32  ;;  %v2507_v35 = vadd.f32 %v2445_v44, %v2383_v56  ;;  %v2569_v4 = vmul.f32 %v7758_v2, %v2335_v21 }
 0x23d   : > { %v1316_v7 = vsub.f32 %v16783_v38, %v1254_v25  ;;  %v10551_v55 = vmul.f32 %v9259_v14, %v10407_v5  ;;  %v2260_v25 = vrot.slane %v10518_v42, 1  ;;  %v10554_v38 = vpop.f32.mrf.mxu2  ;;  %v7697_v22 = vsel %vm1637_vm7, 1.0, %v16589_v47 }
 0x23e   : > { %v16786_v52 = vrot.slane %v10372_v10, 7  ;;  %v2477_v44 = vmul.f32 %v7728_v36, %v2179_v41  ;;  %v2601_v56 = vmul.f32 %v7790_v54, %v2303_v9  ;;  %v10570_v21 = vpop.f32.mrf.mxu0  ;;  %v16790_v10 = vfloor.f32 %v10499_v34 }
 0x23f   : > { %16789 = vst [vmem:[#allocation18_spill] sm:$0xff] %v10570_v21  ;;  %vm1378_vm11 = vcmp.ge.f32.partialorder %v1316_v7, 0.5  ;;  %v16384_v49 = vcvt.s32.f32 %v10542_v60  ;;  %v2384_v36 = vmul.f32 %v9259_v14, %v10435_v31  ;;  %v10580_v41 = vpop.f32.mrf.mxu1  ;;  %v2631_v9 = vadd.f32 %v2569_v4, %v2507_v35 }
 0x240   : > { %v2210_v11 = vsel %vm2172_vm15, %v16786_v52, %v2134_v8  ;;  %v1255_v26 = vmul.f32 62.0, %v16790_v10  ;;  %v10574_v52 = vmul.f32 0.016129032, %v1070_v6  ;;  %16792 = vst [vmem:[#allocation98_spill] sm:$0xff] %v10580_v41  ;;  %v2135_v2 = vrot.slane %v10518_v42, 7  ;;  %vm1638_vm14 = vmand %vm9211_vm10, %vm1378_vm11 }
 0x241   : > { %v2446_v54 = vmul.f32 %v7697_v22, %v2210_v11  ;;  %v10585_v58 = vadd.f32 %v9410_v48, %v9403_v29  ;;  %v7759_v6 = vsel %vm10564_vm8, 1.0, %v16589_v47  ;;  %v2334_v10 = vsel %vm2297_vm13, %v2259_v45, %v2260_v25 }
 0x242   : > { %16791 = vst [vmem:[#allocation30_spill] sm:$0xff] %v10574_v52  ;;  %2775 = vmatmul.f32.gmra.mxu2 %v2631_v9  ;;  %vm1440_vm12 = vcmp.le.f32.partialorder %v1316_v7, 60.5  ;;  %v16793_v11 = vfloor.f32 %v10531_v39  ;;  %v16794_v29 = vcvt.s32.f32 %v10534_v40  ;;  %v16795_v31 = vcvt.s32.f32 %v10391_v15 }
 0x243   : > { %v1071_v45 = vadd.f32 0.5, %v16384_v49  ;;  %v10606_v32 = vadd.s32 232, %v9109_v37  ;;  %v10610_v9 = vmul.f32 %v9259_v14, %v10547_v28  ;;  %v2508_v62 = vadd.f32 %v2446_v54, %v2384_v36  ;;  %v16798_v36 = vld [vmem:[#allocation19_spill] sm:$0xff]  ;;  %vm1949_vm0 = vmand %vm1799_vm9, %vm1440_vm12 }
 0x244   : > { %v1285_v4 = vmul.f32 62.0, %v16793_v11  ;;  %v1100_v48 = vadd.f32 0.5, %v16794_v29  ;;  %v1317_v35 = vsub.f32 %v16795_v31, %v1255_v26  ;;  %v2570_v11 = vmul.f32 %v7759_v6, %v2334_v10  ;;  %v16799_v54 = vld [vmem:[#allocation35_spill] sm:$0xff] }
 0x245   : > { %v2539_v39 = vadd.f32 %v2477_v44, %v10465_v13  ;;  %v2261_v29 = vrot.slane %v10585_v58, 1  ;;  %v10614_v15 = vpop.f32.mrf.mxu2  ;;  %v7698_v26 = vsel %vm1638_vm14, 1.0, %v16589_v47  ;;  %v2209_v31 = vsel %vm2172_vm15, %v2134_v8, %v2135_v2 }
 0x246   : > { %v16796_v49 = vrot.slane %v10407_v5, 7  ;;  %v16797_v22 = vrot.slane %v10340_v23, 7  ;;  %v10629_v13 = vadd.f32 %v16799_v54, %v16798_v36  ;;  %v16800_v44 = vcvt.s32.f32 %v10419_v17 }
 0x247   : > { %v16801_v8 = vrot.slane %v10547_v28, 1  ;;  %v16802_v23 = vrot.slane %v10407_v5, 1  ;;  %v10646_v10 = vmul.f32 0.016129032, %v1100_v48  ;;  %vm1379_vm1 = vcmp.ge.f32.partialorder %v1317_v35, 0.5  ;;  %v10658_v41 = vpop.f32.mrf.mxu1 }
 0x248   : > { %v10625_v34 = vsel %vm2172_vm15, %v16797_v22, %v16796_v49  ;;  %v10636_v6 = vsub.f32 %v16800_v44, %v1285_v4  ;;  %v10648_v22 = vpop.f32.mrf.mxu0  ;;  %v16805_v7 = vfloor.f32 %v10574_v52  ;;  %v10652_v54 = vmul.f32 0.016129032, %v1071_v45  ;;  %16807 = vst [vmem:[#allocation100_spill] sm:$0xff] %v10658_v41  ;;  %vm1639_vm2 = vmand %vm9211_vm10, %vm1379_vm1 }
 0x249   : > { %v10644_v49 = vsel %vm2297_vm13, %v16802_v23, %v16801_v8  ;;  %16803 = vst [vmem:[#allocation19_spill] sm:$0xff] %v10646_v10  ;;  %v16387_v17 = vcvt.s32.f32 %v10606_v32  ;;  %v2385_v4 = vmul.f32 %v9259_v14, %v10518_v42  ;;  %v2632_v8 = vadd.f32 %v2570_v11, %v2508_v62 }
 0x24a   : > { %16804 = vst [vmem:[#allocation35_spill] sm:$0xff] %v10648_v22  ;;  %v1256_v36 = vmul.f32 62.0, %v16805_v7  ;;  %v2447_v48 = vmul.f32 %v7698_v26, %v2209_v31  ;;  %v10662_v23 = vadd.f32 %v9445_v53, %v9440_v19  ;;  %v7760_v52 = vsel %vm1949_vm0, 1.0, %v16589_v47 }
 0x24b   : > { %16806 = vst [vmem:[#allocation99_spill] sm:$0xff] %v10652_v54  ;;  %v2333_v45 = vsel %vm2297_vm13, %v2260_v25, %v2261_v29  ;;  %v10668_v7 = vadd.s32 240, %v9109_v37  ;;  %2778 = vmatmul.f32.gmra.mxu2 %v2632_v8  ;;  %v10674_v62 = vadd.f32 %v2601_v56, %v2539_v39  ;;  %v10678_v53 = vadd.s32 464, %v9109_v37 }
 0x24c   : > { %vm1441_vm3 = vcmp.le.f32.partialorder %v1317_v35, 60.5  ;;  %v16808_v25 = vcvt.s32.f32 %v10457_v27  ;;  %v16389_v26 = vfloor.f32 %v10652_v54  ;;  %v1072_v31 = vadd.f32 0.5, %v16387_v17 }
 0x24d   : > { %v2509_v42 = vadd.f32 %v2447_v48, %v2385_v4  ;;  %v2571_v44 = vmul.f32 %v7760_v52, %v2333_v45  ;;  %vm1409_vm4 = vcmp.ge.f32.partialorder %v10636_v6, 0.5  ;;  %v10688_v56 = vpop.f32.mrf.mxu2  ;;  %v7699_v19 = vsel %vm1639_vm2, 1.0, %v16589_v47  ;;  %v16810_v52 = vld [vmem:[#allocation20_spill] sm:$0xff]  ;;  %vm1950_vm5 = vmand %vm1799_vm9, %vm1441_vm3 }
 0x24e   : > { %v1318_v11 = vsub.f32 %v16808_v25, %v1256_v36  ;;  %v16809_v27 = vrot.slane %v10585_v58, 7  ;;  %v10698_v8 = vmul.f32 %v9259_v14, %v10629_v13  ;;  %v16811_v4 = vld [vmem:[#allocation40_spill] sm:$0xff]  ;;  %vm1471_vm6 = vcmp.le.f32.partialorder %v10636_v6, 60.5  ;;  %vm1669_vm8 = vmand %vm9211_vm10, %vm1409_vm4 }
 0x24f   : > { %v10702_v48 = vadd.f32 %v16811_v4, %v16810_v52  ;;  %v16814_v35 = vfloor.f32 %v10646_v10  ;;  %v2386_v4 = vmul.f32 %v9259_v14, %v10585_v58  ;;  %v10724_v25 = vpop.f32.mrf.mxu1  ;;  %v2633_v39 = vadd.f32 %v2571_v44, %v2509_v42  ;;  %vm1980_vm14 = vmand %vm1799_vm9, %vm1471_vm6 }
 0x250   : > { %v2208_v36 = vsel %vm2172_vm15, %v2135_v2, %v16809_v27  ;;  %v10709_v17 = vpop.f32.mrf.mxu0  ;;  %vm1380_vm7 = vcmp.ge.f32.partialorder %v1318_v11, 0.5  ;;  %v1257_v2 = vmul.f32 62.0, %v16389_v26  ;;  %v10713_v27 = vmul.f32 0.016129032, %v1072_v31  ;;  %16815 = vst [vmem:[#allocation101_spill] sm:$0xff] %v10724_v25 }
 0x251   : > { %16812 = vst [vmem:[#allocation20_spill] sm:$0xff] %v10709_v17  ;;  %v1286_v52 = vmul.f32 62.0, %v16814_v35  ;;  %v2448_v54 = vmul.f32 %v7699_v19, %v2208_v36  ;;  %v10728_v31 = vadd.f32 %v9488_v24, %v9482_v30  ;;  %v7761_v26 = vsel %vm1950_vm5, 1.0, %v16589_v47  ;;  %vm1640_vm11 = vmand %vm9211_vm10, %vm1380_vm7 }
 0x252   : > { %16813 = vst [vmem:[#allocation40_spill] sm:$0xff] %v10713_v27  ;;  %v16816_v17 = vrot.slane %v10662_v23, 1  ;;  %v16817_v10 = vcvt.s32.f32 %v10668_v7  ;;  %v10742_v30 = vadd.s32 248, %v9109_v37  ;;  %v7729_v24 = vsel %vm1669_vm8, 1.0, %v16589_v47 }
 0x253   : > { %2781 = vmatmul.f32.gmra.mxu2 %v2633_v39  ;;  %v16818_v44 = vrot.slane %v10547_v28, 7  ;;  %v16819_v42 = vrot.slane %v10407_v5, 7  ;;  %vm1442_vm12 = vcmp.le.f32.partialorder %v1318_v11, 60.5  ;;  %v16391_v19 = vfloor.f32 %v10713_v27 }
 0x254   : > { %v2332_v35 = vsel %vm2297_vm13, %v2261_v29, %v16816_v17  ;;  %v1073_v41 = vadd.f32 0.5, %v16817_v10  ;;  %v16820_v10 = vcvt.s32.f32 %v10542_v60  ;;  %v16821_v39 = vcvt.s32.f32 %v10534_v40  ;;  %vm10779_vm0 = vmand %vm1799_vm9, %vm1442_vm12 }
 0x255   : > { %v10751_v29 = vsel %vm2172_vm15, %v16819_v42, %v16818_v44  ;;  %v2510_v45 = vadd.f32 %v2448_v54, %v2386_v4  ;;  %v2572_v25 = vmul.f32 %v7761_v26, %v2332_v35  ;;  %v16822_v44 = vcvt.s32.f32 %v10678_v53 }
 0x256   : > { %v1319_v17 = vsub.f32 %v16820_v10, %v1257_v2  ;;  %v1348_v36 = vsub.f32 %v16821_v39, %v1286_v52  ;;  %v10766_v2 = vpop.f32.mrf.mxu2  ;;  %v7700_v42 = vsel %vm1640_vm11, 1.0, %v16589_v47  ;;  %v16823_v6 = vrot.slane %v10662_v23, 7 }
 0x257   : > { %v1101_v11 = vadd.f32 0.5, %v16822_v44  ;;  %v16824_v10 = vrot.slane %v10585_v58, 7  ;;  %v10775_v52 = vmul.f32 0.016129032, %v1073_v41  ;;  %v10785_v4 = vadd.s32 256, %v9109_v37  ;;  %v10799_v5 = vpop.f32.mrf.mxu1 }
 0x258   : > { %v7791_v35 = vsel %vm1980_vm14, 1.0, %v16589_v47  ;;  %v2478_v58 = vmul.f32 %v7729_v24, %v10625_v34  ;;  %v10789_v39 = vpop.f32.mrf.mxu0  ;;  %vm1381_vm1 = vcmp.ge.f32.partialorder %v1319_v17, 0.5  ;;  %v1258_v41 = vmul.f32 62.0, %v16391_v19 }
 0x259   : > { %v2207_v40 = vsel %vm2172_vm15, %v16824_v10, %v16823_v6  ;;  %16825 = vst [vmem:[#allocation102_spill] sm:$0xff] %v10775_v52  ;;  %vm1410_vm2 = vcmp.ge.f32.partialorder %v1348_v36, 0.5  ;;  %vm1472_vm3 = vcmp.le.f32.partialorder %v1348_v36, 60.5  ;;  %v2387_v44 = vmul.f32 %v9259_v14, %v10662_v23  ;;  %v16828_v6 = vld [vmem:[#allocation64_spill] sm:$0xff]  ;;  %vm10814_vm4 = vmand %vm9211_vm10, %vm1381_vm1 }
 0x25a   : > { %v10797_v10 = vadd.f32 %v9536_v3, %v16828_v6  ;;  %v2634_v26 = vadd.f32 %v2572_v25, %v2510_v45  ;;  %v2449_v60 = vmul.f32 %v7700_v42, %v2207_v40  ;;  %v16393_v34 = vrot.slane %v10728_v31, 7  ;;  %vm10830_vm6 = vmand %vm9211_vm10, %vm1410_vm2 }
 0x25b   : > { %v7762_v24 = vsel %vm10779_vm0, 1.0, %v16589_v47  ;;  %v16829_v19 = vrot.slane %v10728_v31, 1  ;;  %v16830_v27 = vrot.slane %v10662_v23, 1  ;;  %v16833_v45 = vcvt.s32.f32 %v10742_v30  ;;  %vm1981_vm7 = vmand %vm1799_vm9, %vm1472_vm3 }
 0x25c   : > { %2784 = vmatmul.f32.gmra.mxu2 %v2634_v26  ;;  %v2602_v54 = vmul.f32 %v7791_v35, %v10644_v49  ;;  %v10822_v6 = vmul.f32 0.016129032, %v1101_v11  ;;  %vm1443_vm5 = vcmp.le.f32.partialorder %v1319_v17, 60.5  ;;  %v16839_v40 = vrot.slane %v10547_v28, 1 }
 0x25d   : > { %v2331_v22 = vsel %vm2297_vm13, %v16830_v27, %v16829_v19  ;;  %v1074_v42 = vadd.f32 0.5, %v16833_v45  ;;  %v16835_v19 = vcvt.s32.f32 %v10606_v32  ;;  %v16838_v45 = vrot.slane %v10629_v13, 1  ;;  %vm10863_vm11 = vmand %vm1799_vm9, %vm1443_vm5 }
 0x25e   : > { %16834 = vst [vmem:[#allocation64_spill] sm:$0xff] %v10822_v6  ;;  %v16395_v17 = vrot.slane %v10797_v10, 1  ;;  %v2511_v11 = vadd.f32 %v2449_v60, %v2387_v44  ;;  %v2573_v32 = vmul.f32 %v7762_v24, %v2331_v22  ;;  %v2540_v35 = vadd.f32 %v2478_v58, %v10551_v55 }
 0x25f   : > { %v1320_v26 = vsub.f32 %v16835_v19, %v1258_v41  ;;  %v10840_v49 = vsel %vm2297_vm13, %v16839_v40, %v16838_v45  ;;  %v10847_v41 = vpop.f32.mrf.mxu2  ;;  %v7701_v19 = vsel %vm10814_vm4, 1.0, %v16589_v47  ;;  %v16840_v40 = vrot.slane %v10662_v23, 7 }
 0x260   : > { %vm1404_vm8 = vcmp.ge.f32.partialorder %v9941_v57, 0.5  ;;  %v16841_v55 = vfloor.f32 %v10775_v52  ;;  %v10867_v58 = vmul.f32 0.016129032, %v1074_v42  ;;  %v16845_v44 = vcvt.s32.f32 %v10785_v4 }
 0x261   : > { %v2206_v60 = vsel %vm2172_vm15, %v16840_v40, %v16393_v34  ;;  %v10871_v23 = vadd.f32 %v2602_v54, %v2540_v35  ;;  %v2388_v45 = vmul.f32 %v9259_v14, %v10728_v31  ;;  %v679_v40 = vpop.f32.mrf.mxu0  ;;  %vm1382_vm12 = vcmp.ge.f32.partialorder %v1320_v26, 0.5  ;;  %v882_v54 = vpop.f32.mrf.mxu1  ;;  %vm1664_vm14 = vmand %vm9211_vm10, %vm1404_vm8 }
 0x262   : > { %v1259_v22 = vmul.f32 62.0, %v16841_v55  ;;  %16844 = vst [vmem:[#allocation103_spill] sm:$0xff] %v10867_v58  ;;  %v1075_v24 = vadd.f32 0.5, %v16845_v44  ;;  %v7730_v55 = vsel %vm10830_vm6, 1.0, %v16589_v47  ;;  %v7792_v27 = vsel %vm1981_vm7, 1.0, %v16589_v47  ;;  %vm1642_vm0 = vmand %vm9211_vm10, %vm1382_vm12 }
 0x263   : > { %v2139_v42 = vrot.slane %v10797_v10, 7  ;;  %v10883_v44 = vadd.f32 %v9581_v12, %v9573_v33  ;;  %v2635_v35 = vadd.f32 %v2573_v32, %v2511_v11  ;;  %v2450_v34 = vmul.f32 %v7701_v19, %v2206_v60 }
 0x264   : > { %v10889_v25 = vadd.f32 %v882_v54, %v679_v40  ;;  %v7763_v3 = vsel %vm10863_vm11, 1.0, %v16589_v47  ;;  %v16846_v52 = vrot.slane %v10728_v31, 1  ;;  %v16847_v12 = vcvt.s32.f32 %v10668_v7 }
 0x265   : > { %2787 = vmatmul.f32.gmra.mxu2 %v2635_v35  ;;  %v10905_v32 = vmul.f32 0.016129032, %v1075_v24  ;;  %v10908_v19 = vadd.s32 264, %v9109_v37  ;;  %v16848_v60 = vfloor.f32 %v10822_v6  ;;  %vm1444_vm1 = vcmp.le.f32.partialorder %v1320_v26, 60.5 }
 0x266   : > { %v2330_v33 = vsel %vm2297_vm13, %v16846_v52, %v16395_v17  ;;  %v1321_v11 = vsub.f32 %v16847_v12, %v1259_v22  ;;  %v16397_v40 = vrot.slane %v10889_v25, 7  ;;  %v7724_v52 = vsel %vm1664_vm14, 1.0, %v16589_v47  ;;  %vm1953_vm3 = vmand %vm1799_vm9, %vm1444_vm1 }
 0x267   : > { %v1287_v36 = vmul.f32 62.0, %v16848_v60  ;;  %v10915_v7 = vadd.s32 472, %v9109_v37  ;;  %v2265_v22 = vrot.slane %v10883_v44, 1  ;;  %v2512_v54 = vadd.f32 %v2450_v34, %v2388_v45  ;;  %v10925_v17 = vpop.f32.mrf.mxu2 }
 0x268   : > { %v2574_v35 = vmul.f32 %v7763_v3, %v2330_v33  ;;  %v2479_v24 = vmul.f32 %v7730_v55, %v10751_v29  ;;  %v16849_v12 = vrot.slane %v10063_v16, 7  ;;  %v7702_v26 = vsel %vm1642_vm0, 1.0, %v16589_v47 }
 0x269   : > { %v16850_v57 = vrot.slane %v10728_v31, 7  ;;  %vm1383_vm2 = vcmp.ge.f32.partialorder %v1321_v11, 0.5  ;;  %v16851_v29 = vfloor.f32 %v10867_v58  ;;  %v2389_v33 = vmul.f32 %v9259_v14, %v10797_v10  ;;  %v16852_v31 = vld [vmem:[#allocation68_spill] sm:$0xff] }
 0x26a   : > { %v2183_v60 = vsel %vm2172_vm15, %v16397_v40, %v16849_v12  ;;  %v10942_v12 = vadd.f32 %v16852_v31, %v9624_v51  ;;  %v2140_v40 = vrot.slane %v10883_v44, 7  ;;  %v2636_v58 = vadd.f32 %v2574_v35, %v2512_v54  ;;  %vm1643_vm5 = vmand %vm9211_vm10, %vm1383_vm2 }
 0x26b   : > { %v2205_v6 = vsel %vm2172_vm15, %v16850_v57, %v2139_v42  ;;  %v2473_v34 = vmul.f32 %v7724_v52, %v2183_v60  ;;  %v1260_v45 = vmul.f32 62.0, %v16851_v29  ;;  %v16853_v57 = vcvt.s32.f32 %v10678_v53  ;;  %v16854_v29 = vld [vmem:[#allocation21_spill] sm:$0xff] }
 0x26c   : > { %v16400_v60 = vcvt.s32.f32 %v10915_v7  ;;  %v2451_v55 = vmul.f32 %v7702_v26, %v2205_v6  ;;  %v7764_v3 = vsel %vm1953_vm3, 1.0, %v16589_v47  ;;  %v16855_v20 = vrot.slane %v10797_v10, 1  ;;  %v16856_v53 = vld [vmem:[#allocation45_spill] sm:$0xff] }
 0x26d   : > { %v1349_v52 = vsub.f32 %v16853_v57, %v1287_v36  ;;  %v2535_v21 = vadd.f32 %v2473_v34, %v16854_v29  ;;  %vm1445_vm4 = vcmp.le.f32.partialorder %v1321_v11, 60.5  ;;  %v10958_v51 = vadd.s32 272, %v9109_v37  ;;  %2790 = vmatmul.f32.gmra.mxu2 %v2636_v58 }
 0x26e   : > { %v2329_v50 = vsel %vm2297_vm13, %v16855_v20, %v2265_v22  ;;  %v16857_v6 = vcvt.s32.f32 %v10742_v30  ;;  %v16858_v35 = vfloor.f32 %v10905_v32  ;;  %v16859_v26 = vcvt.s32.f32 %v10908_v19  ;;  %vm1954_vm7 = vmand %vm1799_vm9, %vm1445_vm4 }
 0x26f   : > { %v2659_v36 = vadd.f32 %v16856_v53, %v2535_v21  ;;  %v2266_v34 = vrot.slane %v10942_v12, 1  ;;  %v2603_v31 = vmul.f32 %v7792_v27, %v10840_v49  ;;  %vm1411_vm6 = vcmp.ge.f32.partialorder %v1349_v52, 0.5 }
 0x270   : > { %v1322_v54 = vsub.f32 %v16857_v6, %v1260_v45  ;;  %v1261_v10 = vmul.f32 62.0, %v16858_v35  ;;  %v1076_v20 = vadd.f32 0.5, %v16859_v26  ;;  %v16860_v57 = vrot.slane %v10629_v13, 7  ;;  %v10978_v6 = vpop.f32.mrf.mxu2  ;;  %v16866_v35 = vld [vmem:[#allocation72_spill] sm:$0xff]  ;;  %vm1671_vm12 = vmand %vm9211_vm10, %vm1411_vm6 }
 0x271   : > { %v16861_v58 = vrot.slane %v10547_v28, 7  ;;  %2859 = vmatmul.f32.vlgmr.msra.gmra.mxu3 %v2659_v36  ;;  %v2513_v30 = vadd.f32 %v2451_v55, %v2389_v33  ;;  %v2575_v45 = vmul.f32 %v7764_v3, %v2329_v50  ;;  %v7703_v29 = vsel %vm1643_vm5, 1.0, %v16589_v47  ;;  %v16865_v36 = vld [vmem:[#allocation70_spill] sm:$0xff] }
 0x272   : > { %v2204_v53 = vsel %vm2172_vm15, %v2139_v42, %v2140_v40  ;;  %v16399_v27 = vcvt.s32.f32 %v10958_v51  ;;  %v2541_v28 = vadd.f32 %v2479_v24, %v10610_v9  ;;  %vm1473_vm8 = vcmp.le.f32.partialorder %v1349_v52, 60.5 }
 0x273   : > { %v2176_v21 = vsel %vm2172_vm15, %v16861_v58, %v16860_v57  ;;  %v16862_v49 = vrot.slane %v10702_v48, 1  ;;  %v16863_v50 = vrot.slane %v10629_v13, 1  ;;  %vm1384_vm11 = vcmp.ge.f32.partialorder %v1322_v54, 0.5  ;;  %vm1982_vm2 = vmand %vm1799_vm9, %vm1473_vm8 }
 0x274   : > { %v16864_v42 = vcvt.s32.f32 %v10785_v4  ;;  %v10993_v11 = vmul.f32 0.016129032, %v1076_v20  ;;  %v1102_v33 = vadd.f32 0.5, %v16400_v60  ;;  %v2390_v9 = vmul.f32 %v9259_v14, %v10883_v44  ;;  %vm11015_vm0 = vmand %vm9211_vm10, %vm1384_vm11 }
 0x275   : > { %v2300_v55 = vsel %vm2297_vm13, %v16863_v50, %v16862_v49  ;;  %v2141_v24 = vrot.slane %v10942_v12, 7  ;;  %v11002_v26 = vadd.f32 %v16866_v35, %v16865_v36  ;;  %v2452_v57 = vmul.f32 %v7703_v29, %v2204_v53 }
 0x276   : > { %v1323_v3 = vsub.f32 %v16864_v42, %v1261_v10  ;;  %v2637_v4 = vadd.f32 %v2575_v45, %v2513_v30  ;;  %v7765_v10 = vsel %vm1954_vm7, 1.0, %v16589_v47  ;;  %v2328_v20 = vsel %vm2297_vm13, %v2265_v22, %v2266_v34  ;;  %v16872_v42 = vld [vmem:[#allocation73_spill] sm:$0xff] }
 0x277   : > { %v11011_v58 = vadd.s32 280, %v9109_v37  ;;  %vm1446_vm14 = vcmp.le.f32.partialorder %v1322_v54, 60.5  ;;  %v1077_v29 = vadd.f32 0.5, %v16399_v27  ;;  %v11021_v53 = vadd.f32 %v2603_v31, %v2541_v28 }
 0x278   : > { %v16869_v30 = vrot.slane %v10702_v48, 7  ;;  %v16870_v45 = vrot.slane %v10629_v13, 7  ;;  %2793 = vmatmul.f32.gmra.mxu2 %v2637_v4  ;;  %vm1385_vm1 = vcmp.ge.f32.partialorder %v1323_v3, 0.5  ;;  %v16401_v49 = vfloor.f32 %v10993_v11  ;;  %v16873_v13 = vld [vmem:[#allocation75_spill] sm:$0xff]  ;;  %vm11051_vm3 = vmand %vm1799_vm9, %vm1446_vm14 }
 0x279   : > { %v7731_v50 = vsel %vm1671_vm12, 1.0, %v16589_v47  ;;  %v11036_v31 = vmul.f32 0.016129032, %v1102_v33  ;;  %v2267_v28 = vrot.slane %v11002_v26, 1  ;;  %v11041_v36 = vadd.f32 %v16873_v13, %v16872_v42  ;;  %2862 = vmatmul.f32.gmra.mxu3 %v10349_v0  ;;  %vm1645_vm4 = vmand %vm9211_vm10, %vm1385_vm1 }
 0x27a   : > { %v11029_v22 = vsel %vm2172_vm15, %v16870_v45, %v16869_v30  ;;  %v2514_v35 = vadd.f32 %v2452_v57, %v2390_v9  ;;  %v2576_v30 = vmul.f32 %v7765_v10, %v2328_v20  ;;  %v16403_v4 = vrot.slane %v11002_v26, 7  ;;  %v11058_v57 = vpop.f32.mrf.mxu2 }
 0x27b   : > { %16871 = vst [vmem:[#allocation68_spill] sm:$0xff] %v11036_v31  ;;  %v7704_v52 = vsel %vm11015_vm0, 1.0, %v16589_v47  ;;  %v2203_v45 = vsel %vm2172_vm15, %v2140_v40, %v2141_v24  ;;  %v16402_v9 = vcvt.s32.f32 %v11011_v58  ;;  %v11063_v0 = vmul.f32 0.016129032, %v1077_v29 }
 0x27c   : > { %v7793_v54 = vsel %vm1982_vm2, 1.0, %v16589_v47  ;;  %v2480_v10 = vmul.f32 %v7731_v50, %v2176_v21  ;;  %v11067_v20 = vadd.s32 480, %v9109_v37  ;;  %v2391_v44 = vmul.f32 %v9259_v14, %v10942_v12 }
 0x27d   : > { %16876 = vst [vmem:[#allocation21_spill] sm:$0xff] %v11063_v0  ;;  %vm1447_vm5 = vcmp.le.f32.partialorder %v1323_v3, 60.5  ;;  %v1262_v40 = vmul.f32 62.0, %v16401_v49  ;;  %v16404_v42 = vfloor.f32 %v11036_v31  ;;  %v16405_v13 = vrot.slane %v11041_v36, 1 }
 0x27e   : > { %v2638_v27 = vadd.f32 %v2576_v30, %v2514_v35  ;;  %v2327_v29 = vsel %vm2297_vm13, %v2266_v34, %v2267_v28  ;;  %v2453_v60 = vmul.f32 %v7704_v52, %v2203_v45  ;;  %v7766_v21 = vsel %vm11051_vm3, 1.0, %v16589_v47  ;;  %vm1956_vm6 = vmand %vm1799_vm9, %vm1447_vm5 }
 0x27f   : > { %v7705_v50 = vsel %vm1645_vm4, 1.0, %v16589_v47  ;;  %v2202_v12 = vsel %vm2172_vm15, %v2141_v24, %v16403_v4  ;;  %v1078_v3 = vadd.f32 0.5, %v16402_v9  ;;  %v2604_v35 = vmul.f32 %v7793_v54, %v2300_v55 }
 0x280   : > { %v11091_v30 = vadd.s32 288, %v9109_v37  ;;  %v16407_v52 = vcvt.s32.f32 %v11067_v20  ;;  %2796 = vmatmul.f32.gmra.mxu2 %v2638_v27  ;;  %v16877_v33 = vcvt.s32.f32 %v10908_v19  ;;  %v2542_v24 = vadd.f32 %v2480_v10, %v10698_v8 }
 0x281   : > { %v1288_v49 = vmul.f32 62.0, %v16404_v42  ;;  %v969_v9 = vadd.s32 400, %v9109_v37  ;;  %v2392_v4 = vmul.f32 %v9259_v14, %v11002_v26  ;;  %v2515_v55 = vadd.f32 %v2453_v60, %v2391_v44  ;;  %2865 = vmatmul.f32.gmra.mxu3 %v10402_v61 }
 0x282   : > { %v1324_v45 = vsub.f32 %v16877_v33, %v1262_v40  ;;  %v2577_v54 = vmul.f32 %v7766_v21, %v2327_v29  ;;  %v2454_v34 = vmul.f32 %v7705_v50, %v2202_v12  ;;  %v7767_v27 = vsel %vm1956_vm6, 1.0, %v16589_v47  ;;  %v2749_v40 = vpop.f32.mrf.mxu2  ;;  %v16882_v21 = vld [vmem:[#allocation76_spill] sm:$0xff]  ;;  %v16883_v50 = vld [vmem:[#allocation78_spill] sm:$0xff] }
 0x283   : > { %v2326_v8 = vsel %vm2297_vm13, %v2267_v28, %v16405_v13  ;;  %v11108_v19 = vmul.f32 0.016129032, %v1078_v3  ;;  %v1031_v10 = vcvt.s32.f32 %v969_v9  ;;  %v16879_v33 = vfloor.f32 %v11063_v0 }
 0x284   : > { %v16880_v44 = vrot.slane %v9571_v43, 1  ;;  %v16881_v61 = vrot.slane %v10702_v48, 1  ;;  %v1103_v28 = vadd.f32 0.5, %v16407_v52  ;;  %v11125_v9 = vadd.f32 %v16883_v50, %v16882_v21  ;;  %v16892_v21 = vld [vmem:[#allocation81_spill] sm:$0xff] }
 0x285   : > { %16878 = vst [vmem:[#allocation45_spill] sm:$0xff] %v11108_v19  ;;  %v1263_v42 = vmul.f32 62.0, %v16879_v33  ;;  %vm1386_vm7 = vcmp.ge.f32.partialorder %v1324_v45, 0.5  ;;  %v11127_v12 = vadd.f32 %v2604_v35, %v2542_v24  ;;  %v1093_v3 = vadd.f32 0.5, %v1031_v10  ;;  %v3125_v35 = vld [vmem:[%s16278_s4 + $0x78] sm:$0xff] }
 0x286   : > { %v11119_v29 = vsel %vm2297_vm13, %v16881_v61, %v16880_v44  ;;  %v2516_v33 = vadd.f32 %v2454_v34, %v2392_v4  ;;  %v2578_v13 = vmul.f32 %v7767_v27, %v2326_v8  ;;  %vm1448_vm8 = vcmp.le.f32.partialorder %v1324_v45, 60.5  ;;  %vm11139_vm11 = vmand %vm9211_vm10, %vm1386_vm7 }
 0x287   : > { %v16884_v60 = vcvt.s32.f32 %v10915_v7  ;;  %v16411_v44 = vrot.slane %v11041_v36, 7  ;;  %v2639_v61 = vadd.f32 %v2577_v54, %v2515_v55  ;;  %v16410_v52 = vfloor.f32 %v11108_v19  ;;  %vm1957_vm12 = vmand %vm1799_vm9, %vm1448_vm8 }
 0x288   : > { %v11135_v0 = vmul.f32 0.016129032, %v1093_v3  ;;  %v16888_v4 = vcvt.s32.f32 %v10958_v51  ;;  %v16889_v7 = vcvt.s32.f32 %v11091_v30  ;;  %v11150_v24 = vadd.s32 296, %v9109_v37 }
 0x289   : > { %v11131_v31 = vsub.f32 %v16884_v60, %v1288_v49  ;;  %v11152_v55 = vmul.f32 0.016129032, %v1103_v28  ;;  %v2393_v54 = vmul.f32 %v9259_v14, %v11041_v36  ;;  %v16413_v27 = vrot.slane %v11125_v9, 1  ;;  %2799 = vmatmul.f32.gmra.mxu2 %v2639_v61  ;;  %v16891_v28 = vld [vmem:[#allocation79_spill] sm:$0xff]  ;;  %2868 = vmatmul.f32.gmra.mxu3 %v10484_v59 }
 0x28a   : > { %16885 = vst [vmem:[#allocation70_spill] sm:$0xff] %v11135_v0  ;;  %v11145_v34 = vsub.f32 %v16888_v4, %v1263_v42  ;;  %v1079_v49 = vadd.f32 0.5, %v16889_v7  ;;  %v11159_v8 = vadd.f32 %v10799_v5, %v10789_v39  ;;  %v16409_v51 = vfloor.f32 %v11135_v0  ;;  %v11177_v5 = vld [vmem:[%s16277_s3] ss:$0 sm:$0xff]  ;;  %v2752_v59 = vpop.f32.mrf.mxu2 }
 0x28b   : > { %16890 = vst [vmem:[#allocation72_spill] sm:$0xff] %v11152_v55  ;;  %v11168_v60 = vmul.f32 %v9259_v14, %v11125_v9  ;;  %v11172_v50 = vadd.f32 %v16892_v21, %v16891_v28  ;;  %v2640_v3 = vadd.f32 %v2578_v13, %v2516_v33  ;;  %v7706_v39 = vsel %vm11139_vm11, 1.0, %v16589_v47 }
 0x28c   : > { %v16893_v45 = vrot.slane %v11002_v26, 7  ;;  %v1264_v13 = vmul.f32 62.0, %v16410_v52  ;;  %vm1412_vm14 = vcmp.ge.f32.partialorder %v11131_v31, 0.5  ;;  %v1279_v33 = vmul.f32 62.0, %v16409_v51 }
 0x28d   : > { %v7768_v4 = vsel %vm1957_vm12, 1.0, %v16589_v47  ;;  %vm1387_vm0 = vcmp.ge.f32.partialorder %v11145_v34, 0.5  ;;  %v11199_v26 = vmul.f32 0.016129032, %v1079_v49  ;;  %v16412_v7 = vcvt.s32.f32 %v11150_v24  ;;  %vm11318_vm12 = vmand %vm9211_vm10, %vm1412_vm14 }
 0x28e   : > { %v2201_v61 = vsel %vm2172_vm15, %v16893_v45, %v16411_v44  ;;  %v11204_v21 = vadd.f32 %v11177_v5, %v2752_v59  ;;  %v16896_v45 = vrot.slane %v11041_v36, 1  ;;  %vm1474_vm1 = vcmp.le.f32.partialorder %v11131_v31, 60.5  ;;  %v3124_v59 = vld [vmem:[%s16278_s4 + $0x70] sm:$0xff]  ;;  %vm11224_vm3 = vmand %vm9211_vm10, %vm1387_vm0 }
 0x28f   : > { %16894 = vst [vmem:[#allocation73_spill] sm:$0xff] %v11199_v26  ;;  %v1341_v52 = vsub.f32 %v1031_v10, %v1279_v33  ;;  %v16417_v49 = vrot.slane %v10889_v25, 1  ;;  %v11215_v44 = vadd.f32 %v11177_v5, %v2749_v40  ;;  %v2455_v42 = vmul.f32 %v7706_v39, %v2201_v61  ;;  %vm11349_vm14 = vmand %vm1799_vm9, %vm1474_vm1 }
 0x290   : > { %16895 = vst [vmem:[#allocation75_spill] sm:$0xff] %v11204_v21  ;;  %v2325_v51 = vsel %vm2297_vm13, %v16896_v45, %v16413_v27  ;;  %vm1449_vm2 = vcmp.le.f32.partialorder %v11145_v34, 60.5  ;;  %v3187_v28 = vmul.f32 %v3125_v35, %v11204_v21  ;;  %v16900_v10 = vcvt.s32.f32 %v11011_v58  ;;  %v3122_v21 = vld [vmem:[%s16278_s4 + $0x60] sm:$0xff] }
 0x291   : > { %16897 = vst [vmem:[#allocation76_spill] sm:$0xff] %v11215_v44  ;;  %vm1403_vm4 = vcmp.ge.f32.partialorder %v1341_v52, 0.5  ;;  %vm1465_vm5 = vcmp.le.f32.partialorder %v1341_v52, 60.5  ;;  %v2410_v40 = vmul.f32 %v9259_v14, %v10889_v25  ;;  %v11236_v39 = vadd.f32 %v11177_v5, %v11058_v57  ;;  %v3123_v52 = vld [vmem:[%s16278_s4 + $0x68] sm:$0xff]  ;;  %2802 = vmatmul.f32.gmra.mxu2 %v2640_v3  ;;  %2871 = vmatmul.f32.gmra.mxu3 %v10674_v62  ;;  %vm11303_vm8 = vmand %vm1799_vm9, %vm1449_vm2 }
 0x292   : > { %v11230_v33 = vsub.f32 %v16900_v10, %v1264_v13  ;;  %v1080_v35 = vadd.f32 0.5, %v16412_v7  ;;  %vm1663_vm6 = vmand %vm9211_vm10, %vm1403_vm4  ;;  %v11245_v58 = vadd.f32 %v11177_v5, %v10978_v6  ;;  %3238 = vmatpush.msrb.mxu3 %v3187_v28  ;;  %v11251_v57 = vadd.s32 304, %v9109_v37 }
 0x293   : > { %v7723_v13 = vsel %vm1663_vm6, 1.0, %v16589_v47  ;;  %vm1974_vm7 = vmand %vm1799_vm9, %vm1465_vm5  ;;  %v16901_v10 = vrot.slane %v10889_v25, 7  ;;  %v16902_v7 = vrot.slane %v11159_v8, 7  ;;  %v3186_v27 = vmul.f32 %v3124_v59, %v11215_v44 }
 0x294   : > { %v7785_v3 = vsel %vm1974_vm7, 1.0, %v16589_v47  ;;  %v16903_v28 = vrot.slane %v10063_v16, 1  ;;  %v16419_v19 = vrot.slane %v11172_v50, 1  ;;  %v2579_v59 = vmul.f32 %v7768_v4, %v2325_v51 }
 0x295   : > { %v2184_v6 = vsel %vm2172_vm15, %v16902_v7, %v16901_v10  ;;  %v2517_v7 = vadd.f32 %v2455_v42, %v2393_v54  ;;  %v7707_v16 = vsel %vm11224_vm3, 1.0, %v16589_v47  ;;  %v11280_v10 = vadd.f32 %v11177_v5, %v10925_v17  ;;  %3239 = vmatpush.msrb.mxu3 %v3186_v27  ;;  %v3121_v17 = vld [vmem:[%s16278_s4 + $0x58] sm:$0xff] }
 0x296   : > { %v2308_v61 = vsel %vm2297_vm13, %v16417_v49, %v16903_v28  ;;  %v2472_v0 = vmul.f32 %v7723_v13, %v2184_v6  ;;  %v3185_v13 = vmul.f32 %v3123_v52, %v11236_v39  ;;  %v11283_v6 = vpop.f32.mrf.mxu2  ;;  %v16904_v28 = vrot.slane %v11125_v9, 7  ;;  %v16913_v52 = vld [vmem:[#allocation84_spill] sm:$0xff] }
 0x297   : > { %v16905_v49 = vrot.slane %v11041_v36, 7  ;;  %v11294_v42 = vadd.f32 %v11177_v5, %v10847_v41  ;;  %vm1388_vm11 = vcmp.ge.f32.partialorder %v11230_v33, 0.5  ;;  %v3120_v41 = vld [vmem:[%s16278_s4 + $0x50] sm:$0xff]  ;;  %v3184_v27 = vmul.f32 %v3122_v21, %v11245_v58 }
 0x298   : > { %v2534_v54 = vadd.f32 %v2472_v0, %v2410_v40  ;;  %v2596_v0 = vmul.f32 %v7785_v3, %v2308_v61  ;;  %3240 = vmatpush.msrb.mxu3 %v3185_v13  ;;  %v16908_v4 = vfloor.f32 %v11199_v26  ;;  %v11322_v45 = vmul.f32 0.016129032, %v1080_v35  ;;  %v16912_v61 = vld [vmem:[#allocation82_spill] sm:$0xff]  ;;  %vm11366_vm1 = vmand %vm9211_vm10, %vm1388_vm11 }
 0x299   : > { %v2200_v62 = vsel %vm2172_vm15, %v16905_v49, %v16904_v28  ;;  %v16418_v40 = vcvt.s32.f32 %v11251_v57  ;;  %v11327_v3 = vadd.f32 %v16913_v52, %v16912_v61  ;;  %v2641_v21 = vadd.f32 %v2579_v59, %v2517_v7  ;;  %2874 = vmatmul.f32.gmra.mxu3 %v10871_v23 }
 0x29a   : > { %v1265_v49 = vmul.f32 62.0, %v16908_v4  ;;  %16911 = vst [vmem:[#allocation78_spill] sm:$0xff] %v11322_v45  ;;  %v2456_v13 = vmul.f32 %v7707_v16, %v2200_v62  ;;  %v11329_v28 = vadd.f32 %v2596_v0, %v2534_v54  ;;  %v11333_v4 = vadd.f32 %v11177_v5, %v10766_v2  ;;  %3241 = vmatpush.msrb.mxu3 %v3184_v27  ;;  %v3119_v16 = vld [vmem:[%s16278_s4 + $0x48] sm:$0xff]  ;;  %v3118_v54 = vld [vmem:[%s16278_s4 + $0x40] sm:$0xff]  ;;  %v3117_v2 = vld [vmem:[%s16278_s4 + $0x38] sm:$0xff] }
 0x29b   : > { %v3183_v51 = vmul.f32 %v3121_v17, %v11280_v10  ;;  %v7769_v35 = vsel %vm11303_vm8, 1.0, %v16589_v47  ;;  %v16914_v61 = vrot.slane %v11125_v9, 1  ;;  %v11355_v59 = vadd.f32 %v11177_v5, %v10688_v56  ;;  %2805 = vmatmul.f32.gmra.mxu2 %v2641_v21 }
 0x29c   : > { %v3182_v62 = vmul.f32 %v3120_v41, %v11294_v42  ;;  %vm1450_vm0 = vcmp.le.f32.partialorder %v11230_v33, 60.5  ;;  %v7732_v56 = vsel %vm11318_vm12, 1.0, %v16589_v47  ;;  %v16919_v17 = vcvt.s32.f32 %v11091_v30 }
 0x29d   : > { %v2324_v7 = vsel %vm2297_vm13, %v16914_v61, %v16419_v19  ;;  %3242 = vmatpush.msrb.mxu3 %v3183_v51  ;;  %v16420_v0 = vfloor.f32 %v11322_v45  ;;  %v1081_v41 = vadd.f32 0.5, %v16418_v40  ;;  %v11384_v27 = vadd.s32 312, %v9109_v37  ;;  %vm1959_vm2 = vmand %vm1799_vm9, %vm1450_vm0 }
 0x29e   : > { %v11378_v36 = vsub.f32 %v16919_v17, %v1265_v49  ;;  %v16421_v34 = vrot.slane %v11327_v3, 1  ;;  %v2518_v52 = vadd.f32 %v2456_v13, %v11168_v60  ;;  %v2580_v21 = vmul.f32 %v7769_v35, %v2324_v7  ;;  %v11399_v61 = vpop.f32.mrf.mxu2  ;;  %v16923_v17 = vld [vmem:[#allocation87_spill] sm:$0xff] }
 0x29f   : > { %v11392_v30 = vsel %vm11349_vm14, 1.0, %v16589_v47  ;;  %v11396_v51 = vadd.f32 %v11177_v5, %v10614_v15  ;;  %v3181_v49 = vmul.f32 %v3119_v16, %v11333_v4  ;;  %3243 = vmatpush.msrb.mxu3 %v3182_v62  ;;  %v7708_v23 = vsel %vm11366_vm1, 1.0, %v16589_v47  ;;  %v3116_v62 = vld [vmem:[%s16278_s4 + $0x30] sm:$0xff] }
 0x2a0   : > { %v16920_v60 = vrot.slane %v11172_v50, 7  ;;  %v16921_v13 = vrot.slane %v11125_v9, 7  ;;  %v2395_v15 = vmul.f32 %v9259_v14, %v11172_v50  ;;  %v11414_v7 = vadd.f32 %v11177_v5, %v10554_v38 }
 0x2a1   : > { %v3180_v16 = vmul.f32 %v3118_v54, %v11355_v59  ;;  %3244 = vmatpush.msrb.mxu3 %v3181_v49  ;;  %vm1389_vm3 = vcmp.ge.f32.partialorder %v11378_v36, 0.5  ;;  %v1266_v38 = vmul.f32 62.0, %v16420_v0  ;;  %v11431_v31 = vmul.f32 0.016129032, %v1081_v41 }
 0x2a2   : > { %v2199_v35 = vsel %vm2172_vm15, %v16921_v13, %v16920_v60  ;;  %v16423_v54 = vcvt.s32.f32 %v11384_v27  ;;  %v16924_v60 = vld [vmem:[#allocation89_spill] sm:$0xff]  ;;  %v2642_v40 = vadd.f32 %v2580_v21, %v2518_v52  ;;  %v11441_v49 = vadd.f32 %v11177_v5, %v10468_v1  ;;  %vm11464_vm5 = vmand %vm9211_vm10, %vm1389_vm3  ;;  %2877 = vmatmul.f32.gmra.mxu3 %v11021_v53 }
 0x2a3   : > { %16922 = vst [vmem:[#allocation79_spill] sm:$0xff] %v11431_v31  ;;  %v11437_v13 = vadd.f32 %v16924_v60, %v16923_v17  ;;  %v2457_v9 = vmul.f32 %v7708_v23, %v2199_v35  ;;  %v3179_v19 = vmul.f32 %v3117_v2, %v11396_v51  ;;  %3245 = vmatpush.msrb.mxu3 %v3180_v16  ;;  %v7770_v41 = vsel %vm1959_vm2, 1.0, %v16589_v47  ;;  %v3115_v1 = vld [vmem:[%s16278_s4 + $0x28] sm:$0xff]  ;;  %v3114_v35 = vld [vmem:[%s16278_s4 + $0x20] sm:$0xff] }
 0x2a4   : > { %v16925_v0 = vrot.slane %v11172_v50, 1  ;;  %v11453_v52 = vadd.f32 %v11177_v5, %v10397_v46  ;;  %v3178_v21 = vmul.f32 %v3116_v62, %v11414_v7  ;;  %2808 = vmatmul.f32.gmra.mxu2 %v2642_v40  ;;  %vm1451_vm4 = vcmp.le.f32.partialorder %v11378_v36, 60.5 }
 0x2a5   : > { %v16928_v46 = vfloor.f32 %v11152_v55  ;;  %3246 = vmatpush.msrb.mxu3 %v3179_v19  ;;  %v16929_v40 = vcvt.s32.f32 %v11150_v24  ;;  %v16425_v16 = vfloor.f32 %v11431_v31  ;;  %v1082_v62 = vadd.f32 0.5, %v16423_v54  ;;  %v16930_v55 = vld [vmem:[#allocation51_spill] sm:$0xff]  ;;  %vm1960_vm6 = vmand %vm1799_vm9, %vm1451_vm4 }
 0x2a6   : > { %v2323_v33 = vsel %vm2297_vm13, %v16925_v0, %v16421_v34  ;;  %v11481_v17 = vadd.s32 320, %v9109_v37  ;;  %v2481_v19 = vmul.f32 %v7732_v56, %v11029_v22  ;;  %v11488_v24 = vadd.f32 %v11177_v5, %v16930_v55  ;;  %v16933_v56 = vld [vmem:[#allocation23_spill] sm:$0xff] }
 0x2a7   : > { %v1289_v0 = vmul.f32 62.0, %v16928_v46  ;;  %v11475_v2 = vsub.f32 %v16929_v40, %v1266_v38  ;;  %v2519_v46 = vadd.f32 %v2457_v9, %v2395_v15  ;;  %v2581_v34 = vmul.f32 %v7770_v41, %v2323_v33  ;;  %3247 = vmatpush.msrb.mxu3 %v3178_v21  ;;  %v11491_v40 = vpop.f32.mrf.mxu2  ;;  %v3113_v9 = vld [vmem:[%s16278_s4 + $0x18] sm:$0xff] }
 0x2a8   : > { %v3177_v38 = vmul.f32 %v3115_v1, %v11441_v49  ;;  %v7709_v54 = vsel %vm11464_vm5, 1.0, %v16589_v47  ;;  %v16931_v60 = vrot.slane %v11327_v3, 7  ;;  %v16932_v53 = vrot.slane %v11172_v50, 7  ;;  %v3112_v1 = vld [vmem:[%s16278_s4 + $0x10] sm:$0xff] }
 0x2a9   : > { %v2396_v55 = vmul.f32 %v9259_v14, %v11327_v3  ;;  %v11506_v15 = vadd.f32 %v11177_v5, %v16933_v56  ;;  %v3176_v33 = vmul.f32 %v3114_v35, %v11453_v52  ;;  %v16934_v50 = vcvt.s32.f32 %v11067_v20 }
 0x2aa   : > { %v2198_v22 = vsel %vm2172_vm15, %v16932_v53, %v16931_v60  ;;  %3248 = vmatpush.msrb.mxu3 %v3177_v38  ;;  %vm1390_vm7 = vcmp.ge.f32.partialorder %v11475_v2, 0.5  ;;  %v1267_v21 = vmul.f32 62.0, %v16425_v16  ;;  %v11524_v23 = vmul.f32 0.016129032, %v1082_v62  ;;  %v16936_v60 = vld [vmem:[#allocation29_spill] sm:$0xff]  ;;  %v16937_v53 = vld [vmem:[#allocation91_spill] sm:$0xff] }
 0x2ab   : > { %v1351_v41 = vsub.f32 %v16934_v50, %v1289_v0  ;;  %v11530_v20 = vadd.f32 %v16937_v53, %v16936_v60  ;;  %v2643_v0 = vadd.f32 %v2581_v34, %v2519_v46  ;;  %v2458_v56 = vmul.f32 %v7709_v54, %v2198_v22  ;;  %v16938_v50 = vld [vmem:[#allocation22_spill] sm:$0xff]  ;;  %v16941_v60 = vld [vmem:[#allocation36_spill] sm:$0xff]  ;;  %v3111_v54 = vld [vmem:[%s16278_s4 + $0x8] sm:$0xff]  ;;  %2880 = vmatmul.f32.gmra.mxu3 %v11127_v12 }
 0x2ac   : > { %16935 = vst [vmem:[#allocation81_spill] sm:$0xff] %v11524_v23  ;;  %v11534_v38 = vadd.f32 %v11177_v5, %v16938_v50  ;;  %v3175_v45 = vmul.f32 %v3113_v9, %v11488_v24  ;;  %3249 = vmatpush.msrb.mxu3 %v3176_v33  ;;  %v7771_v62 = vsel %vm1960_vm6, 1.0, %v16589_v47  ;;  %v16939_v16 = vrot.slane %v11437_v13, 1  ;;  %vm11557_vm11 = vmand %vm9211_vm10, %vm1390_vm7 }
 0x2ad   : > { %v16940_v36 = vrot.slane %v11327_v3, 1  ;;  %v11546_v34 = vadd.f32 %v11177_v5, %v16941_v60  ;;  %v3174_v46 = vmul.f32 %v3112_v1, %v11506_v15  ;;  %2811 = vmatmul.f32.gmra.mxu2 %v2643_v0  ;;  %vm1452_vm8 = vcmp.le.f32.partialorder %v11475_v2, 60.5 }
 0x2ae   : > { %vm1413_vm12 = vcmp.ge.f32.partialorder %v1351_v41, 0.5  ;;  %3250 = vmatpush.msrb.mxu3 %v3175_v45  ;;  %v16944_v9 = vcvt.s32.f32 %v11251_v57  ;;  %v11570_v0 = vadd.s32 328, %v9109_v37  ;;  %v2419_v50 = vmul.f32 %v9259_v14, %v10702_v48  ;;  %vm1961_vm1 = vmand %vm1799_vm9, %vm1452_vm8 }
 0x2af   : > { %v2322_v35 = vsel %vm2297_vm13, %v16940_v36, %v16939_v16  ;;  %v3110_v16 = vld [vmem:[%s16278_s4] sm:$0xff]  ;;  %v16945_v36 = vcvt.s32.f32 %v11481_v17  ;;  %v2520_v60 = vadd.f32 %v2458_v56, %v2396_v55  ;;  %vm1475_vm14 = vcmp.le.f32.partialorder %v1351_v41, 60.5  ;;  %vm1673_vm0 = vmand %vm9211_vm10, %vm1413_vm12 }
 0x2b0   : > { %v1329_v33 = vsub.f32 %v16944_v9, %v1267_v21  ;;  %v2582_v31 = vmul.f32 %v7771_v62, %v2322_v35  ;;  %v2273_v45 = vrot.slane %v11530_v20, 1  ;;  %v3173_v57 = vmul.f32 %v3111_v54, %v11534_v38  ;;  %3251 = vmatpush.msrb.mxu3 %v3174_v46  ;;  %v11577_v21 = vpop.f32.mrf.mxu2  ;;  %vm11606_vm2 = vmand %vm1799_vm9, %vm1475_vm14 }
 0x2b1   : > { %v1083_v53 = vadd.f32 0.5, %v16945_v36  ;;  %v7710_v9 = vsel %vm11557_vm11, 1.0, %v16589_v47  ;;  %v16946_v36 = vrot.slane %v11437_v13, 7  ;;  %v16947_v1 = vrot.slane %v11327_v3, 7 }
 0x2b2   : > { %v3172_v55 = vmul.f32 %v3110_v16, %v11546_v34  ;;  %v2543_v35 = vadd.f32 %v2481_v19, %v2419_v50  ;;  %v2605_v56 = vmul.f32 %v11392_v30, %v11119_v29  ;;  %v16948_v3 = vrot.slane %v9571_v43, 7  ;;  %3252 = vmatpush.msrb.mxu3 %v3173_v57  ;;  %v16954_v50 = vld [vmem:[#allocation31_spill] sm:$0xff]  ;;  %v16955_v57 = vld [vmem:[#allocation92_spill] sm:$0xff] }
 0x2b3   : > { %v2197_v12 = vsel %vm2172_vm15, %v16947_v1, %v16946_v36  ;;  %v16949_v62 = vrot.slane %v10702_v48, 7  ;;  %vm1391_vm3 = vcmp.ge.f32.partialorder %v1329_v33, 0.5  ;;  %v16952_v29 = vfloor.f32 %v11524_v23 }
 0x2b4   : > { %v11612_v2 = vmul.f32 0.016129032, %v1083_v53  ;;  %v16428_v54 = vcvt.s32.f32 %v11570_v0  ;;  %v2397_v48 = vmul.f32 %v9259_v14, %v11437_v13  ;;  %v2644_v46 = vadd.f32 %v2582_v31, %v2520_v60  ;;  %3253 = vmatpush.msrb.mxu3 %v3172_v55  ;;  %v16957_v60 = vld [vmem:[#allocation50_spill] sm:$0xff]  ;;  %vm1651_vm5 = vmand %vm9211_vm10, %vm1391_vm3 }
 0x2b5   : > { %v2174_v41 = vsel %vm2172_vm15, %v16949_v62, %v16948_v3  ;;  %v1268_v30 = vmul.f32 62.0, %v16952_v29  ;;  %v2459_v22 = vmul.f32 %v7710_v9, %v2197_v12  ;;  %v7733_v16 = vsel %vm1673_vm0, 1.0, %v16589_v47 }
 0x2b6   : > { %16953 = vst [vmem:[#allocation82_spill] sm:$0xff] %v11612_v2  ;;  %v2148_v1 = vrot.slane %v11530_v20, 7  ;;  %v11621_v36 = vadd.f32 %v16955_v57, %v16954_v50  ;;  %v7772_v3 = vsel %vm1961_vm1, 1.0, %v16589_v47  ;;  %v16956_v53 = vrot.slane %v11437_v13, 1  ;;  %2814 = vmatmul.f32.gmra.mxu2 %v2644_v46 }
 0x2b7   : > { %v2667_v29 = vadd.f32 %v2605_v56, %v2543_v35  ;;  %v7795_v31 = vsel %vm11606_vm2, 1.0, %v16589_v47  ;;  %v16958_v9 = vrot.slane %v16957_v60, 1  ;;  %v16959_v12 = vrot.slane %v9571_v43, 1 }
 0x2b8   : > { %v2321_v62 = vsel %vm2297_vm13, %v16956_v53, %v2273_v45  ;;  %vm1453_vm4 = vcmp.le.f32.partialorder %v1329_v33, 60.5  ;;  %v16960_v50 = vcvt.s32.f32 %v11384_v27  ;;  %v16430_v35 = vfloor.f32 %v11612_v2  ;;  %v16963_v33 = vld [vmem:[#allocation37_spill] sm:$0xff] }
 0x2b9   : > { %v2298_v55 = vsel %vm2297_vm13, %v16959_v12, %v16958_v9  ;;  %v1084_v56 = vadd.f32 0.5, %v16428_v54  ;;  %v11646_v19 = vadd.s32 336, %v9109_v37  ;;  %2883 = vmatmul.f32.gmra.mxu3 %v2667_v29  ;;  %v2521_v57 = vadd.f32 %v2459_v22, %v2397_v48  ;;  %v11649_v12 = vpop.f32.mrf.mxu2  ;;  %vm1962_vm6 = vmand %vm1799_vm9, %vm1453_vm4  ;;  %v16964_v29 = vld [vmem:[#allocation13_spill] sm:$0xff] }
 0x2ba   : > { %v1330_v46 = vsub.f32 %v16960_v50, %v1268_v30  ;;  %v2583_v53 = vmul.f32 %v7772_v3, %v2321_v62  ;;  %v2482_v60 = vmul.f32 %v7733_v16, %v2174_v41  ;;  %v2274_v9 = vrot.slane %v11621_v36, 1 }
 0x2bb   : > { %v7711_v23 = vsel %vm1651_vm5, 1.0, %v16589_v47  ;;  %v16961_v27 = vrot.slane %v11437_v13, 7  ;;  %v2420_v50 = vmul.f32 %v9259_v14, %v9571_v43  ;;  %v2606_v54 = vmul.f32 %v7795_v31, %v2298_v55 }
 0x2bc   : > { %vm1392_vm7 = vcmp.ge.f32.partialorder %v1330_v46, 0.5  ;;  %v1269_v41 = vmul.f32 62.0, %v16430_v35  ;;  %v11663_v48 = vmul.f32 0.016129032, %v1084_v56  ;;  %v1023_v22 = vcvt.s32.f32 %v11646_v19 }
 0x2bd   : > { %v2196_v30 = vsel %vm2172_vm15, %v16961_v27, %v2148_v1  ;;  %v2398_v13 = vmul.f32 %v9259_v14, %v11530_v20  ;;  %v2645_v16 = vadd.f32 %v2583_v53, %v2521_v57  ;;  %v2544_v3 = vadd.f32 %v2482_v60, %v2420_v50  ;;  %vm1652_vm11 = vmand %vm9211_vm10, %vm1392_vm7 }
 0x2be   : > { %16962 = vst [vmem:[#allocation84_spill] sm:$0xff] %v11663_v48  ;;  %v2460_v62 = vmul.f32 %v7711_v23, %v2196_v30  ;;  %v2149_v43 = vrot.slane %v11621_v36, 7  ;;  %v11671_v31 = vadd.f32 %v16964_v29, %v16963_v33  ;;  %v7773_v55 = vsel %vm1962_vm6, 1.0, %v16589_v47 }
 0x2bf   : > { %v2320_v56 = vsel %vm2297_vm13, %v2273_v45, %v2274_v9  ;;  %2817 = vmatmul.f32.gmra.mxu2 %v2645_v16  ;;  %v2668_v27 = vadd.f32 %v2606_v54, %v2544_v3  ;;  %vm1454_vm8 = vcmp.le.f32.partialorder %v1330_v46, 60.5  ;;  %v16965_v23 = vcvt.s32.f32 %v11481_v17 }
 0x2c0   : > { %v16429_v57 = vfloor.f32 %v11663_v48  ;;  %v1085_v53 = vadd.f32 0.5, %v1023_v22  ;;  %v11685_v60 = vadd.s32 344, %v9109_v37  ;;  %v2522_v45 = vadd.f32 %v2460_v62, %v2398_v13  ;;  %vm1963_vm12 = vmand %vm1799_vm9, %vm1454_vm8 }
 0x2c1   : > { %v1331_v20 = vsub.f32 %v16965_v23, %v1269_v41  ;;  %2886 = vmatmul.f32.gmra.mxu3 %v2668_v27  ;;  %v2584_v30 = vmul.f32 %v7773_v55, %v2320_v56  ;;  %v2275_v54 = vrot.slane %v11671_v31, 1  ;;  %v11688_v46 = vpop.f32.mrf.mxu2  ;;  %v7712_v50 = vsel %vm1652_vm11, 1.0, %v16589_v47  ;;  %v16967_v55 = vld [vmem:[#allocation41_spill] sm:$0xff] }
 0x2c2   : > { %v2195_v17 = vsel %vm2172_vm15, %v2148_v1, %v2149_v43  ;;  %v1270_v41 = vmul.f32 62.0, %v16429_v57  ;;  %v11697_v16 = vmul.f32 0.016129032, %v1085_v53  ;;  %v1024_v13 = vcvt.s32.f32 %v11685_v60  ;;  %v16968_v1 = vld [vmem:[#allocation14_spill] sm:$0xff] }
 0x2c3   : > { %vm1393_vm14 = vcmp.ge.f32.partialorder %v1331_v20, 0.5  ;;  %v2399_v3 = vmul.f32 %v9259_v14, %v11621_v36  ;;  %v2646_v62 = vadd.f32 %v2584_v30, %v2522_v45  ;;  %v2461_v33 = vmul.f32 %v7712_v50, %v2195_v17  ;;  %v16970_v50 = vld [vmem:[#allocation69_spill] sm:$0xff] }
 0x2c4   : > { %16966 = vst [vmem:[#allocation87_spill] sm:$0xff] %v11697_v16  ;;  %v2150_v29 = vrot.slane %v11671_v31, 7  ;;  %v11705_v56 = vadd.f32 %v16968_v1, %v16967_v55  ;;  %v7774_v27 = vsel %vm1963_vm12, 1.0, %v16589_v47  ;;  %v2319_v23 = vsel %vm2297_vm13, %v2274_v9, %v2275_v54  ;;  %vm1653_vm1 = vmand %vm9211_vm10, %vm1393_vm14 }
 0x2c5   : > { %vm1455_vm0 = vcmp.le.f32.partialorder %v1331_v20, 60.5  ;;  %v16969_v36 = vcvt.s32.f32 %v11570_v0  ;;  %v16431_v60 = vfloor.f32 %v11697_v16  ;;  %v1086_v45 = vadd.f32 0.5, %v1024_v13 }
 0x2c6   : > { %v11716_v30 = vadd.s32 352, %v9109_v37  ;;  %v2523_v17 = vadd.f32 %v2461_v33, %v2399_v3  ;;  %v2585_v55 = vmul.f32 %v7774_v27, %v2319_v23  ;;  %v2276_v9 = vrot.slane %v11705_v56, 1  ;;  %vm1964_vm2 = vmand %vm1799_vm9, %vm1455_vm0 }
 0x2c7   : > { %2820 = vmatmul.f32.gmra.mxu2 %v2646_v62  ;;  %v1332_v53 = vsub.f32 %v16969_v36, %v1270_v41  ;;  %v7713_v20 = vsel %vm1653_vm1, 1.0, %v16589_v47  ;;  %v2194_v0 = vsel %vm2172_vm15, %v2149_v43, %v2150_v29  ;;  %v1271_v41 = vmul.f32 62.0, %v16431_v60  ;;  %v16973_v43 = vld [vmem:[#allocation93_spill] sm:$0xff] }
 0x2c8   : > { %v11729_v1 = vmul.f32 0.016129032, %v1086_v45  ;;  %v1025_v3 = vcvt.s32.f32 %v11716_v30  ;;  %v2400_v33 = vmul.f32 %v9259_v14, %v11671_v31  ;;  %v2647_v27 = vadd.f32 %v2585_v55, %v2523_v17 }
 0x2c9   : > { %2889 = vmatmul.f32.gmra.mxu3 %v16970_v50  ;;  %v11720_v62 = vpop.f32.mrf.mxu2  ;;  %vm1394_vm3 = vcmp.ge.f32.partialorder %v1332_v53, 0.5  ;;  %v2462_v23 = vmul.f32 %v7713_v20, %v2194_v0  ;;  %v2151_v36 = vrot.slane %v11705_v56, 7  ;;  %v16972_v50 = vld [vmem:[#allocation15_spill] sm:$0xff]  ;;  %v7775_v35 = vsel %vm1964_vm2, 1.0, %v16589_v47 }
 0x2ca   : > { %16971 = vst [vmem:[#allocation89_spill] sm:$0xff] %v11729_v1  ;;  %v11737_v57 = vadd.f32 %v16973_v43, %v16972_v50  ;;  %v2318_v60 = vsel %vm2297_vm13, %v2275_v54, %v2276_v9  ;;  %vm1456_vm4 = vcmp.le.f32.partialorder %v1332_v53, 60.5  ;;  %vm1654_vm5 = vmand %vm9211_vm10, %vm1394_vm3  ;;  %v1333_v31 = vsub.f32 %v1023_v22, %v1271_v41 }
 0x2cb   : > { %v16433_v45 = vfloor.f32 %v11729_v1  ;;  %v1087_v30 = vadd.f32 0.5, %v1025_v3  ;;  %v11748_v17 = vadd.s32 360, %v9109_v37  ;;  %v2524_v55 = vadd.f32 %v2462_v23, %v2400_v33  ;;  %vm1965_vm6 = vmand %vm1799_vm9, %vm1456_vm4  ;;  %v16975_v23 = vld [vmem:[#allocation52_spill] sm:$0xff] }
 0x2cc   : > { %v2586_v20 = vmul.f32 %v7775_v35, %v2318_v60  ;;  %v2277_v0 = vrot.slane %v11737_v57, 1  ;;  %v7714_v54 = vsel %vm1654_vm5, 1.0, %v16589_v47  ;;  %v2193_v53 = vsel %vm2172_vm15, %v2150_v29, %v2151_v36  ;;  %v16976_v29 = vld [vmem:[#allocation25_spill] sm:$0xff] }
 0x2cd   : > { %vm1395_vm7 = vcmp.ge.f32.partialorder %v1333_v31, 0.5  ;;  %v1272_v19 = vmul.f32 62.0, %v16433_v45  ;;  %v11760_v22 = vmul.f32 0.016129032, %v1087_v30  ;;  %v1026_v35 = vcvt.s32.f32 %v11748_v17 }
 0x2ce   : > { %v2401_v60 = vmul.f32 %v9259_v14, %v11705_v56  ;;  %v2648_v41 = vadd.f32 %v2586_v20, %v2524_v55  ;;  %v2463_v33 = vmul.f32 %v7714_v54, %v2193_v53  ;;  %v11768_v43 = vadd.f32 %v16976_v29, %v16975_v23  ;;  %vm1655_vm11 = vmand %vm9211_vm10, %vm1395_vm7  ;;  %v16978_v29 = vld [vmem:[#allocation55_spill] sm:$0xff] }
 0x2cf   : > { %2823 = vmatmul.f32.gmra.mxu2 %v2647_v27  ;;  %16974 = vst [vmem:[#allocation51_spill] sm:$0xff] %v11760_v22  ;;  %v2152_v27 = vrot.slane %v11737_v57, 7  ;;  %v7776_v16 = vsel %vm1965_vm6, 1.0, %v16589_v47  ;;  %v2317_v45 = vsel %vm2297_vm13, %v2276_v9, %v2277_v0  ;;  %vm1457_vm8 = vcmp.le.f32.partialorder %v1333_v31, 60.5 }
 0x2d0   : > { %v1334_v30 = vsub.f32 %v1024_v13, %v1272_v19  ;;  %v16436_v56 = vfloor.f32 %v11760_v22  ;;  %v1088_v17 = vadd.f32 0.5, %v1026_v35  ;;  %v11777_v55 = vadd.s32 368, %v9109_v37  ;;  %vm1966_vm12 = vmand %vm1799_vm9, %vm1457_vm8 }
 0x2d1   : > { %v11751_v50 = vpop.f32.mrf.mxu2  ;;  %v2525_v20 = vadd.f32 %v2463_v33, %v2401_v60  ;;  %v2587_v54 = vmul.f32 %v7776_v16, %v2317_v45  ;;  %v2278_v53 = vrot.slane %v11768_v43, 1  ;;  %v7715_v9 = vsel %vm1655_vm11, 1.0, %v16589_v47 }
 0x2d2   : > { %v2192_v31 = vsel %vm2172_vm15, %v2151_v36, %v2152_v27  ;;  %vm1396_vm14 = vcmp.ge.f32.partialorder %v1334_v30, 0.5  ;;  %v1273_v13 = vmul.f32 62.0, %v16436_v56  ;;  %v11789_v19 = vmul.f32 0.016129032, %v1088_v17  ;;  %v16979_v36 = vld [vmem:[#allocation27_spill] sm:$0xff] }
 0x2d3   : > { %v1027_v16 = vcvt.s32.f32 %v11777_v55  ;;  %v2402_v45 = vmul.f32 %v9259_v14, %v11737_v57  ;;  %v2649_v60 = vadd.f32 %v2587_v54, %v2525_v20  ;;  %v2153_v33 = vrot.slane %v11768_v43, 7  ;;  %vm1656_vm1 = vmand %vm9211_vm10, %vm1396_vm14 }
 0x2d4   : > { %16977 = vst [vmem:[#allocation23_spill] sm:$0xff] %v11789_v19  ;;  %v11797_v1 = vadd.f32 %v16979_v36, %v16978_v29  ;;  %v7777_v48 = vsel %vm1966_vm12, 1.0, %v16589_v47  ;;  %v2316_v56 = vsel %vm2297_vm13, %v2277_v0, %v2278_v53  ;;  %vm1458_vm0 = vcmp.le.f32.partialorder %v1334_v30, 60.5  ;;  %v16981_v36 = vld [vmem:[#allocation94_spill] sm:$0xff] }
 0x2d5   : > { %v1335_v17 = vsub.f32 %v1025_v3, %v1273_v13  ;;  %v16439_v57 = vfloor.f32 %v11789_v19  ;;  %v1089_v55 = vadd.f32 0.5, %v1027_v16  ;;  %v11806_v20 = vadd.s32 376, %v9109_v37  ;;  %vm1967_vm2 = vmand %vm1799_vm9, %vm1458_vm0 }
 0x2d6   : > { %v7716_v0 = vsel %vm1656_vm1, 1.0, %v16589_v47  ;;  %v2191_v30 = vsel %vm2172_vm15, %v2152_v27, %v2153_v33  ;;  %v16982_v27 = vld [vmem:[#allocation96_spill] sm:$0xff]  ;;  %v7778_v2 = vsel %vm1967_vm2, 1.0, %v16589_v47 }
 0x2d7   : > { %2826 = vmatmul.f32.gmra.mxu2 %v2648_v41  ;;  %v2464_v41 = vmul.f32 %v7715_v9, %v2192_v31  ;;  %v2588_v9 = vmul.f32 %v7777_v48, %v2316_v56  ;;  %v2279_v31 = vrot.slane %v11797_v1, 1  ;;  %vm1397_vm3 = vcmp.ge.f32.partialorder %v1335_v17, 0.5 }
 0x2d8   : > { %v1274_v3 = vmul.f32 62.0, %v16439_v57  ;;  %v11818_v13 = vmul.f32 0.016129032, %v1089_v55  ;;  %v1028_v48 = vcvt.s32.f32 %v11806_v20  ;;  %v2403_v56 = vmul.f32 %v9259_v14, %v11768_v43  ;;  %vm1657_vm5 = vmand %vm9211_vm10, %vm1397_vm3 }
 0x2d9   : > { %v11780_v23 = vpop.f32.mrf.mxu2  ;;  %v2526_v54 = vadd.f32 %v2464_v41, %v2402_v45  ;;  %v2154_v41 = vrot.slane %v11797_v1, 7  ;;  %v11826_v22 = vadd.f32 %v16982_v27, %v16981_v36  ;;  %v2315_v57 = vsel %vm2297_vm13, %v2278_v53, %v2279_v31  ;;  %v16984_v27 = vld [vmem:[#allocation18_spill] sm:$0xff] }
 0x2da   : > { %16980 = vst [vmem:[#allocation29_spill] sm:$0xff] %v11818_v13  ;;  %vm1459_vm4 = vcmp.le.f32.partialorder %v1335_v17, 60.5  ;;  %v1336_v55 = vsub.f32 %v1026_v35, %v1274_v3  ;;  %v16442_v43 = vfloor.f32 %v11818_v13  ;;  %v1090_v20 = vadd.f32 0.5, %v1028_v48 }
 0x2db   : > { %v2650_v45 = vadd.f32 %v2588_v9, %v2526_v54  ;;  %v11835_v54 = vadd.s32 384, %v9109_v37  ;;  %v7717_v53 = vsel %vm1657_vm5, 1.0, %v16589_v47  ;;  %v2190_v17 = vsel %vm2172_vm15, %v2153_v33, %v2154_v41  ;;  %vm1968_vm6 = vmand %vm1799_vm9, %vm1459_vm4  ;;  %v16985_v33 = vld [vmem:[#allocation98_spill] sm:$0xff] }
 0x2dc   : > { %vm1398_vm7 = vcmp.ge.f32.partialorder %v1336_v55, 0.5  ;;  %v1275_v35 = vmul.f32 62.0, %v16442_v43  ;;  %v11847_v3 = vmul.f32 0.016129032, %v1090_v20  ;;  %v11855_v19 = vadd.f32 %v16985_v33, %v16984_v27  ;;  %v16987_v33 = vld [vmem:[#allocation35_spill] sm:$0xff] }
 0x2dd   : > { %v7779_v26 = vsel %vm1968_vm6, 1.0, %v16589_v47  ;;  %vm1460_vm8 = vcmp.le.f32.partialorder %v1336_v55, 60.5  ;;  %vm1658_vm11 = vmand %vm9211_vm10, %vm1398_vm7 }
 0x2de   : > { %16983 = vst [vmem:[#allocation91_spill] sm:$0xff] %v11847_v3  ;;  %v1337_v20 = vsub.f32 %v1027_v16, %v1275_v35  ;;  %vm1969_vm12 = vmand %vm1799_vm9, %vm1460_vm8 }
 0x2df   : > { %2829 = vmatmul.f32.gmra.mxu2 %v2649_v60  ;;  %v2465_v60 = vmul.f32 %v7716_v0, %v2191_v30  ;;  %v2589_v0 = vmul.f32 %v7778_v2, %v2315_v57  ;;  %v2280_v30 = vrot.slane %v11826_v22, 1  ;;  %v1029_v2 = vcvt.s32.f32 %v11835_v54 }
 0x2e0   : > { %v2404_v57 = vmul.f32 %v9259_v14, %v11797_v1  ;;  %v16446_v1 = vfloor.f32 %v11847_v3  ;;  %vm1399_vm14 = vcmp.ge.f32.partialorder %v1337_v20, 0.5  ;;  %v7780_v44 = vsel %vm1969_vm12, 1.0, %v16589_v47 }
 0x2e1   : > { %v11809_v29 = vpop.f32.mrf.mxu2  ;;  %v2527_v9 = vadd.f32 %v2465_v60, %v2403_v56  ;;  %v2155_v60 = vrot.slane %v11826_v22, 7  ;;  %v2314_v43 = vsel %vm2297_vm13, %v2279_v31, %v2280_v30  ;;  %v1091_v54 = vadd.f32 0.5, %v1029_v2  ;;  %vm1659_vm0 = vmand %vm9211_vm10, %vm1399_vm14 }
 0x2e2   : > { %v7718_v31 = vsel %vm1658_vm11, 1.0, %v16589_v47  ;;  %v1276_v16 = vmul.f32 62.0, %v16446_v1  ;;  %vm1461_vm1 = vcmp.le.f32.partialorder %v1337_v20, 60.5 }
 0x2e3   : > { %v2651_v56 = vadd.f32 %v2589_v0, %v2527_v9  ;;  %v11864_v9 = vadd.s32 392, %v9109_v37  ;;  %v2189_v55 = vsel %vm2172_vm15, %v2154_v41, %v2155_v60  ;;  %v11876_v35 = vmul.f32 0.016129032, %v1091_v54  ;;  %v16988_v41 = vld [vmem:[#allocation100_spill] sm:$0xff]  ;;  %vm1970_vm2 = vmand %vm1799_vm9, %vm1461_vm1 }
 0x2e4   : > { %v874_v13 = vadd.f32 %v16988_v41, %v16987_v33  ;;  %v1338_v54 = vsub.f32 %v1028_v48, %v1276_v16  ;;  %v7719_v33 = vsel %vm1659_vm0, 1.0, %v16589_v47 }
 0x2e5   : > { %16986 = vst [vmem:[#allocation22_spill] sm:$0xff] %v11876_v35 }
 0x2e6   : > { %vm1400_vm3 = vcmp.ge.f32.partialorder %v1338_v54, 0.5  ;;  %v2157_v16 = vrot.slane %v874_v13, 7  ;;  %vm1462_vm5 = vcmp.le.f32.partialorder %v1338_v54, 60.5 }
 0x2e7   : > { %2832 = vmatmul.f32.gmra.mxu2 %v2650_v45  ;;  %v2466_v45 = vmul.f32 %v7717_v53, %v2190_v17  ;;  %v2590_v53 = vmul.f32 %v7779_v26, %v2314_v43  ;;  %v2281_v17 = vrot.slane %v11855_v19, 1  ;;  %v1030_v26 = vcvt.s32.f32 %v11864_v9  ;;  %vm1660_vm4 = vmand %vm9211_vm10, %vm1400_vm3 }
 0x2e8   : > { %v2405_v43 = vmul.f32 %v9259_v14, %v11826_v22  ;;  %v16447_v22 = vfloor.f32 %v11876_v35  ;;  %vm1971_vm6 = vmand %vm1799_vm9, %vm1462_vm5  ;;  %vm3234_vm3 = vcmask 916480  }
 0x2e9   : > { %v11838_v36 = vpop.f32.mrf.mxu2  ;;  %v2528_v0 = vadd.f32 %v2466_v45, %v2404_v57  ;;  %v2156_v45 = vrot.slane %v11855_v19, 7  ;;  %v2313_v3 = vsel %vm2297_vm13, %v2280_v30, %v2281_v17  ;;  %v1092_v9 = vadd.f32 0.5, %v1030_v26 }
 0x2ea   : > { %v1277_v48 = vmul.f32 62.0, %v16447_v22 }
 0x2eb   : > { %v2652_v57 = vadd.f32 %v2590_v53, %v2528_v0  ;;  %v2591_v53 = vmul.f32 %v7780_v44, %v2313_v3  ;;  %v2188_v41 = vsel %vm2172_vm15, %v2155_v60, %v2156_v45  ;;  %v11899_v30 = vmul.f32 0.016129032, %v1092_v9 }
 0x2ec   : > { %v2406_v44 = vmul.f32 %v9259_v14, %v11855_v19  ;;  %v2468_v20 = vmul.f32 %v7719_v33, %v2188_v41  ;;  %v7781_v60 = vsel %vm1970_vm2, 1.0, %v16589_v47  ;;  %v1339_v9 = vsub.f32 %v1029_v2, %v1277_v48 }
 0x2ed   : > { %16989 = vst [vmem:[#allocation36_spill] sm:$0xff] %v11899_v30  ;;  %v16448_v22 = vfloor.f32 %v11899_v30  ;;  %v7720_v41 = vsel %vm1660_vm4, 1.0, %v16589_v47  ;;  %v2407_v2 = vmul.f32 %v9259_v14, %v874_v13 }
 0x2ee   : > { %v2530_v19 = vadd.f32 %v2468_v20, %v2406_v44  ;;  %vm1401_vm7 = vcmp.ge.f32.partialorder %v1339_v9, 0.5  ;;  %vm1463_vm11 = vcmp.le.f32.partialorder %v1339_v9, 60.5 }
 0x2ef   : > { %2835 = vmatmul.f32.gmra.mxu2 %v2651_v56  ;;  %v2467_v56 = vmul.f32 %v7718_v31, %v2189_v55  ;;  %v2282_v31 = vrot.slane %v874_v13, 1  ;;  %vm1661_vm8 = vmand %vm9211_vm10, %vm1401_vm7  ;;  %vm3356_vm7 = vcmask 1043456  }
 0x2f0   : > { %v7721_v13 = vsel %vm1661_vm8, 1.0, %v16589_v47  ;;  %vm1972_vm12 = vmand %vm1799_vm9, %vm1463_vm11 }
 0x2f1   : > { %v11867_v27 = vpop.f32.mrf.mxu2  ;;  %v2529_v0 = vadd.f32 %v2467_v56, %v2405_v43  ;;  %v16990_v43 = vld [vmem:[#allocation20_spill] sm:$0xff]  ;;  %v2312_v1 = vsel %vm2297_vm13, %v2281_v17, %v2282_v31  ;;  %v1278_v17 = vmul.f32 62.0, %v16448_v22 }
 0x2f3   : > { %v2653_v3 = vadd.f32 %v2591_v53, %v2529_v0  ;;  %v2592_v0 = vmul.f32 %v7781_v60, %v2312_v1  ;;  %v7782_v1 = vsel %vm1971_vm6, 1.0, %v16589_v47  ;;  %v2284_v60 = vrot.slane %v11159_v8, 1 }
 0x2f4   : > { %vm3326_vm6 = vcmask 523264  }
 0x2f5   : > { %v2654_v54 = vadd.f32 %v2592_v0, %v2530_v19 }
 0x2f7   : > { %2838 = vmatmul.f32.gmra.mxu2 %v2652_v57  ;;  %v16991_v57 = vld [vmem:[#allocation101_spill] sm:$0xff] }
 0x2f8   : > { %v877_v56 = vadd.f32 %v16991_v57, %v16990_v43  ;;  %v2187_v43 = vsel %vm2172_vm15, %v2156_v45, %v2157_v16  ;;  %v1340_v45 = vsub.f32 %v1030_v26, %v1278_v17  ;;  %v7783_v26 = vsel %vm1972_vm12, 1.0, %v16589_v47 }
 0x2f9   : > { %v11890_v55 = vpop.f32.mrf.mxu2  ;;  %v2469_v48 = vmul.f32 %v7720_v41, %v2187_v43 }
 0x2fa   : > { %v2283_v53 = vrot.slane %v877_v56, 1  ;;  %v2158_v44 = vrot.slane %v877_v56, 7  ;;  %vm1402_vm14 = vcmp.ge.f32.partialorder %v1340_v45, 0.5  ;;  %vm1464_vm1 = vcmp.le.f32.partialorder %v1340_v45, 60.5 }
 0x2fb   : > { %v2531_v20 = vadd.f32 %v2469_v48, %v2407_v2  ;;  %vm1662_vm0 = vmand %vm9211_vm10, %vm1402_vm14  ;;  %v3141_v2 = vld [vmem:[%s16278_s4 + $0xf8] sm:$0xff] }
 0x2fc   : > { %v2186_v19 = vsel %vm2172_vm15, %v2157_v16, %v2158_v44  ;;  %v2310_v9 = vsel %vm2297_vm13, %v2283_v53, %v2284_v60  ;;  %vm1973_vm10 = vmand %vm1799_vm9, %vm1464_vm1 }
 0x2fd   : > { %v2470_v41 = vmul.f32 %v7721_v13, %v2186_v19  ;;  %v2594_v16 = vmul.f32 %v7783_v26, %v2310_v9  ;;  %v7784_v13 = vsel %vm1973_vm10, 1.0, %v16589_v47  ;;  %v16996_v19 = vrot.slane %v10889_v25, 1 }
 0x2fe   : > { %vm3352_vm10 = vcmask 31744  }
 0x2ff   : > { %2841 = vmatmul.f32.gmra.mxu2 %v2653_v3  ;;  %v2311_v3 = vsel %vm2297_vm13, %v2282_v31, %v2283_v53  ;;  %v2408_v31 = vmul.f32 %v9259_v14, %v877_v56  ;;  %v7722_v56 = vsel %vm1662_vm0, 1.0, %v16589_v47 }
 0x300   : > { %v2593_v57 = vmul.f32 %v7782_v1, %v2311_v3  ;;  %v2409_v1 = vmul.f32 %v9259_v14, %v11159_v8  ;;  %v3140_v3 = vld [vmem:[%s16278_s4 + $0xf0] sm:$0xff]  ;;  %v2309_v14 = vsel %vm2297_vm13, %v2284_v60, %v16996_v19 }
 0x301   : > { %v2794_v33 = vpop.f32.mrf.mxu2  ;;  %v2532_v43 = vadd.f32 %v2470_v41, %v2408_v31  ;;  %v3138_v31 = vld [vmem:[%s16278_s4 + $0xe0] sm:$0xff]  ;;  %v2595_v60 = vmul.f32 %v7784_v13, %v2309_v14  ;;  %v3137_v41 = vld [vmem:[%s16278_s4 + $0xd8] sm:$0xff]  ;;  %v3131_v13 = vld [vmem:[%s16278_s4 + $0xa8] sm:$0xff] }
 0x302   : > { %v2655_v0 = vadd.f32 %v2593_v57, %v2531_v20  ;;  %v11958_v45 = vadd.f32 %v11177_v5, %v2794_v33  ;;  %v3139_v57 = vld [vmem:[%s16278_s4 + $0xe8] sm:$0xff] }
 0x304   : > { %16995 = vst [vmem:[#allocation50_spill] sm:$0xff] %v11958_v45 }
 0x307   : > { %2844 = vmatmul.f32.gmra.mxu2 %v2654_v54  ;;  %v16992_v54 = vrot.slane %v11159_v8, 7  ;;  %v11971_v8 = vadd.f32 %v11177_v5, %v11890_v55 }
 0x309   : > { %v2797_v22 = vpop.f32.mrf.mxu2  ;;  %v2185_v48 = vsel %vm2172_vm15, %v2158_v44, %v16992_v54  ;;  %16997 = vst [vmem:[#allocation37_spill] sm:$0xff] %v11971_v8 }
 0x30a   : > { %v11945_v53 = vadd.f32 %v11177_v5, %v2797_v22  ;;  %v2656_v22 = vadd.f32 %v2594_v16, %v2532_v43  ;;  %v2471_v20 = vmul.f32 %v7722_v56, %v2185_v48  ;;  %v3200_v43 = vmul.f32 %v3138_v31, %v11971_v8 }
 0x30c   : > { %16993 = vst [vmem:[#allocation31_spill] sm:$0xff] %v11945_v53  ;;  %v3202_v33 = vmul.f32 %v3140_v3, %v11945_v53  ;;  %v2533_v55 = vadd.f32 %v2471_v20, %v2409_v1 }
 0x30f   : > { %2847 = vmatmul.f32.gmra.mxu2 %v2655_v0  ;;  %v11980_v0 = vld [vmem:[%s16277_s3] ss:$0 sm:$0xff] }
 0x310   : > { %v11984_v25 = vadd.f32 %v11980_v0, %v11867_v27  ;;  %v11994_v9 = vadd.f32 %v11980_v0, %v11838_v36  ;;  %v3136_v27 = vld [vmem:[%s16278_s4 + $0xd0] sm:$0xff]  ;;  %v12002_v16 = vadd.f32 %v11980_v0, %v11809_v29  ;;  %v3135_v36 = vld [vmem:[%s16278_s4 + $0xc8] sm:$0xff]  ;;  %v12010_v56 = vadd.f32 %v11980_v0, %v11780_v23  ;;  %v3134_v29 = vld [vmem:[%s16278_s4 + $0xc0] sm:$0xff] }
 0x311   : > { %v2800_v17 = vpop.f32.mrf.mxu2  ;;  %v12018_v48 = vadd.f32 %v11980_v0, %v11751_v50  ;;  %v3133_v23 = vld [vmem:[%s16278_s4 + $0xb8] sm:$0xff]  ;;  %v3132_v50 = vld [vmem:[%s16278_s4 + $0xb0] sm:$0xff]  ;;  %v12036_v20 = vadd.f32 %v11980_v0, %v11688_v46  ;;  %v3130_v46 = vld [vmem:[%s16278_s4 + $0xa0] sm:$0xff]  ;;  %v12053_v14 = vadd.f32 %v11980_v0, %v11577_v21 }
 0x312   : > { %v11948_v18 = vadd.f32 %v11177_v5, %v2800_v17  ;;  %16998 = vst [vmem:[#allocation13_spill] sm:$0xff] %v11984_v25  ;;  %v3201_v5 = vmul.f32 %v3139_v57, %v11958_v45  ;;  %v3199_v17 = vmul.f32 %v3137_v41, %v11984_v25  ;;  %v3198_v54 = vmul.f32 %v3136_v27, %v11994_v9  ;;  %v3128_v21 = vld [vmem:[%s16278_s4 + $0x90] sm:$0xff]  ;;  %v3127_v41 = vld [vmem:[%s16278_s4 + $0x88] sm:$0xff]  ;;  %v3126_v27 = vld [vmem:[%s16278_s4 + $0x80] sm:$0xff] }
 0x313   : > { %16999 = vst [vmem:[#allocation41_spill] sm:$0xff] %v11994_v9  ;;  %v3197_v1 = vmul.f32 %v3135_v36, %v12002_v16  ;;  %v3195_v57 = vmul.f32 %v3133_v23, %v12018_v48  ;;  %v3155_v25 = vld [vmem:[%s16278_s4 + $0x168] sm:$0xff] }
 0x314   : > { %16994 = vst [vmem:[#allocation92_spill] sm:$0xff] %v11948_v18  ;;  %v3203_v44 = vmul.f32 %v3141_v2, %v11948_v18  ;;  %v2657_v2 = vadd.f32 %v2595_v60, %v2533_v55  ;;  %v12071_v55 = vadd.f32 %v11980_v0, %v11399_v61 }
 0x315   : > { %17000 = vst [vmem:[#allocation14_spill] sm:$0xff] %v12002_v16 }
 0x316   : > { %3258 = vmatpush.msra.mxu3 %v3203_v44  ;;  %17001 = vst [vmem:[#allocation69_spill] sm:$0xff] %v12010_v56  ;;  %v12028_v44 = vadd.f32 %v11980_v0, %v11720_v62  ;;  %v12044_v62 = vadd.f32 %v11980_v0, %v11649_v12  ;;  %v3129_v12 = vld [vmem:[%s16278_s4 + $0x98] sm:$0xff]  ;;  %v3189_v61 = vmul.f32 %v3127_v41, %v12071_v55  ;;  %v17003_v41 = vld [vmem:[#allocation34_spill] sm:$0xff] }
 0x317   : > { %2850 = vmatmul.f32.gmra.mxu2 %v2656_v22  ;;  %17002 = vst [vmem:[#allocation15_spill] sm:$0xff] %v12018_v48  ;;  %v3196_v22 = vmul.f32 %v3134_v29, %v12010_v56  ;;  %v3191_v60 = vmul.f32 %v3129_v12, %v12053_v14 }
 0x318   : > { %3259 = vmatpush.msra.mxu3 %v3202_v33  ;;  %v3194_v19 = vmul.f32 %v3132_v50, %v12028_v44  ;;  %v3193_v33 = vmul.f32 %v3131_v13, %v12036_v20 }
 0x319   : > { %v11990_v26 = vpop.f32.mrf.mxu2 }
 0x31a   : > { %3260 = vmatpush.msra.mxu3 %v3201_v5  ;;  %v3192_v5 = vmul.f32 %v3130_v46, %v12044_v62 }
 0x31c   : > { %3261 = vmatpush.msra.mxu3 %v3200_v43 }
 0x31e   : > { %3262 = vmatpush.msra.mxu3 %v3199_v17 }
 0x31f   : > { %2853 = vmatmul.f32.gmra.mxu2 %v2657_v2 }
 0x320   : > { %3263 = vmatpush.msra.mxu3 %v3198_v54  ;;  %v12093_v54 = vpop.f32.mrf.mxu3 }
 0x321   : > { %v12024_v3 = vpop.f32.mrf.mxu2 }
 0x322   : > { %3264 = vmatpush.msra.mxu3 %v3197_v1 }
 0x324   : > { %3265 = vmatpush.msra.mxu3 %v3196_v22 }
 0x326   : > { %3266 = vmatpush.msra.mxu3 %v3195_v57 }
 0x327   : > { %2856 = vmatmul.f32.gmra.mxu2 %v11329_v28  ;;  %v12063_v28 = vadd.f32 %v11980_v0, %v11491_v40  ;;  %v12079_v40 = vadd.f32 %v11980_v0, %v11283_v6 }
 0x328   : > { %3267 = vmatpush.msra.mxu3 %v3194_v19  ;;  %v12097_v23 = vpop.f32.mrf.mxu3  ;;  %v12104_v19 = vcvt.s32.f32 %v9165_v63 }
 0x329   : > { %v12059_v31 = vpop.f32.mrf.mxu2  ;;  %v3190_v43 = vmul.f32 %v3128_v21, %v12063_v28  ;;  %v3188_v2 = vmul.f32 %v3126_v27, %v12079_v40  ;;  %v2893_v27 = vadd.s32 128, %v9165_v63 }
 0x32a   : > { %3268 = vmatpush.msra.mxu3 %v3193_v33  ;;  %v2900_v33 = vadd.f32 0.5, %v12104_v19 }
 0x32c   : > { %3269 = vmatpush.msra.mxu3 %v3192_v5  ;;  %v2904_v12 = vmul.f32 0.016129032, %v2900_v33 }
 0x32e   : > { %3270 = vmatpush.msra.mxu3 %v3191_v60  ;;  %v2908_v5 = vfloor.f32 %v2904_v12 }
 0x330   : > { %3271 = vmatpush.msra.mxu3 %v3190_v43  ;;  %v12099_v50 = vpop.f32.mrf.mxu3  ;;  %vm2912_vm9 = vcmp.eq.f32.partialorder %v2908_v5, %v17003_v41  ;;  %v16455_v43 = vmov 1.0  }
 0x331   : > { %v12086_v17 = vpop.f32.mrf.mxu2  ;;  %7863 = vmatmul.msk.f32.vlgmr.msrb.gmra.mxu3 %vm2912_vm9, %v16455_v43 }
 0x332   : > { %3272 = vmatpush.msra.mxu3 %v3189_v61  ;;  %v2897_v61 = vcvt.s32.f32 %v2893_v27  ;;  %v3157_v27 = vld [vmem:[%s16278_s4 + $0x178] sm:$0xff] }
 0x334   : > { %3273 = vmatpush.msra.mxu3 %v3188_v2  ;;  %v2901_v2 = vadd.f32 0.5, %v2897_v61 }
 0x336   : > { %v2905_v30 = vmul.f32 0.016129032, %v2901_v2 }
 0x338   : > { %v12101_v13 = vpop.f32.mrf.mxu3  ;;  %v2909_v35 = vfloor.f32 %v2905_v30 }
 0x339   : > { %v12089_v36 = vpop.f32.mrf.mxu2 }
 0x33a   : > { %vm2913_vm13 = vcmp.eq.f32.partialorder %v2909_v35, %v17003_v41  ;;  %v3156_v35 = vld [vmem:[%s16278_s4 + $0x170] sm:$0xff] }
 0x33b   : > { %7864 = vmatmul.msk.f32.vlgmr.msra.gmra.mxu3 %vm2913_vm13, %v16455_v43 }
 0x340   : > { %v12107_v21 = vpop.f32.mrf.mxu3 }
 0x342   : > { %v12091_v6 = vpop.f32.mrf.mxu2 }
 0x348   : > { %v12112_v53 = vpop.f32.mrf.mxu3 }
 0x34a   : > { %v12095_v29 = vpop.f32.mrf.mxu2 }
 0x350   : > { %v12116_v12 = vpop.f32.mrf.mxu3 }
 0x352   : > { %v2824_v1 = vpop.f32.mrf.mxu2 }
 0x358   : > { %v12118_v45 = vpop.f32.mrf.mxu3 }
 0x35a   : > { %v2827_v22 = vpop.f32.mrf.mxu2 }
 0x362   : > { %v2830_v57 = vpop.f32.mrf.mxu2 }
 0x36a   : > { %v2833_v46 = vpop.f32.mrf.mxu2 }
 0x372   : > { %v2836_v60 = vpop.f32.mrf.mxu2 }
 0x373   : > { %v12147_v16 = vadd.f32 %v11980_v0, %v2836_v60  ;;  %v3152_v60 = vld [vmem:[%s16278_s4 + $0x150] sm:$0xff] }
 0x375   : > { %17008 = vst [vmem:[#allocation27_spill] sm:$0xff] %v12147_v16 }
 0x37a   : > { %v2839_v18 = vpop.f32.mrf.mxu2 }
 0x37b   : > { %v12140_v9 = vadd.f32 %v11980_v0, %v2839_v18  ;;  %v3153_v18 = vld [vmem:[%s16278_s4 + $0x158] sm:$0xff] }
 0x37d   : > { %17007 = vst [vmem:[#allocation55_spill] sm:$0xff] %v12140_v9 }
 0x382   : > { %v2842_v33 = vpop.f32.mrf.mxu2 }
 0x383   : > { %v12133_v2 = vadd.f32 %v11980_v0, %v2842_v33 }
 0x385   : > { %17006 = vst [vmem:[#allocation25_spill] sm:$0xff] %v12133_v2  ;;  %v3217_v33 = vmul.f32 %v3155_v25, %v12133_v2  ;;  %v3215_v25 = vmul.f32 %v3153_v18, %v12147_v16 }
 0x38a   : > { %v2845_v5 = vpop.f32.mrf.mxu2 }
 0x38b   : > { %v12124_v61 = vadd.f32 %v11980_v0, %v2845_v5 }
 0x38d   : > { %17004 = vst [vmem:[#allocation93_spill] sm:$0xff] %v12124_v61  ;;  %v3218_v5 = vmul.f32 %v3156_v35, %v12124_v61  ;;  %v12163_v35 = vadd.f32 %v11980_v0, %v2830_v57  ;;  %v3150_v57 = vld [vmem:[%s16278_s4 + $0x140] sm:$0xff]  ;;  %v12178_v61 = vadd.f32 %v11980_v0, %v2824_v1  ;;  %v3148_v1 = vld [vmem:[%s16278_s4 + $0x130] sm:$0xff] }
 0x38f   : > { %17010 = vst [vmem:[#allocation96_spill] sm:$0xff] %v12163_v35 }
 0x390   : > { %17012 = vst [vmem:[#allocation98_spill] sm:$0xff] %v12178_v61 }
 0x392   : > { %v2848_v8 = vpop.f32.mrf.mxu2 }
 0x393   : > { %v12127_v30 = vadd.f32 %v11980_v0, %v2848_v8  ;;  %v3154_v8 = vld [vmem:[%s16278_s4 + $0x160] sm:$0xff] }
 0x395   : > { %17005 = vst [vmem:[#allocation52_spill] sm:$0xff] %v12127_v30  ;;  %v3219_v43 = vmul.f32 %v3157_v27, %v12127_v30  ;;  %v12150_v27 = vpop.f32.mrf.mxu3  ;;  %v12156_v30 = vadd.f32 %v11980_v0, %v2833_v46  ;;  %v12170_v46 = vadd.f32 %v11980_v0, %v2827_v22  ;;  %v3149_v22 = vld [vmem:[%s16278_s4 + $0x138] sm:$0xff] }
 0x397   : > { %3278 = vmatpush.msrb.mxu3 %v3219_v43  ;;  %17009 = vst [vmem:[#allocation94_spill] sm:$0xff] %v12156_v30  ;;  %v3216_v43 = vmul.f32 %v3154_v8, %v12140_v9  ;;  %v3214_v8 = vmul.f32 %v3152_v60, %v12156_v30  ;;  %v3212_v60 = vmul.f32 %v3150_v57, %v12170_v46 }
 0x398   : > { %17011 = vst [vmem:[#allocation18_spill] sm:$0xff] %v12170_v46  ;;  %v12202_v57 = vadd.f32 %v11980_v0, %v12089_v36  ;;  %v3145_v36 = vld [vmem:[%s16278_s4 + $0x118] sm:$0xff] }
 0x399   : > { %3279 = vmatpush.msrb.mxu3 %v3218_v5  ;;  %v3151_v5 = vld [vmem:[%s16278_s4 + $0x148] sm:$0xff] }
 0x39a   : > { %v3213_v18 = vmul.f32 %v3151_v5, %v12163_v35  ;;  %v12194_v5 = vadd.f32 %v11980_v0, %v12091_v6  ;;  %17015 = vst [vmem:[#allocation20_spill] sm:$0xff] %v12202_v57  ;;  %v3146_v6 = vld [vmem:[%s16278_s4 + $0x120] sm:$0xff]  ;;  %v2851_v16 = vpop.f32.mrf.mxu2 }
 0x39b   : > { %3280 = vmatpush.msrb.mxu3 %v3217_v33  ;;  %v2894_v33 = vadd.s32 256, %v9165_v63 }
 0x39c   : > { %17014 = vst [vmem:[#allocation100_spill] sm:$0xff] %v12194_v5 }
 0x39d   : > { %3281 = vmatpush.msrb.mxu3 %v3216_v43  ;;  %v12186_v43 = vadd.f32 %v11980_v0, %v12095_v29  ;;  %v2887_v2 = vpop.f32.mrf.mxu3  ;;  %v3147_v29 = vld [vmem:[%s16278_s4 + $0x128] sm:$0xff] }
 0x39f   : > { %3282 = vmatpush.msrb.mxu3 %v3215_v25  ;;  %17013 = vst [vmem:[#allocation35_spill] sm:$0xff] %v12186_v43  ;;  %v2898_v25 = vcvt.s32.f32 %v2894_v33  ;;  %v3210_v33 = vmul.f32 %v3148_v1, %v12186_v43  ;;  %v12218_v1 = vadd.f32 %v11980_v0, %v12059_v31  ;;  %v3143_v31 = vld [vmem:[%s16278_s4 + $0x108] sm:$0xff] }
 0x3a1   : > { %3283 = vmatpush.msrb.mxu3 %v3214_v8  ;;  %v3211_v8 = vmul.f32 %v3149_v22, %v12178_v61  ;;  %v12210_v22 = vadd.f32 %v11980_v0, %v12086_v17  ;;  %17017 = vst [vmem:[#allocation34_spill] sm:$0xff] %v12218_v1  ;;  %v3144_v17 = vld [vmem:[%s16278_s4 + $0x110] sm:$0xff] }
 0x3a3   : > { %3284 = vmatpush.msrb.mxu3 %v3213_v18  ;;  %v2902_v18 = vadd.f32 0.5, %v2898_v25  ;;  %17016 = vst [vmem:[#allocation101_spill] sm:$0xff] %v12210_v22  ;;  %v3208_v25 = vmul.f32 %v3146_v6, %v12202_v57  ;;  %v12234_v6 = vadd.f32 %v11980_v0, %v11990_v26  ;;  %v3171_v26 = vld [vmem:[%s16278_s4 + $0x1e8] sm:$0xff] }
 0x3a5   : > { %3285 = vmatpush.msrb.mxu3 %v3212_v60  ;;  %v3209_v60 = vmul.f32 %v3147_v29, %v12194_v5  ;;  %v12226_v29 = vadd.f32 %v11980_v0, %v12024_v3  ;;  %v2890_v9 = vpop.f32.mrf.mxu3  ;;  %17019 = vst [vmem:[#allocation105_spill] sm:$0xff] %v12234_v6  ;;  %v3142_v3 = vld [vmem:[%s16278_s4 + $0x100] sm:$0xff] }
 0x3a6   : > { %v3204_v30 = vmul.f32 %v3142_v3, %v12234_v6  ;;  %v2895_v3 = vadd.s32 384, %v9165_v63 }
 0x3a7   : > { %3286 = vmatpush.msrb.mxu3 %v3211_v8  ;;  %v2906_v8 = vmul.f32 0.016129032, %v2902_v18  ;;  %17018 = vst [vmem:[#allocation104_spill] sm:$0xff] %v12226_v29  ;;  %v3206_v18 = vmul.f32 %v3144_v17, %v12218_v1  ;;  %v12249_v17 = vadd.f32 %v11980_v0, %v2887_v2  ;;  %v17023_v2 = vmov 1.0  }
 0x3a9   : > { %3287 = vmatpush.msrb.mxu3 %v3210_v33  ;;  %v3207_v33 = vmul.f32 %v3145_v36, %v12210_v22  ;;  %v3205_v36 = vmul.f32 %v3143_v31, %v12226_v29  ;;  %17021 = vst [vmem:[#allocation107_spill] sm:$0xff] %v12249_v17  ;;  %v3169_v31 = vld [vmem:[%s16278_s4 + $0x1d8] sm:$0xff] }
 0x3aa   : > { %v17101_v29 = vld [vmem:[#allocation95_spill] sm:$0xff] }
 0x3ab   : > { %3288 = vmatpush.msrb.mxu3 %v3209_v60  ;;  %v2910_v60 = vfloor.f32 %v2906_v8  ;;  %v3170_v8 = vld [vmem:[%s16278_s4 + $0x1e0] sm:$0xff] }
 0x3ad   : > { %3289 = vmatpush.msrb.mxu3 %v3208_v25  ;;  %v12242_v25 = vadd.f32 %v11980_v0, %v2890_v9  ;;  %vm2914_vm15 = vcmp.eq.f32.partialorder %v2910_v60, %v17003_v41  ;;  %v12257_v9 = vadd.f32 %v11980_v0, %v12150_v27  ;;  %v3232_v60 = vmul.f32 %v3170_v8, %v12249_v17  ;;  %v3168_v27 = vld [vmem:[%s16278_s4 + $0x1d0] sm:$0xff] }
 0x3ae   : > { %v12283_v8 = vadd.f32 %v11980_v0, %v12112_v53  ;;  %v3165_v53 = vld [vmem:[%s16278_s4 + $0x1b8] sm:$0xff] }
 0x3af   : > { %3290 = vmatpush.msrb.mxu3 %v3207_v33  ;;  %17020 = vst [vmem:[#allocation106_spill] sm:$0xff] %v12242_v25  ;;  %v3233_v33 = vmul.f32 %v3171_v26, %v12242_v25  ;;  %v2854_v26 = vpop.f32.mrf.mxu2  ;;  %v2899_v25 = vcvt.s32.f32 %v2895_v3  ;;  %v3164_v3 = vld [vmem:[%s16278_s4 + $0x1b0] sm:$0xff] }
 0x3b0   : > { %17022 = vst [vmem:[#allocation108_spill] sm:$0xff] %v12257_v9 }
 0x3b1   : > { %3291 = vmatpush.msrb.mxu3 %v3206_v18  ;;  %v12266_v18 = vadd.f32 %v11980_v0, %v12118_v45  ;;  %v3167_v45 = vld [vmem:[%s16278_s4 + $0x1c8] sm:$0xff]  ;;  %17026 = vst [vmem:[#allocation111_spill] sm:$0xff] %v12283_v8 }
 0x3b3   : > { %3292 = vmatpush.msrb.mxu3 %v3205_v36  ;;  %17024 = vst [vmem:[#allocation109_spill] sm:$0xff] %v12266_v18  ;;  %v3231_v36 = vmul.f32 %v3169_v31, %v12257_v9  ;;  %v12291_v31 = vadd.f32 %v11980_v0, %v12107_v21  ;;  %v2903_v21 = vadd.f32 0.5, %v2899_v25  ;;  %v3162_v25 = vld [vmem:[%s16278_s4 + $0x1a0] sm:$0xff] }
 0x3b5   : > { %3293 = vmatpush.msrb.mxu3 %v3204_v30  ;;  %v12275_v30 = vadd.f32 %v11980_v0, %v12116_v12  ;;  %v3166_v12 = vld [vmem:[%s16278_s4 + $0x1c0] sm:$0xff]  ;;  %17027 = vst [vmem:[#allocation112_spill] sm:$0xff] %v12291_v31  ;;  %v2907_v17 = vmul.f32 0.016129032, %v2903_v21  ;;  %v3160_v21 = vld [vmem:[%s16278_s4 + $0x190] sm:$0xff] }
 0x3b6   : > { %7865 = vmatmul.msk.f32.vlgmr.msrb.gmra.mxu3 %vm2914_vm15, %v17023_v2 }
 0x3b7   : > { %3300 = vmatpush.msra.mxu3 %v3233_v33  ;;  %17025 = vst [vmem:[#allocation110_spill] sm:$0xff] %v12275_v30  ;;  %v3230_v33 = vmul.f32 %v3168_v27, %v12266_v18  ;;  %v12299_v27 = vadd.f32 %v11980_v0, %v12101_v13  ;;  %v3163_v13 = vld [vmem:[%s16278_s4 + $0x1a8] sm:$0xff]  ;;  %v2911_v9 = vfloor.f32 %v2907_v17  ;;  %v3158_v17 = vld [vmem:[%s16278_s4 + $0x180] sm:$0xff] }
 0x3b9   : > { %3301 = vmatpush.msra.mxu3 %v3232_v60  ;;  %v3229_v60 = vmul.f32 %v3167_v45, %v12275_v30  ;;  %17028 = vst [vmem:[#allocation113_spill] sm:$0xff] %v12299_v27  ;;  %v12307_v45 = vadd.f32 %v11980_v0, %v12099_v50  ;;  %v2857_v50 = vpop.f32.mrf.mxu2  ;;  %vm2915_vm2 = vcmp.eq.f32.partialorder %v2911_v9, %v17003_v41  ;;  %v3323_v41 = vld [vmem:[%s16279_s5 + $0x28] sm:$0xff]  ;;  %v3322_v9 = vld [vmem:[%s16279_s5 + $0x20] sm:$0xff] }
 0x3bb   : > { %3302 = vmatpush.msra.mxu3 %v3231_v36  ;;  %v3228_v36 = vmul.f32 %v3166_v12, %v12283_v8  ;;  %17029 = vst [vmem:[#allocation114_spill] sm:$0xff] %v12307_v45  ;;  %v12315_v12 = vadd.f32 %v11980_v0, %v12097_v23  ;;  %v3161_v23 = vld [vmem:[%s16278_s4 + $0x198] sm:$0xff] }
 0x3bd   : > { %3303 = vmatpush.msra.mxu3 %v3230_v33  ;;  %v3227_v33 = vmul.f32 %v3165_v53, %v12291_v31  ;;  %17030 = vst [vmem:[#allocation115_spill] sm:$0xff] %v12315_v12  ;;  %v12323_v53 = vadd.f32 %v11980_v0, %v12093_v54 }
 0x3bf   : > { %3304 = vmatpush.msra.mxu3 %v3229_v60  ;;  %v3226_v60 = vmul.f32 %v3164_v3, %v12299_v27  ;;  %17031 = vst [vmem:[#allocation116_spill] sm:$0xff] %v12323_v53  ;;  %v3224_v3 = vmul.f32 %v3162_v25, %v12315_v12  ;;  %v3223_v54 = vmul.f32 %v3161_v23, %v12323_v53  ;;  %v7800_v23 = vsel %vm2915_vm2, 1.0, %v16589_v47 }
 0x3c0   : > { %v12344_v25 = vadd.f32 %v11980_v0, %v2851_v16  ;;  %v3324_v16 = vld [vmem:[%s16279_s5 + $0x30] sm:$0xff] }
 0x3c1   : > { %3305 = vmatpush.msra.mxu3 %v3228_v36  ;;  %v3225_v36 = vmul.f32 %v3163_v13, %v12307_v45  ;;  %v12338_v13 = vadd.f32 %v11980_v0, %v2854_v26 }
 0x3c2   : > { %17034 = vst [vmem:[#allocation119_spill] sm:$0xff] %v12344_v25 }
 0x3c3   : > { %3306 = vmatpush.msra.mxu3 %v3227_v33  ;;  %v12331_v33 = vadd.f32 %v11980_v0, %v2857_v50  ;;  %17033 = vst [vmem:[#allocation118_spill] sm:$0xff] %v12338_v13  ;;  %v3325_v0 = vld [vmem:[%s16279_s5 + $0x38] sm:$0xff] }
 0x3c5   : > { %3307 = vmatpush.msra.mxu3 %v3226_v60  ;;  %17032 = vst [vmem:[#allocation117_spill] sm:$0xff] %v12331_v33  ;;  %v3159_v60 = vld [vmem:[%s16278_s4 + $0x188] sm:$0xff]  ;;  %v3222_v50 = vmul.f32 %v3160_v21, %v12331_v33  ;;  %v3320_v21 = vld [vmem:[%s16279_s5 + $0x10] sm:$0xff] }
 0x3c6   : > { %v3221_v26 = vmul.f32 %v3159_v60, %v12338_v13  ;;  %v3318_v60 = vld [vmem:[%s16279_s5] sm:$0xff] }
 0x3c7   : > { %3308 = vmatpush.msra.mxu3 %v3225_v36  ;;  %v3220_v36 = vmul.f32 %v3158_v17, %v12344_v25 }
 0x3c9   : > { %3309 = vmatpush.msra.mxu3 %v3224_v3  ;;  %v3321_v3 = vld [vmem:[%s16279_s5 + $0x18] sm:$0xff] }
 0x3cb   : > { %3310 = vmatpush.msra.mxu3 %v3223_v54  ;;  %v3319_v54 = vld [vmem:[%s16279_s5 + $0x8] sm:$0xff] }
 0x3cd   : > { %3311 = vmatpush.msra.mxu3 %v3222_v50  ;;  %v17035_v50 = vld [vmem:[#allocation58_spill] sm:$0xff] }
 0x3ce   : > { %v6338_v17 = vsub.s32 %v17035_v50, %v9165_v63 }
 0x3cf   : > { %3312 = vmatpush.msra.mxu3 %v3221_v26 }
 0x3d0   : > { %vm6360_vm4 = vcmp.lt.s32.totalorder %v6338_v17, 0  ;;  %v6361_v26 = vsub.s32 0, %v6338_v17 }
 0x3d1   : > { %3313 = vmatpush.msra.mxu3 %v3220_v36  ;;  %v3255_v36 = vpop.f32.mrf.mxu3 }
 0x3d2   : > { %7866 = vmatmul.msk.f32.vlgmr.msra.gmra.mxu3 %vm3234_vm3, %v7800_v23  ;;  %v6362_v23 = vsel %vm6360_vm4, %v6361_v26, %v6338_v17  ;;  %v17037_v26 = vld [vmem:[#allocation53_spill] sm:$0xff] }
 0x3d3   : > { %3338 = vmatpush.msrb.mxu3 %v3325_v0  ;;  %vm6370_vm5 = vcmp.eq.s32.totalorder %v6362_v23, 32  ;;  %v6853_v23 = vld [vmem:[%s16281_s7 + $0x78] sm:$0xff] }
 0x3d4   : > { %7941 = vmatpush.msk.msrb.mxu0 %vm6370_vm5, %v17023_v2  ;;  %7257 = vmatpush.msrb.mxu2 %v6853_v23 }
 0x3d5   : > { %3339 = vmatpush.msrb.mxu3 %v3324_v16 }
 0x3d7   : > { %3340 = vmatpush.msrb.mxu3 %v3323_v41 }
 0x3d9   : > { %3341 = vmatpush.msrb.mxu3 %v3322_v9  ;;  %v3275_v0 = vpop.f32.mrf.mxu3 }
 0x3da   : > { %v3276_v41 = vadd.f32 %v3275_v0, %v3255_v36  ;;  %v6336_v36 = vsub.s32 %v17037_v26, %v9165_v63  ;;  %v6852_v0 = vld [vmem:[%s16281_s7 + $0x70] sm:$0xff] }
 0x3db   : > { %3342 = vmatpush.msrb.mxu3 %v3321_v3  ;;  %7054 = vmatpush.msrb.mxu1 %v6852_v0 }
 0x3dc   : > { %vm6354_vm11 = vcmp.lt.s32.totalorder %v6336_v36, 0 }
 0x3dd   : > { %3343 = vmatpush.msrb.mxu3 %v3320_v21 }
 0x3df   : > { %3344 = vmatpush.msrb.mxu3 %v3319_v54  ;;  %v3351_v54 = vld [vmem:[%s16280_s6] sm:$0xf] }
 0x3e1   : > { %3345 = vmatpush.msrb.mxu3 %v3318_v60  ;;  %v17036_v60 = vld [vmem:[#allocation56_spill] sm:$0xff] }
 0x3e2   : > { %v6337_v50 = vsub.s32 %v17036_v60, %v9165_v63 }
 0x3e3   : > { %7868 = vmatpush.msk.msra.mxu3 %vm3356_vm7, %v3351_v54  ;;  %vm3399_vm7 = vcmask 64512  }
 0x3e4   : > { %vm6357_vm8 = vcmp.lt.s32.totalorder %v6337_v50, 0  ;;  %v6358_v17 = vsub.s32 0, %v6337_v50 }
 0x439   : > { %v3295_v16 = vpop.f32.mrf.mxu3 }
 0x43a   : > { %v3296_v9 = vadd.f32 %v3295_v16, %v3276_v41  ;;  %v17038_v16 = vld [vmem:[#allocation48_spill] sm:$0xff] }
 0x43b   : > { %v6335_v41 = vsub.s32 %v17038_v16, %v9165_v63 }
 0x43d   : > { %vm6351_vm12 = vcmp.lt.s32.totalorder %v6335_v41, 0  ;;  %v6352_v54 = vsub.s32 0, %v6335_v41 }
 0x43f   : > { %v6353_v26 = vsel %vm6351_vm12, %v6352_v54, %v6335_v41 }
 0x440   : > { %vm6367_vm1 = vcmp.eq.s32.totalorder %v6353_v26, 32  ;;  %v6848_v26 = vld [vmem:[%s16281_s7 + $0x50] sm:$0xff] }
 0x455   : > { %v3315_v3 = vpop.f32.mrf.mxu3 }
 0x456   : > { %v3316_v21 = vadd.f32 %v3315_v3, %v3296_v9  ;;  %v6851_v9 = vld [vmem:[%s16281_s7 + $0x68] sm:$0xff]  ;;  %v6359_v3 = vsel %vm6357_vm8, %v6358_v17, %v6337_v50  ;;  %v6850_v50 = vld [vmem:[%s16281_s7 + $0x60] sm:$0xff] }
 0x457   : > { %vm6369_vm14 = vcmp.eq.s32.totalorder %v6359_v3, 32  ;;  %7258 = vmatpush.msrb.mxu2 %v6851_v9  ;;  %v17039_v17 = vld [vmem:[#allocation44_spill] sm:$0xff]  ;;  %7055 = vmatpush.msrb.mxu1 %v6850_v50 }
 0x458   : > { %7867 = vmatmul.msk.f32.vlgmr.msrb.gmra.mxu3 %vm3326_vm6, %v3316_v21  ;;  %v6355_v21 = vsub.s32 0, %v6336_v36  ;;  %7942 = vmatpush.msk.msrb.mxu0 %vm6369_vm14, %v17023_v2  ;;  %v6334_v0 = vsub.s32 %v17039_v17, %v9165_v63 }
 0x459   : > { %7056 = vmatpush.msrb.mxu1 %v6848_v26 }
 0x45a   : > { %v6356_v60 = vsel %vm6354_vm11, %v6355_v21, %v6336_v36  ;;  %vm6348_vm9 = vcmp.lt.s32.totalorder %v6334_v0, 0  ;;  %v6349_v36 = vsub.s32 0, %v6334_v0 }
 0x45b   : > { %vm6368_vm0 = vcmp.eq.s32.totalorder %v6356_v60, 32  ;;  %v6849_v60 = vld [vmem:[%s16281_s7 + $0x58] sm:$0xff] }
 0x45c   : > { %7943 = vmatpush.msk.msrb.mxu0 %vm6368_vm0, %v17023_v2  ;;  %v6350_v41 = vsel %vm6348_vm9, %v6349_v36, %v6334_v0  ;;  %7259 = vmatpush.msrb.mxu2 %v6849_v60 }
 0x45d   : > { %vm6366_vm13 = vcmp.eq.s32.totalorder %v6350_v41, 32  ;;  %v17040_v41 = vld [vmem:[#allocation39_spill] sm:$0xff] }
 0x45e   : > { %7944 = vmatpush.msk.msrb.mxu0 %vm6367_vm1, %v17023_v2 }
 0x460   : > { %7945 = vmatpush.msk.msrb.mxu0 %vm6366_vm13, %v17023_v2 }
 0x4db   : > { %v3347_v16 = vpop.f32.mrf.mxu3 }
 0x4dc   : > { %v3350_v23 = vmax.f32 %v3347_v16, 0.0 }
 0x4de   : > { %7869 = vmatmul.msk.f32.vlgmr.msra.gmra.mxu3 %vm3352_vm10, %v3350_v23 }
 0x561   : > { %v3377_v9 = vpop.f32.mrf.mxu3 }
 0x562   : > { %v7870_v3 = vmul.f32 -1.442695, %v3377_v9  ;;  %v17041_v9 = vfloor.f32 %v17040_v41 }
 0x564   : > { %8248 = vpow2.f32 %v7870_v3  ;;  %vm2924_vm2 = vcmp.eq.f32.partialorder %v17041_v9, %v12104_v19 }
 0x565   : > { %v7801_v60 = vsel %vm2924_vm2, 1.0, %v16589_v47 }
 0x56a   : > { %v8249_v21 = vpop.eup %8248 }
 0x56b   : > { %v3383_v54 = vadd.f32 1.0, %v8249_v21 }
 0x56d   : > { %8250 = vrcp.f32 %v3383_v54  ;;  %v3395_v17 = vand.u32 2147483648, %v3383_v54  ;;  %v3393_v36 = vand.u32 2147483647, %v3383_v54  ;;  %vm3389_vm3 = vweird.f32 %v3383_v54 }
 0x56f   : > { %v3396_v21 = vor.u32 1.1754944e-38, %v3395_v17  ;;  %vm3394_vm5 = vcmp.eq.f32.partialorder %v3393_v36, 8.507059e+37 }
 0x573   : > { %v8251_v16 = vpop.eup %8250 }
 0x574   : > { %v3385_v23 = vmul.f32 %v8251_v16, %v3383_v54  ;;  %vm3390_vm15 = vweird.f32 %v8251_v16  ;;  %v17044_v54 = vld [vmem:[#allocation38_spill] sm:$0xff] }
 0x575   : > { %vm3391_vm4 = vmor %vm3389_vm3, %vm3390_vm15  ;;  %v6333_v17 = vsub.s32 %v17044_v54, %v9165_v63  ;;  %v17051_v54 = vld [vmem:[#allocation57_spill] sm:$0xff] }
 0x576   : > { %v3386_v50 = vsub.f32 1.0, %v3385_v23  ;;  %v17042_v23 = vld [vmem:[#allocation42_spill] sm:$0xff] }
 0x577   : > { %vm6345_vm12 = vcmp.lt.s32.totalorder %v6333_v17, 0 }
 0x578   : > { %v3387_v0 = vmul.f32 %v8251_v16, %v3386_v50  ;;  %v17043_v50 = vfloor.f32 %v17042_v23 }
 0x57a   : > { %v3388_v3 = vadd.f32 %v8251_v16, %v3387_v0  ;;  %vm2925_vm8 = vcmp.eq.f32.partialorder %v17043_v50, %v12104_v19 }
 0x57b   : > { %v7802_v41 = vsel %vm2925_vm8, 1.0, %v16589_v47 }
 0x57c   : > { %v3392_v18 = vsel %vm3391_vm4, %v8251_v16, %v3388_v3  ;;  %v17045_v16 = vld [vmem:[#allocation46_spill] sm:$0xff]  ;;  %v17047_v3 = vld [vmem:[#allocation49_spill] sm:$0xff] }
 0x57d   : > { %v3397_v26 = vsel %vm3394_vm5, %v3396_v21, %v3392_v18  ;;  %v17046_v0 = vfloor.f32 %v17045_v16  ;;  %v6346_v18 = vsub.s32 0, %v6333_v17  ;;  %v17048_v21 = vfloor.f32 %v17047_v3  ;;  %v17055_v3 = vld [vmem:[#allocation60_spill] sm:$0xff] }
 0x57e   : > { %3601 = vmatpush.msrb.mxu3 %v3397_v26  ;;  %v17049_v26 = vld [vmem:[#allocation54_spill] sm:$0xff] }
 0x57f   : > { %7871 = vmatmul.msk.f32.vlgmr.msrb.gmra.mxu3 %vm3399_vm7, %v7801_v60  ;;  %vm2926_vm11 = vcmp.eq.f32.partialorder %v17046_v0, %v12104_v19  ;;  %v6347_v36 = vsel %vm6345_vm12, %v6346_v18, %v6333_v17  ;;  %vm2927_vm0 = vcmp.eq.f32.partialorder %v17048_v21, %v12104_v19  ;;  %v17050_v23 = vfloor.f32 %v17049_v26  ;;  %v6846_v0 = vld [vmem:[%s16281_s7 + $0x40] sm:$0xff]  ;;  %v17053_v18 = vld [vmem:[#allocation59_spill] sm:$0xff]  ;;  %v17057_v26 = vld [vmem:[#allocation33_spill] sm:$0xff] }
 0x580   : > { %v7803_v9 = vsel %vm2926_vm11, 1.0, %v16589_v47  ;;  %vm6365_vm14 = vcmp.eq.s32.totalorder %v6347_v36, 32  ;;  %v7804_v60 = vsel %vm2927_vm0, 1.0, %v16589_v47  ;;  %v17052_v17 = vfloor.f32 %v17051_v54  ;;  %7057 = vmatpush.msrb.mxu1 %v6846_v0  ;;  %v17060_v0 = vld [vmem:[#allocation62_spill] sm:$0xff] }
 0x581   : > { %7946 = vmatpush.msk.msrb.mxu0 %vm6365_vm14, %v17023_v2  ;;  %vm2928_vm1 = vcmp.eq.f32.partialorder %v17050_v23, %v12104_v19  ;;  %v17054_v36 = vfloor.f32 %v17053_v18  ;;  %v17056_v21 = vfloor.f32 %v17055_v3  ;;  %v6332_v23 = vsub.s32 %v17057_v26, %v9165_v63  ;;  %v17064_v26 = vld [vmem:[#allocation66_spill] sm:$0xff] }
 0x582   : > { %v7805_v50 = vsel %vm2928_vm1, 1.0, %v16589_v47  ;;  %vm2929_vm10 = vcmp.eq.f32.partialorder %v17052_v17, %v12104_v19  ;;  %v17061_v18 = vfloor.f32 %v17060_v0  ;;  %v17068_v0 = vld [vmem:[#allocation71_spill] sm:$0xff] }
 0x583   : > { %v7806_v16 = vsel %vm2929_vm10, 1.0, %v16589_v47  ;;  %vm2930_vm9 = vcmp.eq.f32.partialorder %v17054_v36, %v12104_v19  ;;  %vm2931_vm13 = vcmp.eq.f32.partialorder %v17056_v21, %v12104_v19  ;;  %vm6342_vm2 = vcmp.lt.s32.totalorder %v6332_v23, 0 }
 0x584   : > { %v6343_v54 = vsub.s32 0, %v6332_v23  ;;  %vm2933_vm4 = vcmp.eq.f32.partialorder %v17061_v18, %v12104_v19  ;;  %v17069_v18 = vfloor.f32 %v17068_v0 }
 0x585   : > { %v7810_v36 = vsel %vm2933_vm4, 1.0, %v16589_v47 }
 0x586   : > { %v6344_v17 = vsel %vm6342_vm2, %v6343_v54, %v6332_v23  ;;  %v17065_v23 = vfloor.f32 %v17064_v26  ;;  %v17066_v54 = vld [vmem:[#allocation67_spill] sm:$0xff]  ;;  %vm2937_vm12 = vcmp.eq.f32.partialorder %v17069_v18, %v12104_v19 }
 0x587   : > { %7872 = vmatmul.msk.f32.gmra.mxu3 %vm3399_vm7, %v7802_v41  ;;  %v6847_v41 = vld [vmem:[%s16281_s7 + $0x48] sm:$0xff]  ;;  %vm6364_vm3 = vcmp.eq.s32.totalorder %v6344_v17, 32  ;;  %v17067_v17 = vfloor.f32 %v17066_v54 }
 0x588   : > { %7260 = vmatpush.msrb.mxu2 %v6847_v41  ;;  %7947 = vmatpush.msk.msrb.mxu0 %vm6364_vm3, %v17023_v2  ;;  %vm2935_vm8 = vcmp.eq.f32.partialorder %v17065_v23, %v12104_v19 }
 0x589   : > { %vm2936_vm11 = vcmp.eq.f32.partialorder %v17067_v17, %v12104_v19 }
 0x58f   : > { %7873 = vmatmul.msk.f32.gmra.mxu3 %vm3399_vm7, %v7803_v9  ;;  %v7807_v9 = vsel %vm2930_vm9, 1.0, %v16589_v47 }
 0x597   : > { %7874 = vmatmul.msk.f32.gmra.mxu3 %vm3399_vm7, %v7804_v60  ;;  %v7808_v60 = vsel %vm2931_vm13, 1.0, %v16589_v47 }
 0x59f   : > { %7875 = vmatmul.msk.f32.gmra.mxu3 %vm3399_vm7, %v7805_v50  ;;  %v17058_v50 = vld [vmem:[#allocation61_spill] sm:$0xff] }
 0x5a0   : > { %v17059_v41 = vfloor.f32 %v17058_v50  ;;  %v7812_v50 = vsel %vm2935_vm8, 1.0, %v16589_v47 }
 0x5a2   : > { %vm2932_vm15 = vcmp.eq.f32.partialorder %v17059_v41, %v12104_v19  ;;  %v6844_v41 = vld [vmem:[%s16281_s7 + $0x30] sm:$0xff] }
 0x5a3   : > { %7058 = vmatpush.msrb.mxu1 %v6844_v41 }
 0x5a7   : > { %7876 = vmatmul.msk.f32.gmra.mxu3 %vm3399_vm7, %v7806_v16  ;;  %v7809_v16 = vsel %vm2932_vm15, 1.0, %v16589_v47 }
 0x5af   : > { %7877 = vmatmul.msk.f32.gmra.mxu3 %vm3399_vm7, %v7807_v9  ;;  %v17062_v9 = vld [vmem:[#allocation65_spill] sm:$0xff] }
 0x5b0   : > { %v17063_v3 = vfloor.f32 %v17062_v9  ;;  %v17070_v9 = vld [vmem:[#allocation74_spill] sm:$0xff] }
 0x5b2   : > { %vm2934_vm5 = vcmp.eq.f32.partialorder %v17063_v3, %v12104_v19  ;;  %v17071_v3 = vfloor.f32 %v17070_v9 }
 0x5b3   : > { %v7811_v21 = vsel %vm2934_vm5, 1.0, %v16589_v47 }
 0x5b4   : > { %vm2938_vm14 = vcmp.eq.f32.partialorder %v17071_v3, %v12104_v19 }
 0x5b7   : > { %7878 = vmatmul.msk.f32.gmra.mxu3 %vm3399_vm7, %v7808_v60  ;;  %v6845_v60 = vld [vmem:[%s16281_s7 + $0x38] sm:$0xff] }
 0x5b8   : > { %7261 = vmatpush.msrb.mxu2 %v6845_v60  ;;  %v17072_v60 = vld [vmem:[#allocation77_spill] sm:$0xff] }
 0x5b9   : > { %v17073_v26 = vfloor.f32 %v17072_v60 }
 0x5bb   : > { %vm2939_vm0 = vcmp.eq.f32.partialorder %v17073_v26, %v12104_v19 }
 0x5bc   : > { %v7816_v23 = vsel %vm2939_vm0, 1.0, %v16589_v47 }
 0x5bf   : > { %7879 = vmatmul.msk.f32.gmra.mxu3 %vm3399_vm7, %v7809_v16  ;;  %v7813_v16 = vsel %vm2936_vm11, 1.0, %v16589_v47 }
 0x5c7   : > { %7880 = vmatmul.msk.f32.gmra.mxu3 %vm3399_vm7, %v7810_v36  ;;  %v7814_v36 = vsel %vm2937_vm12, 1.0, %v16589_v47 }
 0x5cf   : > { %7881 = vmatmul.msk.f32.gmra.mxu3 %vm3399_vm7, %v7811_v21  ;;  %v7815_v21 = vsel %vm2938_vm14, 1.0, %v16589_v47 }
 0x5d7   : > { %7882 = vmatmul.msk.f32.gmra.mxu3 %vm3399_vm7, %v7812_v50  ;;  %v17074_v50 = vld [vmem:[#allocation80_spill] sm:$0xff] }
 0x5d8   : > { %v17075_v41 = vfloor.f32 %v17074_v50 }
 0x5da   : > { %vm2940_vm1 = vcmp.eq.f32.partialorder %v17075_v41, %v12104_v19  ;;  %v17076_v41 = vld [vmem:[#allocation83_spill] sm:$0xff] }
 0x5db   : > { %v7817_v54 = vsel %vm2940_vm1, 1.0, %v16589_v47 }
 0x5df   : > { %7883 = vmatmul.msk.f32.gmra.mxu3 %vm3399_vm7, %v7813_v16 }
 0x5e7   : > { %7884 = vmatmul.msk.f32.gmra.mxu3 %vm3399_vm7, %v7814_v36 }
 0x5ef   : > { %7885 = vmatmul.msk.f32.gmra.mxu3 %vm3399_vm7, %v7815_v21 }
 0x5f7   : > { %7886 = vmatmul.msk.f32.gmra.mxu3 %vm3399_vm7, %v7816_v23 }
 0x5ff   : > { %7887 = vmatmul.msk.f32.gmra.mxu3 %vm3399_vm7, %v7817_v54  ;;  %v17077_v54 = vfloor.f32 %v17076_v41  ;;  %v17078_v41 = vld [vmem:[#allocation88_spill] sm:$0xff] }
 0x601   : > { %vm2941_vm9 = vcmp.eq.f32.partialorder %v17077_v54, %v12104_v19  ;;  %v17079_v54 = vfloor.f32 %v17078_v41 }
 0x602   : > { %v3603_v17 = vpop.f32.mrf.mxu3 }
 0x603   : > { %v12519_v16 = vmul.f32 %v3603_v17, %v11546_v34  ;;  %v6331_v17 = vsub.s32 %v9109_v37, %v9165_v63  ;;  %vm2942_vm4 = vcmp.eq.f32.partialorder %v17079_v54, %v12104_v19 }
 0x605   : > { %v12522_v0 = vmul.f32 0.70710677, %v12519_v16  ;;  %vm6339_vm2 = vcmp.lt.s32.totalorder %v6331_v17, 0 }
 0x607   : > { %v3975_v18 = vand.u32 2147483647, %v12522_v0  ;;  %vm6021_vm12 = vcmp.ge.f32.partialorder %v12522_v0, 0.0 }
 0x609   : > { %v4037_v36 = vmul.f32 0.3275911, %v3975_v18  ;;  %v5649_v27 = vsub.f32 0.0, %v3975_v18 }
 0x60a   : > { %v3606_v34 = vpop.f32.mrf.mxu3 }
 0x60b   : > { %v4099_v9 = vadd.f32 1.0, %v4037_v36  ;;  %v7818_v36 = vsel %vm2941_vm9, 1.0, %v16589_v47  ;;  %v12536_v63 = vmul.f32 %v3606_v34, %v11534_v38  ;;  %v17081_v38 = vld [vmem:[#allocation90_spill] sm:$0xff] }
 0x60c   : > { %7888 = vmatmul.msk.f32.gmra.mxu3 %vm3399_vm7, %v7818_v36 }
 0x60d   : > { %8252 = vrcp.f32 %v4099_v9  ;;  %v4172_v26 = vand.u32 2147483648, %v4099_v9  ;;  %v4170_v50 = vand.u32 2147483647, %v4099_v9  ;;  %vm4166_vm13 = vweird.f32 %v4099_v9 }
 0x60f   : > { %v4173_v8 = vor.u32 1.1754944e-38, %v4172_v26  ;;  %vm4171_vm3 = vcmp.eq.f32.partialorder %v4170_v50, 8.507059e+37  ;;  %v7819_v26 = vsel %vm2942_vm4, 1.0, %v16589_v47 }
 0x613   : > { %v8253_v3 = vpop.eup %8252 }
 0x614   : > { %v4162_v21 = vmul.f32 %v8253_v3, %v4099_v9  ;;  %vm4167_vm10 = vweird.f32 %v8253_v3  ;;  %7889 = vmatmul.msk.f32.gmra.mxu3 %vm3399_vm7, %v7819_v26  ;;  %v17083_v26 = vld [vmem:[#allocation32_spill] sm:$0xff] }
 0x615   : > { %vm4168_vm15 = vmor %vm4166_vm13, %vm4167_vm10 }
 0x616   : > { %v4163_v60 = vsub.f32 1.0, %v4162_v21  ;;  %v6340_v21 = vsub.s32 0, %v6331_v17 }
 0x618   : > { %v4164_v23 = vmul.f32 %v8253_v3, %v4163_v60  ;;  %v6341_v45 = vsel %vm6339_vm2, %v6340_v21, %v6331_v17 }
 0x619   : > { %vm6363_vm5 = vcmp.eq.s32.totalorder %v6341_v45, 32  ;;  %v17082_v45 = vfloor.f32 %v17081_v38 }
 0x61a   : > { %v4165_v30 = vadd.f32 %v8253_v3, %v4164_v23  ;;  %7948 = vmatpush.msk.msrb.mxu0 %vm6363_vm5, %v17023_v2  ;;  %v5711_v23 = vmul.f32 %v5649_v27, %v3975_v18 }
 0x61b   : > { %vm2943_vm8 = vcmp.eq.f32.partialorder %v17082_v45, %v12104_v19 }
 0x61c   : > { %v4169_v60 = vsel %vm4168_vm15, %v8253_v3, %v4165_v30  ;;  %v3609_v30 = vpop.f32.mrf.mxu3  ;;  %v5773_v17 = vmul.f32 1.442695, %v5711_v23  ;;  %v7820_v18 = vsel %vm2943_vm8, 1.0, %v16589_v47  ;;  %v17084_v23 = vfloor.f32 %v17083_v26 }
 0x61d   : > { %v4174_v31 = vsel %vm4171_vm3, %v4173_v8, %v4169_v60  ;;  %v12541_v8 = vmul.f32 0.70710677, %v12536_v63  ;;  %v12545_v36 = vmul.f32 %v3609_v30, %v11506_v15  ;;  %v6843_v15 = vld [vmem:[%s16281_s7 + $0x28] sm:$0xff]  ;;  %7890 = vmatmul.msk.f32.gmra.mxu3 %vm3399_vm7, %v7820_v18  ;;  %v3851_v26 = vmul.f32 0.5, %v12519_v16 }
 0x61e   : > { %v5091_v37 = vmul.f32 1.0614054, %v4174_v31  ;;  %8254 = vpow2.f32 %v5773_v17  ;;  %7262 = vmatpush.msrb.mxu2 %v6843_v15  ;;  %vm2944_vm11 = vcmp.eq.f32.partialorder %v17084_v23, %v12104_v19 }
 0x61f   : > { %17080 = vst [vmem:[#allocation58_spill] sm:$0xff] %v12545_v36  ;;  %v12551_v34 = vand.u32 2147483647, %v12541_v8  ;;  %v12555_v21 = vmul.f32 0.70710677, %v12545_v36  ;;  %v7821_v45 = vsel %vm2944_vm11, 1.0, %v16589_v47 }
 0x620   : > { %v5153_v9 = vadd.f32 -1.4531521, %v5091_v37 }
 0x621   : > { %v4038_v54 = vmul.f32 0.3275911, %v12551_v34 }
 0x622   : > { %v5215_v3 = vmul.f32 %v5153_v9, %v4174_v31  ;;  %v12563_v9 = vand.u32 2147483647, %v12555_v21 }
 0x624   : > { %v5277_v50 = vadd.f32 1.4214138, %v5215_v3  ;;  %v3612_v60 = vpop.f32.mrf.mxu3  ;;  %v4100_v3 = vadd.f32 1.0, %v4038_v54 }
 0x625   : > { %v12569_v38 = vmul.f32 %v3612_v60, %v11488_v24  ;;  %7891 = vmatmul.msk.f32.gmra.mxu3 %vm3399_vm7, %v7821_v45  ;;  %v17086_v60 = vld [vmem:[#allocation12_spill] sm:$0xff] }
 0x626   : > { %v5339_v2 = vmul.f32 %v5277_v50, %v4174_v31  ;;  %v8255_v50 = vpop.eup %8254  ;;  %8256 = vrcp.f32 %v4100_v3  ;;  %v17087_v54 = vfloor.f32 %v17086_v60  ;;  %vm4181_vm9 = vweird.f32 %v4100_v3 }
 0x627   : > { %17085 = vst [vmem:[#allocation56_spill] sm:$0xff] %v12569_v38 }
 0x628   : > { %v5401_v27 = vadd.f32 -0.28449672, %v5339_v2  ;;  %v6842_v2 = vld [vmem:[%s16281_s7 + $0x20] sm:$0xff]  ;;  %vm2945_vm14 = vcmp.eq.f32.partialorder %v17087_v54, %v12104_v19 }
 0x629   : > { %7059 = vmatpush.msrb.mxu1 %v6842_v2 }
 0x62a   : > { %v5463_v41 = vmul.f32 %v5401_v27, %v4174_v31  ;;  %v4039_v27 = vmul.f32 0.3275911, %v12563_v9 }
 0x62c   : > { %v5525_v37 = vadd.f32 0.2548296, %v5463_v41  ;;  %v3615_v18 = vpop.f32.mrf.mxu3  ;;  %v12578_v41 = vmul.f32 0.70710677, %v12569_v38  ;;  %v12581_v24 = vadd.f32 1.0, %v4039_v27 }
 0x62e   : > { %v5587_v30 = vmul.f32 %v5525_v37, %v4174_v31  ;;  %8258 = vrcp.f32 %v12581_v24  ;;  %vm4196_vm4 = vweird.f32 %v12581_v24 }
 0x630   : > { %v5897_v17 = vmul.f32 %v8255_v50, %v5587_v30  ;;  %v8257_v30 = vpop.eup %8256  ;;  %v12588_v50 = vand.u32 2147483647, %v12578_v41 }
 0x631   : > { %v4177_v2 = vmul.f32 %v8257_v30, %v4100_v3  ;;  %vm4182_vm1 = vweird.f32 %v8257_v30 }
 0x632   : > { %v5959_v15 = vsub.f32 1.0, %v5897_v17  ;;  %v7822_v17 = vsel %vm2945_vm14, 1.0, %v16589_v47  ;;  %v4040_v27 = vmul.f32 0.3275911, %v12588_v50  ;;  %vm4183_vm13 = vmor %vm4181_vm9, %vm4182_vm1  ;;  %vm6022_vm9 = vcmp.ge.f32.partialorder %v12541_v8, 0.0 }
 0x633   : > { %7892 = vmatmul.msk.f32.gmra.mxu3 %vm3399_vm7, %v7822_v17 }
 0x634   : > { %v6083_v31 = vsub.f32 0.0, %v5959_v15  ;;  %v3618_v0 = vpop.f32.mrf.mxu3  ;;  %v8259_v54 = vpop.eup %8258 }
 0x635   : > { %v12619_v25 = vmul.f32 %v3618_v0, %v11441_v49  ;;  %vm4197_vm2 = vweird.f32 %v8259_v54  ;;  %v4200_v49 = vand.u32 2147483647, %v12581_v24 }
 0x636   : > { %v6145_v37 = vsel %vm6021_vm12, %v5959_v15, %v6083_v31  ;;  %v12596_v15 = vmul.f32 %v3615_v18, %v11453_v52  ;;  %v17089_v31 = vld [vmem:[#allocation43_spill] sm:$0xff]  ;;  %v4187_v52 = vand.u32 2147483648, %v4100_v3  ;;  %vm4198_vm5 = vmor %vm4196_vm4, %vm4197_vm2 }
 0x637   : > { %v6207_v23 = vadd.f32 1.0, %v6145_v37  ;;  %v17090_v60 = vfloor.f32 %v17089_v31  ;;  %v4178_v37 = vsub.f32 1.0, %v4177_v2  ;;  %v17091_v2 = vld [vmem:[#allocation24_spill] sm:$0xff]  ;;  %v4185_v31 = vand.u32 2147483647, %v4100_v3 }
 0x638   : > { %17088 = vst [vmem:[#allocation53_spill] sm:$0xff] %v12596_v15  ;;  %v12605_v12 = vmul.f32 0.70710677, %v12596_v15  ;;  %v4188_v13 = vor.u32 1.1754944e-38, %v4187_v52  ;;  %v12635_v0 = vmul.f32 0.70710677, %v12619_v25 }
 0x639   : > { %v6269_v45 = vmul.f32 %v6207_v23, %v3851_v26  ;;  %vm2946_vm0 = vcmp.eq.f32.partialorder %v17090_v60, %v12104_v19  ;;  %v12601_v26 = vadd.f32 1.0, %v4040_v27  ;;  %v4179_v53 = vmul.f32 %v8257_v30, %v4178_v37 }
 0x63a   : > { %v7823_v23 = vsel %vm2946_vm0, 1.0, %v16589_v47  ;;  %v12611_v18 = vand.u32 2147483647, %v12605_v12  ;;  %v17092_v27 = vfloor.f32 %v17091_v2  ;;  %vm4186_vm15 = vcmp.eq.f32.partialorder %v4185_v31, 8.507059e+37 }
 0x63b   : > { %7949 = vmatmul.msk.f32.vlgmr.msrb.gmra.mxu0 %vm3326_vm6, %v6269_v45  ;;  %v4192_v45 = vmul.f32 %v8259_v54, %v12581_v24  ;;  %7893 = vmatmul.msk.f32.gmra.mxu3 %vm3399_vm7, %v7823_v23  ;;  %8260 = vrcp.f32 %v12601_v26  ;;  %v4180_v33 = vadd.f32 %v8257_v30, %v4179_v53  ;;  %v5650_v2 = vsub.f32 0.0, %v12551_v34 }
 0x63c   : > { %v3621_v17 = vpop.f32.mrf.mxu3  ;;  %vm2947_vm10 = vcmp.eq.f32.partialorder %v17092_v27, %v12104_v19  ;;  %v4041_v23 = vmul.f32 0.3275911, %v12611_v18  ;;  %v4202_v53 = vand.u32 2147483648, %v12581_v24  ;;  %vm4201_vm8 = vcmp.eq.f32.partialorder %v4200_v49, 8.507059e+37 }
 0x63d   : > { %v4193_v60 = vsub.f32 1.0, %v4192_v45  ;;  %v7824_v37 = vsel %vm2947_vm10, 1.0, %v16589_v47  ;;  %v4184_v46 = vsel %vm4183_vm13, %v8257_v30, %v4180_v33  ;;  %v5712_v52 = vmul.f32 %v5650_v2, %v12551_v34 }
 0x63e   : > { %v12624_v45 = vsel %vm4186_vm15, %v4188_v13, %v4184_v46  ;;  %v12632_v30 = vadd.f32 1.0, %v4041_v23  ;;  %v17093_v46 = vld [vmem:[#allocation16_spill] sm:$0xff]  ;;  %vm4211_vm14 = vweird.f32 %v12601_v26 }
 0x63f   : > { %v4194_v27 = vmul.f32 %v8259_v54, %v4193_v60  ;;  %v5092_v3 = vmul.f32 1.0614054, %v12624_v45  ;;  %v17094_v13 = vfloor.f32 %v17093_v46  ;;  %v12646_v46 = vand.u32 2147483647, %v12635_v0 }
 0x640   : > { %8262 = vrcp.f32 %v12632_v30  ;;  %v5775_v24 = vmul.f32 1.442695, %v5712_v52  ;;  %v4230_v8 = vand.u32 2147483647, %v12632_v30  ;;  %vm4226_vm2 = vweird.f32 %v12632_v30 }
 0x641   : > { %v12621_v61 = vpop.eup %8260  ;;  %vm2948_vm3 = vcmp.eq.f32.partialorder %v17094_v13, %v12104_v19  ;;  %v5154_v31 = vadd.f32 -1.4531521, %v5092_v3  ;;  %v4195_v60 = vadd.f32 %v8259_v54, %v4194_v27  ;;  %v12655_v3 = vmul.f32 %v3621_v17, %v11414_v7 }
 0x642   : > { %v4207_v33 = vmul.f32 %v12621_v61, %v12601_v26  ;;  %v7825_v5 = vsel %vm2948_vm3, 1.0, %v16589_v47  ;;  %8264 = vpow2.f32 %v5775_v24  ;;  %vm4212_vm12 = vweird.f32 %v12621_v61 }
 0x643   : > { %7894 = vmatmul.msk.f32.gmra.mxu3 %vm3399_vm7, %v7824_v37  ;;  %v4203_v37 = vor.u32 1.1754944e-38, %v4202_v53  ;;  %v5216_v23 = vmul.f32 %v5154_v31, %v12624_v45  ;;  %v4199_v57 = vsel %vm4198_vm5, %v8259_v54, %v4195_v60  ;;  %v5651_v53 = vsub.f32 0.0, %v12563_v9  ;;  %17095 = vst [vmem:[#allocation48_spill] sm:$0xff] %v12655_v3  ;;  %vm12680_vm0 = vmor %vm4211_vm14, %vm4212_vm12 }
 0x644   : > { %v3624_v35 = vpop.f32.mrf.mxu3  ;;  %v4208_v43 = vsub.f32 1.0, %v4207_v33  ;;  %v4042_v31 = vmul.f32 0.3275911, %v12646_v46  ;;  %vm4231_vm4 = vcmp.eq.f32.partialorder %v4230_v8, 8.507059e+37  ;;  %vm6023_vm5 = vcmp.ge.f32.partialorder %v12555_v21, 0.0 }
 0x645   : > { %v12650_v34 = vsel %vm4201_vm8, %v4203_v37, %v4199_v57  ;;  %v5278_v2 = vadd.f32 1.4214138, %v5216_v23  ;;  %v17096_v57 = vld [vmem:[#allocation17_spill] sm:$0xff]  ;;  %v5713_v7 = vmul.f32 %v5651_v53, %v12563_v9  ;;  %v4215_v9 = vand.u32 2147483647, %v12601_v26 }
 0x646   : > { %v5093_v27 = vmul.f32 1.0614054, %v12650_v34  ;;  %v4209_v33 = vmul.f32 %v12621_v61, %v4208_v43  ;;  %v17097_v52 = vfloor.f32 %v17096_v57  ;;  %v12665_v37 = vpop.eup %8262  ;;  %v4217_v43 = vand.u32 2147483648, %v12601_v26 }
 0x647   : > { %v5340_v54 = vmul.f32 %v5278_v2, %v12624_v45  ;;  %v12675_v24 = vadd.f32 1.0, %v4042_v31  ;;  %v12691_v31 = vmul.f32 %v3624_v35, %v11396_v51  ;;  %v5777_v22 = vmul.f32 1.442695, %v5713_v7 }
 0x648   : > { %v5155_v49 = vadd.f32 -1.4531521, %v5093_v27  ;;  %vm2949_vm11 = vcmp.eq.f32.partialorder %v17097_v52, %v12104_v19  ;;  %v4218_v1 = vor.u32 1.1754944e-38, %v4217_v43  ;;  %v17102_v51 = vfloor.f32 %v17101_v29 }
 0x649   : > { %v5402_v17 = vadd.f32 -0.28449672, %v5340_v54  ;;  %v7826_v23 = vsel %vm2949_vm11, 1.0, %v16589_v47  ;;  %v4222_v54 = vmul.f32 %v12665_v37, %v12632_v30  ;;  %17100 = vst [vmem:[#allocation44_spill] sm:$0xff] %v12691_v31  ;;  %8266 = vrcp.f32 %v12675_v24 }
 0x64a   : > { %v5217_v60 = vmul.f32 %v5155_v49, %v12650_v34  ;;  %v4210_v49 = vadd.f32 %v12621_v61, %v4209_v33  ;;  %vm2950_vm1 = vcmp.eq.f32.partialorder %v17102_v51, %v12104_v19  ;;  %vm4216_vm10 = vcmp.eq.f32.partialorder %v4215_v9, 8.507059e+37 }
 0x64b   : > { %7895 = vmatmul.msk.f32.gmra.mxu3 %vm3399_vm7, %v7825_v5  ;;  %v12670_v5 = vmul.f32 0.70710677, %v12655_v3  ;;  %v5464_v27 = vmul.f32 %v5402_v17, %v12624_v45  ;;  %v8265_v17 = vpop.eup %8264  ;;  %v4223_v35 = vsub.f32 1.0, %v4222_v54  ;;  %8268 = vpow2.f32 %v5777_v22 }
 0x64c   : > { %v12648_v13 = vpop.f32.mrf.mxu3  ;;  %v5279_v2 = vadd.f32 1.4214138, %v5217_v60  ;;  %v4214_v26 = vsel %vm12680_vm0, %v12621_v61, %v4210_v49  ;;  %v12708_v61 = vmul.f32 0.70710677, %v12691_v31  ;;  %v7827_v29 = vsel %vm2950_vm1, 1.0, %v16589_v47 }
 0x64d   : > { %v12688_v52 = vand.u32 2147483647, %v12670_v5  ;;  %v5526_v60 = vadd.f32 0.2548296, %v5464_v27  ;;  %v12704_v27 = vsel %vm4216_vm10, %v4218_v1, %v4214_v26  ;;  %v4224_v1 = vmul.f32 %v12665_v37, %v4223_v35 }
 0x64e   : > { %v5341_v57 = vmul.f32 %v5279_v2, %v12650_v34  ;;  %v5094_v43 = vmul.f32 1.0614054, %v12704_v27  ;;  %v12720_v26 = vand.u32 2147483647, %v12708_v61  ;;  %vm4227_vm13 = vweird.f32 %v12665_v37 }
 0x64f   : > { %v5588_v2 = vmul.f32 %v5526_v60, %v12624_v45  ;;  %v4043_v6 = vmul.f32 0.3275911, %v12688_v52  ;;  %v5652_v45 = vsub.f32 0.0, %v12588_v50  ;;  %v4225_v56 = vadd.f32 %v12665_v37, %v4224_v1  ;;  %vm4228_vm3 = vmor %vm4226_vm2, %vm4227_vm13 }
 0x650   : > { %v5156_v53 = vadd.f32 -1.4531521, %v5094_v43  ;;  %v12748_v48 = vmul.f32 %v12648_v13, %v11355_v59  ;;  %v6841_v59 = vld [vmem:[%s16281_s7 + $0x18] sm:$0xff]  ;;  %v6840_v13 = vld [vmem:[%s16281_s7 + $0x10] sm:$0xff]  ;;  %vm4241_vm12 = vweird.f32 %v12675_v24  ;;  %vm6024_vm14 = vcmp.ge.f32.partialorder %v12578_v41, 0.0 }
 0x651   : > { %v5898_v7 = vmul.f32 %v8265_v17, %v5588_v2  ;;  %v12717_v60 = vadd.f32 1.0, %v4043_v6  ;;  %v3852_v2 = vmul.f32 0.5, %v12536_v63  ;;  %v5714_v51 = vmul.f32 %v5652_v45, %v12588_v50  ;;  %v17103_v45 = vld [vmem:[#allocation30_spill] sm:$0xff]  ;;  %7263 = vmatpush.msrb.mxu2 %v6841_v59  ;;  %7060 = vmatpush.msrb.mxu1 %v6840_v13  ;;  %v17105_v59 = vld [vmem:[#allocation99_spill] sm:$0xff] }
 0x652   : > { %v5218_v22 = vmul.f32 %v5156_v53, %v12704_v27  ;;  %v4232_v6 = vand.u32 2147483648, %v12632_v30  ;;  %v4044_v50 = vmul.f32 0.3275911, %v12720_v26  ;;  %v4229_v30 = vsel %vm4228_vm3, %v12665_v37, %v4225_v56 }
 0x653   : > { %7896 = vmatmul.msk.f32.gmra.mxu3 %vm3399_vm7, %v7826_v23  ;;  %v5403_v23 = vadd.f32 -0.28449672, %v5341_v57  ;;  %v5960_v9 = vsub.f32 1.0, %v5898_v7  ;;  %v12715_v57 = vpop.eup %8266  ;;  %8270 = vrcp.f32 %v12717_v60  ;;  %v17106_v13 = vfloor.f32 %v17105_v59 }
 0x654   : > { %v12694_v33 = vpop.f32.mrf.mxu3  ;;  %v5280_v43 = vadd.f32 1.4214138, %v5218_v22  ;;  %v4233_v1 = vor.u32 1.1754944e-38, %v4232_v6  ;;  %vm4242_vm11 = vweird.f32 %v12715_v57  ;;  %vm6025_vm2 = vcmp.ge.f32.partialorder %v12605_v12, 0.0 }
 0x655   : > { %v5465_v49 = vmul.f32 %v5403_v23, %v12650_v34  ;;  %v6084_v17 = vsub.f32 0.0, %v5960_v9  ;;  %vm2952_vm8 = vcmp.eq.f32.partialorder %v17106_v13, %v12104_v19  ;;  %vm4243_vm0 = vmor %vm4241_vm12, %vm4242_vm11 }
 0x656   : > { %v5342_v22 = vmul.f32 %v5280_v43, %v12704_v27  ;;  %v12753_v43 = vadd.f32 1.0, %v4044_v50  ;;  %v12756_v6 = vsel %vm4231_vm4, %v4233_v1, %v4229_v30  ;;  %v4247_v30 = vand.u32 2147483648, %v12675_v24 }
 0x657   : > { %v5527_v54 = vadd.f32 0.2548296, %v5465_v49  ;;  %v6146_v23 = vsel %vm6022_vm9, %v5960_v9, %v6084_v17  ;;  %v8269_v49 = vpop.eup %8268  ;;  %v17104_v9 = vfloor.f32 %v17103_v45  ;;  %v5095_v37 = vmul.f32 1.0614054, %v12756_v6 }
 0x658   : > { %v6208_v53 = vadd.f32 1.0, %v6146_v23  ;;  %v5653_v23 = vsub.f32 0.0, %v12611_v18  ;;  %v12772_v45 = vmul.f32 0.70710677, %v12748_v48  ;;  %vm4256_vm9 = vweird.f32 %v12717_v60 }
 0x659   : > { %v5589_v35 = vmul.f32 %v5527_v54, %v12650_v34  ;;  %vm2951_vm15 = vcmp.eq.f32.partialorder %v17104_v9, %v12104_v19  ;;  %v5779_v54 = vmul.f32 1.442695, %v5714_v51 }
 0x65a   : > { %v6270_v17 = vmul.f32 %v6208_v53, %v3852_v2  ;;  %v7828_v51 = vsel %vm2951_vm15, 1.0, %v16589_v47  ;;  %v5715_v8 = vmul.f32 %v5653_v23, %v12611_v18  ;;  %v12782_v23 = vmul.f32 %v12694_v33, %v11333_v4 }
 0x65b   : > { %7897 = vmatmul.msk.f32.gmra.mxu3 %vm3399_vm7, %v7827_v29  ;;  %v4237_v29 = vmul.f32 %v12715_v57, %v12675_v24  ;;  %v5899_v34 = vmul.f32 %v8269_v49, %v5589_v35  ;;  %v5404_v49 = vadd.f32 -0.28449672, %v5342_v22  ;;  %8272 = vpow2.f32 %v5779_v54 }
 0x65c   : > { %v12730_v7 = vpop.f32.mrf.mxu3  ;;  %7950 = vmatmul.msk.f32.gmra.mxu0 %vm3326_vm6, %v6270_v17  ;;  %8274 = vrcp.f32 %v12753_v43  ;;  %v5781_v18 = vmul.f32 1.442695, %v5715_v8  ;;  %v7829_v33 = vsel %vm2952_vm8, 1.0, %v16589_v47  ;;  %v4245_v8 = vand.u32 2147483647, %v12675_v24 }
 0x65d   : > { %v5961_v35 = vsub.f32 1.0, %v5899_v34  ;;  %v4238_v2 = vsub.f32 1.0, %v4237_v29  ;;  %v5466_v56 = vmul.f32 %v5404_v49, %v12704_v27  ;;  %v12767_v29 = vpop.eup %8270  ;;  %v3853_v34 = vmul.f32 0.5, %v12545_v36 }
 0x65e   : > { %v4252_v22 = vmul.f32 %v12767_v29, %v12717_v60  ;;  %v5157_v49 = vadd.f32 -1.4531521, %v5095_v37  ;;  %8276 = vpow2.f32 %v5781_v18  ;;  %vm4246_vm1 = vcmp.eq.f32.partialorder %v4245_v8, 8.507059e+37 }
 0x65f   : > { %v6085_v53 = vsub.f32 0.0, %v5961_v35  ;;  %v4239_v21 = vmul.f32 %v12715_v57, %v4238_v2  ;;  %v5528_v54 = vadd.f32 0.2548296, %v5466_v56  ;;  %v12787_v2 = vand.u32 2147483647, %v12772_v45 }
 0x660   : > { %v4253_v56 = vsub.f32 1.0, %v4252_v22  ;;  %vm4257_vm13 = vweird.f32 %v12767_v29  ;;  %vm4271_vm8 = vweird.f32 %v12753_v43 }
 0x661   : > { %v6147_v50 = vsel %vm6023_vm5, %v5961_v35, %v6085_v53  ;;  %v5590_v35 = vmul.f32 %v5528_v54, %v12704_v27  ;;  %v5219_v53 = vmul.f32 %v5157_v49, %v12756_v6  ;;  %v4240_v27 = vadd.f32 %v12715_v57, %v4239_v21  ;;  %vm12853_vm15 = vmor %vm4256_vm9, %vm4257_vm13 }
 0x662   : > { %v6209_v9 = vadd.f32 1.0, %v6147_v50  ;;  %v4045_v21 = vmul.f32 0.3275911, %v12787_v2  ;;  %v5654_v49 = vsub.f32 0.0, %v12646_v46 }
 0x663   : > { %7898 = vmatmul.msk.f32.gmra.mxu3 %vm3399_vm7, %v7828_v51  ;;  %v8273_v51 = vpop.eup %8272  ;;  %v5281_v37 = vadd.f32 1.4214138, %v5219_v53  ;;  %v4244_v24 = vsel %vm4243_vm0, %v12715_v57, %v4240_v27  ;;  %v12830_v27 = vmul.f32 %v12730_v7, %v11294_v42  ;;  %v4262_v7 = vand.u32 2147483648, %v12717_v60 }
 0x664   : > { %v12776_v17 = vpop.f32.mrf.mxu3  ;;  %v6271_v1 = vmul.f32 %v6209_v9, %v3853_v34  ;;  %v5900_v4 = vmul.f32 %v8273_v51, %v5590_v35  ;;  %v12799_v50 = vpop.eup %8274  ;;  %v3854_v34 = vmul.f32 0.5, %v12569_v38  ;;  %v12804_v9 = vmul.f32 0.70710677, %v12782_v23  ;;  %v17116_v38 = vld [vmem:[#allocation103_spill] sm:$0xff] }
 0x665   : > { %v5343_v22 = vmul.f32 %v5281_v37, %v12756_v6  ;;  %v4254_v51 = vmul.f32 %v12767_v29, %v4253_v56  ;;  %v4267_v53 = vmul.f32 %v12799_v50, %v12753_v43  ;;  %v12826_v57 = vadd.f32 1.0, %v4045_v21 }
 0x666   : > { %7951 = vmatmul.msk.f32.gmra.mxu0 %vm3326_vm6, %v6271_v1  ;;  %v5962_v54 = vsub.f32 1.0, %v5900_v4  ;;  %v4248_v1 = vor.u32 1.1754944e-38, %v4247_v30  ;;  %v12817_v18 = vand.u32 2147483647, %v12804_v9  ;;  %v17107_v30 = vld [vmem:[#allocation40_spill] sm:$0xff]  ;;  %v5716_v8 = vmul.f32 %v5654_v49, %v12646_v46 }
 0x667   : > { %v5405_v41 = vadd.f32 -0.28449672, %v5343_v22  ;;  %v4255_v42 = vadd.f32 %v12767_v29, %v4254_v51  ;;  %8278 = vrcp.f32 %v12826_v57  ;;  %vm4272_vm5 = vweird.f32 %v12799_v50 }
 0x668   : > { %v6086_v35 = vsub.f32 0.0, %v5962_v54  ;;  %v12821_v4 = vsel %vm4246_vm1, %v4248_v1, %v4244_v24  ;;  %v8277_v1 = vpop.eup %8276  ;;  %v4268_v24 = vsub.f32 1.0, %v4267_v53  ;;  %v4046_v46 = vmul.f32 0.3275911, %v12817_v18  ;;  %vm12901_vm11 = vmor %vm4271_vm8, %vm4272_vm5 }
 0x669   : > { %v5467_v37 = vmul.f32 %v5405_v41, %v12756_v6  ;;  %v12844_v41 = vmul.f32 0.70710677, %v12830_v27  ;;  %v3855_v53 = vmul.f32 0.5, %v12596_v15  ;;  %v17117_v36 = vfloor.f32 %v17116_v38 }
 0x66a   : > { %v6148_v59 = vsel %vm6024_vm14, %v5962_v54, %v6086_v35  ;;  %v5096_v54 = vmul.f32 1.0614054, %v12821_v4  ;;  %vm6026_vm0 = vcmp.ge.f32.partialorder %v12635_v0, 0.0  ;;  %vm4286_vm9 = vweird.f32 %v12826_v57 }
 0x66b   : > { %7899 = vmatmul.msk.f32.gmra.mxu3 %vm3399_vm7, %v7829_v33  ;;  %v17108_v33 = vfloor.f32 %v17107_v30  ;;  %v6210_v56 = vadd.f32 1.0, %v6148_v59  ;;  %v5529_v35 = vadd.f32 0.2548296, %v5467_v37  ;;  %v4260_v59 = vand.u32 2147483647, %v12717_v60 }
 0x66c   : > { %v12819_v13 = vpop.f32.mrf.mxu3  ;;  %v5158_v49 = vadd.f32 -1.4531521, %v5096_v54  ;;  %v5783_v30 = vmul.f32 1.442695, %v5716_v8  ;;  %v4263_v37 = vor.u32 1.1754944e-38, %v4262_v7  ;;  %v4269_v8 = vmul.f32 %v12799_v50, %v4268_v24 }
 0x66d   : > { %vm2953_vm10 = vcmp.eq.f32.partialorder %v17108_v33, %v12104_v19  ;;  %v6272_v21 = vmul.f32 %v6210_v56, %v3854_v34  ;;  %v5591_v34 = vmul.f32 %v5529_v35, %v12756_v6  ;;  %v4259_v6 = vsel %vm12853_vm15, %v12767_v29, %v4255_v42  ;;  %v17111_v29 = vld [vmem:[#allocation102_spill] sm:$0xff]  ;;  %v12877_v7 = vpop.eup %8278 }
 0x66e   : > { %v7830_v22 = vsel %vm2953_vm10, 1.0, %v16589_v47  ;;  %v5220_v56 = vmul.f32 %v5158_v49, %v12821_v4  ;;  %v12864_v54 = vadd.f32 1.0, %v4046_v46  ;;  %v12867_v60 = vand.u32 2147483647, %v12844_v41 }
 0x66f   : > { %7952 = vmatmul.msk.f32.gmra.mxu0 %vm3326_vm6, %v6272_v21  ;;  %v5901_v33 = vmul.f32 %v8277_v1, %v5591_v34  ;;  %vm4261_vm3 = vcmp.eq.f32.partialorder %v4260_v59, 8.507059e+37  ;;  %8280 = vpow2.f32 %v5783_v30  ;;  %v5655_v1 = vsub.f32 0.0, %v12688_v52 }
 0x670   : > { %v5282_v21 = vadd.f32 1.4214138, %v5220_v56  ;;  %v12872_v49 = vsel %vm4261_vm3, %v4263_v37, %v4259_v6  ;;  %v17112_v42 = vfloor.f32 %v17111_v29  ;;  %v4277_v24 = vand.u32 2147483648, %v12753_v43 }
 0x671   : > { %v12884_v59 = vmul.f32 %v12776_v17, %v11280_v10  ;;  %v5097_v30 = vmul.f32 1.0614054, %v12872_v49  ;;  %8282 = vrcp.f32 %v12864_v54  ;;  %v4047_v56 = vmul.f32 0.3275911, %v12867_v60 }
 0x672   : > { %vm2954_vm4 = vcmp.eq.f32.partialorder %v17112_v42, %v12104_v19  ;;  %v5344_v34 = vmul.f32 %v5282_v21, %v12821_v4  ;;  %v4282_v10 = vmul.f32 %v12877_v7, %v12826_v57  ;;  %v4275_v21 = vand.u32 2147483647, %v12753_v43 }
 0x673   : > { %7900 = vmatmul.msk.f32.gmra.mxu3 %vm3399_vm7, %v7830_v22  ;;  %v5963_v22 = vsub.f32 1.0, %v5901_v33  ;;  %17113 = vst [vmem:[#allocation39_spill] sm:$0xff] %v12884_v59  ;;  %v7831_v51 = vsel %vm2954_vm4, 1.0, %v16589_v47  ;;  %v4270_v33 = vadd.f32 %v12799_v50, %v4269_v8  ;;  %v5717_v8 = vmul.f32 %v5655_v1, %v12688_v52 }
 0x674   : > { %v12870_v35 = vpop.f32.mrf.mxu3  ;;  %v5406_v37 = vadd.f32 -0.28449672, %v5344_v34  ;;  %v12908_v34 = vmul.f32 0.70710677, %v12884_v59  ;;  %v4278_v43 = vor.u32 1.1754944e-38, %v4277_v24  ;;  %v12913_v1 = vadd.f32 1.0, %v4047_v56 }
 0x675   : > { %v6087_v46 = vsub.f32 0.0, %v5963_v22  ;;  %v8281_v42 = vpop.eup %8280  ;;  %v4274_v52 = vsel %vm12901_vm11, %v12799_v50, %v4270_v33  ;;  %vm4276_vm12 = vcmp.eq.f32.partialorder %v4275_v21, 8.507059e+37  ;;  %vm2955_vm14 = vcmp.eq.f32.partialorder %v17117_v36, %v12104_v19 }
 0x676   : > { %v5468_v12 = vmul.f32 %v5406_v37, %v12821_v4  ;;  %v3856_v37 = vmul.f32 0.5, %v12619_v25  ;;  %v12924_v33 = vsel %vm4276_vm12, %v4278_v43, %v4274_v52  ;;  %v7832_v56 = vsel %vm2955_vm14, 1.0, %v16589_v47 }
 0x677   : > { %v6149_v6 = vsel %vm6025_vm2, %v5963_v22, %v6087_v46  ;;  %v5159_v22 = vadd.f32 -1.4531521, %v5097_v30  ;;  %v5656_v46 = vsub.f32 0.0, %v12720_v26  ;;  %v4283_v30 = vsub.f32 1.0, %v4282_v10 }
 0x678   : > { %v6211_v17 = vadd.f32 1.0, %v6149_v6  ;;  %v5530_v6 = vadd.f32 0.2548296, %v5468_v12  ;;  %v12929_v10 = vand.u32 2147483647, %v12908_v34  ;;  %v5657_v36 = vsub.f32 0.0, %v12787_v2 }
 0x679   : > { %v5221_v15 = vmul.f32 %v5159_v22, %v12872_v49  ;;  %v5718_v29 = vmul.f32 %v5656_v46, %v12720_v26  ;;  %v5098_v38 = vmul.f32 1.0614054, %v12924_v33  ;;  %8284 = vrcp.f32 %v12913_v1 }
 0x67a   : > { %v5592_v50 = vmul.f32 %v5530_v6, %v12821_v4  ;;  %v12946_v22 = vmul.f32 0.5, %v12655_v3  ;;  %v4284_v46 = vmul.f32 %v12877_v7, %v4283_v30  ;;  %v12950_v52 = vmul.f32 0.5, %v12691_v31 }
 0x67b   : > { %7901 = vmatmul.msk.f32.gmra.mxu3 %vm3399_vm7, %v7831_v51  ;;  %v6273_v51 = vmul.f32 %v6211_v17, %v3855_v53  ;;  %v12921_v53 = vpop.eup %8282  ;;  %v5283_v24 = vadd.f32 1.4214138, %v5221_v15  ;;  %v5785_v17 = vmul.f32 1.442695, %v5717_v8  ;;  %v12943_v8 = vmul.f32 %v12819_v13, %v11245_v58 }
 0x67c   : > { %v12931_v21 = vpop.f32.mrf.mxu3  ;;  %v5902_v4 = vmul.f32 %v8281_v42, %v5592_v50  ;;  %v4297_v26 = vmul.f32 %v12921_v53, %v12864_v54  ;;  %v5160_v12 = vadd.f32 -1.4531521, %v5098_v38  ;;  %v5787_v43 = vmul.f32 1.442695, %v5718_v29 }
 0x67d   : > { %7953 = vmatmul.msk.f32.gmra.mxu0 %vm3326_vm6, %v6273_v51  ;;  %v5345_v15 = vmul.f32 %v5283_v24, %v12872_v49  ;;  %8286 = vpow2.f32 %v5785_v17  ;;  %v4048_v6 = vmul.f32 0.3275911, %v12929_v10  ;;  %v5719_v50 = vmul.f32 %v5657_v36, %v12787_v2 }
 0x67e   : > { %v5964_v42 = vsub.f32 1.0, %v5902_v4  ;;  %v5222_v13 = vmul.f32 %v5160_v12, %v12924_v33  ;;  %vm4287_vm1 = vweird.f32 %v12877_v7  ;;  %v4292_v30 = vand.u32 2147483648, %v12826_v57 }
 0x67f   : > { %v5407_v51 = vadd.f32 -0.28449672, %v5345_v15  ;;  %v12959_v17 = vmul.f32 0.70710677, %v12943_v8  ;;  %v12961_v38 = vpop.eup %8284  ;;  %v4285_v36 = vadd.f32 %v12877_v7, %v4284_v46  ;;  %vm6027_vm10 = vcmp.ge.f32.partialorder %v12670_v5, 0.0  ;;  %vm12973_vm13 = vmor %vm4286_vm9, %vm4287_vm1 }
 0x680   : > { %v6088_v24 = vsub.f32 0.0, %v5964_v42  ;;  %v5284_v2 = vadd.f32 1.4214138, %v5222_v13  ;;  %v12968_v15 = vadd.f32 1.0, %v4048_v6  ;;  %8288 = vpow2.f32 %v5787_v43 }
 0x681   : > { %v5469_v58 = vmul.f32 %v5407_v51, %v12872_v49  ;;  %v5789_v0 = vmul.f32 1.442695, %v5719_v50  ;;  %v4312_v6 = vmul.f32 %v12961_v38, %v12913_v1  ;;  %v4289_v43 = vsel %vm12973_vm13, %v12877_v7, %v4285_v36 }
 0x682   : > { %v6150_v29 = vsel %vm6026_vm0, %v5964_v42, %v6088_v24  ;;  %v5346_v46 = vmul.f32 %v5284_v2, %v12924_v33  ;;  %v12988_v50 = vand.u32 2147483647, %v12959_v17  ;;  %vm4302_vm15 = vweird.f32 %v12921_v53 }
 0x683   : > { %7902 = vmatmul.msk.f32.gmra.mxu3 %vm3399_vm7, %v7832_v56  ;;  %v4298_v56 = vsub.f32 1.0, %v4297_v26  ;;  %v5531_v4 = vadd.f32 0.2548296, %v5469_v58  ;;  %v6212_v12 = vadd.f32 1.0, %v6150_v29  ;;  %v4290_v26 = vand.u32 2147483647, %v12826_v57  ;;  %v8287_v24 = vpop.eup %8286 }
 0x684   : > { %v12982_v57 = vpop.f32.mrf.mxu3  ;;  %v4293_v29 = vor.u32 1.1754944e-38, %v4292_v30  ;;  %8290 = vrcp.f32 %v12968_v15  ;;  %v4313_v36 = vsub.f32 1.0, %v4312_v6  ;;  %v17121_v51 = vfloor.f32 %v10905_v32 }
 0x685   : > { %v5593_v42 = vmul.f32 %v5531_v4, %v12872_v49  ;;  %v4299_v58 = vmul.f32 %v12921_v53, %v4298_v56  ;;  %v6274_v13 = vmul.f32 %v6212_v12, %v3856_v37  ;;  %v5408_v4 = vadd.f32 -0.28449672, %v5346_v46 }
 0x686   : > { %v4307_v56 = vand.u32 2147483648, %v12864_v54  ;;  %vm4291_vm2 = vcmp.eq.f32.partialorder %v4290_v26, 8.507059e+37  ;;  %v12996_v37 = vmul.f32 %v12870_v35, %v11236_v39  ;;  %vm2956_vm3 = vcmp.eq.f32.partialorder %v17121_v51, %v12104_v19  ;;  %v8289_v46 = vpop.eup %8288 }
 0x687   : > { %v5903_v49 = vmul.f32 %v8287_v24, %v5593_v42  ;;  %7954 = vmatmul.msk.f32.gmra.mxu0 %vm3326_vm6, %v6274_v13  ;;  %v5470_v30 = vmul.f32 %v5408_v4, %v12924_v33  ;;  %v12999_v2 = vsel %vm4291_vm2, %v4293_v29, %v4289_v43  ;;  %v4300_v42 = vadd.f32 %v12921_v53, %v4299_v58 }
 0x688   : > { %17120 = vst [vmem:[#allocation42_spill] sm:$0xff] %v12996_v37  ;;  %v5099_v12 = vmul.f32 1.0614054, %v12999_v2  ;;  %v4049_v26 = vmul.f32 0.3275911, %v12988_v50  ;;  %v7833_v35 = vsel %vm2956_vm3, 1.0, %v16589_v47  ;;  %vm4301_vm4 = vweird.f32 %v12864_v54 }
 0x689   : > { %v5965_v7 = vsub.f32 1.0, %v5903_v49  ;;  %v5532_v39 = vadd.f32 0.2548296, %v5470_v30  ;;  %v5658_v13 = vsub.f32 0.0, %v12817_v18  ;;  %v4305_v43 = vand.u32 2147483647, %v12864_v54  ;;  %vm13015_vm8 = vmor %vm4301_vm4, %vm4302_vm15 }
 0x68a   : > { %v5161_v6 = vadd.f32 -1.4531521, %v5099_v12  ;;  %vm6028_vm5 = vcmp.ge.f32.partialorder %v12708_v61, 0.0  ;;  %v13020_v58 = vmul.f32 0.70710677, %v12996_v37  ;;  %v13025_v4 = vpop.eup %8290  ;;  %8292 = vpow2.f32 %v5789_v0 }
 0x68b   : > { %v6089_v24 = vsub.f32 0.0, %v5965_v7  ;;  %7903 = vmatmul.msk.f32.gmra.mxu3 %vm3399_vm7, %v7833_v35  ;;  %v5594_v49 = vmul.f32 %v5532_v39, %v12924_v33  ;;  %v4304_v12 = vsel %vm13015_vm8, %v12921_v53, %v4300_v42  ;;  %v4308_v51 = vor.u32 1.1754944e-38, %v4307_v56 }
 0x68c   : > { %v5223_v30 = vmul.f32 %v5161_v6, %v12999_v2  ;;  %v4314_v35 = vmul.f32 %v12961_v38, %v4313_v36  ;;  %v13032_v31 = vadd.f32 1.0, %v4049_v26  ;;  %v5720_v5 = vmul.f32 %v5658_v13, %v12817_v18 }
 0x68d   : > { %v6151_v29 = vsel %vm6027_vm10, %v5965_v7, %v6089_v24  ;;  %v5904_v3 = vmul.f32 %v8289_v46, %v5594_v49  ;;  %v13036_v24 = vpop.f32.mrf.mxu3  ;;  %vm4306_vm11 = vcmp.eq.f32.partialorder %v4305_v43, 8.507059e+37  ;;  %v13039_v0 = vand.u32 2147483647, %v13020_v58 }
 0x68e   : > { %v6213_v54 = vadd.f32 1.0, %v6151_v29  ;;  %v5285_v7 = vadd.f32 1.4214138, %v5223_v30  ;;  %v13041_v6 = vsel %vm4306_vm11, %v4308_v51, %v4304_v12  ;;  %v17124_v53 = vfloor.f32 %v10993_v11  ;;  %v17127_v12 = vld [vmem:[#allocation76_spill] sm:$0xff]  ;;  %v17130_v30 = vld [vmem:[#allocation75_spill] sm:$0xff] }
 0x68f   : > { %v5966_v39 = vsub.f32 1.0, %v5904_v3  ;;  %vm4317_vm14 = vweird.f32 %v12961_v38  ;;  %v4327_v18 = vmul.f32 %v13025_v4, %v12968_v15  ;;  %v5100_v56 = vmul.f32 1.0614054, %v13041_v6 }
 0x690   : > { %v6275_v33 = vmul.f32 %v6213_v54, %v12946_v22  ;;  %vm2957_vm12 = vcmp.eq.f32.partialorder %v17124_v53, %v12104_v19  ;;  %v5347_v22 = vmul.f32 %v5285_v7, %v12999_v2  ;;  %8294 = vrcp.f32 %v13032_v31  ;;  %v8293_v11 = vpop.eup %8292 }
 0x691   : > { %v6090_v3 = vsub.f32 0.0, %v5966_v39  ;;  %v7834_v36 = vsel %vm2957_vm12, 1.0, %v16589_v47  ;;  %v4315_v42 = vadd.f32 %v12961_v38, %v4314_v35  ;;  %v4322_v46 = vand.u32 2147483648, %v12913_v1 }
 0x692   : > { %7955 = vmatmul.msk.f32.gmra.mxu0 %vm3326_vm6, %v6275_v33  ;;  %v5659_v26 = vsub.f32 0.0, %v12867_v60  ;;  %v5409_v13 = vadd.f32 -0.28449672, %v5347_v22  ;;  %v5162_v43 = vadd.f32 -1.4531521, %v5100_v56  ;;  %vm4316_vm0 = vweird.f32 %v12913_v1 }
 0x693   : > { %7904 = vmatmul.msk.f32.gmra.mxu3 %vm3399_vm7, %v7834_v36  ;;  %v4050_v32 = vmul.f32 0.3275911, %v13039_v0  ;;  %v6152_v29 = vsel %vm6028_vm5, %v5966_v39, %v6090_v3  ;;  %v4320_v49 = vand.u32 2147483647, %v12913_v1  ;;  %v13064_v54 = vmul.f32 0.5, %v12748_v48  ;;  %vm13068_vm1 = vmor %vm4316_vm0, %vm4317_vm14 }
 0x694   : > { %v13074_v51 = vmul.f32 %v12931_v21, %v17127_v12  ;;  %v6214_v35 = vadd.f32 1.0, %v6152_v29  ;;  %v5471_v33 = vmul.f32 %v5409_v13, %v12999_v2  ;;  %v13078_v61 = vmul.f32 0.5, %v12782_v23 }
 0x695   : > { %v4328_v1 = vsub.f32 1.0, %v4327_v18  ;;  %v5224_v7 = vmul.f32 %v5162_v43, %v13041_v6  ;;  %v4319_v39 = vsel %vm13068_vm1, %v12961_v38, %v4315_v42  ;;  %v5791_v53 = vmul.f32 1.442695, %v5720_v5  ;;  %v13096_v5 = vpop.f32.mrf.mxu3  ;;  %v17128_v42 = vld [vmem:[#allocation21_spill] sm:$0xff] }
 0x696   : > { %v4323_v22 = vor.u32 1.1754944e-38, %v4322_v46  ;;  %v6276_v56 = vmul.f32 %v6214_v35, %v12950_v52  ;;  %v5533_v3 = vadd.f32 0.2548296, %v5471_v33  ;;  %v13085_v21 = vpop.eup %8294  ;;  %vm6029_vm10 = vcmp.ge.f32.partialorder %v12772_v45, 0.0 }
 0x697   : > { %v5721_v36 = vmul.f32 %v5659_v26, %v12867_v60  ;;  %v13089_v13 = vadd.f32 1.0, %v4050_v32  ;;  %v5286_v18 = vadd.f32 1.4214138, %v5224_v7  ;;  %vm4321_vm9 = vcmp.eq.f32.partialorder %v4320_v49, 8.507059e+37  ;;  %v6839_v60 = vld [vmem:[%s16281_s7 + $0x8] sm:$0xff] }
 0x698   : > { %v13092_v43 = vmul.f32 0.70710677, %v13074_v51  ;;  %v5595_v38 = vmul.f32 %v5533_v3, %v12999_v2  ;;  %v13098_v52 = vsel %vm4321_vm9, %v4323_v22, %v4319_v39  ;;  %v17129_v46 = vfloor.f32 %v17128_v42  ;;  %7264 = vmatpush.msrb.mxu2 %v6839_v60 }
 0x699   : > { %v4329_v26 = vmul.f32 %v13025_v4, %v4328_v1  ;;  %v5348_v32 = vmul.f32 %v5286_v18, %v13041_v6  ;;  %v5101_v29 = vmul.f32 1.0614054, %v13098_v52  ;;  %8296 = vpow2.f32 %v5791_v53 }
 0x69a   : > { %7956 = vmatmul.msk.f32.gmra.mxu0 %vm3326_vm6, %v6276_v56  ;;  %vm2958_vm13 = vcmp.eq.f32.partialorder %v17129_v46, %v12104_v19  ;;  %v4342_v49 = vmul.f32 %v13085_v21, %v13032_v31  ;;  %v13114_v12 = vmul.f32 %v12982_v57, %v17130_v30  ;;  %v5905_v35 = vmul.f32 %v8293_v11, %v5595_v38 }
 0x69b   : > { %v7835_v2 = vsel %vm2958_vm13, 1.0, %v16589_v47  ;;  %v13118_v33 = vmul.f32 0.5, %v12830_v27  ;;  %v5793_v1 = vmul.f32 1.442695, %v5721_v36  ;;  %8298 = vrcp.f32 %v13089_v13 }
 0x69c   : > { %7905 = vmatmul.msk.f32.gmra.mxu3 %vm3399_vm7, %v7835_v2  ;;  %v5410_v7 = vadd.f32 -0.28449672, %v5348_v32  ;;  %v13122_v39 = vmul.f32 0.5, %v12884_v59  ;;  %v5660_v53 = vsub.f32 0.0, %v12929_v10  ;;  %v13126_v22 = vand.u32 2147483647, %v13092_v43 }
 0x69d   : > { %v5967_v57 = vsub.f32 1.0, %v5905_v35  ;;  %vm4332_vm15 = vweird.f32 %v13025_v4  ;;  %v5163_v56 = vadd.f32 -1.4531521, %v5101_v29  ;;  %v4330_v3 = vadd.f32 %v13025_v4, %v4329_v26 }
 0x69e   : > { %v5472_v11 = vmul.f32 %v5410_v7, %v13041_v6  ;;  %v4337_v36 = vand.u32 2147483648, %v12968_v15  ;;  %v4343_v18 = vsub.f32 1.0, %v4342_v49  ;;  %v13133_v38 = vmul.f32 0.70710677, %v13114_v12 }
 0x69f   : > { %v6091_v42 = vsub.f32 0.0, %v5967_v57  ;;  %8300 = vpow2.f32 %v5793_v1  ;;  %vm4331_vm2 = vweird.f32 %v12968_v15  ;;  %v5225_v60 = vmul.f32 %v5163_v56, %v13098_v52  ;;  %v8297_v32 = vpop.eup %8296 }
 0x6a0   : > { %v5534_v46 = vadd.f32 0.2548296, %v5472_v11  ;;  %vm6030_vm3 = vcmp.ge.f32.partialorder %v12804_v9, 0.0  ;;  %vm13138_vm4 = vmor %vm4331_vm2, %vm4332_vm15  ;;  %v5722_v26 = vmul.f32 %v5660_v53, %v12929_v10  ;;  %v4051_v2 = vmul.f32 0.3275911, %v13126_v22 }
 0x6a1   : > { %v6153_v49 = vsel %vm6029_vm10, %v5967_v57, %v6091_v42  ;;  %v4335_v30 = vand.u32 2147483647, %v12968_v15  ;;  %v13147_v35 = vpop.eup %8298  ;;  %v5287_v11 = vadd.f32 1.4214138, %v5225_v60  ;;  %v4334_v56 = vsel %vm13138_vm4, %v13025_v4, %v4330_v3  ;;  %v13160_v15 = vpop.f32.mrf.mxu3 }
 0x6a2   : > { %v6215_v1 = vadd.f32 1.0, %v6153_v49  ;;  %v5596_v7 = vmul.f32 %v5534_v46, %v13041_v6  ;;  %v4338_v59 = vor.u32 1.1754944e-38, %v4337_v36  ;;  %v13154_v10 = vmul.f32 0.5, %v12943_v8  ;;  %v6838_v6 = vld [vmem:[%s16281_s7] sm:$0xff]  ;;  %v17133_v49 = vld [vmem:[#allocation45_spill] sm:$0xff] }
 0x6a3   : > { %v4344_v53 = vmul.f32 %v13085_v21, %v4343_v18  ;;  %v13158_v45 = vand.u32 2147483647, %v13133_v38  ;;  %v5349_v4 = vmul.f32 %v5287_v11, %v13098_v52  ;;  %vm4336_vm5 = vcmp.eq.f32.partialorder %v4335_v30, 8.507059e+37  ;;  %7061 = vmatpush.msrb.mxu1 %v6838_v6 }
 0x6a4   : > { %v6277_v57 = vmul.f32 %v6215_v1, %v13064_v54  ;;  %v5906_v42 = vmul.f32 %v8297_v32, %v5596_v7  ;;  %v4357_v3 = vmul.f32 %v13147_v35, %v13089_v13  ;;  %v13169_v36 = vadd.f32 1.0, %v4051_v2 }
 0x6a5   : > { %v13173_v18 = vmul.f32 %v13036_v24, %v12079_v40  ;;  %v13175_v46 = vsel %vm4336_vm5, %v4338_v59, %v4334_v56  ;;  %v8301_v60 = vpop.eup %8300  ;;  %v5411_v32 = vadd.f32 -0.28449672, %v5349_v4  ;;  %v17134_v30 = vfloor.f32 %v17133_v49 }
 0x6a6   : > { %7957 = vmatmul.msk.f32.gmra.mxu0 %vm3326_vm6, %v6277_v57  ;;  %v5968_v54 = vsub.f32 1.0, %v5906_v42  ;;  %v5102_v29 = vmul.f32 1.0614054, %v13175_v46  ;;  %v5795_v1 = vmul.f32 1.442695, %v5722_v26  ;;  %vm4346_vm11 = vweird.f32 %v13032_v31 }
 0x6a7   : > { %vm2959_vm8 = vcmp.eq.f32.partialorder %v17134_v30, %v12104_v19  ;;  %vm4347_vm12 = vweird.f32 %v13085_v21  ;;  %v4052_v40 = vmul.f32 0.3275911, %v13158_v45  ;;  %v5473_v24 = vmul.f32 %v5411_v32, %v13098_v52 }
 0x6a8   : > { %v6092_v59 = vsub.f32 0.0, %v5968_v54  ;;  %v5164_v2 = vadd.f32 -1.4531521, %v5102_v29  ;;  %v4345_v7 = vadd.f32 %v13085_v21, %v4344_v53  ;;  %v4352_v11 = vand.u32 2147483648, %v13032_v31  ;;  %vm13202_vm0 = vmor %vm4346_vm11, %vm4347_vm12 }
 0x6a9   : > { %v4358_v56 = vsub.f32 1.0, %v4357_v3  ;;  %v13189_v6 = vmul.f32 0.70710677, %v13173_v18  ;;  %v7836_v26 = vsel %vm2959_vm8, 1.0, %v16589_v47  ;;  %8302 = vrcp.f32 %v13169_v36 }
 0x6aa   : > { %v6154_v57 = vsel %vm6030_vm3, %v5968_v54, %v6092_v59  ;;  %v5535_v42 = vadd.f32 0.2548296, %v5473_v24  ;;  %v5226_v4 = vmul.f32 %v5164_v2, %v13175_v46  ;;  %7906 = vmatmul.msk.f32.gmra.mxu3 %vm3399_vm7, %v7836_v26  ;;  %vm6031_vm14 = vcmp.ge.f32.partialorder %v12844_v41, 0.0  ;;  %v13219_v26 = vpop.f32.mrf.mxu3 }
 0x6ab   : > { %8304 = vpow2.f32 %v5795_v1  ;;  %v5661_v3 = vsub.f32 0.0, %v12988_v50  ;;  %v6216_v9 = vadd.f32 1.0, %v6154_v57  ;;  %v4350_v54 = vand.u32 2147483647, %v13032_v31 }
 0x6ac   : > { %v13208_v32 = vadd.f32 1.0, %v4052_v40  ;;  %v5597_v29 = vmul.f32 %v5535_v42, %v13098_v52  ;;  %v5288_v49 = vadd.f32 1.4214138, %v5226_v4  ;;  %v4349_v30 = vsel %vm13202_vm0, %v13085_v21, %v4345_v7 }
 0x6ad   : > { %v4353_v1 = vor.u32 1.1754944e-38, %v4352_v11  ;;  %v4359_v59 = vmul.f32 %v13147_v35, %v4358_v56  ;;  %v13216_v24 = vand.u32 2147483647, %v13189_v6  ;;  %v6278_v2 = vmul.f32 %v6216_v9, %v13078_v61  ;;  %v17137_v11 = vld [vmem:[#allocation73_spill] sm:$0xff] }
 0x6ae   : > { %v5662_v31 = vsub.f32 0.0, %v13039_v0  ;;  %v5907_v40 = vmul.f32 %v8301_v60, %v5597_v29  ;;  %v5350_v52 = vmul.f32 %v5288_v49, %v13175_v46  ;;  %vm4351_vm1 = vcmp.eq.f32.partialorder %v4350_v54, 8.507059e+37 }
 0x6af   : > { %vm4362_vm10 = vweird.f32 %v13147_v35  ;;  %v4367_v21 = vand.u32 2147483648, %v13089_v13  ;;  %7958 = vmatmul.msk.f32.gmra.mxu0 %vm3326_vm6, %v6278_v2  ;;  %v13226_v7 = vsel %vm4351_vm1, %v4353_v1, %v4349_v30  ;;  %v17138_v56 = vfloor.f32 %v17137_v11  ;;  %v13231_v61 = vpop.eup %8302 }
 0x6b0   : > { %8306 = vrcp.f32 %v13208_v32  ;;  %v5969_v60 = vsub.f32 1.0, %v5907_v40  ;;  %v5412_v57 = vadd.f32 -0.28449672, %v5350_v52  ;;  %v5103_v42 = vmul.f32 1.0614054, %v13226_v7 }
 0x6b1   : > { %vm2960_vm9 = vcmp.eq.f32.partialorder %v17138_v56, %v12104_v19  ;;  %v8305_v4 = vpop.eup %8304  ;;  %v4053_v53 = vmul.f32 0.3275911, %v13216_v24  ;;  %v13238_v9 = vmul.f32 %v13096_v5, %v12071_v55  ;;  %v4360_v29 = vadd.f32 %v13147_v35, %v4359_v59 }
 0x6b2   : > { %v7837_v54 = vsel %vm2960_vm9, 1.0, %v16589_v47  ;;  %v6093_v49 = vsub.f32 0.0, %v5969_v60  ;;  %v5474_v30 = vmul.f32 %v5412_v57, %v13175_v46  ;;  %v5165_v1 = vadd.f32 -1.4531521, %v5103_v42 }
 0x6b3   : > { %7907 = vmatmul.msk.f32.gmra.mxu3 %vm3399_vm7, %v7837_v54  ;;  %v4365_v2 = vand.u32 2147483647, %v13089_v13  ;;  %v5723_v40 = vmul.f32 %v5661_v3, %v12988_v50  ;;  %v13247_v52 = vmul.f32 0.5, %v12996_v37  ;;  %v5724_v55 = vmul.f32 %v5662_v31, %v13039_v0  ;;  %v17139_v37 = vld [vmem:[#allocation78_spill] sm:$0xff] }
 0x6b4   : > { %v4372_v5 = vmul.f32 %v13231_v61, %v13169_v36  ;;  %vm4361_vm13 = vweird.f32 %v13089_v13  ;;  %v6155_v59 = vsel %vm6031_vm14, %v5969_v60, %v6093_v49  ;;  %v5536_v11 = vadd.f32 0.2548296, %v5474_v30  ;;  %v13269_v30 = vpop.f32.mrf.mxu3 }
 0x6b5   : > { %v5227_v56 = vmul.f32 %v5165_v1, %v13226_v7  ;;  %vm6032_vm15 = vcmp.ge.f32.partialorder %v12908_v34, 0.0  ;;  %vm4363_vm2 = vmor %vm4361_vm13, %vm4362_vm10  ;;  %v4368_v50 = vor.u32 1.1754944e-38, %v4367_v21  ;;  %v13259_v3 = vadd.f32 1.0, %v4053_v53 }
 0x6b6   : > { %v13262_v0 = vmul.f32 0.70710677, %v13238_v9  ;;  %v6217_v31 = vadd.f32 1.0, %v6155_v59  ;;  %v13264_v57 = vpop.eup %8306  ;;  %v5598_v41 = vmul.f32 %v5536_v11, %v13175_v46  ;;  %v4364_v60 = vsel %vm4363_vm2, %v13147_v35, %v4360_v29 }
 0x6b7   : > { %v5289_v13 = vadd.f32 1.4214138, %v5227_v56  ;;  %vm4366_vm3 = vcmp.eq.f32.partialorder %v4365_v2, 8.507059e+37  ;;  %v5797_v42 = vmul.f32 1.442695, %v5723_v40  ;;  %v4373_v54 = vsub.f32 1.0, %v4372_v5 }
 0x6b8   : > { %v6279_v49 = vmul.f32 %v6217_v31, %v13118_v33  ;;  %v13271_v21 = vsel %vm4366_vm3, %v4368_v50, %v4364_v60  ;;  %v5908_v53 = vmul.f32 %v8305_v4, %v5598_v41  ;;  %v17140_v46 = vfloor.f32 %v17139_v37 }
 0x6b9   : > { %v5351_v1 = vmul.f32 %v5289_v13, %v13226_v7  ;;  %v5104_v59 = vmul.f32 1.0614054, %v13271_v21  ;;  %v5799_v11 = vmul.f32 1.442695, %v5724_v55  ;;  %v5663_v35 = vsub.f32 0.0, %v13126_v22 }
 0x6ba   : > { %vm2961_vm4 = vcmp.eq.f32.partialorder %v17140_v46, %v12104_v19  ;;  %v4387_v29 = vmul.f32 %v13264_v57, %v13208_v32  ;;  %7959 = vmatmul.msk.f32.gmra.mxu0 %vm3326_vm6, %v6279_v49  ;;  %8308 = vrcp.f32 %v13259_v3  ;;  %v13285_v4 = vand.u32 2147483647, %v13262_v0 }
 0x6bb   : > { %v7838_v33 = vsel %vm2961_vm4, 1.0, %v16589_v47  ;;  %v5970_v2 = vsub.f32 1.0, %v5908_v53  ;;  %v5413_v40 = vadd.f32 -0.28449672, %v5351_v1  ;;  %8310 = vpow2.f32 %v5797_v42 }
 0x6bc   : > { %7908 = vmatmul.msk.f32.gmra.mxu3 %vm3399_vm7, %v7838_v33  ;;  %v13289_v37 = vmul.f32 0.5, %v13074_v51  ;;  %v5664_v55 = vsub.f32 0.0, %v13158_v45  ;;  %v5166_v5 = vadd.f32 -1.4531521, %v5104_v59  ;;  %v4374_v56 = vmul.f32 %v13231_v61, %v4373_v54 }
 0x6bd   : > { %v13295_v50 = vmul.f32 %v13160_v15, %v12063_v28  ;;  %v6094_v31 = vsub.f32 0.0, %v5970_v2  ;;  %v5475_v41 = vmul.f32 %v5413_v40, %v13226_v7  ;;  %8312 = vpow2.f32 %v5799_v11  ;;  %v13317_v40 = vpop.f32.mrf.mxu3 }
 0x6be   : > { %v4382_v13 = vand.u32 2147483648, %v13169_v36  ;;  %v5725_v60 = vmul.f32 %v5663_v35, %v13126_v22  ;;  %v4388_v42 = vsub.f32 1.0, %v4387_v29  ;;  %v4054_v49 = vmul.f32 0.3275911, %v13285_v4 }
 0x6bf   : > { %v6156_v53 = vsel %vm6032_vm15, %v5970_v2, %v6094_v31  ;;  %v5537_v1 = vadd.f32 0.2548296, %v5475_v41  ;;  %v5228_v54 = vmul.f32 %v5166_v5, %v13271_v21  ;;  %vm6033_vm5 = vcmp.ge.f32.partialorder %v12959_v17, 0.0 }
 0x6c0   : > { %vm4376_vm8 = vweird.f32 %v13169_v36  ;;  %vm4377_vm11 = vweird.f32 %v13231_v61  ;;  %v5726_v28 = vmul.f32 %v5664_v55, %v13158_v45  ;;  %v6218_v15 = vadd.f32 1.0, %v6156_v53  ;;  %v13308_v59 = vpop.eup %8308 }
 0x6c1   : > { %v13311_v22 = vmul.f32 0.70710677, %v13295_v50  ;;  %v5599_v34 = vmul.f32 %v5537_v1, %v13226_v7  ;;  %v5290_v46 = vadd.f32 1.4214138, %v5228_v54  ;;  %v4375_v11 = vadd.f32 %v13231_v61, %v4374_v56  ;;  %v8311_v35 = vpop.eup %8310  ;;  %vm13322_vm12 = vmor %vm4376_vm8, %vm4377_vm11 }
 0x6c2   : > { %v5801_v29 = vmul.f32 1.442695, %v5725_v60  ;;  %v4389_v33 = vmul.f32 %v13264_v57, %v4388_v42  ;;  %v6280_v2 = vmul.f32 %v6218_v15, %v13122_v39  ;;  %v4380_v45 = vand.u32 2147483647, %v13169_v36 }
 0x6c3   : > { %v4383_v7 = vor.u32 1.1754944e-38, %v4382_v13  ;;  %v13326_v5 = vadd.f32 1.0, %v4054_v49  ;;  %v5909_v56 = vmul.f32 %v8311_v35, %v5599_v34  ;;  %v5352_v31 = vmul.f32 %v5290_v46, %v13271_v21  ;;  %v8313_v41 = vpop.eup %8312 }
 0x6c4   : > { %vm4391_vm14 = vweird.f32 %v13208_v32  ;;  %v5803_v39 = vmul.f32 1.442695, %v5726_v28  ;;  %v4402_v60 = vmul.f32 %v13308_v59, %v13259_v3  ;;  %7960 = vmatmul.msk.f32.gmra.mxu0 %vm3326_vm6, %v6280_v2  ;;  %v4379_v36 = vsel %vm13322_vm12, %v13231_v61, %v4375_v11  ;;  %v17143_v11 = vld [vmem:[#allocation79_spill] sm:$0xff] }
 0x6c5   : > { %v4397_v13 = vand.u32 2147483648, %v13208_v32  ;;  %v13338_v42 = vand.u32 2147483647, %v13311_v22  ;;  %v5971_v49 = vsub.f32 1.0, %v5909_v56  ;;  %v5414_v53 = vadd.f32 -0.28449672, %v5352_v31 }
 0x6c6   : > { %vm4392_vm0 = vweird.f32 %v13264_v57  ;;  %v13343_v1 = vmul.f32 %v13219_v26, %v12053_v14  ;;  %vm4381_vm1 = vcmp.eq.f32.partialorder %v4380_v45, 8.507059e+37  ;;  %v4390_v54 = vadd.f32 %v13264_v57, %v4389_v33 }
 0x6c7   : > { %8314 = vrcp.f32 %v13326_v5  ;;  %v6095_v28 = vsub.f32 0.0, %v5971_v49  ;;  %v5476_v61 = vmul.f32 %v5414_v53, %v13271_v21  ;;  %v13348_v15 = vsel %vm4381_vm1, %v4383_v7, %v4379_v36  ;;  %vm13357_vm9 = vmor %vm4391_vm14, %vm4392_vm0 }
 0x6c8   : > { %v4403_v34 = vsub.f32 1.0, %v4402_v60  ;;  %v5105_v46 = vmul.f32 1.0614054, %v13348_v15  ;;  %v17144_v35 = vfloor.f32 %v17143_v11  ;;  %v4395_v14 = vand.u32 2147483647, %v13208_v32 }
 0x6c9   : > { %v4055_v33 = vmul.f32 0.3275911, %v13338_v42  ;;  %v6157_v2 = vsel %vm6033_vm5, %v5971_v49, %v6095_v28  ;;  %v5538_v45 = vadd.f32 0.2548296, %v5476_v61  ;;  %vm6034_vm13 = vcmp.ge.f32.partialorder %v13020_v58, 0.0  ;;  %v13378_v61 = vpop.f32.mrf.mxu3 }
 0x6ca   : > { %vm2962_vm10 = vcmp.eq.f32.partialorder %v17144_v35, %v12104_v19  ;;  %v13367_v7 = vmul.f32 0.70710677, %v13343_v1  ;;  %v6219_v56 = vadd.f32 1.0, %v6157_v2  ;;  %v5167_v31 = vadd.f32 -1.4531521, %v5105_v46 }
 0x6cb   : > { %v7839_v55 = vsel %vm2962_vm10, 1.0, %v16589_v47  ;;  %v4394_v32 = vsel %vm13357_vm9, %v13264_v57, %v4390_v54  ;;  %8316 = vpow2.f32 %v5801_v29  ;;  %v4398_v60 = vor.u32 1.1754944e-38, %v4397_v13  ;;  %v6590_v13 = vpop.f32.mrf.mxu0 }
 0x6cc   : > { %7909 = vmatmul.msk.f32.gmra.mxu3 %vm3399_vm7, %v7839_v55  ;;  %v5665_v17 = vsub.f32 0.0, %v13216_v24  ;;  %v5600_v36 = vmul.f32 %v5538_v45, %v13271_v21  ;;  %v4404_v49 = vmul.f32 %v13308_v59, %v4403_v34  ;;  %v6281_v53 = vmul.f32 %v6219_v56, %v13154_v10  ;;  %v17147_v34 = vld [vmem:[#allocation81_spill] sm:$0xff] }
 0x6cd   : > { %v5229_v28 = vmul.f32 %v5167_v31, %v13348_v15  ;;  %vm4396_vm15 = vcmp.eq.f32.partialorder %v4395_v14, 8.507059e+37  ;;  %v13380_v46 = vpop.eup %8314  ;;  %v13383_v11 = vmul.f32 0.5, %v13114_v12  ;;  %8318 = vpow2.f32 %v5803_v39 }
 0x6ce   : > { %v5910_v57 = vmul.f32 %v8313_v41, %v5600_v36  ;;  %v13385_v29 = vsel %vm4396_vm15, %v4398_v60, %v4394_v32  ;;  %v13387_v21 = vadd.f32 1.0, %v4055_v33  ;;  %v13390_v54 = vand.u32 2147483647, %v13367_v7  ;;  %7961 = vmatmul.msk.f32.gmra.mxu0 %vm3326_vm6, %v6281_v53 }
 0x6cf   : > { %v5291_v10 = vadd.f32 1.4214138, %v5229_v28  ;;  %v17148_v35 = vfloor.f32 %v17147_v34  ;;  %v5727_v14 = vmul.f32 %v5665_v17, %v13216_v24  ;;  %v5106_v41 = vmul.f32 1.0614054, %v13385_v29 }
 0x6d0   : > { %v5972_v26 = vsub.f32 1.0, %v5910_v57  ;;  %vm4407_vm3 = vweird.f32 %v13308_v59  ;;  %v6776_v2 = vmul.f32 %v6590_v13, %v12519_v16  ;;  %v4405_v45 = vadd.f32 %v13308_v59, %v4404_v49 }
 0x6d1   : > { %vm2963_vm2 = vcmp.eq.f32.partialorder %v17148_v35, %v12104_v19  ;;  %v5353_v33 = vmul.f32 %v5291_v10, %v13348_v15  ;;  %v8317_v55 = vpop.eup %8316  ;;  %vm4406_vm4 = vweird.f32 %v13259_v3  ;;  %v4412_v56 = vand.u32 2147483648, %v13259_v3 }
 0x6d2   : > { %v7840_v39 = vsel %vm2963_vm2, 1.0, %v16589_v47  ;;  %v6096_v31 = vsub.f32 0.0, %v5972_v26  ;;  %v5168_v24 = vadd.f32 -1.4531521, %v5106_v41  ;;  %8320 = vrcp.f32 %v13387_v21  ;;  %8011 = vmatmul.msk.f32.vlgmr.msrb.gmra.mxu1 %vm3326_vm6, %v6776_v2  ;;  %vm13414_vm5 = vmor %vm4406_vm4, %vm4407_vm3  ;;  %8073 = vmatmul.msk.f32.vlgmr.msrb.gmra.mxu2 %vm3326_vm6, %v6776_v2 }
 0x6d3   : > { %v4056_v32 = vmul.f32 0.3275911, %v13390_v54  ;;  %v5415_v60 = vadd.f32 -0.28449672, %v5353_v33  ;;  %v4410_v17 = vand.u32 2147483647, %v13259_v3  ;;  %v13410_v16 = vpop.eup %8318  ;;  %v4417_v49 = vmul.f32 %v13380_v46, %v13326_v5 }
 0x6d4   : > { %7910 = vmatmul.msk.f32.gmra.mxu3 %vm3399_vm7, %v7840_v39  ;;  %v5666_v53 = vsub.f32 0.0, %v13285_v4  ;;  %v6158_v28 = vsel %vm6034_vm13, %v5972_v26, %v6096_v31  ;;  %v5230_v3 = vmul.f32 %v5168_v24, %v13385_v29  ;;  %v13427_v57 = vmul.f32 %v13269_v30, %v12044_v62  ;;  %v13439_v62 = vpop.f32.mrf.mxu3 }
 0x6d5   : > { %v6220_v13 = vadd.f32 1.0, %v6158_v28  ;;  %v5477_v10 = vmul.f32 %v5415_v60, %v13348_v15  ;;  %v4409_v34 = vsel %vm13414_vm5, %v13308_v59, %v4405_v45  ;;  %v13434_v35 = vmul.f32 0.5, %v13173_v18 }
 0x6d6   : > { %17151 = vst [vmem:[#allocation38_spill] sm:$0xff] %v13427_v57  ;;  %v4413_v58 = vor.u32 1.1754944e-38, %v4412_v56  ;;  %v5805_v26 = vmul.f32 1.442695, %v5727_v14  ;;  %v5292_v41 = vadd.f32 1.4214138, %v5230_v3  ;;  %v5728_v59 = vmul.f32 %v5666_v53, %v13285_v4 }
 0x6d7   : > { %v13436_v39 = vadd.f32 1.0, %v4056_v32  ;;  %v6282_v33 = vmul.f32 %v6220_v13, %v13247_v52  ;;  %v5539_v2 = vadd.f32 0.2548296, %v5477_v10  ;;  %vm4411_vm8 = vcmp.eq.f32.partialorder %v4410_v17, 8.507059e+37  ;;  %v17152_v4 = vld [vmem:[#allocation82_spill] sm:$0xff] }
 0x6d8   : > { %vm6035_vm11 = vcmp.ge.f32.partialorder %v13092_v43, 0.0  ;;  %v13443_v30 = vmul.f32 0.5, %v13238_v9  ;;  %v5354_v45 = vmul.f32 %v5292_v41, %v13385_v29  ;;  %v13447_v56 = vsel %vm4411_vm8, %v4413_v58, %v4409_v34  ;;  %v13449_v31 = vpop.eup %8320 }
 0x6d9   : > { %v6593_v14 = vpop.f32.mrf.mxu0  ;;  %v4418_v24 = vsub.f32 1.0, %v4417_v49  ;;  %v13452_v52 = vmul.f32 0.70710677, %v13427_v57  ;;  %7962 = vmatmul.msk.f32.gmra.mxu0 %vm3326_vm6, %v6282_v33  ;;  %v5601_v32 = vmul.f32 %v5539_v2, %v13348_v15  ;;  %v5107_v60 = vmul.f32 1.0614054, %v13447_v56 }
 0x6da   : > { %8322 = vpow2.f32 %v5805_v26  ;;  %v5416_v17 = vadd.f32 -0.28449672, %v5354_v45  ;;  %v17153_v36 = vfloor.f32 %v17152_v4  ;;  %v6777_v53 = vmul.f32 %v6593_v14, %v12536_v63 }
 0x6db   : > { %v4427_v28 = vand.u32 2147483648, %v13326_v5  ;;  %8324 = vrcp.f32 %v13436_v39  ;;  %v5911_v49 = vmul.f32 %v8317_v55, %v5601_v32  ;;  %v5169_v3 = vadd.f32 -1.4531521, %v5107_v60 }
 0x6dc   : > { %vm2964_vm12 = vcmp.eq.f32.partialorder %v17153_v36, %v12104_v19  ;;  %v5807_v13 = vmul.f32 1.442695, %v5728_v59  ;;  %v4432_v15 = vmul.f32 %v13449_v31, %v13387_v21  ;;  %v5478_v10 = vmul.f32 %v5416_v17, %v13385_v29  ;;  %8012 = vmatmul.msk.f32.gmra.mxu1 %vm3326_vm6, %v6777_v53  ;;  %8074 = vmatmul.msk.f32.gmra.mxu2 %vm3326_vm6, %v6777_v53  ;;  %v13497_v53 = vpop.f32.mrf.mxu3 }
 0x6dd   : > { %v7841_v34 = vsel %vm2964_vm12, 1.0, %v16589_v47  ;;  %v4419_v63 = vmul.f32 %v13380_v46, %v4418_v24  ;;  %v13471_v58 = vand.u32 2147483647, %v13452_v52  ;;  %v13475_v55 = vmul.f32 %v13317_v40, %v12036_v20 }
 0x6de   : > { %v5973_v26 = vsub.f32 1.0, %v5911_v49  ;;  %7911 = vmatmul.msk.f32.gmra.mxu3 %vm3399_vm7, %v7841_v34  ;;  %vm4421_vm14 = vweird.f32 %v13326_v5  ;;  %v13480_v41 = vmul.f32 0.5, %v13295_v50  ;;  %v5540_v33 = vadd.f32 0.2548296, %v5478_v10 }
 0x6df   : > { %17154 = vst [vmem:[#allocation46_spill] sm:$0xff] %v13475_v55  ;;  %v5231_v2 = vmul.f32 %v5169_v3, %v13447_v56  ;;  %vm6036_vm0 = vcmp.ge.f32.partialorder %v13133_v38, 0.0  ;;  %vm4422_vm1 = vweird.f32 %v13380_v46  ;;  %v4428_v59 = vor.u32 1.1754944e-38, %v4427_v28  ;;  %v17160_v38 = vld [vmem:[#allocation58_spill] sm:$0xff] }
 0x6e0   : > { %v5667_v45 = vsub.f32 0.0, %v13338_v42  ;;  %v6097_v20 = vsub.f32 0.0, %v5973_v26  ;;  %v13486_v40 = vpop.eup %8322  ;;  %8326 = vpow2.f32 %v5807_v13  ;;  %v4433_v14 = vsub.f32 1.0, %v4432_v15  ;;  %vm13504_vm10 = vmor %vm4421_vm14, %vm4422_vm1 }
 0x6e1   : > { %v5602_v24 = vmul.f32 %v5540_v33, %v13385_v29  ;;  %v5293_v32 = vadd.f32 1.4214138, %v5231_v2  ;;  %v13489_v60 = vpop.eup %8324  ;;  %v4057_v17 = vmul.f32 0.3275911, %v13471_v58  ;;  %v13493_v4 = vmul.f32 0.70710677, %v13475_v55 }
 0x6e2   : > { %v6159_v36 = vsel %vm6035_vm11, %v5973_v26, %v6097_v20  ;;  %v4420_v28 = vadd.f32 %v13380_v46, %v4419_v63  ;;  %v4425_v43 = vand.u32 2147483647, %v13326_v5  ;;  %vm4436_vm9 = vweird.f32 %v13387_v21 }
 0x6e3   : > { %v6221_v49 = vadd.f32 1.0, %v6159_v36  ;;  %v5912_v3 = vmul.f32 %v13410_v16, %v5602_v24  ;;  %v5355_v13 = vmul.f32 %v5293_v32, %v13447_v56  ;;  %v4442_v15 = vand.u32 2147483648, %v13387_v21  ;;  %v6596_v24 = vpop.f32.mrf.mxu0 }
 0x6e4   : > { %v5729_v10 = vmul.f32 %v5667_v45, %v13338_v42  ;;  %v4424_v34 = vsel %vm13504_vm10, %v13380_v46, %v4420_v28  ;;  %v4434_v63 = vmul.f32 %v13449_v31, %v4433_v14  ;;  %v4447_v26 = vmul.f32 %v13489_v60, %v13436_v39 }
 0x6e5   : > { %v6283_v16 = vmul.f32 %v6221_v49, %v13289_v37  ;;  %v5974_v33 = vsub.f32 1.0, %v5912_v3  ;;  %v5668_v5 = vsub.f32 0.0, %v13390_v54  ;;  %v13522_v2 = vadd.f32 1.0, %v4057_v17  ;;  %v17157_v37 = vld [vmem:[#allocation84_spill] sm:$0xff] }
 0x6e6   : > { %v5417_v20 = vadd.f32 -0.28449672, %v5355_v13  ;;  %vm4426_vm13 = vcmp.eq.f32.partialorder %v4425_v43, 8.507059e+37  ;;  %v13524_v42 = vpop.eup %8326  ;;  %v13527_v45 = vand.u32 2147483647, %v13493_v4  ;;  %v17158_v32 = vfloor.f32 %v17157_v37 }
 0x6e7   : > { %7963 = vmatmul.msk.f32.gmra.mxu0 %vm3326_vm6, %v6283_v16  ;;  %v6098_v46 = vsub.f32 0.0, %v5974_v33  ;;  %v13530_v14 = vsel %vm4426_vm13, %v4428_v59, %v4424_v34  ;;  %vm4437_vm2 = vweird.f32 %v13449_v31  ;;  %v5809_v17 = vmul.f32 1.442695, %v5729_v10 }
 0x6e8   : > { %vm2965_vm15 = vcmp.eq.f32.partialorder %v17158_v32, %v12104_v19  ;;  %v13538_v36 = vmul.f32 %v13378_v61, %v12028_v44  ;;  %v5479_v28 = vmul.f32 %v5417_v20, %v13447_v56  ;;  %v4448_v29 = vsub.f32 1.0, %v4447_v26  ;;  %vm13556_vm4 = vmor %vm4436_vm9, %vm4437_vm2 }
 0x6e9   : > { %v6160_v49 = vsel %vm6036_vm0, %v5974_v33, %v6098_v46  ;;  %v5108_v59 = vmul.f32 1.0614054, %v13530_v14  ;;  %v4435_v3 = vadd.f32 %v13449_v31, %v4434_v63  ;;  %8328 = vrcp.f32 %v13522_v2 }
 0x6ea   : > { %17159 = vst [vmem:[#allocation49_spill] sm:$0xff] %v13538_v36  ;;  %v6222_v13 = vadd.f32 1.0, %v6160_v49  ;;  %v5541_v43 = vadd.f32 0.2548296, %v5479_v28  ;;  %v7842_v10 = vsel %vm2965_vm15, 1.0, %v16589_v47  ;;  %vm6037_vm3 = vcmp.ge.f32.partialorder %v13189_v6, 0.0 }
 0x6eb   : > { %v5730_v44 = vmul.f32 %v5668_v5, %v13390_v54  ;;  %v4058_v61 = vmul.f32 0.3275911, %v13527_v45  ;;  %v5170_v34 = vadd.f32 -1.4531521, %v5108_v59  ;;  %7912 = vmatmul.msk.f32.gmra.mxu3 %vm3399_vm7, %v7842_v10  ;;  %v6778_v26 = vmul.f32 %v6596_v24, %v17160_v38  ;;  %v13565_v5 = vpop.f32.mrf.mxu3 }
 0x6ec   : > { %v13561_v16 = vmul.f32 0.70710677, %v13538_v36  ;;  %v6284_v54 = vmul.f32 %v6222_v13, %v13383_v11  ;;  %v5603_v33 = vmul.f32 %v5541_v43, %v13447_v56  ;;  %v4440_v20 = vand.u32 2147483647, %v13387_v21 }
 0x6ed   : > { %v4443_v24 = vor.u32 1.1754944e-38, %v4442_v15  ;;  %v4449_v46 = vmul.f32 %v13489_v60, %v4448_v29  ;;  %v5232_v37 = vmul.f32 %v5170_v34, %v13530_v14  ;;  %v4439_v32 = vsel %vm13556_vm4, %v13449_v31, %v4435_v3  ;;  %8013 = vmatmul.msk.f32.gmra.mxu1 %vm3326_vm6, %v6778_v26  ;;  %8075 = vmatmul.msk.f32.gmra.mxu2 %vm3326_vm6, %v6778_v26  ;;  %v6599_v29 = vpop.f32.mrf.mxu0  ;;  %v17163_v3 = vld [vmem:[#allocation87_spill] sm:$0xff]  ;;  %v17167_v26 = vld [vmem:[#allocation56_spill] sm:$0xff] }
 0x6ee   : > { %8330 = vpow2.f32 %v5809_v17  ;;  %vm4451_vm5 = vweird.f32 %v13436_v39  ;;  %v4457_v11 = vand.u32 2147483648, %v13436_v39  ;;  %v5913_v21 = vmul.f32 %v13486_v40, %v5603_v33  ;;  %v17165_v40 = vld [vmem:[#allocation15_spill] sm:$0xff] }
 0x6ef   : > { %v5811_v56 = vmul.f32 1.442695, %v5730_v44  ;;  %v13578_v15 = vadd.f32 1.0, %v4058_v61  ;;  %7964 = vmatmul.msk.f32.gmra.mxu0 %vm3326_vm6, %v6284_v54  ;;  %v5294_v28 = vadd.f32 1.4214138, %v5232_v37  ;;  %vm4441_vm8 = vcmp.eq.f32.partialorder %v4440_v20, 8.507059e+37  ;;  %v13581_v31 = vpop.eup %8328 }
 0x6f0   : > { %v13584_v49 = vand.u32 2147483647, %v13561_v16  ;;  %v5975_v17 = vsub.f32 1.0, %v5913_v21  ;;  %v13586_v59 = vsel %vm4441_vm8, %v4443_v24, %v4439_v32  ;;  %v17164_v13 = vfloor.f32 %v17163_v3 }
 0x6f1   : > { %vm4452_vm12 = vweird.f32 %v13489_v60  ;;  %v13594_v43 = vmul.f32 %v13439_v62, %v17165_v40  ;;  %v5356_v10 = vmul.f32 %v5294_v28, %v13530_v14  ;;  %v4450_v44 = vadd.f32 %v13489_v60, %v4449_v46 }
 0x6f2   : > { %vm2966_vm11 = vcmp.eq.f32.partialorder %v17164_v13, %v12104_v19  ;;  %v6099_v61 = vsub.f32 0.0, %v5975_v17  ;;  %v5109_v34 = vmul.f32 1.0614054, %v13586_v59  ;;  %v6779_v63 = vmul.f32 %v6599_v29, %v17167_v26  ;;  %vm13610_vm14 = vmor %vm4451_vm5, %vm4452_vm12 }
 0x6f3   : > { %17166 = vst [vmem:[#allocation54_spill] sm:$0xff] %v13594_v43  ;;  %v7843_v38 = vsel %vm2966_vm11, 1.0, %v16589_v47  ;;  %v4462_v54 = vmul.f32 %v13581_v31, %v13522_v2  ;;  %8332 = vrcp.f32 %v13578_v15  ;;  %v5418_v33 = vadd.f32 -0.28449672, %v5356_v10  ;;  %v13634_v10 = vpop.f32.mrf.mxu3 }
 0x6f4   : > { %7913 = vmatmul.msk.f32.gmra.mxu3 %vm3399_vm7, %v7843_v38  ;;  %v4455_v62 = vand.u32 2147483647, %v13436_v39  ;;  %v13606_v20 = vpop.eup %8330  ;;  %v5669_v46 = vsub.f32 0.0, %v13471_v58  ;;  %v4059_v37 = vmul.f32 0.3275911, %v13584_v49  ;;  %v6161_v32 = vsel %vm6037_vm3, %v5975_v17, %v6099_v61 }
 0x6f5   : > { %v5171_v21 = vadd.f32 -1.4531521, %v5109_v34  ;;  %v13619_v28 = vmul.f32 0.70710677, %v13594_v43  ;;  %v6223_v29 = vadd.f32 1.0, %v6161_v32  ;;  %v5480_v3 = vmul.f32 %v5418_v33, %v13530_v14  ;;  %8014 = vmatmul.msk.f32.gmra.mxu1 %vm3326_vm6, %v6779_v63  ;;  %8076 = vmatmul.msk.f32.gmra.mxu2 %vm3326_vm6, %v6779_v63 }
 0x6f6   : > { %v4454_v39 = vsel %vm13610_vm14, %v13489_v60, %v4450_v44  ;;  %v13628_v13 = vmul.f32 0.5, %v13343_v1  ;;  %v4458_v6 = vor.u32 1.1754944e-38, %v4457_v11  ;;  %v13631_v17 = vmul.f32 0.5, %v13427_v57 }
 0x6f7   : > { %v5233_v40 = vmul.f32 %v5171_v21, %v13586_v59  ;;  %v4463_v61 = vsub.f32 1.0, %v4462_v54  ;;  %v6285_v34 = vmul.f32 %v6223_v29, %v13434_v35  ;;  %v5542_v38 = vadd.f32 0.2548296, %v5480_v3  ;;  %v17172_v21 = vld [vmem:[#allocation53_spill] sm:$0xff] }
 0x6f8   : > { %vm4456_vm0 = vcmp.eq.f32.partialorder %v4455_v62, 8.507059e+37  ;;  %vm6038_vm1 = vcmp.ge.f32.partialorder %v13262_v0, 0.0  ;;  %8334 = vpow2.f32 %v5811_v56  ;;  %v13638_v60 = vadd.f32 1.0, %v4059_v37  ;;  %v17170_v37 = vld [vmem:[#allocation89_spill] sm:$0xff]  ;;  %v17177_v0 = vld [vmem:[#allocation51_spill] sm:$0xff] }
 0x6f9   : > { %v5295_v44 = vadd.f32 1.4214138, %v5233_v40  ;;  %v13640_v26 = vsel %vm4456_vm0, %v4458_v6, %v4454_v39  ;;  %v13642_v11 = vpop.eup %8332  ;;  %v5731_v63 = vmul.f32 %v5669_v46, %v13471_v58  ;;  %v13646_v33 = vand.u32 2147483647, %v13619_v28  ;;  %7965 = vmatmul.msk.f32.gmra.mxu0 %vm3326_vm6, %v6285_v34 }
 0x6fa   : > { %v5604_v35 = vmul.f32 %v5542_v38, %v13530_v14  ;;  %v5110_v54 = vmul.f32 1.0614054, %v13640_v26  ;;  %v6602_v62 = vpop.f32.mrf.mxu0  ;;  %v5670_v56 = vsub.f32 0.0, %v13527_v45  ;;  %v17171_v32 = vfloor.f32 %v17170_v37  ;;  %v17173_v38 = vld [vmem:[#allocation69_spill] sm:$0xff] }
 0x6fb   : > { %v5357_v24 = vmul.f32 %v5295_v44, %v13586_v59  ;;  %v6780_v58 = vmul.f32 %v6602_v62, %v17172_v21  ;;  %v4464_v46 = vmul.f32 %v13581_v31, %v4463_v61  ;;  %v4472_v29 = vand.u32 2147483648, %v13522_v2 }
 0x6fc   : > { %vm2967_vm10 = vcmp.eq.f32.partialorder %v17171_v32, %v12104_v19  ;;  %v5914_v3 = vmul.f32 %v13524_v42, %v5604_v35  ;;  %v5172_v14 = vadd.f32 -1.4531521, %v5110_v54  ;;  %v4477_v39 = vmul.f32 %v13642_v11, %v13578_v15 }
 0x6fd   : > { %8336 = vrcp.f32 %v13638_v60  ;;  %v5419_v6 = vadd.f32 -0.28449672, %v5357_v24  ;;  %v7844_v40 = vsel %vm2967_vm10, 1.0, %v16589_v47  ;;  %v4060_v34 = vmul.f32 0.3275911, %v13646_v33  ;;  %8015 = vmatmul.msk.f32.gmra.mxu1 %vm3326_vm6, %v6780_v58  ;;  %8077 = vmatmul.msk.f32.gmra.mxu2 %vm3326_vm6, %v6780_v58 }
 0x6fe   : > { %v13667_v44 = vmul.f32 %v13497_v53, %v17173_v38  ;;  %v5976_v61 = vsub.f32 1.0, %v5914_v3  ;;  %v5234_v62 = vmul.f32 %v5172_v14, %v13640_v26  ;;  %7914 = vmatmul.msk.f32.gmra.mxu3 %vm3399_vm7, %v7844_v40  ;;  %v13672_v42 = vpop.eup %8334  ;;  %vm4466_vm9 = vweird.f32 %v13522_v2  ;;  %v13683_v38 = vpop.f32.mrf.mxu3 }
 0x6ff   : > { %v13676_v35 = vmul.f32 0.5, %v13475_v55  ;;  %v5732_v54 = vmul.f32 %v5670_v56, %v13527_v45  ;;  %v5481_v24 = vmul.f32 %v5419_v6, %v13586_v59  ;;  %vm4467_vm13 = vweird.f32 %v13581_v31 }
 0x700   : > { %17174 = vst [vmem:[#allocation57_spill] sm:$0xff] %v13667_v44  ;;  %v4473_v53 = vor.u32 1.1754944e-38, %v4472_v29  ;;  %v5813_v37 = vmul.f32 1.442695, %v5731_v63  ;;  %v6100_v32 = vsub.f32 0.0, %v5976_v61  ;;  %v4478_v21 = vsub.f32 1.0, %v4477_v39  ;;  %vm13705_vm3 = vmor %vm4466_vm9, %vm4467_vm13 }
 0x701   : > { %v4487_v3 = vand.u32 2147483648, %v13578_v15  ;;  %v5543_v14 = vadd.f32 0.2548296, %v5481_v24  ;;  %v5296_v40 = vadd.f32 1.4214138, %v5234_v62  ;;  %vm6039_vm15 = vcmp.ge.f32.partialorder %v13311_v22, 0.0 }
 0x702   : > { %v13686_v55 = vadd.f32 1.0, %v4060_v34  ;;  %v13689_v45 = vmul.f32 0.70710677, %v13667_v44  ;;  %v6162_v56 = vsel %vm6038_vm1, %v5976_v61, %v6100_v32  ;;  %v4465_v63 = vadd.f32 %v13581_v31, %v4464_v46 }
 0x703   : > { %v13694_v58 = vpop.eup %8336  ;;  %v5815_v29 = vmul.f32 1.442695, %v5732_v54  ;;  %v6224_v39 = vadd.f32 1.0, %v6162_v56  ;;  %v5605_v6 = vmul.f32 %v5543_v14, %v13586_v59  ;;  %v5358_v62 = vmul.f32 %v5296_v40, %v13640_v26 }
 0x704   : > { %8338 = vpow2.f32 %v5813_v37  ;;  %vm4481_vm2 = vweird.f32 %v13578_v15  ;;  %v5671_v34 = vsub.f32 0.0, %v13584_v49  ;;  %v4470_v24 = vand.u32 2147483647, %v13522_v2  ;;  %v6605_v40 = vpop.f32.mrf.mxu0 }
 0x705   : > { %v4479_v46 = vmul.f32 %v13642_v11, %v4478_v21  ;;  %v6286_v59 = vmul.f32 %v6224_v39, %v13443_v30  ;;  %v5915_v61 = vmul.f32 %v13606_v20, %v5605_v6  ;;  %v5420_v54 = vadd.f32 -0.28449672, %v5358_v62 }
 0x706   : > { %v4488_v37 = vor.u32 1.1754944e-38, %v4487_v3  ;;  %8340 = vrcp.f32 %v13686_v55  ;;  %v13714_v32 = vand.u32 2147483647, %v13689_v45  ;;  %v4469_v2 = vsel %vm13705_vm3, %v13581_v31, %v4465_v63 }
 0x707   : > { %8342 = vpow2.f32 %v5815_v29  ;;  %v4492_v14 = vmul.f32 %v13694_v58, %v13638_v60  ;;  %7966 = vmatmul.msk.f32.gmra.mxu0 %vm3326_vm6, %v6286_v59  ;;  %v5977_v30 = vsub.f32 1.0, %v5915_v61  ;;  %v5482_v20 = vmul.f32 %v5420_v54, %v13640_v26  ;;  %v13744_v61 = vpop.f32.mrf.mxu3 }
 0x708   : > { %vm4482_vm4 = vweird.f32 %v13642_v11  ;;  %v13725_v21 = vmul.f32 0.5, %v13538_v36  ;;  %v5733_v3 = vmul.f32 %v5671_v34, %v13584_v49  ;;  %vm4471_vm5 = vcmp.eq.f32.partialorder %v4470_v24, 8.507059e+37 }
 0x709   : > { %v6101_v56 = vsub.f32 0.0, %v5977_v30  ;;  %v5544_v31 = vadd.f32 0.2548296, %v5482_v20  ;;  %v13728_v63 = vsel %vm4471_vm5, %v4473_v53, %v4469_v2  ;;  %v4480_v29 = vadd.f32 %v13642_v11, %v4479_v46  ;;  %vm13752_vm12 = vmor %vm4481_vm2, %vm4482_vm4 }
 0x70a   : > { %v13731_v39 = vpop.eup %8338  ;;  %vm6040_vm8 = vcmp.ge.f32.partialorder %v13367_v7, 0.0  ;;  %v4061_v6 = vmul.f32 0.3275911, %v13714_v32  ;;  %v5111_v62 = vmul.f32 1.0614054, %v13728_v63  ;;  %v17178_v59 = vfloor.f32 %v17177_v0 }
 0x70b   : > { %v4485_v49 = vand.u32 2147483647, %v13578_v15  ;;  %v4493_v34 = vsub.f32 1.0, %v4492_v14  ;;  %v6163_v53 = vsel %vm6039_vm15, %v5977_v30, %v6101_v56  ;;  %v5606_v24 = vmul.f32 %v5544_v31, %v13640_v26  ;;  %v17181_v14 = vld [vmem:[#allocation14_spill] sm:$0xff] }
 0x70c   : > { %vm2968_vm11 = vcmp.eq.f32.partialorder %v17178_v59, %v12104_v19  ;;  %v13746_v54 = vpop.eup %8340  ;;  %v13758_v22 = vmul.f32 %v13565_v5, %v17181_v14  ;;  %v6225_v30 = vadd.f32 1.0, %v6163_v53  ;;  %v5173_v26 = vadd.f32 -1.4531521, %v5111_v62 }
 0x70d   : > { %v7845_v46 = vsel %vm2968_vm11, 1.0, %v16589_v47  ;;  %v6781_v20 = vmul.f32 %v6605_v40, %v12619_v25  ;;  %v13762_v56 = vpop.eup %8342  ;;  %v13765_v31 = vmul.f32 0.5, %v13594_v43  ;;  %v5672_v15 = vsub.f32 0.0, %v13646_v33  ;;  %v17186_v43 = vld [vmem:[#allocation41_spill] sm:$0xff] }
 0x70e   : > { %17182 = vst [vmem:[#allocation59_spill] sm:$0xff] %v13758_v22  ;;  %7915 = vmatmul.msk.f32.gmra.mxu3 %vm3399_vm7, %v7845_v46  ;;  %v5916_v0 = vmul.f32 %v13672_v42, %v5606_v24  ;;  %v4484_v5 = vsel %vm13752_vm12, %v13642_v11, %v4480_v29  ;;  %vm4496_vm14 = vweird.f32 %v13638_v60  ;;  %v13773_v62 = vadd.f32 1.0, %v4061_v6 }
 0x70f   : > { %v6287_v59 = vmul.f32 %v6225_v30, %v13480_v41  ;;  %v5235_v25 = vmul.f32 %v5173_v26, %v13728_v63  ;;  %vm4486_vm0 = vcmp.eq.f32.partialorder %v4485_v49, 8.507059e+37  ;;  %8016 = vmatmul.msk.f32.gmra.mxu1 %vm3326_vm6, %v6781_v20  ;;  %8078 = vmatmul.msk.f32.gmra.mxu2 %vm3326_vm6, %v6781_v20  ;;  %v4502_v40 = vand.u32 2147483648, %v13638_v60  ;;  %v17183_v49 = vld [vmem:[#allocation23_spill] sm:$0xff]  ;;  %v6608_v26 = vpop.f32.mrf.mxu0 }
 0x710   : > { %v4507_v42 = vmul.f32 %v13746_v54, %v13686_v55  ;;  %v5978_v53 = vsub.f32 1.0, %v5916_v0  ;;  %v13782_v11 = vsel %vm4486_vm0, %v4488_v37, %v4484_v5  ;;  %v4494_v29 = vmul.f32 %v13694_v58, %v4493_v34 }
 0x711   : > { %v13786_v6 = vmul.f32 0.70710677, %v13758_v22  ;;  %7967 = vmatmul.msk.f32.gmra.mxu0 %vm3326_vm6, %v6287_v59  ;;  %v5297_v41 = vadd.f32 1.4214138, %v5235_v25  ;;  %v17184_v24 = vfloor.f32 %v17183_v49  ;;  %v5817_v46 = vmul.f32 1.442695, %v5733_v3 }
 0x712   : > { %v6102_v2 = vsub.f32 0.0, %v5978_v53  ;;  %v5112_v14 = vmul.f32 1.0614054, %v13782_v11  ;;  %vm4497_vm10 = vweird.f32 %v13694_v58  ;;  %v5734_v37 = vmul.f32 %v5672_v15, %v13646_v33  ;;  %v17185_v3 = vld [vmem:[#allocation48_spill] sm:$0xff] }
 0x713   : > { %vm2969_vm1 = vcmp.eq.f32.partialorder %v17184_v24, %v12104_v19  ;;  %8344 = vrcp.f32 %v13773_v62  ;;  %v5359_v34 = vmul.f32 %v5297_v41, %v13728_v63  ;;  %v4508_v20 = vsub.f32 1.0, %v4507_v42  ;;  %vm13823_vm9 = vmor %vm4496_vm14, %vm4497_vm10 }
 0x714   : > { %v7846_v30 = vsel %vm2969_vm1, 1.0, %v16589_v47  ;;  %v6164_v0 = vsel %vm6040_vm8, %v5978_v53, %v6102_v2  ;;  %v5174_v5 = vadd.f32 -1.4531521, %v5112_v14  ;;  %v6782_v59 = vmul.f32 %v6608_v26, %v17185_v3  ;;  %v13812_v53 = vpop.f32.mrf.mxu3 }
 0x715   : > { %v13802_v25 = vand.u32 2147483647, %v13786_v6  ;;  %v6226_v49 = vadd.f32 1.0, %v6164_v0  ;;  %v5421_v24 = vadd.f32 -0.28449672, %v5359_v34  ;;  %v4495_v33 = vadd.f32 %v13694_v58, %v4494_v29 }
 0x716   : > { %7916 = vmatmul.msk.f32.gmra.mxu3 %vm3399_vm7, %v7846_v30  ;;  %v4503_v15 = vor.u32 1.1754944e-38, %v4502_v40  ;;  %v4517_v41 = vand.u32 2147483648, %v13686_v55  ;;  %v13809_v42 = vmul.f32 %v13634_v10, %v17186_v43  ;;  %v5236_v7 = vmul.f32 %v5174_v5, %v13782_v11 }
 0x717   : > { %8346 = vpow2.f32 %v5817_v46  ;;  %v5673_v2 = vsub.f32 0.0, %v13714_v32  ;;  %v6288_v14 = vmul.f32 %v6226_v49, %v13628_v13  ;;  %v5483_v30 = vmul.f32 %v5421_v24, %v13728_v63  ;;  %8017 = vmatmul.msk.f32.gmra.mxu1 %vm3326_vm6, %v6782_v59  ;;  %8079 = vmatmul.msk.f32.gmra.mxu2 %vm3326_vm6, %v6782_v59 }
 0x718   : > { %17187 = vst [vmem:[#allocation60_spill] sm:$0xff] %v13809_v42  ;;  %v4509_v10 = vmul.f32 %v13746_v54, %v4508_v20  ;;  %vm4511_vm13 = vweird.f32 %v13686_v55  ;;  %v5819_v40 = vmul.f32 1.442695, %v5734_v37  ;;  %v5298_v13 = vadd.f32 1.4214138, %v5236_v7 }
 0x719   : > { %v13829_v29 = vpop.eup %8344  ;;  %v4062_v46 = vmul.f32 0.3275911, %v13802_v25  ;;  %7968 = vmatmul.msk.f32.gmra.mxu0 %vm3326_vm6, %v6288_v14  ;;  %v5545_v34 = vadd.f32 0.2548296, %v5483_v30  ;;  %v4499_v26 = vsel %vm13823_vm9, %v13694_v58, %v4495_v33  ;;  %v4500_v0 = vand.u32 2147483647, %v13638_v60 }
 0x71a   : > { %vm6041_vm15 = vcmp.ge.f32.partialorder %v13452_v52, 0.0  ;;  %v4518_v20 = vor.u32 1.1754944e-38, %v4517_v41  ;;  %v13839_v5 = vmul.f32 0.5, %v13667_v44  ;;  %v13842_v37 = vmul.f32 0.70710677, %v13809_v42  ;;  %v17190_v33 = vld [vmem:[#allocation29_spill] sm:$0xff] }
 0x71b   : > { %v5360_v3 = vmul.f32 %v5298_v13, %v13782_v11  ;;  %vm4512_vm2 = vweird.f32 %v13746_v54  ;;  %v5735_v59 = vmul.f32 %v5673_v2, %v13714_v32  ;;  %v5607_v49 = vmul.f32 %v5545_v34, %v13728_v63  ;;  %v6611_v63 = vpop.f32.mrf.mxu0  ;;  %v17220_v44 = vld [vmem:[#allocation105_spill] sm:$0xff] }
 0x71c   : > { %vm4501_vm3 = vcmp.eq.f32.partialorder %v4500_v0, 8.507059e+37  ;;  %v4522_v60 = vmul.f32 %v13829_v29, %v13773_v62  ;;  %v17191_v41 = vfloor.f32 %v17190_v33  ;;  %v13857_v14 = vadd.f32 1.0, %v4062_v46  ;;  %vm13878_vm5 = vmor %vm4511_vm13, %vm4512_vm2  ;;  %v13884_v33 = vpop.f32.mrf.mxu3 }
 0x71d   : > { %v5422_v58 = vadd.f32 -0.28449672, %v5360_v3  ;;  %v13850_v24 = vsel %vm4501_vm3, %v4503_v15, %v4499_v26  ;;  %v13855_v7 = vpop.eup %8346  ;;  %v5917_v30 = vmul.f32 %v13731_v39, %v5607_v49  ;;  %v4510_v2 = vadd.f32 %v13746_v54, %v4509_v10  ;;  %v17192_v15 = vld [vmem:[#allocation13_spill] sm:$0xff] }
 0x71e   : > { %vm2970_vm4 = vcmp.eq.f32.partialorder %v17191_v41, %v12104_v19  ;;  %v5113_v32 = vmul.f32 1.0614054, %v13850_v24  ;;  %v13863_v43 = vand.u32 2147483647, %v13842_v37  ;;  %v13867_v13 = vmul.f32 %v13683_v38, %v17192_v15 }
 0x71f   : > { %v5484_v34 = vmul.f32 %v5422_v58, %v13782_v11  ;;  %v7847_v26 = vsel %vm2970_vm4, 1.0, %v16589_v47  ;;  %8348 = vpow2.f32 %v5819_v40  ;;  %v4532_v46 = vand.u32 2147483648, %v13773_v62  ;;  %v17196_v40 = vld [vmem:[#allocation44_spill] sm:$0xff] }
 0x720   : > { %17193 = vst [vmem:[#allocation33_spill] sm:$0xff] %v13867_v13  ;;  %v5979_v39 = vsub.f32 1.0, %v5917_v30  ;;  %7917 = vmatmul.msk.f32.gmra.mxu3 %vm3399_vm7, %v7847_v26  ;;  %v4515_v0 = vand.u32 2147483647, %v13686_v55  ;;  %v5821_v38 = vmul.f32 1.442695, %v5735_v59  ;;  %v6783_v58 = vmul.f32 %v6611_v63, %v17196_v40 }
 0x721   : > { %v5674_v3 = vsub.f32 0.0, %v13802_v25  ;;  %v5546_v49 = vadd.f32 0.2548296, %v5484_v34  ;;  %vm6042_vm8 = vcmp.ge.f32.partialorder %v13493_v4, 0.0  ;;  %v4523_v41 = vsub.f32 1.0, %v4522_v60 }
 0x722   : > { %v6103_v30 = vsub.f32 0.0, %v5979_v39  ;;  %v5175_v15 = vadd.f32 -1.4531521, %v5113_v32  ;;  %v4514_v55 = vsel %vm13878_vm5, %v13746_v54, %v4510_v2  ;;  %8350 = vrcp.f32 %v13857_v14  ;;  %8018 = vmatmul.msk.f32.gmra.mxu1 %vm3326_vm6, %v6783_v58  ;;  %8080 = vmatmul.msk.f32.gmra.mxu2 %vm3326_vm6, %v6783_v58  ;;  %v17197_v58 = vld [vmem:[#allocation91_spill] sm:$0xff] }
 0x723   : > { %v4063_v59 = vmul.f32 0.3275911, %v13863_v43  ;;  %v13893_v26 = vmul.f32 0.70710677, %v13867_v13  ;;  %v5608_v63 = vmul.f32 %v5546_v49, %v13782_v11  ;;  %vm4526_vm11 = vweird.f32 %v13773_v62 }
 0x724   : > { %v13899_v60 = vor.u32 1.1754944e-38, %v4532_v46  ;;  %v6165_v54 = vsel %vm6041_vm15, %v5979_v39, %v6103_v30  ;;  %v5237_v32 = vmul.f32 %v5175_v15, %v13850_v24  ;;  %vm4516_vm12 = vcmp.eq.f32.partialorder %v4515_v0, 8.507059e+37 }
 0x725   : > { %v5736_v2 = vmul.f32 %v5674_v3, %v13802_v25  ;;  %v6227_v34 = vadd.f32 1.0, %v6165_v54  ;;  %v5918_v10 = vmul.f32 %v13762_v56, %v5608_v63  ;;  %v13906_v11 = vsel %vm4516_vm12, %v4518_v20, %v4514_v55  ;;  %v13908_v49 = vpop.eup %8348 }
 0x726   : > { %v4524_v40 = vmul.f32 %v13829_v29, %v4523_v41  ;;  %8352 = vpow2.f32 %v5821_v38  ;;  %v5299_v46 = vadd.f32 1.4214138, %v5237_v32  ;;  %v17198_v52 = vfloor.f32 %v17197_v58  ;;  %v13939_v58 = vpop.f32.mrf.mxu3 }
 0x727   : > { %v13914_v39 = vadd.f32 1.0, %v4063_v59  ;;  %v13917_v0 = vand.u32 2147483647, %v13893_v26  ;;  %v6289_v25 = vmul.f32 %v6227_v34, %v13631_v17  ;;  %v5980_v56 = vsub.f32 1.0, %v5918_v10  ;;  %v6614_v59 = vpop.f32.mrf.mxu0 }
 0x728   : > { %vm2971_vm14 = vcmp.eq.f32.partialorder %v17198_v52, %v12104_v19  ;;  %vm4527_vm0 = vweird.f32 %v13829_v29  ;;  %v13922_v20 = vmul.f32 0.5, %v13758_v22  ;;  %v5361_v38 = vmul.f32 %v5299_v46, %v13850_v24  ;;  %v13926_v41 = vpop.eup %8350 }
 0x729   : > { %v5114_v3 = vmul.f32 1.0614054, %v13906_v11  ;;  %v4547_v30 = vand.u32 2147483648, %v13857_v14  ;;  %v5823_v15 = vmul.f32 1.442695, %v5736_v2  ;;  %7969 = vmatmul.msk.f32.gmra.mxu0 %vm3326_vm6, %v6289_v25  ;;  %v6104_v55 = vsub.f32 0.0, %v5980_v56  ;;  %vm13953_vm1 = vmor %vm4526_vm11, %vm4527_vm0 }
 0x72a   : > { %v7848_v17 = vsel %vm2971_vm14, 1.0, %v16589_v47  ;;  %v5675_v63 = vsub.f32 0.0, %v13863_v43  ;;  %v5423_v54 = vadd.f32 -0.28449672, %v5361_v38  ;;  %v4525_v34 = vadd.f32 %v13829_v29, %v4524_v40 }
 0x72b   : > { %v5176_v32 = vadd.f32 -1.4531521, %v5114_v3  ;;  %7918 = vmatmul.msk.f32.gmra.mxu3 %vm3399_vm7, %v7848_v17  ;;  %8354 = vrcp.f32 %v13914_v39  ;;  %v4064_v10 = vmul.f32 0.3275911, %v13917_v0  ;;  %v6166_v2 = vsel %vm6042_vm8, %v5980_v56, %v6104_v55  ;;  %v17201_v56 = vld [vmem:[#allocation37_spill] sm:$0xff] }
 0x72c   : > { %v6784_v46 = vmul.f32 %v6614_v59, %v12748_v48  ;;  %v13941_v52 = vpop.eup %8352  ;;  %v4537_v25 = vmul.f32 %v13926_v41, %v13857_v14  ;;  %v13946_v38 = vmul.f32 0.5, %v13809_v42  ;;  %v6228_v40 = vadd.f32 1.0, %v6166_v2 }
 0x72d   : > { %v5485_v3 = vmul.f32 %v5423_v54, %v13850_v24  ;;  %v13957_v48 = vor.u32 1.1754944e-38, %v4547_v30  ;;  %8356 = vpow2.f32 %v5823_v15  ;;  %v13961_v55 = vmul.f32 %v13744_v61, %v17201_v56 }
 0x72e   : > { %v5238_v17 = vmul.f32 %v5176_v32, %v13906_v11  ;;  %8019 = vmatmul.msk.f32.gmra.mxu1 %vm3326_vm6, %v6784_v46  ;;  %8081 = vmatmul.msk.f32.gmra.mxu2 %vm3326_vm6, %v6784_v46  ;;  %v6290_v59 = vmul.f32 %v6228_v40, %v13676_v35  ;;  %v4529_v2 = vsel %vm13953_vm1, %v13829_v29, %v4525_v34  ;;  %v4530_v30 = vand.u32 2147483647, %v13773_v62  ;;  %v17203_v32 = vld [vmem:[#allocation50_spill] sm:$0xff] }
 0x72f   : > { %17202 = vst [vmem:[#allocation61_spill] sm:$0xff] %v13961_v55  ;;  %v5547_v54 = vadd.f32 0.2548296, %v5485_v3  ;;  %vm6043_vm10 = vcmp.ge.f32.partialorder %v13561_v16, 0.0  ;;  %v5737_v61 = vmul.f32 %v5675_v63, %v13863_v43  ;;  %v13973_v15 = vadd.f32 1.0, %v4064_v10  ;;  %v17205_v29 = vld [vmem:[#allocation22_spill] sm:$0xff]  ;;  %v6617_v4 = vpop.f32.mrf.mxu0 }
 0x730   : > { %v13977_v56 = vmul.f32 %v13812_v53, %v17203_v32  ;;  %v5300_v46 = vadd.f32 1.4214138, %v5238_v17  ;;  %v4538_v42 = vsub.f32 1.0, %v4537_v25  ;;  %vm4542_vm9 = vweird.f32 %v13926_v41 }
 0x731   : > { %v5609_v35 = vmul.f32 %v5547_v54, %v13850_v24  ;;  %vm4531_vm13 = vcmp.eq.f32.partialorder %v4530_v30, 8.507059e+37  ;;  %v17206_v62 = vfloor.f32 %v17205_v29  ;;  %v13984_v34 = vpop.eup %8354  ;;  %v5676_v43 = vsub.f32 0.0, %v13917_v0  ;;  %7970 = vmatmul.msk.f32.gmra.mxu0 %vm3326_vm6, %v6290_v59 }
 0x732   : > { %17204 = vst [vmem:[#allocation62_spill] sm:$0xff] %v13977_v56  ;;  %v13988_v63 = vmul.f32 0.70710677, %v13961_v55  ;;  %v5362_v53 = vmul.f32 %v5300_v46, %v13906_v11  ;;  %v13993_v10 = vsel %vm4531_vm13, %v13899_v60, %v4529_v2  ;;  %vm4541_vm2 = vweird.f32 %v13857_v14 }
 0x733   : > { %vm2972_vm15 = vcmp.eq.f32.partialorder %v17206_v62, %v12104_v19  ;;  %v4562_v24 = vand.u32 2147483648, %v13914_v39  ;;  %v5919_v25 = vmul.f32 %v13855_v7, %v5609_v35  ;;  %v5115_v40 = vmul.f32 1.0614054, %v13993_v10  ;;  %v14000_v17 = vpop.eup %8356  ;;  %v14018_v62 = vpop.f32.mrf.mxu3  ;;  %vm14050_vm8 = vmor %vm4541_vm2, %vm4542_vm9 }
 0x734   : > { %v7849_v3 = vsel %vm2972_vm15, 1.0, %v16589_v47  ;;  %v5825_v54 = vmul.f32 1.442695, %v5737_v61  ;;  %8358 = vrcp.f32 %v13973_v15  ;;  %v14004_v59 = vmul.f32 0.70710677, %v13977_v56 }
 0x735   : > { %v5424_v60 = vadd.f32 -0.28449672, %v5362_v53  ;;  %7919 = vmatmul.msk.f32.gmra.mxu3 %vm3399_vm7, %v7849_v3  ;;  %v4552_v2 = vmul.f32 %v13984_v34, %v13914_v39  ;;  %v5981_v7 = vsub.f32 1.0, %v5919_v25  ;;  %v5177_v30 = vadd.f32 -1.4531521, %v5115_v40 }
 0x736   : > { %v6785_v32 = vmul.f32 %v6617_v4, %v12782_v23  ;;  %v14011_v46 = vmul.f32 0.5, %v13867_v13  ;;  %v5738_v61 = vmul.f32 %v5676_v43, %v13917_v0  ;;  %v14015_v35 = vand.u32 2147483647, %v13988_v63 }
 0x737   : > { %v5486_v29 = vmul.f32 %v5424_v60, %v13906_v11  ;;  %v4539_v53 = vmul.f32 %v13926_v41, %v4538_v42  ;;  %v14021_v3 = vor.u32 1.1754944e-38, %v4562_v24  ;;  %v6105_v25 = vsub.f32 0.0, %v5981_v7 }
 0x738   : > { %v5239_v40 = vmul.f32 %v5177_v30, %v13993_v10  ;;  %8020 = vmatmul.msk.f32.gmra.mxu1 %vm3326_vm6, %v6785_v32  ;;  %8082 = vmatmul.msk.f32.gmra.mxu2 %vm3326_vm6, %v6785_v32  ;;  %8360 = vpow2.f32 %v5825_v54  ;;  %v4577_v23 = vand.u32 2147483648, %v13973_v15  ;;  %v14028_v0 = vand.u32 2147483647, %v14004_v59 }
 0x739   : > { %v5548_v43 = vadd.f32 0.2548296, %v5486_v29  ;;  %vm6044_vm3 = vcmp.ge.f32.partialorder %v13619_v28, 0.0  ;;  %v4553_v4 = vsub.f32 1.0, %v4552_v2  ;;  %vm4557_vm4 = vweird.f32 %v13984_v34  ;;  %v17207_v29 = vld [vmem:[#allocation31_spill] sm:$0xff] }
 0x73a   : > { %v6167_v42 = vsel %vm6043_vm10, %v5981_v7, %v6105_v25  ;;  %v5301_v24 = vadd.f32 1.4214138, %v5239_v40  ;;  %v14034_v60 = vpop.eup %8358  ;;  %v5827_v30 = vmul.f32 1.442695, %v5738_v61  ;;  %v4065_v54 = vmul.f32 0.3275911, %v14015_v35 }
 0x73b   : > { %v6229_v32 = vadd.f32 1.0, %v6167_v42  ;;  %v5610_v13 = vmul.f32 %v5548_v43, %v13906_v11  ;;  %vm4556_vm5 = vweird.f32 %v13914_v39  ;;  %v14041_v22 = vmul.f32 %v13884_v33, %v17207_v29 }
 0x73c   : > { %v5363_v2 = vmul.f32 %v5301_v24, %v13993_v10  ;;  %v4540_v16 = vadd.f32 %v13926_v41, %v4539_v53  ;;  %v4545_v7 = vand.u32 2147483647, %v13857_v14  ;;  %v14054_v11 = vor.u32 1.1754944e-38, %v4577_v23  ;;  %vm14107_vm0 = vmor %vm4556_vm5, %vm4557_vm4 }
 0x73d   : > { %17208 = vst [vmem:[#allocation65_spill] sm:$0xff] %v14041_v22  ;;  %v4066_v25 = vmul.f32 0.3275911, %v14028_v0  ;;  %v6291_v33 = vmul.f32 %v6229_v32, %v13725_v21  ;;  %v5920_v40 = vmul.f32 %v13908_v49, %v5610_v13  ;;  %v4554_v53 = vmul.f32 %v13984_v34, %v4553_v4  ;;  %v6620_v13 = vpop.f32.mrf.mxu0 }
 0x73e   : > { %v4567_v43 = vmul.f32 %v14034_v60, %v13973_v15  ;;  %v5425_v42 = vadd.f32 -0.28449672, %v5363_v2  ;;  %v4544_v14 = vsel %vm14050_vm8, %v13926_v41, %v4540_v16  ;;  %v14065_v24 = vpop.eup %8360  ;;  %8362 = vpow2.f32 %v5827_v30  ;;  %v17211_v41 = vld [vmem:[#allocation36_spill] sm:$0xff] }
 0x73f   : > { %v14067_v23 = vadd.f32 1.0, %v4065_v54  ;;  %7971 = vmatmul.msk.f32.gmra.mxu0 %vm3326_vm6, %v6291_v33  ;;  %v5982_v21 = vsub.f32 1.0, %v5920_v40  ;;  %vm4546_vm11 = vcmp.eq.f32.partialorder %v4545_v7, 8.507059e+37  ;;  %v14071_v49 = vmul.f32 0.70710677, %v14041_v22  ;;  %v14086_v7 = vpop.f32.mrf.mxu3 }
 0x740   : > { %v5487_v4 = vmul.f32 %v5425_v42, %v13993_v10  ;;  %v14075_v32 = vsel %vm4546_vm11, %v13957_v48, %v4544_v14  ;;  %v17212_v29 = vfloor.f32 %v17211_v41  ;;  %v14081_v30 = vmul.f32 0.5, %v13961_v55 }
 0x741   : > { %v5677_v54 = vsub.f32 0.0, %v14015_v35  ;;  %v14084_v2 = vadd.f32 1.0, %v4066_v25  ;;  %v6106_v16 = vsub.f32 0.0, %v5982_v21  ;;  %v4568_v61 = vsub.f32 1.0, %v4567_v43 }
 0x742   : > { %vm2973_vm12 = vcmp.eq.f32.partialorder %v17212_v29, %v12104_v19  ;;  %v5549_v33 = vadd.f32 0.2548296, %v5487_v4  ;;  %v5116_v40 = vmul.f32 1.0614054, %v14075_v32  ;;  %v4555_v48 = vadd.f32 %v13984_v34, %v4554_v53 }
 0x743   : > { %vm6045_vm14 = vcmp.ge.f32.partialorder %v13689_v45, 0.0  ;;  %8364 = vrcp.f32 %v14067_v23  ;;  %v6168_v42 = vsel %vm6044_vm3, %v5982_v21, %v6106_v16  ;;  %v7850_v14 = vsel %vm2973_vm12, 1.0, %v16589_v47 }
 0x744   : > { %v6786_v25 = vmul.f32 %v6620_v13, %v12830_v27  ;;  %v14097_v41 = vand.u32 2147483647, %v14071_v49  ;;  %v6230_v43 = vadd.f32 1.0, %v6168_v42  ;;  %v5611_v4 = vmul.f32 %v5549_v33, %v13993_v10  ;;  %7920 = vmatmul.msk.f32.gmra.mxu3 %vm3399_vm7, %v7850_v14  ;;  %v14101_v53 = vpop.eup %8362  ;;  %v17217_v42 = vld [vmem:[#allocation70_spill] sm:$0xff] }
 0x745   : > { %v5178_v29 = vadd.f32 -1.4531521, %v5116_v40  ;;  %vm4571_vm1 = vweird.f32 %v13973_v15  ;;  %vm4572_vm10 = vweird.f32 %v14034_v60  ;;  %v5739_v27 = vmul.f32 %v5677_v54, %v14015_v35  ;;  %v17215_v40 = vld [vmem:[#allocation92_spill] sm:$0xff] }
 0x746   : > { %8366 = vrcp.f32 %v14084_v2  ;;  %v4560_v10 = vand.u32 2147483647, %v13914_v39  ;;  %8021 = vmatmul.msk.f32.gmra.mxu1 %vm3326_vm6, %v6786_v25  ;;  %8083 = vmatmul.msk.f32.gmra.mxu2 %vm3326_vm6, %v6786_v25  ;;  %v6292_v21 = vmul.f32 %v6230_v43, %v13765_v31  ;;  %v5921_v13 = vmul.f32 %v13941_v52, %v5611_v4  ;;  %vm14175_vm15 = vmor %vm4571_vm1, %vm4572_vm10 }
 0x747   : > { %v5240_v16 = vmul.f32 %v5178_v29, %v14075_v32  ;;  %v4559_v33 = vsel %vm14107_vm0, %v13984_v34, %v4555_v48  ;;  %v4569_v35 = vmul.f32 %v14034_v60, %v4568_v61  ;;  %v5678_v54 = vsub.f32 0.0, %v14028_v0  ;;  %v6623_v34 = vpop.f32.mrf.mxu0 }
 0x748   : > { %v14128_v39 = vmul.f32 %v13939_v58, %v17215_v40  ;;  %v17218_v14 = vfloor.f32 %v17217_v42  ;;  %v4067_v31 = vmul.f32 0.3275911, %v14097_v41  ;;  %7972 = vmatmul.msk.f32.gmra.mxu0 %vm3326_vm6, %v6292_v21  ;;  %v5983_v52 = vsub.f32 1.0, %v5921_v13  ;;  %v17219_v42 = vld [vmem:[#allocation39_spill] sm:$0xff] }
 0x749   : > { %v5302_v25 = vadd.f32 1.4214138, %v5240_v16  ;;  %vm4561_vm13 = vcmp.eq.f32.partialorder %v4560_v10, 8.507059e+37  ;;  %v14135_v48 = vpop.eup %8364  ;;  %v4592_v61 = vand.u32 2147483648, %v14067_v23  ;;  %v14139_v43 = vmul.f32 0.5, %v13977_v56  ;;  %v14154_v56 = vpop.f32.mrf.mxu3 }
 0x74a   : > { %17216 = vst [vmem:[#allocation66_spill] sm:$0xff] %v14128_v39  ;;  %vm2974_vm9 = vcmp.eq.f32.partialorder %v17218_v14, %v12104_v19  ;;  %v14142_v58 = vsel %vm4561_vm13, %v14021_v3, %v4559_v33  ;;  %v5829_v29 = vmul.f32 1.442695, %v5739_v27  ;;  %v6107_v28 = vsub.f32 0.0, %v5983_v52 }
 0x74b   : > { %v7851_v4 = vsel %vm2974_vm9, 1.0, %v16589_v47  ;;  %v5364_v21 = vmul.f32 %v5302_v25, %v14075_v32  ;;  %v5117_v13 = vmul.f32 1.0614054, %v14142_v58  ;;  %v5740_v16 = vmul.f32 %v5678_v54, %v14028_v0 }
 0x74c   : > { %v14147_v10 = vpop.eup %8366  ;;  %v14151_v40 = vmul.f32 0.70710677, %v14128_v39  ;;  %v6787_v14 = vmul.f32 %v6623_v34, %v17219_v42  ;;  %v4570_v3 = vadd.f32 %v14034_v60, %v4569_v35  ;;  %v14157_v33 = vadd.f32 1.0, %v4067_v31  ;;  %7921 = vmatmul.msk.f32.gmra.mxu3 %vm3399_vm7, %v7851_v4 }
 0x74d   : > { %v6169_v27 = vsel %vm6045_vm14, %v5983_v52, %v6107_v28  ;;  %v5426_v25 = vadd.f32 -0.28449672, %v5364_v21  ;;  %v5179_v55 = vadd.f32 -1.4531521, %v5117_v13  ;;  %v4582_v0 = vmul.f32 %v14135_v48, %v14067_v23 }
 0x74e   : > { %v6231_v54 = vadd.f32 1.0, %v6169_v27  ;;  %v14166_v34 = vmul.f32 %v14018_v62, %v17220_v44  ;;  %v4575_v42 = vand.u32 2147483647, %v13973_v15  ;;  %8022 = vmatmul.msk.f32.gmra.mxu1 %vm3326_vm6, %v6787_v14  ;;  %8084 = vmatmul.msk.f32.gmra.mxu2 %vm3326_vm6, %v6787_v14  ;;  %v14179_v35 = vor.u32 1.1754944e-38, %v4592_v61 }
 0x74f   : > { %8368 = vpow2.f32 %v5829_v29  ;;  %v5488_v44 = vmul.f32 %v5426_v25, %v14075_v32  ;;  %v5241_v62 = vmul.f32 %v5179_v55, %v14142_v58  ;;  %v4597_v31 = vmul.f32 %v14147_v10, %v14084_v2  ;;  %v6626_v27 = vpop.f32.mrf.mxu0 }
 0x750   : > { %17221 = vst [vmem:[#allocation67_spill] sm:$0xff] %v14166_v34  ;;  %v4006_v52 = vand.u32 2147483647, %v14151_v40  ;;  %v6293_v4 = vmul.f32 %v6231_v54, %v13839_v5  ;;  %v4574_v15 = vsel %vm14175_vm15, %v14034_v60, %v4570_v3  ;;  %v4607_v28 = vand.u32 2147483648, %v14084_v2  ;;  %v17224_v54 = vld [vmem:[#allocation85_spill] sm:$0xff] }
 0x751   : > { %8370 = vrcp.f32 %v14157_v33  ;;  %v5550_v61 = vadd.f32 0.2548296, %v5488_v44  ;;  %v5303_v29 = vadd.f32 1.4214138, %v5241_v62  ;;  %vm6046_vm2 = vcmp.ge.f32.partialorder %v13786_v6, 0.0 }
 0x752   : > { %v4583_v55 = vsub.f32 1.0, %v4582_v0  ;;  %vm4587_vm3 = vweird.f32 %v14135_v48  ;;  %v5831_v21 = vmul.f32 1.442695, %v5740_v16  ;;  %7973 = vmatmul.msk.f32.gmra.mxu0 %vm3326_vm6, %v6293_v4  ;;  %v14196_v5 = vmul.f32 0.70710677, %v14166_v34 }
 0x753   : > { %vm4576_vm4 = vcmp.eq.f32.partialorder %v4575_v42, 8.507059e+37  ;;  %v5679_v60 = vsub.f32 0.0, %v14097_v41  ;;  %v5612_v13 = vmul.f32 %v5550_v61, %v14075_v32  ;;  %v5365_v14 = vmul.f32 %v5303_v29, %v14142_v58  ;;  %v14221_v29 = vpop.f32.mrf.mxu3 }
 0x754   : > { %v14202_v3 = vsel %vm4576_vm4, %v14054_v11, %v4574_v15  ;;  %vm4586_vm5 = vweird.f32 %v14067_v23  ;;  %v4598_v25 = vsub.f32 1.0, %v4597_v31  ;;  %v4068_v16 = vmul.f32 0.3275911, %v4006_v52 }
 0x755   : > { %v5118_v0 = vmul.f32 1.0614054, %v14202_v3  ;;  %v17225_v45 = vfloor.f32 %v17224_v54  ;;  %v14209_v42 = vpop.eup %8368  ;;  %v5922_v32 = vmul.f32 %v14000_v17, %v5612_v13  ;;  %v5427_v44 = vadd.f32 -0.28449672, %v5365_v14  ;;  %vm14263_vm0 = vmor %vm4586_vm5, %vm4587_vm3 }
 0x756   : > { %v6788_v11 = vmul.f32 %v6626_v27, %v12943_v8  ;;  %v4584_v4 = vmul.f32 %v14135_v48, %v4583_v55  ;;  %v14215_v15 = vor.u32 1.1754944e-38, %v4607_v28  ;;  %v14218_v31 = vand.u32 2147483647, %v14196_v5  ;;  %v17226_v27 = vld [vmem:[#allocation104_spill] sm:$0xff] }
 0x757   : > { %vm2975_vm8 = vcmp.eq.f32.partialorder %v17225_v45, %v12104_v19  ;;  %v5180_v61 = vadd.f32 -1.4531521, %v5118_v0  ;;  %v14223_v54 = vpop.eup %8370  ;;  %8372 = vpow2.f32 %v5831_v21  ;;  %v5741_v17 = vmul.f32 %v5679_v60, %v14097_v41 }
 0x758   : > { %v7852_v62 = vsel %vm2975_vm8, 1.0, %v16589_v47  ;;  %v5984_v13 = vsub.f32 1.0, %v5922_v32  ;;  %v5489_v8 = vmul.f32 %v5427_v44, %v14142_v58  ;;  %8023 = vmatmul.msk.f32.gmra.mxu1 %vm3326_vm6, %v6788_v11  ;;  %8085 = vmatmul.msk.f32.gmra.mxu2 %vm3326_vm6, %v6788_v11  ;;  %v4599_v28 = vmul.f32 %v14147_v10, %v4598_v25 }
 0x759   : > { %7922 = vmatmul.msk.f32.gmra.mxu3 %vm3399_vm7, %v7852_v62  ;;  %v14231_v55 = vmul.f32 0.5, %v14041_v22  ;;  %v5680_v14 = vsub.f32 0.0, %v4006_v52  ;;  %v14235_v0 = vmul.f32 %v14086_v7, %v17226_v27  ;;  %v14237_v21 = vadd.f32 1.0, %v4068_v16 }
 0x75a   : > { %v6108_v41 = vsub.f32 0.0, %v5984_v13  ;;  %v5551_v60 = vadd.f32 0.2548296, %v5489_v8  ;;  %v5242_v45 = vmul.f32 %v5180_v61, %v14202_v3  ;;  %vm6047_vm11 = vcmp.ge.f32.partialorder %v13842_v37, 0.0 }
 0x75b   : > { %17227 = vst [vmem:[#allocation71_spill] sm:$0xff] %v14235_v0  ;;  %vm4602_vm12 = vweird.f32 %v14147_v10  ;;  %v4612_v25 = vmul.f32 %v14223_v54, %v14157_v33  ;;  %v4622_v32 = vand.u32 2147483648, %v14157_v33  ;;  %v4069_v44 = vmul.f32 0.3275911, %v14218_v31 }
 0x75c   : > { %v4585_v7 = vadd.f32 %v14135_v48, %v4584_v4  ;;  %v5833_v62 = vmul.f32 1.442695, %v5741_v17  ;;  %v6170_v16 = vsel %vm6046_vm2, %v5984_v13, %v6108_v41  ;;  %v5613_v11 = vmul.f32 %v5551_v60, %v14142_v58 }
 0x75d   : > { %v5304_v61 = vadd.f32 1.4214138, %v5242_v45  ;;  %vm4601_vm14 = vweird.f32 %v14084_v2  ;;  %v14252_v8 = vmul.f32 0.5, %v14128_v39  ;;  %v5742_v27 = vmul.f32 %v5680_v14, %v4006_v52  ;;  %v14257_v57 = vpop.eup %8372 }
 0x75e   : > { %v6232_v22 = vadd.f32 1.0, %v6170_v16  ;;  %v14255_v36 = vmul.f32 0.70710677, %v14235_v0  ;;  %8374 = vrcp.f32 %v14237_v21  ;;  %v5923_v58 = vmul.f32 %v14065_v24, %v5613_v11  ;;  %vm14316_vm2 = vmor %vm4601_vm14, %vm4602_vm12 }
 0x75f   : > { %v5366_v52 = vmul.f32 %v5304_v61, %v14202_v3  ;;  %v4590_v4 = vand.u32 2147483647, %v14067_v23  ;;  %v4613_v17 = vsub.f32 1.0, %v4612_v25  ;;  %v14271_v13 = vadd.f32 1.0, %v4069_v44  ;;  %v17230_v44 = vld [vmem:[#allocation26_spill] sm:$0xff] }
 0x760   : > { %v6294_v14 = vmul.f32 %v6232_v22, %v13922_v20  ;;  %v4589_v41 = vsel %vm14263_vm0, %v14135_v48, %v4585_v7  ;;  %v14277_v60 = vor.u32 1.1754944e-38, %v4622_v32  ;;  %8376 = vpow2.f32 %v5833_v62  ;;  %v6629_v22 = vpop.f32.mrf.mxu0  ;;  %v14285_v20 = vpop.f32.mrf.mxu3 }
 0x761   : > { %v5985_v45 = vsub.f32 1.0, %v5923_v58  ;;  %v5428_v16 = vadd.f32 -0.28449672, %v5366_v52  ;;  %vm4617_vm1 = vweird.f32 %v14223_v54  ;;  %v4637_v24 = vand.u32 2147483648, %v14237_v21 }
 0x762   : > { %7974 = vmatmul.msk.f32.gmra.mxu0 %vm3326_vm6, %v6294_v14  ;;  %v14283_v23 = vand.u32 2147483647, %v14255_v36  ;;  %vm4591_vm10 = vcmp.eq.f32.partialorder %v4590_v4, 8.507059e+37  ;;  %v17231_v7 = vfloor.f32 %v17230_v44  ;;  %v4614_v62 = vmul.f32 %v14223_v54, %v4613_v17  ;;  %v17236_v44 = vld [vmem:[#allocation42_spill] sm:$0xff] }
 0x763   : > { %v6109_v25 = vsub.f32 0.0, %v5985_v45  ;;  %v5490_v48 = vmul.f32 %v5428_v16, %v14202_v3  ;;  %v14289_v32 = vsel %vm4591_vm10, %v14179_v35, %v4589_v41  ;;  %vm4616_vm13 = vweird.f32 %v14157_v33 }
 0x764   : > { %vm2976_vm9 = vcmp.eq.f32.partialorder %v17231_v7, %v12104_v19  ;;  %v14296_v11 = vmul.f32 1.442695, %v5742_v27  ;;  %8378 = vrcp.f32 %v14271_v13  ;;  %v4600_v61 = vadd.f32 %v14147_v10, %v4599_v28  ;;  %v14300_v6 = vpop.eup %8374  ;;  %vm14367_vm5 = vmor %vm4616_vm13, %vm4617_vm1 }
 0x765   : > { %v6171_v35 = vsel %vm6047_vm11, %v5985_v45, %v6109_v25  ;;  %v5552_v58 = vadd.f32 0.2548296, %v5490_v48  ;;  %v5119_v52 = vmul.f32 1.0614054, %v14289_v32  ;;  %v4605_v4 = vand.u32 2147483647, %v14084_v2 }
 0x766   : > { %vm6048_vm15 = vcmp.ge.f32.partialorder %v13893_v26, 0.0  ;;  %v5681_v17 = vsub.f32 0.0, %v14218_v31  ;;  %v4070_v27 = vmul.f32 0.3275911, %v14283_v23  ;;  %v6233_v14 = vadd.f32 1.0, %v6171_v35  ;;  %v14310_v28 = vpop.eup %8376  ;;  %v17234_v45 = vld [vmem:[#allocation34_spill] sm:$0xff] }
 0x767   : > { %v7853_v41 = vsel %vm2976_vm9, 1.0, %v16589_v47  ;;  %v14322_v16 = vmul.f32 %v14154_v56, %v17234_v45  ;;  %v5614_v25 = vmul.f32 %v5552_v58, %v14202_v3  ;;  %v5181_v48 = vadd.f32 -1.4531521, %v5119_v52 }
 0x768   : > { %7923 = vmatmul.msk.f32.gmra.mxu3 %vm3399_vm7, %v7853_v41  ;;  %v6789_v7 = vmul.f32 %v6629_v22, %v17236_v44  ;;  %v4627_v35 = vmul.f32 %v14300_v6, %v14237_v21  ;;  %v14330_v2 = vmul.f32 0.5, %v14166_v34  ;;  %v6295_v39 = vmul.f32 %v6233_v14, %v13946_v38  ;;  %v14358_v37 = vpop.f32.mrf.mxu3 }
 0x769   : > { %17235 = vst [vmem:[#allocation74_spill] sm:$0xff] %v14322_v16  ;;  %v4604_v56 = vsel %vm14316_vm2, %v14147_v10, %v4600_v61  ;;  %v14336_v45 = vor.u32 1.1754944e-38, %v4637_v24  ;;  %v5924_v3 = vmul.f32 %v14101_v53, %v5614_v25  ;;  %v5243_v58 = vmul.f32 %v5181_v48, %v14289_v32  ;;  %v17237_v10 = vld [vmem:[#allocation86_spill] sm:$0xff]  ;;  %v17241_v48 = vld [vmem:[#allocation101_spill] sm:$0xff] }
 0x76a   : > { %vm4606_vm3 = vcmp.eq.f32.partialorder %v4605_v4, 8.507059e+37  ;;  %8024 = vmatmul.msk.f32.gmra.mxu1 %vm3326_vm6, %v6789_v7  ;;  %8086 = vmatmul.msk.f32.gmra.mxu2 %vm3326_vm6, %v6789_v7  ;;  %v14342_v22 = vpop.eup %8378  ;;  %v5743_v52 = vmul.f32 %v5681_v17, %v14218_v31  ;;  %v17238_v24 = vfloor.f32 %v17237_v10  ;;  %v4615_v53 = vadd.f32 %v14223_v54, %v4614_v62  ;;  %v6632_v17 = vpop.f32.mrf.mxu0 }
 0x76b   : > { %7975 = vmatmul.msk.f32.gmra.mxu0 %vm3326_vm6, %v6295_v39  ;;  %v14347_v38 = vsel %vm4606_vm3, %v14215_v15, %v4604_v56  ;;  %v14353_v61 = vadd.f32 1.0, %v4070_v27  ;;  %v14356_v4 = vmul.f32 0.70710677, %v14322_v16  ;;  %v5986_v14 = vsub.f32 1.0, %v5924_v3 }
 0x76c   : > { %vm2977_vm4 = vcmp.eq.f32.partialorder %v17238_v24, %v12104_v19  ;;  %v5305_v41 = vadd.f32 1.4214138, %v5243_v58  ;;  %v4628_v31 = vsub.f32 1.0, %v4627_v35  ;;  %v5120_v39 = vmul.f32 1.0614054, %v14347_v38 }
 0x76d   : > { %v7854_v15 = vsel %vm2977_vm4, 1.0, %v16589_v47  ;;  %v4620_v25 = vand.u32 2147483647, %v14157_v33  ;;  %v6110_v27 = vsub.f32 0.0, %v5986_v14  ;;  %v14373_v44 = vmul.f32 %v14221_v29, %v17241_v48 }
 0x76e   : > { %v5367_v7 = vmul.f32 %v5305_v41, %v14289_v32  ;;  %v6790_v35 = vmul.f32 %v6632_v17, %v13074_v51  ;;  %v4642_v56 = vmul.f32 %v14342_v22, %v14271_v13  ;;  %v4652_v3 = vand.u32 2147483648, %v14271_v13 }
 0x76f   : > { %17242 = vst [vmem:[#allocation77_spill] sm:$0xff] %v14373_v44  ;;  %v5182_v58 = vadd.f32 -1.4531521, %v5120_v39  ;;  %v4619_v33 = vsel %vm14367_vm5, %v14223_v54, %v4615_v53  ;;  %8380 = vrcp.f32 %v14353_v61  ;;  %v5682_v10 = vsub.f32 0.0, %v14283_v23 }
 0x770   : > { %v6172_v29 = vsel %vm6048_vm15, %v5986_v14, %v6110_v27  ;;  %v5429_v24 = vadd.f32 -0.28449672, %v5367_v7  ;;  %7924 = vmatmul.msk.f32.gmra.mxu3 %vm3399_vm7, %v7854_v15  ;;  %v14389_v51 = vand.u32 2147483647, %v14356_v4  ;;  %vm4621_vm8 = vcmp.eq.f32.partialorder %v4620_v25, 8.507059e+37  ;;  %v17243_v27 = vld [vmem:[#allocation28_spill] sm:$0xff] }
 0x771   : > { %v6234_v41 = vadd.f32 1.0, %v6172_v29  ;;  %v5244_v39 = vmul.f32 %v5182_v58, %v14347_v38  ;;  %8382 = vpow2.f32 %v14296_v11  ;;  %v14394_v54 = vmul.f32 0.70710677, %v14373_v44 }
 0x772   : > { %v5491_v53 = vmul.f32 %v5429_v24, %v14289_v32  ;;  %v14398_v26 = vsel %vm4621_vm8, %v14277_v60, %v4619_v33  ;;  %8025 = vmatmul.msk.f32.gmra.mxu1 %vm3326_vm6, %v6790_v35  ;;  %8087 = vmatmul.msk.f32.gmra.mxu2 %vm3326_vm6, %v6790_v35  ;;  %v4629_v14 = vmul.f32 %v14300_v6, %v4628_v31  ;;  %vm4632_vm11 = vweird.f32 %v14300_v6 }
 0x773   : > { %v5837_v15 = vmul.f32 1.442695, %v5743_v52  ;;  %v6296_v17 = vmul.f32 %v6234_v41, %v14011_v46  ;;  %v5744_v11 = vmul.f32 %v5682_v10, %v14283_v23  ;;  %v5306_v62 = vadd.f32 1.4214138, %v5244_v39  ;;  %v6635_v23 = vpop.f32.mrf.mxu0 }
 0x774   : > { %v5553_v25 = vadd.f32 0.2548296, %v5491_v53  ;;  %v17244_v48 = vfloor.f32 %v17243_v27  ;;  %vm6049_vm14 = vcmp.ge.f32.partialorder %v13988_v63, 0.0  ;;  %vm4631_vm0 = vweird.f32 %v14237_v21 }
 0x775   : > { %v4643_v60 = vsub.f32 1.0, %v4642_v56  ;;  %v14411_v7 = vor.u32 1.1754944e-38, %v4652_v3  ;;  %v4071_v31 = vmul.f32 0.3275911, %v14389_v51  ;;  %7976 = vmatmul.msk.f32.gmra.mxu0 %vm3326_vm6, %v6296_v17  ;;  %v5121_v46 = vmul.f32 1.0614054, %v14398_v26  ;;  %v14416_v52 = vpop.eup %8380  ;;  %v3717_v3 = vpop.f32.mrf.mxu3  ;;  %vm4633_vm13 = vmor %vm4631_vm0, %vm4632_vm11 }
 0x776   : > { %vm2978_vm12 = vcmp.eq.f32.partialorder %v17244_v48, %v12104_v19  ;;  %v14419_v35 = vand.u32 2147483647, %v14394_v54  ;;  %v5615_v58 = vmul.f32 %v5553_v25, %v14289_v32  ;;  %v5368_v33 = vmul.f32 %v5306_v62, %v14347_v38 }
 0x777   : > { %v7855_v56 = vsel %vm2978_vm12, 1.0, %v16589_v47  ;;  %8384 = vpow2.f32 %v5837_v15  ;;  %v14425_v10 = vmul.f32 0.5, %v14235_v0  ;;  %v5183_v29 = vadd.f32 -1.4531521, %v5121_v46  ;;  %v14428_v41 = vpop.eup %8382 }
 0x778   : > { %v6791_v24 = vmul.f32 %v6635_v23, %v13114_v12  ;;  %vm4647_vm1 = vweird.f32 %v14342_v22  ;;  %v5839_v39 = vmul.f32 1.442695, %v5744_v11  ;;  %v5925_v53 = vmul.f32 %v14209_v42, %v5615_v58  ;;  %7925 = vmatmul.msk.f32.gmra.mxu3 %vm3399_vm7, %v7855_v56  ;;  %v17245_v12 = vld [vmem:[#allocation35_spill] sm:$0xff] }
 0x779   : > { %v5430_v32 = vadd.f32 -0.28449672, %v5368_v33  ;;  %vm4646_vm10 = vweird.f32 %v14271_v13  ;;  %v4657_v15 = vmul.f32 %v14416_v52, %v14353_v61  ;;  %v14436_v17 = vadd.f32 1.0, %v4071_v31 }
 0x77a   : > { %v5245_v25 = vmul.f32 %v5183_v29, %v14398_v26  ;;  %v14440_v62 = vmul.f32 %v3717_v3, %v17245_v12  ;;  %v4644_v27 = vmul.f32 %v14342_v22, %v4643_v60  ;;  %v4072_v11 = vmul.f32 0.3275911, %v14419_v35  ;;  %8026 = vmatmul.msk.f32.gmra.mxu1 %vm3326_vm6, %v6791_v24  ;;  %8088 = vmatmul.msk.f32.gmra.mxu2 %vm3326_vm6, %v6791_v24  ;;  %vm14490_vm2 = vmor %vm4646_vm10, %vm4647_vm1 }
 0x77b   : > { %v5987_v42 = vsub.f32 1.0, %v5925_v53  ;;  %v5492_v48 = vmul.f32 %v5430_v32, %v14347_v38  ;;  %v4667_v46 = vand.u32 2147483648, %v14353_v61  ;;  %v14449_v31 = vmul.f32 0.5, %v14322_v16 }
 0x77c   : > { %v4630_v23 = vadd.f32 %v14300_v6, %v4629_v14  ;;  %v4635_v58 = vand.u32 2147483647, %v14237_v21  ;;  %8386 = vpow2.f32 %v5839_v39  ;;  %v5307_v56 = vadd.f32 1.4214138, %v5245_v25 }
 0x77d   : > { %v6111_v60 = vsub.f32 0.0, %v5987_v42  ;;  %v5554_v33 = vadd.f32 0.2548296, %v5492_v48  ;;  %v14453_v3 = vpop.eup %8384  ;;  %vm6050_vm9 = vcmp.ge.f32.partialorder %v14004_v59, 0.0  ;;  %v4658_v29 = vsub.f32 1.0, %v4657_v15 }
 0x77e   : > { %8388 = vrcp.f32 %v14436_v17  ;;  %v5683_v24 = vsub.f32 0.0, %v14389_v51  ;;  %v14459_v53 = vmul.f32 0.70710677, %v14440_v62  ;;  %v14465_v14 = vadd.f32 1.0, %v4072_v11 }
 0x77f   : > { %v6173_v39 = vsel %vm6049_vm14, %v5987_v42, %v6111_v60  ;;  %v5616_v32 = vmul.f32 %v5554_v33, %v14347_v38  ;;  %v5369_v15 = vmul.f32 %v5307_v56, %v14398_v26  ;;  %v4634_v48 = vsel %vm4633_vm13, %v14300_v6, %v4630_v23 }
 0x780   : > { %v6235_v25 = vadd.f32 1.0, %v6173_v39  ;;  %v14472_v12 = vand.u32 2147483647, %v14459_v53  ;;  %vm4636_vm15 = vcmp.eq.f32.partialorder %v4635_v58, 8.507059e+37  ;;  %v4645_v63 = vadd.f32 %v14342_v22, %v4644_v27  ;;  %v17248_v39 = vld [vmem:[#allocation20_spill] sm:$0xff] }
 0x781   : > { %v5926_v16 = vmul.f32 %v14257_v57, %v5616_v32  ;;  %v5431_v21 = vadd.f32 -0.28449672, %v5369_v15  ;;  %v14477_v11 = vsel %vm4636_vm15, %v14336_v45, %v4634_v48  ;;  %v4650_v33 = vand.u32 2147483647, %v14271_v13 }
 0x782   : > { %v6297_v42 = vmul.f32 %v6235_v25, %v14081_v30  ;;  %v4075_v38 = vmul.f32 0.3275911, %v14472_v12  ;;  %v5122_v60 = vmul.f32 1.0614054, %v14477_v11  ;;  %v14484_v56 = vpop.eup %8386  ;;  %vm4661_vm3 = vweird.f32 %v14353_v61 }
 0x783   : > { %8390 = vrcp.f32 %v14465_v14  ;;  %v5988_v30 = vsub.f32 1.0, %v5926_v16  ;;  %v5493_v6 = vmul.f32 %v5431_v21, %v14398_v26  ;;  %v4659_v27 = vmul.f32 %v14416_v52, %v4658_v29 }
 0x784   : > { %v14497_v45 = vpop.eup %8388  ;;  %7977 = vmatmul.msk.f32.gmra.mxu0 %vm3326_vm6, %v6297_v42  ;;  %v14501_v23 = vadd.f32 1.0, %v4075_v38  ;;  %v5184_v13 = vadd.f32 -1.4531521, %v5122_v60  ;;  %v4649_v58 = vsel %vm14490_vm2, %v14342_v22, %v4645_v63  ;;  %v14508_v32 = vmul.f32 %v14285_v20, %v17248_v39 }
 0x785   : > { %v6112_v16 = vsub.f32 0.0, %v5988_v30  ;;  %v5555_v15 = vadd.f32 0.2548296, %v5493_v6  ;;  %vm4651_vm4 = vcmp.eq.f32.partialorder %v4650_v33, 8.507059e+37  ;;  %vm6051_vm5 = vcmp.ge.f32.partialorder %v14071_v49, 0.0 }
 0x786   : > { %17249 = vst [vmem:[#allocation80_spill] sm:$0xff] %v14508_v32  ;;  %v4668_v25 = vor.u32 1.1754944e-38, %v4667_v46  ;;  %v5745_v29 = vmul.f32 %v5683_v24, %v14389_v51  ;;  %8392 = vrcp.f32 %v14501_v23  ;;  %v14514_v48 = vsel %vm4651_vm4, %v14411_v7, %v4649_v58 }
 0x787   : > { %v4682_v21 = vand.u32 2147483648, %v14436_v17  ;;  %v5684_v22 = vsub.f32 0.0, %v14419_v35  ;;  %v6174_v20 = vsel %vm6050_vm9, %v5988_v30, %v6112_v16  ;;  %v5617_v63 = vmul.f32 %v5555_v15, %v14398_v26 }
 0x788   : > { %vm4662_vm8 = vweird.f32 %v14416_v52  ;;  %v4672_v46 = vmul.f32 %v14497_v45, %v14436_v17  ;;  %v6236_v51 = vadd.f32 1.0, %v6174_v20  ;;  %v5246_v24 = vmul.f32 %v5184_v13, %v14477_v11  ;;  %v17252_v20 = vld [vmem:[#allocation47_spill] sm:$0xff] }
 0x789   : > { %v14525_v42 = vpop.eup %8390  ;;  %v14528_v7 = vmul.f32 0.70710677, %v14508_v32  ;;  %v5927_v38 = vmul.f32 %v14310_v28, %v5617_v63  ;;  %v5123_v59 = vmul.f32 1.0614054, %v14514_v48  ;;  %v4660_v60 = vadd.f32 %v14416_v52, %v4659_v27  ;;  %vm14539_vm11 = vmor %vm4661_vm3, %vm4662_vm8 }
 0x78a   : > { %v14533_v26 = vmul.f32 1.442695, %v5745_v29  ;;  %v6298_v33 = vmul.f32 %v6236_v51, %v14139_v43  ;;  %v5308_v57 = vadd.f32 1.4214138, %v5246_v24  ;;  %v4665_v30 = vand.u32 2147483647, %v14353_v61 }
 0x78b   : > { %v14543_v13 = vor.u32 1.1754944e-38, %v4682_v21  ;;  %v5746_v28 = vmul.f32 %v5684_v22, %v14419_v35  ;;  %v5989_v58 = vsub.f32 1.0, %v5927_v38  ;;  %v5185_v39 = vadd.f32 -1.4531521, %v5123_v59  ;;  %v17254_v24 = vld [vmem:[#allocation100_spill] sm:$0xff] }
 0x78c   : > { %v14546_v27 = vpop.eup %8392  ;;  %v4673_v16 = vsub.f32 1.0, %v4672_v46  ;;  %v14550_v43 = vmul.f32 %v14525_v42, %v14465_v14  ;;  %7978 = vmatmul.msk.f32.gmra.mxu0 %vm3326_vm6, %v6298_v33  ;;  %v5370_v61 = vmul.f32 %v5308_v57, %v14477_v11  ;;  %v4664_v15 = vsel %vm14539_vm11, %v14416_v52, %v4660_v60  ;;  %v6854_v60 = vld [vmem:[%s16282_s8] sm:$0x3] }
 0x78d   : > { %v14558_v29 = vand.u32 2147483647, %v14528_v7  ;;  %v6113_v35 = vsub.f32 0.0, %v5989_v58  ;;  %v4732_v21 = vmul.f32 %v14546_v27, %v14501_v23  ;;  %vm4666_vm12 = vcmp.eq.f32.partialorder %v4665_v30, 8.507059e+37 }
 0x78e   : > { %v5432_v22 = vadd.f32 -0.28449672, %v5370_v61  ;;  %v17253_v63 = vfloor.f32 %v17252_v20  ;;  %v5247_v46 = vmul.f32 %v5185_v39, %v14514_v48  ;;  %v14566_v51 = vsel %vm4666_vm12, %v4668_v25, %v4664_v15  ;;  %v6638_v39 = vpop.f32.mrf.mxu0  ;;  %v7063_v61 = vpop.f32.mrf.mxu1 }
 0x78f   : > { %v14570_v52 = vmul.f32 %v14358_v37, %v17254_v24  ;;  %v6175_v38 = vsel %vm6051_vm5, %v5989_v58, %v6113_v35  ;;  %v5124_v33 = vmul.f32 1.0614054, %v14566_v51  ;;  %v14581_v25 = vperm.slane %v6854_v60, 0  ;;  %v3720_v24 = vpop.f32.mrf.mxu3 }
 0x790   : > { %vm2979_vm14 = vcmp.eq.f32.partialorder %v17253_v63, %v12104_v19  ;;  %v6237_v57 = vadd.f32 1.0, %v6175_v38  ;;  %v5494_v30 = vmul.f32 %v5432_v22, %v14477_v11  ;;  %v5309_v37 = vadd.f32 1.4214138, %v5247_v46 }
 0x791   : > { %17255 = vst [vmem:[#allocation83_spill] sm:$0xff] %v14570_v52  ;;  %v7856_v59 = vsel %vm2979_vm14, 1.0, %v16589_v47  ;;  %v14584_v6 = vmul.f32 0.5, %v14373_v44  ;;  %v4733_v58 = vsub.f32 1.0, %v4732_v21  ;;  %v5186_v15 = vadd.f32 -1.4531521, %v5124_v33 }
 0x792   : > { %7926 = vmatmul.msk.f32.gmra.mxu3 %vm3399_vm7, %v7856_v59  ;;  %v6299_v35 = vmul.f32 %v6237_v57, %v14231_v55  ;;  %v5556_v20 = vadd.f32 0.2548296, %v5494_v30  ;;  %v6792_v22 = vmul.f32 %v6638_v39, %v13173_v18  ;;  %v7064_v63 = vadd.f32 %v7063_v61, %v14581_v25  ;;  %v17256_v59 = vld [vmem:[#allocation98_spill] sm:$0xff]  ;;  %v17257_v61 = vld [vmem:[#allocation97_spill] sm:$0xff] }
 0x793   : > { %vm6052_vm0 = vcmp.ge.f32.partialorder %v14151_v40, 0.0  ;;  %v14591_v46 = vmul.f32 1.442695, %v5746_v28  ;;  %v4073_v38 = vmul.f32 0.3275911, %v14558_v29  ;;  %v14595_v21 = vmul.f32 %v3720_v24, %v17256_v59  ;;  %v7266_v24 = vpop.f32.mrf.mxu2 }
 0x794   : > { %v5371_v33 = vmul.f32 %v5309_v37, %v14514_v48  ;;  %v4674_v49 = vmul.f32 %v14497_v45, %v4673_v16  ;;  %v14601_v18 = vmul.f32 0.70710677, %v14570_v52  ;;  %7979 = vmatmul.msk.f32.gmra.mxu0 %vm3326_vm6, %v6299_v35  ;;  %v5618_v57 = vmul.f32 %v5556_v20, %v14477_v11  ;;  %7452 = vst [vmem:[%s14607_s14] sm:$0xff] %v7064_v63 }
 0x795   : > { %8027 = vmatmul.msk.f32.gmra.mxu1 %vm3326_vm6, %v6792_v22  ;;  %vm4677_vm1 = vweird.f32 %v14497_v45  ;;  %v5685_v28 = vsub.f32 0.0, %v14558_v29  ;;  %v4734_v16 = vmul.f32 %v14546_v27, %v4733_v58  ;;  %v14615_v30 = vmul.f32 0.70710677, %v14595_v21  ;;  %8089 = vmatmul.msk.f32.gmra.mxu2 %vm3326_vm6, %v6792_v22 }
 0x796   : > { %v5433_v37 = vadd.f32 -0.28449672, %v5371_v33  ;;  %v5928_v11 = vmul.f32 %v14428_v41, %v5618_v57  ;;  %v14619_v39 = vperm.slane %v6854_v60, 1  ;;  %v17258_v35 = vfloor.f32 %v17257_v61  ;;  %v6641_v61 = vpop.f32.mrf.mxu0 }
 0x797   : > { %v5248_v20 = vmul.f32 %v5186_v15, %v14566_v51  ;;  %vm4676_vm9 = vweird.f32 %v14436_v17  ;;  %v14626_v63 = vadd.f32 1.0, %v4073_v38  ;;  %v14629_v58 = vand.u32 2147483647, %v14615_v30 }
 0x798   : > { %vm2980_vm10 = vcmp.eq.f32.partialorder %v17258_v35, %v12104_v19  ;;  %v5495_v22 = vmul.f32 %v5433_v37, %v14514_v48  ;;  %v14634_v60 = vand.u32 2147483647, %v14601_v18  ;;  %v4742_v59 = vand.u32 2147483648, %v14501_v23  ;;  %v7066_v35 = vpop.f32.mrf.mxu1  ;;  %vm14684_vm5 = vmor %vm4676_vm9, %vm4677_vm1 }
 0x799   : > { %v7857_v41 = vsel %vm2980_vm10, 1.0, %v16589_v47  ;;  %v5990_v33 = vsub.f32 1.0, %v5928_v11  ;;  %v7267_v15 = vadd.f32 %v7266_v24, %v14619_v39  ;;  %v4735_v38 = vadd.f32 %v14546_v27, %v4734_v16 }
 0x79a   : > { %7927 = vmatmul.msk.f32.gmra.mxu3 %vm3399_vm7, %v7857_v41  ;;  %vm4737_vm13 = vweird.f32 %v14546_v27  ;;  %v4076_v57 = vmul.f32 0.3275911, %v14629_v58  ;;  %v5557_v37 = vadd.f32 0.2548296, %v5495_v22  ;;  %v6793_v44 = vmul.f32 %v6641_v61, %v13238_v9  ;;  %v3723_v41 = vpop.f32.mrf.mxu3  ;;  %v17265_v9 = vld [vmem:[#allocation19_spill] sm:$0xff] }
 0x79b   : > { %v6114_v55 = vsub.f32 0.0, %v5990_v33  ;;  %7453 = vst [vmem:[%s14607_s14 + $0x8] sm:$0xff] %v7267_v15  ;;  %v7067_v11 = vadd.f32 %v7066_v35, %v14581_v25  ;;  %v5310_v0 = vadd.f32 1.4214138, %v5248_v20  ;;  %vm6053_vm15 = vcmp.ge.f32.partialorder %v14196_v5, 0.0 }
 0x79c   : > { %vm4736_vm2 = vweird.f32 %v14501_v23  ;;  %v4740_v16 = vand.u32 2147483647, %v14501_v23  ;;  %v14648_v24 = vadd.f32 1.0, %v4076_v57  ;;  %v5619_v22 = vmul.f32 %v5557_v37, %v14514_v48  ;;  %v17261_v23 = vld [vmem:[#allocation18_spill] sm:$0xff] }
 0x79d   : > { %v5747_v34 = vmul.f32 %v5685_v28, %v14558_v29  ;;  %v4074_v15 = vmul.f32 0.3275911, %v14634_v60  ;;  %vm14655_vm3 = vmor %vm4736_vm2, %vm4737_vm13  ;;  %v6176_v20 = vsel %vm6052_vm0, %v5990_v33, %v6114_v55  ;;  %7454 = vst [vmem:[%s14607_s14 + $0x10] sm:$0xff] %v7067_v11  ;;  %v14663_v57 = vmul.f32 %v3723_v41, %v17261_v23  ;;  %8028 = vmatmul.msk.f32.gmra.mxu1 %vm3326_vm6, %v6793_v44 }
 0x79e   : > { %v4739_v48 = vsel %vm14655_vm3, %v14546_v27, %v4735_v38  ;;  %v6238_v29 = vadd.f32 1.0, %v6176_v20  ;;  %8394 = vrcp.f32 %v14648_v24  ;;  %8090 = vmatmul.msk.f32.gmra.mxu2 %vm3326_vm6, %v6793_v44  ;;  %v4675_v28 = vadd.f32 %v14497_v45, %v4674_v49  ;;  %v7269_v38 = vpop.f32.mrf.mxu2 }
 0x79f   : > { %8396 = vrcp.f32 %v14626_v63  ;;  %v4743_v40 = vor.u32 1.1754944e-38, %v4742_v59  ;;  %v5929_v55 = vmul.f32 %v14453_v3, %v5619_v22  ;;  %v5372_v33 = vmul.f32 %v5310_v0, %v14566_v51 }
 0x7a0   : > { %v4712_v37 = vand.u32 2147483648, %v14626_v63  ;;  %vm4741_vm4 = vcmp.eq.f32.partialorder %v4740_v16, 8.507059e+37  ;;  %v6300_v61 = vmul.f32 %v6238_v29, %v14252_v8  ;;  %v14678_v27 = vmul.f32 0.70710677, %v14663_v57  ;;  %v6644_v16 = vpop.f32.mrf.mxu0 }
 0x7a1   : > { %v5845_v3 = vmul.f32 1.442695, %v5747_v34  ;;  %v14688_v49 = vsel %vm4741_vm4, %v4743_v40, %v4739_v48  ;;  %v5991_v0 = vsub.f32 1.0, %v5929_v55  ;;  %v4680_v59 = vand.u32 2147483647, %v14436_v17 }
 0x7a2   : > { %17262 = vst [vmem:[#allocation88_spill] sm:$0xff] %v14678_v27  ;;  %v14691_v8 = vadd.f32 1.0, %v4074_v15  ;;  %7980 = vmatmul.msk.f32.gmra.mxu0 %vm3326_vm6, %v6300_v61  ;;  %v14695_v35 = vand.u32 2147483647, %v14678_v27  ;;  %v7270_v11 = vadd.f32 %v7269_v38, %v14619_v39  ;;  %v4679_v34 = vsel %vm14684_vm5, %v14497_v45, %v4675_v28  ;;  %v7069_v45 = vpop.f32.mrf.mxu1  ;;  %v3726_v28 = vpop.f32.mrf.mxu3  ;;  %v17275_v27 = vld [vmem:[#allocation64_spill] sm:$0xff] }
 0x7a3   : > { %v6115_v22 = vsub.f32 0.0, %v5991_v0  ;;  %v5434_v41 = vadd.f32 -0.28449672, %v5372_v33  ;;  %v17266_v20 = vfloor.f32 %v17265_v9  ;;  %v6794_v17 = vmul.f32 %v6644_v16, %v13295_v50 }
 0x7a4   : > { %v14705_v15 = vpop.eup %8394  ;;  %8398 = vpow2.f32 %v14533_v26  ;;  %v5129_v23 = vmul.f32 1.0614054, %v14688_v49  ;;  %v4077_v48 = vmul.f32 0.3275911, %v14695_v35  ;;  %7455 = vst [vmem:[%s14607_s14 + $0x18] sm:$0xff] %v7270_v11  ;;  %vm4681_vm11 = vcmp.eq.f32.partialorder %v4680_v59, 8.507059e+37 }
 0x7a5   : > { %vm2981_vm8 = vcmp.eq.f32.partialorder %v17266_v20, %v12104_v19  ;;  %v14712_v40 = vpop.eup %8396  ;;  %v4747_v55 = vmul.f32 %v14705_v15, %v14648_v24  ;;  %v6177_v50 = vsel %vm6053_vm15, %v5991_v0, %v6115_v22  ;;  %v5496_v33 = vmul.f32 %v5434_v41, %v14566_v51  ;;  %8029 = vmatmul.msk.f32.gmra.mxu1 %vm3326_vm6, %v6794_v17  ;;  %v17267_v11 = vld [vmem:[#allocation96_spill] sm:$0xff] }
 0x7a6   : > { %v7858_v29 = vsel %vm2981_vm8, 1.0, %v16589_v47  ;;  %8400 = vrcp.f32 %v14691_v8  ;;  %v6239_v26 = vadd.f32 1.0, %v6177_v50  ;;  %v14722_v61 = vadd.f32 1.0, %v4077_v48  ;;  %8091 = vmatmul.msk.f32.gmra.mxu2 %vm3326_vm6, %v6794_v17 }
 0x7a7   : > { %7928 = vmatmul.msk.f32.gmra.mxu3 %vm3399_vm7, %v7858_v29  ;;  %v14725_v38 = vsel %vm4681_vm11, %v14543_v13, %v4679_v34  ;;  %v4748_v5 = vsub.f32 1.0, %v4747_v55  ;;  %v5558_v44 = vadd.f32 0.2548296, %v5496_v33  ;;  %v7070_v0 = vadd.f32 %v7069_v45, %v14581_v25 }
 0x7a8   : > { %v14730_v16 = vmul.f32 %v3726_v28, %v17267_v11  ;;  %v5686_v59 = vsub.f32 0.0, %v14634_v60  ;;  %v5191_v22 = vadd.f32 -1.4531521, %v5129_v23  ;;  %v6301_v41 = vmul.f32 %v6239_v26, %v14330_v2 }
 0x7a9   : > { %8402 = vrcp.f32 %v14722_v61  ;;  %vm6054_vm12 = vcmp.ge.f32.partialorder %v14255_v36, 0.0  ;;  %v17269_v13 = vand.u32 2147483648, %v14465_v14  ;;  %v4749_v9 = vmul.f32 %v14705_v15, %v4748_v5  ;;  %7456 = vst [vmem:[%s14607_s14 + $0x20] sm:$0xff] %v7070_v0 }
 0x7aa   : > { %17268 = vst [vmem:[#allocation90_spill] sm:$0xff] %v14730_v16  ;;  %8404 = vpow2.f32 %v14591_v46  ;;  %v5125_v20 = vmul.f32 1.0614054, %v14725_v38  ;;  %v14744_v17 = vpop.eup %8398  ;;  %v14747_v23 = vmul.f32 0.5, %v14508_v32  ;;  %v14751_v2 = vmul.f32 %v14712_v40, %v14626_v63  ;;  %7981 = vmatmul.msk.f32.gmra.mxu0 %vm3326_vm6, %v6301_v41 }
 0x7ab   : > { %v14738_v34 = vor.u32 1.1754944e-38, %v17269_v13  ;;  %v5620_v48 = vmul.f32 %v5558_v44, %v14566_v51  ;;  %v14756_v46 = vmul.f32 0.70710677, %v14730_v16  ;;  %v17271_v29 = vsub.f32 1.0, %v14550_v43 }
 0x7ac   : > { %vm4692_vm14 = vweird.f32 %v14525_v42  ;;  %v14762_v28 = vor.u32 1.1754944e-38, %v4712_v37  ;;  %8406 = vpow2.f32 %v5845_v3  ;;  %v14765_v55 = vmul.f32 0.5, %v14570_v52  ;;  %v14767_v50 = vpop.eup %8400 }
 0x7ad   : > { %17270 = vst [vmem:[#allocation32_spill] sm:$0xff] %v14756_v46  ;;  %v4689_v45 = vmul.f32 %v14525_v42, %v17271_v29  ;;  %v14770_v33 = vmul.f32 %v5686_v59, %v14634_v60  ;;  %v5253_v51 = vmul.f32 %v5191_v22, %v14688_v49  ;;  %v5930_v26 = vmul.f32 %v14484_v56, %v5620_v48 }
 0x7ae   : > { %17272 = vst [vmem:[#allocation12_spill] sm:$0xff] %v14765_v55  ;;  %v14775_v43 = vand.u32 2147483647, %v14756_v46  ;;  %vm4691_vm0 = vweird.f32 %v14465_v14  ;;  %v4750_v3 = vadd.f32 %v14705_v15, %v4749_v9  ;;  %vm4752_vm1 = vweird.f32 %v14705_v15 }
 0x7af   : > { %v5187_v5 = vadd.f32 -1.4531521, %v5125_v20  ;;  %v14781_v44 = vpop.eup %8402  ;;  %v4757_v0 = vand.u32 2147483648, %v14648_v24  ;;  %v5992_v11 = vsub.f32 1.0, %v5930_v26  ;;  %v14790_v22 = vmul.f32 %v14767_v50, %v14691_v8  ;;  %vm14834_vm3 = vmor %vm4691_vm0, %vm4692_vm14 }
 0x7b0   : > { %v4078_v56 = vmul.f32 0.3275911, %v14775_v43  ;;  %v14786_v59 = vpop.eup %8404  ;;  %vm4751_vm10 = vweird.f32 %v14648_v24  ;;  %v4755_v41 = vand.u32 2147483647, %v14648_v24  ;;  %v4762_v13 = vmul.f32 %v14781_v44, %v14722_v61 }
 0x7b1   : > { %v5315_v9 = vadd.f32 1.4214138, %v5253_v51  ;;  %vm14796_vm9 = vmor %vm4751_vm10, %vm4752_vm1  ;;  %v6116_v48 = vsub.f32 0.0, %v5992_v11  ;;  %v5249_v26 = vmul.f32 %v5187_v5, %v14725_v38  ;;  %v5687_v60 = vsub.f32 0.0, %v14472_v12 }
 0x7b2   : > { %v14800_v29 = vadd.f32 1.0, %v4078_v56  ;;  %v14803_v37 = vpop.eup %8406  ;;  %v4754_v24 = vsel %vm14796_vm9, %v14705_v15, %v4750_v3  ;;  %v4763_v52 = vsub.f32 1.0, %v4762_v13  ;;  %v4690_v51 = vadd.f32 %v14525_v42, %v4689_v45  ;;  %v7272_v56 = vpop.f32.mrf.mxu2 }
 0x7b3   : > { %v4758_v32 = vor.u32 1.1754944e-38, %v4757_v0  ;;  %v6178_v16 = vsel %vm6054_vm12, %v5992_v11, %v6116_v48  ;;  %v4695_v5 = vand.u32 2147483647, %v14465_v14  ;;  %vm4756_vm13 = vcmp.eq.f32.partialorder %v4755_v41, 8.507059e+37  ;;  %v6647_v11 = vpop.f32.mrf.mxu0  ;;  %v3729_v13 = vpop.f32.mrf.mxu3 }
 0x7b4   : > { %8408 = vrcp.f32 %v14800_v29  ;;  %v4764_v55 = vmul.f32 %v14781_v44, %v4763_v52  ;;  %v6240_v46 = vadd.f32 1.0, %v6178_v16  ;;  %v17276_v20 = vfloor.f32 %v17275_v27  ;;  %v7072_v16 = vpop.f32.mrf.mxu1 }
 0x7b5   : > { %v5377_v45 = vmul.f32 %v5315_v9, %v14688_v49  ;;  %v14823_v36 = vsel %vm4756_vm13, %v4758_v32, %v4754_v24  ;;  %v4770_v3 = vand.u32 2147483647, %v14722_v61  ;;  %v5311_v0 = vadd.f32 1.4214138, %v5249_v26 }
 0x7b6   : > { %vm14818_vm15 = vcmp.eq.f32.partialorder %v17276_v20, %v12104_v19  ;;  %v4765_v41 = vadd.f32 %v14781_v44, %v4764_v55  ;;  %vm4767_vm2 = vweird.f32 %v14781_v44  ;;  %v6302_v52 = vmul.f32 %v6240_v46, %v14425_v10  ;;  %v17283_v20 = vld [vmem:[#allocation94_spill] sm:$0xff] }
 0x7b7   : > { %v7273_v27 = vadd.f32 %v7272_v56, %v14619_v39  ;;  %v14839_v9 = vmul.f32 %v5687_v60, %v14472_v12  ;;  %v4772_v55 = vand.u32 2147483648, %v14722_v61  ;;  %v5373_v48 = vmul.f32 %v5311_v0, %v14725_v38 }
 0x7b8   : > { %v7859_v10 = vsel %vm14818_vm15, 1.0, %v16589_v47  ;;  %v5130_v46 = vmul.f32 1.0614054, %v14823_v36  ;;  %vm4766_vm4 = vweird.f32 %v14722_v61  ;;  %7982 = vmatmul.msk.f32.gmra.mxu0 %vm3326_vm6, %v6302_v52  ;;  %v6795_v14 = vmul.f32 %v6647_v11, %v13343_v1 }
 0x7b9   : > { %7457 = vst [vmem:[%s14607_s14 + $0x28] sm:$0xff] %v7273_v27  ;;  %7929 = vmatmul.msk.f32.gmra.mxu3 %vm3399_vm7, %v7859_v10  ;;  %v4694_v12 = vsel %vm14834_vm3, %v14525_v42, %v4690_v51  ;;  %v5439_v26 = vadd.f32 -0.28449672, %v5377_v45  ;;  %vm14857_vm5 = vmor %vm4766_vm4, %vm4767_vm2  ;;  %v5435_v61 = vadd.f32 -0.28449672, %v5373_v48  ;;  %v7073_v56 = vadd.f32 %v7072_v16, %v14581_v25 }
 0x7ba   : > { %v8409_v60 = vpop.eup %8408  ;;  %v14863_v15 = vmul.f32 %v3729_v13, %v17283_v20  ;;  %v4769_v1 = vsel %vm14857_vm5, %v14781_v44, %v4765_v41  ;;  %vm4771_vm8 = vcmp.eq.f32.partialorder %v4770_v3, 8.507059e+37  ;;  %vm4696_vm11 = vcmp.eq.f32.partialorder %v4695_v5, 8.507059e+37  ;;  %8030 = vmatmul.msk.f32.gmra.mxu1 %vm3326_vm6, %v6795_v14  ;;  %8092 = vmatmul.msk.f32.gmra.mxu2 %vm3326_vm6, %v6795_v14  ;;  %v7275_v13 = vpop.f32.mrf.mxu2 }
 0x7bb   : > { %v4777_v42 = vmul.f32 %v8409_v60, %v14800_v29  ;;  %v4773_v51 = vor.u32 1.1754944e-38, %v4772_v55  ;;  %v5497_v45 = vmul.f32 %v5435_v61, %v14725_v38  ;;  %7458 = vst [vmem:[%s14607_s14 + $0x30] sm:$0xff] %v7073_v56  ;;  %v14877_v11 = vsel %vm4696_vm11, %v14738_v34, %v4694_v12  ;;  %v17284_v55 = vld [vmem:[#allocation68_spill] sm:$0xff] }
 0x7bc   : > { %v14874_v0 = vmul.f32 0.70710677, %v14863_v15  ;;  %v5192_v52 = vadd.f32 -1.4531521, %v5130_v46  ;;  %vm4781_vm12 = vweird.f32 %v14800_v29  ;;  %v5126_v5 = vmul.f32 1.0614054, %v14877_v11 }
 0x7bd   : > { %v4778_v44 = vsub.f32 1.0, %v4777_v42  ;;  %v14881_v3 = vsel %vm4771_vm8, %v4773_v51, %v4769_v1  ;;  %v4787_v41 = vand.u32 2147483648, %v14800_v29  ;;  %v5559_v27 = vadd.f32 0.2548296, %v5497_v45 }
 0x7be   : > { %v14885_v16 = vand.u32 2147483647, %v14874_v0  ;;  %vm6055_vm14 = vcmp.ge.f32.partialorder %v14356_v4, 0.0  ;;  %vm4782_vm0 = vweird.f32 %v8409_v60  ;;  %v5188_v34 = vadd.f32 -1.4531521, %v5126_v5 }
 0x7bf   : > { %v4779_v32 = vmul.f32 %v8409_v60, %v4778_v44  ;;  %v17285_v48 = vfloor.f32 %v17284_v55  ;;  %v4785_v10 = vand.u32 2147483647, %v14800_v29  ;;  %v5621_v46 = vmul.f32 %v5559_v27, %v14725_v38  ;;  %vm14901_vm10 = vmor %vm4781_vm12, %vm4782_vm0 }
 0x7c0   : > { %v4079_v14 = vmul.f32 0.3275911, %v14885_v16  ;;  %v7276_v12 = vadd.f32 %v7275_v13, %v14619_v39  ;;  %v5254_v24 = vmul.f32 %v5192_v52, %v14823_v36  ;;  %v5131_v61 = vmul.f32 1.0614054, %v14881_v3 }
 0x7c1   : > { %vm2983_vm1 = vcmp.eq.f32.partialorder %v17285_v48, %v12104_v19  ;;  %v4780_v56 = vadd.f32 %v8409_v60, %v4779_v32  ;;  %v5250_v20 = vmul.f32 %v5188_v34, %v14877_v11  ;;  %v5688_v1 = vsub.f32 0.0, %v14629_v58 }
 0x7c2   : > { %v5931_v38 = vmul.f32 %v14744_v17, %v5621_v46  ;;  %v14906_v51 = vadd.f32 1.0, %v4079_v14  ;;  %7459 = vst [vmem:[%s14607_s14 + $0x38] sm:$0xff] %v7276_v12  ;;  %v7860_v45 = vsel %vm2983_vm1, 1.0, %v16589_v47  ;;  %vm4707_vm9 = vweird.f32 %v14712_v40 }
 0x7c3   : > { %v5501_v52 = vmul.f32 %v5439_v26, %v14688_v49  ;;  %v4784_v44 = vsel %vm14901_vm10, %v8409_v60, %v4780_v56  ;;  %v4788_v5 = vor.u32 1.1754944e-38, %v4787_v41  ;;  %v5312_v29 = vadd.f32 1.4214138, %v5250_v20  ;;  %7930 = vmatmul.msk.f32.gmra.mxu3 %vm3399_vm7, %v7860_v45 }
 0x7c4   : > { %v4718_v27 = vsub.f32 1.0, %v14790_v22  ;;  %vm4786_vm13 = vcmp.eq.f32.partialorder %v4785_v10, 8.507059e+37  ;;  %v5993_v17 = vsub.f32 1.0, %v5931_v38  ;;  %8410 = vrcp.f32 %v14906_v51  ;;  %v3732_v38 = vpop.f32.mrf.mxu3 }
 0x7c5   : > { %vm4706_vm15 = vweird.f32 %v14626_v63  ;;  %v5849_v13 = vmul.f32 1.442695, %v14839_v9  ;;  %v5316_v32 = vadd.f32 1.4214138, %v5254_v24  ;;  %v5193_v34 = vadd.f32 -1.4531521, %v5131_v61  ;;  %v6650_v24 = vpop.f32.mrf.mxu0  ;;  %v7075_v61 = vpop.f32.mrf.mxu1 }
 0x7c6   : > { %v14919_v26 = vsel %vm4786_vm13, %v4788_v5, %v4784_v44  ;;  %v14922_v60 = vmul.f32 1.442695, %v14770_v33  ;;  %v5750_v41 = vmul.f32 %v5688_v1, %v14629_v58  ;;  %v6117_v55 = vsub.f32 0.0, %v5993_v17  ;;  %v17290_v5 = vld [vmem:[#allocation38_spill] sm:$0xff]  ;;  %vm14963_vm3 = vmor %vm4706_vm15, %vm4707_vm9 }
 0x7c7   : > { %v5374_v22 = vmul.f32 %v5312_v29, %v14877_v11  ;;  %v17288_v48 = vsub.f32 1.0, %v14751_v2  ;;  %v17289_v46 = vand.u32 2147483648, %v14691_v8  ;;  %v5563_v9 = vadd.f32 0.2548296, %v5501_v52 }
 0x7c8   : > { %v5689_v12 = vsub.f32 0.0, %v14695_v35  ;;  %v14935_v33 = vmul.f32 %v14767_v50, %v4718_v27  ;;  %v5132_v58 = vmul.f32 1.0614054, %v14919_v26  ;;  %v6179_v56 = vsel %vm6055_vm14, %v5993_v17, %v6117_v55 }
 0x7c9   : > { %v4704_v10 = vmul.f32 %v14712_v40, %v17288_v48  ;;  %v14931_v14 = vor.u32 1.1754944e-38, %v17289_v46  ;;  %v5436_v2 = vadd.f32 -0.28449672, %v5374_v22  ;;  %8412 = vpow2.f32 %v5849_v13 }
 0x7ca   : > { %v5378_v20 = vmul.f32 %v5316_v32, %v14823_v36  ;;  %v5255_v1 = vmul.f32 %v5193_v34, %v14881_v3  ;;  %v6241_v42 = vadd.f32 1.0, %v6179_v56  ;;  %v8411_v45 = vpop.eup %8410  ;;  %v5851_v52 = vmul.f32 1.442695, %v5750_v41  ;;  %v17291_v41 = vld [vmem:[#allocation27_spill] sm:$0xff] }
 0x7cb   : > { %v5498_v44 = vmul.f32 %v5436_v2, %v14877_v11  ;;  %v6796_v29 = vmul.f32 %v6650_v24, %v17290_v5  ;;  %v7076_v27 = vadd.f32 %v7075_v61, %v14581_v25  ;;  %v5625_v4 = vmul.f32 %v5563_v9, %v14688_v49 }
 0x7cc   : > { %v5751_v17 = vmul.f32 %v5689_v12, %v14695_v35  ;;  %v6303_v13 = vmul.f32 %v6241_v42, %v14449_v31  ;;  %v4792_v32 = vmul.f32 %v8411_v45, %v14906_v51  ;;  %v5194_v55 = vadd.f32 -1.4531521, %v5132_v58 }
 0x7cd   : > { %v5690_v34 = vsub.f32 0.0, %v14775_v43  ;;  %v5560_v22 = vadd.f32 0.2548296, %v5498_v44  ;;  %7460 = vst [vmem:[%s14607_s14 + $0x40] sm:$0xff] %v7076_v27  ;;  %v14952_v48 = vmul.f32 %v3732_v38, %v17291_v41  ;;  %8031 = vmatmul.msk.f32.gmra.mxu1 %vm3326_vm6, %v6796_v29  ;;  %8093 = vmatmul.msk.f32.gmra.mxu2 %vm3326_vm6, %v6796_v29  ;;  %vm6056_vm2 = vcmp.ge.f32.partialorder %v14394_v54, 0.0 }
 0x7ce   : > { %v5440_v49 = vadd.f32 -0.28449672, %v5378_v20  ;;  %v5317_v35 = vadd.f32 1.4214138, %v5255_v1  ;;  %7983 = vmatmul.msk.f32.gmra.mxu0 %vm3326_vm6, %v6303_v13  ;;  %v4793_v31 = vsub.f32 1.0, %v4792_v32  ;;  %v4705_v46 = vadd.f32 %v14712_v40, %v4704_v10 }
 0x7cf   : > { %v4802_v12 = vand.u32 2147483648, %v14906_v51  ;;  %v5622_v24 = vmul.f32 %v5560_v22, %v14877_v11  ;;  %v14970_v61 = vmul.f32 0.70710677, %v14952_v48  ;;  %v4710_v58 = vand.u32 2147483647, %v14626_v63  ;;  %v8413_v56 = vpop.eup %8412 }
 0x7d0   : > { %v4794_v2 = vmul.f32 %v8411_v45, %v4793_v31  ;;  %vm4797_vm4 = vweird.f32 %v8411_v45  ;;  %v4800_v10 = vand.u32 2147483647, %v14906_v51  ;;  %v4709_v20 = vsel %vm14963_vm3, %v14712_v40, %v4705_v46 }
 0x7d1   : > { %v5256_v1 = vmul.f32 %v5194_v55, %v14919_v26  ;;  %v5932_v42 = vmul.f32 %v14786_v59, %v5622_v24  ;;  %v14980_v11 = vand.u32 2147483647, %v14970_v61  ;;  %vm4711_vm5 = vcmp.eq.f32.partialorder %v4710_v58, 8.507059e+37 }
 0x7d2   : > { %vm4721_vm8 = vweird.f32 %v14691_v8  ;;  %v5502_v63 = vmul.f32 %v5440_v49, %v14823_v36  ;;  %v4795_v38 = vadd.f32 %v8411_v45, %v4794_v2  ;;  %vm4796_vm11 = vweird.f32 %v14906_v51 }
 0x7d3   : > { %v14986_v44 = vsel %vm4711_vm5, %v14762_v28, %v4709_v20  ;;  %vm4798_vm12 = vmor %vm4796_vm11, %vm4797_vm4  ;;  %v4803_v40 = vor.u32 1.1754944e-38, %v4802_v12  ;;  %v5994_v5 = vsub.f32 1.0, %v5932_v42  ;;  %v4080_v29 = vmul.f32 0.3275911, %v14980_v11 }
 0x7d4   : > { %v5127_v59 = vmul.f32 1.0614054, %v14986_v44  ;;  %v5379_v27 = vmul.f32 %v5317_v35, %v14881_v3  ;;  %v5752_v13 = vmul.f32 %v5690_v34, %v14775_v43  ;;  %v4799_v32 = vsel %vm4798_vm12, %v8411_v45, %v4795_v38 }
 0x7d5   : > { %vm4801_vm14 = vcmp.eq.f32.partialorder %v4800_v10, 8.507059e+37  ;;  %v5318_v55 = vadd.f32 1.4214138, %v5256_v1  ;;  %v6118_v51 = vsub.f32 0.0, %v5994_v5  ;;  %v14994_v41 = vadd.f32 1.0, %v4080_v29 }
 0x7d6   : > { %v14992_v22 = vsel %vm4801_vm14, %v4803_v40, %v4799_v32  ;;  %v5564_v28 = vadd.f32 0.2548296, %v5502_v63  ;;  %8414 = vpow2.f32 %v5851_v52  ;;  %v5189_v31 = vadd.f32 -1.4531521, %v5127_v59 }
 0x7d7   : > { %v5133_v49 = vmul.f32 1.0614054, %v14992_v22  ;;  %vm4722_vm0 = vweird.f32 %v14767_v50  ;;  %v5853_v46 = vmul.f32 1.442695, %v5751_v17  ;;  %v6180_v35 = vsel %vm6056_vm2, %v5994_v5, %v6118_v51 }
 0x7d8   : > { %8416 = vrcp.f32 %v14994_v41  ;;  %v5441_v43 = vadd.f32 -0.28449672, %v5379_v27  ;;  %v6242_v34 = vadd.f32 1.0, %v6180_v35  ;;  %v4720_v9 = vadd.f32 %v14767_v50, %v14935_v33  ;;  %vm15015_vm1 = vmor %vm4721_vm8, %vm4722_vm0 }
 0x7d9   : > { %v5195_v45 = vadd.f32 -1.4531521, %v5133_v49  ;;  %v15003_v12 = vmul.f32 %v8413_v56, %v5625_v4  ;;  %v5380_v52 = vmul.f32 %v5318_v55, %v14919_v26  ;;  %v5855_v24 = vmul.f32 1.442695, %v5752_v13  ;;  %v17296_v13 = vld [vmem:[#allocation72_spill] sm:$0xff] }
 0x7da   : > { %v5251_v58 = vmul.f32 %v5189_v31, %v14986_v44  ;;  %v5626_v17 = vmul.f32 %v5564_v28, %v14823_v36  ;;  %v5691_v2 = vsub.f32 0.0, %v14885_v16  ;;  %v6304_v10 = vmul.f32 %v6242_v34, %v14584_v6  ;;  %v7278_v28 = vpop.f32.mrf.mxu2 }
 0x7db   : > { %v5257_v54 = vmul.f32 %v5195_v45, %v14992_v22  ;;  %8418 = vpow2.f32 %v14922_v60  ;;  %v15021_v4 = vmul.f32 0.5, %v14440_v62  ;;  %v4725_v56 = vand.u32 2147483647, %v14691_v8 }
 0x7dc   : > { %v5313_v36 = vadd.f32 1.4214138, %v5251_v58  ;;  %v8415_v20 = vpop.eup %8414  ;;  %v5503_v1 = vmul.f32 %v5441_v43, %v14881_v3  ;;  %8420 = vpow2.f32 %v5853_v46  ;;  %7984 = vmatmul.msk.f32.gmra.mxu0 %vm3326_vm6, %v6304_v10  ;;  %v4724_v42 = vsel %vm15015_vm1, %v14767_v50, %v4720_v9  ;;  %v17298_v10 = vld [vmem:[#allocation46_spill] sm:$0xff] }
 0x7dd   : > { %v5319_v6 = vadd.f32 1.4214138, %v5257_v54  ;;  %v5997_v60 = vsub.f32 1.0, %v15003_v12  ;;  %v5442_v38 = vadd.f32 -0.28449672, %v5380_v52  ;;  %8422 = vpow2.f32 %v5855_v24  ;;  %v6653_v52 = vpop.f32.mrf.mxu0  ;;  %v7078_v24 = vpop.f32.mrf.mxu1 }
 0x7de   : > { %v8417_v63 = vpop.eup %8416  ;;  %v5375_v40 = vmul.f32 %v5313_v36, %v14986_v44  ;;  %v15031_v5 = vmul.f32 %v8415_v20, %v5626_v17  ;;  %v5753_v8 = vmul.f32 %v5691_v2, %v14885_v16  ;;  %vm4726_vm10 = vcmp.eq.f32.partialorder %v4725_v56, 8.507059e+37  ;;  %v3735_v56 = vpop.f32.mrf.mxu3 }
 0x7df   : > { %v4807_v29 = vmul.f32 %v8417_v63, %v14994_v41  ;;  %v5381_v59 = vmul.f32 %v5319_v6, %v14992_v22  ;;  %v17297_v50 = vfloor.f32 %v17296_v13  ;;  %v15040_v32 = vsel %vm4726_vm10, %v14931_v14, %v4724_v42 }
 0x7e0   : > { %v5437_v27 = vadd.f32 -0.28449672, %v5375_v40  ;;  %v5565_v55 = vadd.f32 0.2548296, %v5503_v1  ;;  %v5128_v16 = vmul.f32 1.0614054, %v15040_v32  ;;  %v5504_v46 = vmul.f32 %v5442_v38, %v14919_v26 }
 0x7e1   : > { %vm2984_vm9 = vcmp.eq.f32.partialorder %v17297_v50, %v12104_v19  ;;  %v4808_v51 = vsub.f32 1.0, %v4807_v29  ;;  %v15044_v31 = vpop.eup %8418  ;;  %v4817_v35 = vand.u32 2147483648, %v14994_v41  ;;  %v7279_v45 = vadd.f32 %v7278_v28, %v14619_v39  ;;  %v17299_v1 = vld [vmem:[#allocation55_spill] sm:$0xff] }
 0x7e2   : > { %v7861_v49 = vsel %vm2984_vm9, 1.0, %v16589_v47  ;;  %v5499_v43 = vmul.f32 %v5437_v27, %v14986_v44  ;;  %v8421_v14 = vpop.eup %8420  ;;  %vm4812_vm13 = vweird.f32 %v8417_v63  ;;  %v4815_v9 = vand.u32 2147483647, %v14994_v41 }
 0x7e3   : > { %7931 = vmatmul.msk.f32.gmra.mxu3 %vm3399_vm7, %v7861_v49  ;;  %v4809_v34 = vmul.f32 %v8417_v63, %v4808_v51  ;;  %v5190_v58 = vadd.f32 -1.4531521, %v5128_v16  ;;  %v8423_v17 = vpop.eup %8422  ;;  %v5443_v54 = vadd.f32 -0.28449672, %v5381_v59  ;;  %7461 = vst [vmem:[%s14607_s14 + $0x48] sm:$0xff] %v7279_v45  ;;  %v6797_v33 = vmul.f32 %v6653_v52, %v17298_v10  ;;  %v7281_v10 = vpop.f32.mrf.mxu2 }
 0x7e4   : > { %v5561_v2 = vadd.f32 0.2548296, %v5499_v43  ;;  %v7079_v36 = vadd.f32 %v7078_v24, %v14581_v25  ;;  %vm6057_vm15 = vcmp.ge.f32.partialorder %v14528_v7, 0.0  ;;  %vm4811_vm2 = vweird.f32 %v14994_v41 }
 0x7e5   : > { %v4810_v20 = vadd.f32 %v8417_v63, %v4809_v34  ;;  %v15058_v6 = vmul.f32 %v3735_v56, %v17299_v1  ;;  %v5252_v42 = vmul.f32 %v5190_v58, %v15040_v32  ;;  %v5998_v38 = vsub.f32 1.0, %v15031_v5  ;;  %vm4813_vm3 = vmor %vm4811_vm2, %vm4812_vm13  ;;  %8032 = vmatmul.msk.f32.gmra.mxu1 %vm3326_vm6, %v6797_v33  ;;  %8094 = vmatmul.msk.f32.gmra.mxu2 %vm3326_vm6, %v6797_v33 }
 0x7e6   : > { %v5857_v40 = vmul.f32 1.442695, %v5753_v8  ;;  %v4818_v29 = vor.u32 1.1754944e-38, %v4817_v35  ;;  %v5623_v59 = vmul.f32 %v5561_v2, %v14986_v44  ;;  %7462 = vst [vmem:[%s14607_s14 + $0x50] sm:$0xff] %v7079_v36  ;;  %v5566_v27 = vadd.f32 0.2548296, %v5504_v46 }
 0x7e7   : > { %v4814_v41 = vsel %vm4813_vm3, %v8417_v63, %v4810_v20  ;;  %vm4816_vm4 = vcmp.eq.f32.partialorder %v4815_v9, 8.507059e+37  ;;  %v15068_v13 = vmul.f32 0.70710677, %v15058_v6  ;;  %vm6059_vm5 = vcmp.ge.f32.partialorder %v14459_v53, 0.0 }
 0x7e8   : > { %v5505_v5 = vmul.f32 %v5443_v54, %v14992_v22  ;;  %v15072_v8 = vsel %vm4816_vm4, %v4818_v29, %v4814_v41  ;;  %v5933_v50 = vmul.f32 %v14803_v37, %v5623_v59  ;;  %v5314_v44 = vadd.f32 1.4214138, %v5252_v42  ;;  %v6656_v42 = vpop.f32.mrf.mxu0 }
 0x7e9   : > { %v6121_v51 = vsub.f32 0.0, %v5997_v60  ;;  %v5627_v28 = vmul.f32 %v5565_v55, %v14881_v3  ;;  %v5134_v63 = vmul.f32 1.0614054, %v15072_v8  ;;  %v15080_v49 = vand.u32 2147483647, %v15068_v13  ;;  %v17300_v55 = vld [vmem:[#allocation63_spill] sm:$0xff] }
 0x7ea   : > { %v6122_v16 = vsub.f32 0.0, %v5998_v38  ;;  %v5692_v46 = vsub.f32 0.0, %v14980_v11  ;;  %v5995_v35 = vsub.f32 1.0, %v5933_v50  ;;  %v5376_v43 = vmul.f32 %v5314_v44, %v15040_v32 }
 0x7eb   : > { %v5628_v45 = vmul.f32 %v5566_v27, %v14919_v26  ;;  %8424 = vpow2.f32 %v5857_v40  ;;  %v5196_v37 = vadd.f32 -1.4531521, %v5134_v63  ;;  %v4081_v34 = vmul.f32 0.3275911, %v15080_v49 }
 0x7ec   : > { %v5567_v9 = vadd.f32 0.2548296, %v5505_v5  ;;  %v6119_v52 = vsub.f32 0.0, %v5995_v35  ;;  %v5438_v3 = vadd.f32 -0.28449672, %v5376_v43  ;;  %v17301_v24 = vfloor.f32 %v17300_v55  ;;  %v3738_v5 = vpop.f32.mrf.mxu3 }
 0x7ed   : > { %v15089_v58 = vmul.f32 %v8421_v14, %v5627_v28  ;;  %v5258_v54 = vmul.f32 %v5196_v37, %v15072_v8  ;;  %v15092_v2 = vadd.f32 1.0, %v4081_v34  ;;  %v5754_v33 = vmul.f32 %v5692_v46, %v14980_v11  ;;  %v7284_v34 = vpop.f32.mrf.mxu2 }
 0x7ee   : > { %vm2985_vm8 = vcmp.eq.f32.partialorder %v17301_v24, %v12104_v19  ;;  %v6181_v36 = vsel %vm6057_vm15, %v5995_v35, %v6119_v52  ;;  %v5500_v56 = vmul.f32 %v5438_v3, %v15040_v32  ;;  %v7282_v20 = vadd.f32 %v7281_v10, %v14619_v39 }
 0x7ef   : > { %v7862_v26 = vsel %vm2985_vm8, 1.0, %v16589_v47  ;;  %v15101_v19 = vmul.f32 %v8423_v17, %v5628_v45  ;;  %v5320_v14 = vadd.f32 1.4214138, %v5258_v54  ;;  %v6243_v1 = vadd.f32 1.0, %v6181_v36  ;;  %v7081_v47 = vpop.f32.mrf.mxu1 }
 0x7f0   : > { %7932 = vmatmul.msk.f32.gmra.mxu3 %vm3399_vm7, %v7862_v26  ;;  %8426 = vrcp.f32 %v15092_v2  ;;  %v15105_v40 = vmul.f32 0.5, %v14595_v21  ;;  %vm6060_vm11 = vcmp.ge.f32.partialorder %v14615_v30, 0.0  ;;  %v15109_v7 = vmul.f32 0.5, %v14663_v57  ;;  %7463 = vst [vmem:[%s14607_s14 + $0x58] sm:$0xff] %v7282_v20  ;;  %v6659_v10 = vpop.f32.mrf.mxu0 }
 0x7f1   : > { %v5629_v11 = vmul.f32 %v5567_v9, %v14992_v22  ;;  %v8425_v29 = vpop.eup %8424  ;;  %v6183_v17 = vsel %vm6059_vm5, %v5997_v60, %v6121_v51  ;;  %v5382_v59 = vmul.f32 %v5320_v14, %v15072_v8  ;;  %v6305_v27 = vmul.f32 %v6243_v1, %v14747_v23  ;;  %v17302_v22 = vld [vmem:[#allocation49_spill] sm:$0xff]  ;;  %v17303_v60 = vld [vmem:[#allocation88_spill] sm:$0xff] }
 0x7f2   : > { %v5562_v41 = vadd.f32 0.2548296, %v5500_v56  ;;  %vm6058_vm7 = vcmp.ge.f32.partialorder %v14601_v18, 0.0  ;;  %v6184_v30 = vsel %vm6060_vm11, %v5998_v38, %v6122_v16  ;;  %v5999_v50 = vsub.f32 1.0, %v15089_v58  ;;  %v17304_v51 = vld [vmem:[#allocation32_spill] sm:$0xff]  ;;  %v17305_v16 = vld [vmem:[#allocation25_spill] sm:$0xff] }
 0x7f3   : > { %v5859_v44 = vmul.f32 1.442695, %v5754_v33  ;;  %v6798_v28 = vmul.f32 %v6656_v42, %v17302_v22  ;;  %v6000_v63 = vsub.f32 1.0, %v15101_v19  ;;  %v5444_v12 = vadd.f32 -0.28449672, %v5382_v59  ;;  %7985 = vmatmul.msk.f32.gmra.mxu0 %vm3326_vm6, %v6305_v27  ;;  %v17306_v56 = vld [vmem:[#allocation54_spill] sm:$0xff] }
 0x7f4   : > { %v5624_v53 = vmul.f32 %v5562_v41, %v15040_v32  ;;  %v7082_v23 = vadd.f32 %v7081_v47, %v14581_v25  ;;  %vm6061_vm12 = vcmp.ge.f32.partialorder %v17303_v60, 0.0  ;;  %vm6062_vm14 = vcmp.ge.f32.partialorder %v17304_v51, 0.0  ;;  %v3741_v47 = vpop.f32.mrf.mxu3 }
 0x7f5   : > { %v15128_v38 = vmul.f32 %v8425_v29, %v5629_v11  ;;  %v15131_v46 = vmul.f32 %v3738_v5, %v17305_v16  ;;  %8033 = vmatmul.msk.f32.gmra.mxu1 %vm3326_vm6, %v6798_v28  ;;  %8095 = vmatmul.msk.f32.gmra.mxu2 %vm3326_vm6, %v6798_v28  ;;  %v6245_v43 = vadd.f32 1.0, %v6183_v17  ;;  %v6246_v45 = vadd.f32 1.0, %v6184_v30  ;;  %v17307_v17 = vld [vmem:[#allocation93_spill] sm:$0xff] }
 0x7f6   : > { %v8427_v35 = vpop.eup %8426  ;;  %v5506_v32 = vmul.f32 %v5444_v12, %v15072_v8  ;;  %v5934_v37 = vmul.f32 %v15044_v31, %v5624_v53  ;;  %7464 = vst [vmem:[%s14607_s14 + $0x60] sm:$0xff] %v7082_v23  ;;  %v6123_v9 = vsub.f32 0.0, %v5999_v50  ;;  %8428 = vpow2.f32 %v5859_v44  ;;  %v7287_v53 = vpop.f32.mrf.mxu2 }
 0x7f7   : > { %v4822_v52 = vmul.f32 %v8427_v35, %v15092_v2  ;;  %v15140_v3 = vmul.f32 0.70710677, %v15131_v46  ;;  %v6124_v55 = vsub.f32 0.0, %v6000_v63  ;;  %v7285_v54 = vadd.f32 %v7284_v34, %v14619_v39  ;;  %v7084_v26 = vpop.f32.mrf.mxu1 }
 0x7f8   : > { %v5568_v24 = vadd.f32 0.2548296, %v5506_v32  ;;  %v5996_v58 = vsub.f32 1.0, %v5934_v37  ;;  %v6001_v33 = vsub.f32 1.0, %v15128_v38  ;;  %v6799_v20 = vmul.f32 %v6659_v10, %v17306_v56  ;;  %v17309_v38 = vld [vmem:[#allocation90_spill] sm:$0xff]  ;;  %v6662_v34 = vpop.f32.mrf.mxu0 }
 0x7f9   : > { %v4823_v31 = vsub.f32 1.0, %v4822_v52  ;;  %v15145_v36 = vand.u32 2147483647, %v15140_v3  ;;  %v4830_v19 = vand.u32 2147483647, %v15092_v2  ;;  %v4832_v14 = vand.u32 2147483648, %v15092_v2 }
 0x7fa   : > { %v6120_v1 = vsub.f32 0.0, %v5996_v58  ;;  %7465 = vst [vmem:[%s14607_s14 + $0x68] sm:$0xff] %v7285_v54  ;;  %v7085_v42 = vadd.f32 %v7084_v26, %v14581_v25  ;;  %vm4827_vm0 = vweird.f32 %v8427_v35  ;;  %v15154_v59 = vmul.f32 %v3741_v47, %v17307_v17 }
 0x7fb   : > { %v4824_v11 = vmul.f32 %v8427_v35, %v4823_v31  ;;  %v4082_v29 = vmul.f32 0.3275911, %v15145_v36  ;;  %v6185_v27 = vsel %vm6061_vm12, %v5999_v50, %v6123_v9  ;;  %v6186_v41 = vsel %vm6062_vm14, %v6000_v63, %v6124_v55 }
 0x7fc   : > { %v5630_v5 = vmul.f32 %v5568_v24, %v15072_v8  ;;  %v6182_v30 = vsel %vm6058_vm7, %v5996_v58, %v6120_v1  ;;  %7466 = vst [vmem:[%s14607_s14 + $0x70] sm:$0xff] %v7085_v42  ;;  %v8429_v44 = vpop.eup %8428  ;;  %vm4826_vm1 = vweird.f32 %v15092_v2  ;;  %v6125_v50 = vsub.f32 0.0, %v6001_v33  ;;  %v17308_v2 = vld [vmem:[#allocation12_spill] sm:$0xff]  ;;  %v3744_v54 = vpop.f32.mrf.mxu3 }
 0x7fd   : > { %v4825_v22 = vadd.f32 %v8427_v35, %v4824_v11  ;;  %v6244_v28 = vadd.f32 1.0, %v6182_v30  ;;  %v15165_v12 = vadd.f32 1.0, %v4082_v29  ;;  %8034 = vmatmul.msk.f32.gmra.mxu1 %vm3326_vm6, %v6799_v20  ;;  %8096 = vmatmul.msk.f32.gmra.mxu2 %vm3326_vm6, %v6799_v20  ;;  %vm4828_vm10 = vmor %vm4826_vm1, %vm4827_vm0  ;;  %v4833_v63 = vor.u32 1.1754944e-38, %v4832_v14 }
 0x7fe   : > { %v5693_v8 = vsub.f32 0.0, %v15080_v49  ;;  %v15172_v18 = vmul.f32 0.70710677, %v15154_v59  ;;  %vm4831_vm9 = vcmp.eq.f32.partialorder %v4830_v19, 8.507059e+37  ;;  %v6307_v51 = vmul.f32 %v6245_v43, %v15021_v4  ;;  %v17310_v19 = vld [vmem:[#allocation57_spill] sm:$0xff] }
 0x7ff   : > { %v4829_v23 = vsel %vm4828_vm10, %v8427_v35, %v4825_v22  ;;  %v6306_v60 = vmul.f32 %v6244_v28, %v17308_v2  ;;  %8430 = vrcp.f32 %v15165_v12  ;;  %v3892_v16 = vmul.f32 0.5, %v17309_v38  ;;  %v7087_v9 = vpop.f32.mrf.mxu1 }
 0x800   : > { %v15178_v32 = vmul.f32 %v8429_v44, %v5630_v5  ;;  %v15180_v37 = vsel %vm4831_vm9, %v4833_v63, %v4829_v23  ;;  %v6247_v52 = vadd.f32 1.0, %v6185_v27  ;;  %v15185_v35 = vand.u32 2147483647, %v15172_v18 }
 0x801   : > { %v5135_v55 = vmul.f32 1.0614054, %v15180_v37  ;;  %7986 = vmatmul.msk.f32.gmra.mxu0 %vm3326_vm6, %v6306_v60  ;;  %v7288_v24 = vadd.f32 %v7287_v53, %v14619_v39  ;;  %v15189_v4 = vmul.f32 %v6246_v45, %v15105_v40  ;;  %v6248_v43 = vadd.f32 1.0, %v6186_v41  ;;  %v17311_v45 = vld [vmem:[#allocation52_spill] sm:$0xff] }
 0x802   : > { %v3893_v58 = vmul.f32 0.5, %v14863_v15  ;;  %vm6063_vm13 = vcmp.ge.f32.partialorder %v14874_v0, 0.0  ;;  %v5755_v31 = vmul.f32 %v5693_v8, %v15080_v49  ;;  %v4083_v56 = vmul.f32 0.3275911, %v15185_v35 }
 0x803   : > { %v6187_v10 = vsel %vm6063_vm13, %v6001_v33, %v6125_v50  ;;  %v5197_v26 = vadd.f32 -1.4531521, %v5135_v55  ;;  %7467 = vst [vmem:[%s14607_s14 + $0x78] sm:$0xff] %v7288_v24  ;;  %v6002_v20 = vsub.f32 1.0, %v15178_v32  ;;  %v6800_v14 = vmul.f32 %v6662_v34, %v17310_v19  ;;  %v6665_v50 = vpop.f32.mrf.mxu0  ;;  %v17312_v32 = vld [vmem:[#allocation59_spill] sm:$0xff] }
 0x804   : > { %v7088_v40 = vadd.f32 %v7087_v9, %v14581_v25  ;;  %v15200_v1 = vmul.f32 %v3744_v54, %v17311_v45  ;;  %v15203_v0 = vmul.f32 %v6247_v52, %v15109_v7  ;;  %v15206_v33 = vmul.f32 0.5, %v14952_v48  ;;  %v7290_v7 = vpop.f32.mrf.mxu2  ;;  %v3747_v9 = vpop.f32.mrf.mxu3 }
 0x805   : > { %v8431_v42 = vpop.eup %8430  ;;  %v5259_v49 = vmul.f32 %v5197_v26, %v15180_v37  ;;  %v15209_v47 = vadd.f32 1.0, %v4083_v56  ;;  %v15211_v11 = vmul.f32 %v6248_v43, %v3892_v16  ;;  %vm6064_vm15 = vcmp.ge.f32.partialorder %v14970_v61, 0.0  ;;  %8035 = vmatmul.msk.f32.gmra.mxu1 %vm3326_vm6, %v6800_v14  ;;  %8097 = vmatmul.msk.f32.gmra.mxu2 %vm3326_vm6, %v6800_v14  ;;  %v17313_v43 = vld [vmem:[#allocation119_spill] sm:$0xff] }
 0x806   : > { %v15215_v29 = vmul.f32 0.5, %v15058_v6  ;;  %v4837_v17 = vmul.f32 %v8431_v42, %v15165_v12  ;;  %7468 = vst [vmem:[%s14607_s14 + $0x80] sm:$0xff] %v7088_v40  ;;  %v6249_v27 = vadd.f32 1.0, %v6187_v10  ;;  %v5861_v5 = vmul.f32 1.442695, %v5755_v31 }
 0x807   : > { %v5321_v41 = vadd.f32 1.4214138, %v5259_v49  ;;  %8432 = vrcp.f32 %v15209_v47  ;;  %v6126_v30 = vsub.f32 0.0, %v6002_v20  ;;  %v5694_v22 = vsub.f32 0.0, %v15145_v36  ;;  %v7090_v63 = vpop.f32.mrf.mxu1 }
 0x808   : > { %v4838_v44 = vsub.f32 1.0, %v4837_v17  ;;  %v15224_v28 = vmul.f32 0.70710677, %v15200_v1  ;;  %v4845_v53 = vand.u32 2147483647, %v15165_v12  ;;  %v4847_v23 = vand.u32 2147483648, %v15165_v12 }
 0x809   : > { %v5383_v8 = vmul.f32 %v5321_v41, %v15180_v37  ;;  %7987 = vmatmul.msk.f32.gmra.mxu0 %vm3326_vm6, %v6307_v51  ;;  %v7291_v2 = vadd.f32 %v7290_v7, %v14619_v39  ;;  %vm4842_vm2 = vweird.f32 %v8431_v42  ;;  %v6801_v34 = vmul.f32 %v6665_v50, %v17312_v32 }
 0x80a   : > { %v4839_v60 = vmul.f32 %v8431_v42, %v4838_v44  ;;  %v15232_v16 = vand.u32 2147483647, %v15224_v28  ;;  %v5695_v55 = vsub.f32 0.0, %v15185_v35  ;;  %v7091_v24 = vadd.f32 %v7090_v63, %v14581_v25 }
 0x80b   : > { %v5445_v52 = vadd.f32 -0.28449672, %v5383_v8  ;;  %7469 = vst [vmem:[%s14607_s14 + $0x88] sm:$0xff] %v7291_v2  ;;  %v15239_v54 = vmul.f32 %v3747_v9, %v17313_v43  ;;  %v15241_v51 = vmul.f32 %v6249_v27, %v3893_v58  ;;  %vm4841_vm3 = vweird.f32 %v15165_v12 }
 0x80c   : > { %v4840_v10 = vadd.f32 %v8431_v42, %v4839_v60  ;;  %v4084_v26 = vmul.f32 0.3275911, %v15232_v16  ;;  %vm4843_vm4 = vmor %vm4841_vm3, %vm4842_vm2  ;;  %v4848_v19 = vor.u32 1.1754944e-38, %v4847_v23  ;;  %v5756_v14 = vmul.f32 %v5694_v22, %v15145_v36  ;;  %7470 = vst [vmem:[%s14607_s14 + $0x90] sm:$0xff] %v7091_v24  ;;  %v7293_v12 = vpop.f32.mrf.mxu2  ;;  %v6668_v22 = vpop.f32.mrf.mxu0  ;;  %v17314_v24 = vld [vmem:[#allocation60_spill] sm:$0xff] }
 0x80d   : > { %v8433_v31 = vpop.eup %8432  ;;  %v5507_v56 = vmul.f32 %v5445_v52, %v15180_v37  ;;  %v15250_v40 = vmul.f32 0.70710677, %v15239_v54  ;;  %vm4846_vm5 = vcmp.eq.f32.partialorder %v4845_v53, 8.507059e+37  ;;  %8036 = vmatmul.msk.f32.gmra.mxu1 %vm3326_vm6, %v6801_v34  ;;  %8098 = vmatmul.msk.f32.gmra.mxu2 %vm3326_vm6, %v6801_v34  ;;  %v6188_v17 = vsel %vm6064_vm15, %v6002_v20, %v6126_v30  ;;  %v3750_v53 = vpop.f32.mrf.mxu3 }
 0x80e   : > { %v4844_v45 = vsel %vm4843_vm4, %v8431_v42, %v4840_v10  ;;  %v4852_v58 = vmul.f32 %v8433_v31, %v15209_v47  ;;  %v15253_v49 = vadd.f32 1.0, %v4084_v26  ;;  %v5757_v36 = vmul.f32 %v5695_v55, %v15185_v35 }
 0x80f   : > { %v15259_v7 = vsel %vm4846_vm5, %v4848_v19, %v4844_v45  ;;  %v15263_v27 = vand.u32 2147483647, %v15250_v40  ;;  %v4862_v44 = vand.u32 2147483648, %v15209_v47  ;;  %v7093_v50 = vpop.f32.mrf.mxu1  ;;  %v5569_v63 = vadd.f32 0.2548296, %v5507_v56 }
 0x810   : > { %v5136_v42 = vmul.f32 1.0614054, %v15259_v7  ;;  %v4853_v41 = vsub.f32 1.0, %v4852_v58  ;;  %8434 = vrcp.f32 %v15253_v49  ;;  %v15269_v61 = vmul.f32 0.5, %v15131_v46 }
 0x811   : > { %8436 = vpow2.f32 %v5861_v5  ;;  %v4860_v20 = vand.u32 2147483647, %v15209_v47  ;;  %7988 = vmatmul.msk.f32.gmra.mxu0 %vm3326_vm6, %v15189_v4  ;;  %vm4857_vm8 = vweird.f32 %v8433_v31  ;;  %v4085_v8 = vmul.f32 0.3275911, %v15263_v27 }
 0x812   : > { %v5198_v35 = vadd.f32 -1.4531521, %v5136_v42  ;;  %v4854_v30 = vmul.f32 %v8433_v31, %v4853_v41  ;;  %v15275_v23 = vadd.f32 1.0, %v6188_v17  ;;  %v5863_v2 = vmul.f32 1.442695, %v5756_v14 }
 0x813   : > { %vm4856_vm11 = vweird.f32 %v15209_v47  ;;  %v5865_v5 = vmul.f32 1.442695, %v5757_v36  ;;  %v4863_v34 = vor.u32 1.1754944e-38, %v4862_v44  ;;  %v15279_v9 = vadd.f32 1.0, %v4085_v8 }
 0x814   : > { %v5260_v60 = vmul.f32 %v5198_v35, %v15259_v7  ;;  %v4855_v32 = vadd.f32 %v8433_v31, %v4854_v30  ;;  %v5631_v4 = vmul.f32 %v5569_v63, %v15180_v37  ;;  %vm4858_vm7 = vmor %vm4856_vm11, %vm4857_vm8  ;;  %v5696_v52 = vsub.f32 0.0, %v15232_v16  ;;  %v7296_v56 = vpop.f32.mrf.mxu2  ;;  %v6671_v35 = vpop.f32.mrf.mxu0 }
 0x815   : > { %v7294_v55 = vadd.f32 %v7293_v12, %v14619_v39  ;;  %v6802_v43 = vmul.f32 %v6668_v22, %v17314_v24  ;;  %vm4861_vm12 = vcmp.eq.f32.partialorder %v4860_v20, 8.507059e+37  ;;  %8438 = vrcp.f32 %v15279_v9 }
 0x816   : > { %v8435_v10 = vpop.eup %8434  ;;  %v5322_v26 = vadd.f32 1.4214138, %v5260_v60  ;;  %v4859_v47 = vsel %vm4858_vm7, %v8433_v31, %v4855_v32  ;;  %8440 = vpow2.f32 %v5863_v2  ;;  %v4875_v45 = vand.u32 2147483647, %v15253_v49 }
 0x817   : > { %v8437_v19 = vpop.eup %8436  ;;  %v15286_v14 = vsel %vm4861_vm12, %v4863_v34, %v4859_v47  ;;  %v4867_v37 = vmul.f32 %v8435_v10, %v15253_v49  ;;  %7471 = vst [vmem:[%s14607_s14 + $0x98] sm:$0xff] %v7294_v55  ;;  %8037 = vmatmul.msk.f32.gmra.mxu1 %vm3326_vm6, %v6802_v43  ;;  %8099 = vmatmul.msk.f32.gmra.mxu2 %vm3326_vm6, %v6802_v43  ;;  %8442 = vpow2.f32 %v5865_v5  ;;  %v4877_v12 = vand.u32 2147483648, %v15253_v49  ;;  %v7096_v17 = vpop.f32.mrf.mxu1 }
 0x818   : > { %v5384_v58 = vmul.f32 %v5322_v26, %v15259_v7  ;;  %v5137_v31 = vmul.f32 1.0614054, %v15286_v14  ;;  %v15296_v36 = vmul.f32 %v8437_v19, %v5631_v4  ;;  %v15299_v41 = vmul.f32 %v5696_v52, %v15232_v16  ;;  %v17317_v16 = vld [vmem:[#allocation118_spill] sm:$0xff]  ;;  %v3753_v34 = vpop.f32.mrf.mxu3  ;;  %v17318_v19 = vld [vmem:[#allocation33_spill] sm:$0xff] }
 0x819   : > { %v4868_v42 = vsub.f32 1.0, %v4867_v37  ;;  %7989 = vmatmul.msk.f32.gmra.mxu0 %vm3326_vm6, %v15203_v0  ;;  %v7094_v44 = vadd.f32 %v7093_v50, %v14581_v25  ;;  %vm4871_vm14 = vweird.f32 %v15253_v49  ;;  %v5697_v20 = vsub.f32 0.0, %v15263_v27 }
 0x81a   : > { %v5446_v22 = vadd.f32 -0.28449672, %v5384_v58  ;;  %v5199_v63 = vadd.f32 -1.4531521, %v5137_v31  ;;  %vm4872_vm0 = vweird.f32 %v8435_v10  ;;  %vm15306_vm1 = vcmp.eq.f32.partialorder %v4875_v45, 8.507059e+37 }
 0x81b   : > { %v4869_v30 = vmul.f32 %v8435_v10, %v4868_v42  ;;  %7472 = vst [vmem:[%s14607_s14 + $0xa0] sm:$0xff] %v7094_v44  ;;  %v15312_v2 = vmul.f32 %v3750_v53, %v17317_v16  ;;  %v8439_v0 = vpop.eup %8438  ;;  %v4878_v60 = vor.u32 1.1754944e-38, %v4877_v12  ;;  %v7297_v32 = vadd.f32 %v7296_v56, %v14619_v39  ;;  %vm4873_vm9 = vmor %vm4871_vm14, %vm4872_vm0 }
 0x81c   : > { %v5508_v50 = vmul.f32 %v5446_v22, %v15259_v7  ;;  %v5261_v5 = vmul.f32 %v5199_v63, %v15286_v14  ;;  %v8441_v4 = vpop.eup %8440  ;;  %v6003_v52 = vsub.f32 1.0, %v15296_v36  ;;  %v4882_v24 = vmul.f32 %v8439_v0, %v15279_v9  ;;  %v7299_v45 = vpop.f32.mrf.mxu2  ;;  %v17319_v36 = vld [vmem:[#allocation117_spill] sm:$0xff] }
 0x81d   : > { %v4870_v55 = vadd.f32 %v8435_v10, %v4869_v30  ;;  %v4890_v43 = vand.u32 2147483647, %v15279_v9  ;;  %v15320_v53 = vpop.eup %8442  ;;  %vm6065_vm10 = vcmp.ge.f32.partialorder %v15068_v13, 0.0  ;;  %v15327_v56 = vmul.f32 0.70710677, %v15312_v2  ;;  %7473 = vst [vmem:[%s14607_s14 + $0xa8] sm:$0xff] %v7297_v32 }
 0x81e   : > { %v5570_v26 = vadd.f32 0.2548296, %v5508_v50  ;;  %v5323_v47 = vadd.f32 1.4214138, %v5261_v5  ;;  %v6803_v37 = vmul.f32 %v6671_v35, %v17318_v19  ;;  %v4883_v31 = vsub.f32 1.0, %v4882_v24 }
 0x81f   : > { %v4874_v58 = vsel %vm4873_vm9, %v8435_v10, %v4870_v55  ;;  %v7097_v12 = vadd.f32 %v7096_v17, %v14581_v25  ;;  %v15333_v42 = vmul.f32 %v3753_v34, %v17319_v36  ;;  %v4892_v22 = vand.u32 2147483648, %v15279_v9  ;;  %v7099_v10 = vpop.f32.mrf.mxu1 }
 0x820   : > { %v5385_v44 = vmul.f32 %v5323_v47, %v15286_v14  ;;  %v15338_v49 = vsel %vm15306_vm1, %v4878_v60, %v4874_v58  ;;  %v15342_v63 = vand.u32 2147483647, %v15327_v56  ;;  %8038 = vmatmul.msk.f32.gmra.mxu1 %vm3326_vm6, %v6803_v37  ;;  %8100 = vmatmul.msk.f32.gmra.mxu2 %vm3326_vm6, %v6803_v37  ;;  %v5632_v17 = vmul.f32 %v5570_v26, %v15259_v7  ;;  %v6674_v26 = vpop.f32.mrf.mxu0 }
 0x821   : > { %v5138_v35 = vmul.f32 1.0614054, %v15338_v49  ;;  %v4884_v30 = vmul.f32 %v8439_v0, %v4883_v31  ;;  %vm4887_vm13 = vweird.f32 %v8439_v0  ;;  %7990 = vmatmul.msk.f32.gmra.mxu0 %vm3326_vm6, %v15211_v11  ;;  %7474 = vst [vmem:[%s14607_s14 + $0xb0] sm:$0xff] %v7097_v12  ;;  %v6127_v8 = vsub.f32 0.0, %v6003_v52 }
 0x822   : > { %v5447_v16 = vadd.f32 -0.28449672, %v5385_v44  ;;  %vm4886_vm15 = vweird.f32 %v15279_v9  ;;  %v4086_v50 = vmul.f32 0.3275911, %v15342_v63  ;;  %v15354_v32 = vmul.f32 0.70710677, %v15333_v42 }
 0x823   : > { %v5200_v5 = vadd.f32 -1.4531521, %v5138_v35  ;;  %v4885_v60 = vadd.f32 %v8439_v0, %v4884_v30  ;;  %v7300_v7 = vadd.f32 %v7299_v45, %v14619_v39  ;;  %vm4888_vm2 = vmor %vm4886_vm15, %vm4887_vm13  ;;  %v4893_v55 = vor.u32 1.1754944e-38, %v4892_v22 }
 0x824   : > { %v5509_v34 = vmul.f32 %v5447_v16, %v15286_v14  ;;  %v5759_v11 = vmul.f32 %v5697_v20, %v15263_v27  ;;  %v15359_v24 = vadd.f32 1.0, %v4086_v50  ;;  %v15361_v9 = vmul.f32 %v8441_v4, %v5632_v17  ;;  %v15371_v31 = vpop.f32.mrf.mxu2  ;;  %v3756_v17 = vpop.f32.mrf.mxu3 }
 0x825   : > { %v5262_v47 = vmul.f32 %v5200_v5, %v15338_v49  ;;  %v4889_v19 = vsel %vm4888_vm2, %v8439_v0, %v4885_v60  ;;  %vm4891_vm3 = vcmp.eq.f32.partialorder %v4890_v43, 8.507059e+37  ;;  %7475 = vst [vmem:[%s14607_s14 + $0xb8] sm:$0xff] %v7300_v7  ;;  %v15369_v45 = vand.u32 2147483647, %v15354_v32  ;;  %v17320_v5 = vld [vmem:[#allocation61_spill] sm:$0xff] }
 0x826   : > { %v5571_v37 = vadd.f32 0.2548296, %v5509_v34  ;;  %v15365_v58 = vsel %vm4891_vm3, %v4893_v55, %v4889_v19  ;;  %8444 = vrcp.f32 %v15359_v24  ;;  %v6189_v27 = vsel %vm6065_vm10, %v6003_v52, %v6127_v8 }
 0x827   : > { %v5324_v20 = vadd.f32 1.4214138, %v5262_v47  ;;  %v5867_v4 = vmul.f32 1.442695, %v15299_v41  ;;  %v5139_v0 = vmul.f32 1.0614054, %v15365_v58  ;;  %v15382_v44 = vpop.f32.mrf.mxu1  ;;  %v6312_v22 = vmul.f32 %v15275_v23, %v15206_v33 }
 0x828   : > { %vm6066_vm4 = vcmp.ge.f32.partialorder %v15140_v3, 0.0  ;;  %v15379_v43 = vmul.f32 0.5, %v15154_v59  ;;  %v5633_v12 = vmul.f32 %v5571_v37, %v15286_v14  ;;  %v5869_v36 = vmul.f32 1.442695, %v5759_v11 }
 0x829   : > { %v6004_v13 = vsub.f32 1.0, %v15361_v9  ;;  %v5386_v52 = vmul.f32 %v5324_v20, %v15338_v49  ;;  %v5201_v41 = vadd.f32 -1.4531521, %v5139_v0  ;;  %7991 = vmatmul.msk.f32.gmra.mxu0 %vm3326_vm6, %v15241_v51  ;;  %v6251_v35 = vadd.f32 1.0, %v6189_v27 }
 0x82a   : > { %v15391_v30 = vmul.f32 0.5, %v15200_v1  ;;  %v15394_v14 = vmul.f32 0.5, %v15239_v54  ;;  %v4087_v8 = vmul.f32 0.3275911, %v15369_v45  ;;  %v15398_v33 = vmul.f32 %v15320_v53, %v5633_v12 }
 0x82b   : > { %v5448_v23 = vadd.f32 -0.28449672, %v5386_v52  ;;  %8446 = vpow2.f32 %v5867_v4  ;;  %v5263_v16 = vmul.f32 %v5201_v41, %v15365_v58  ;;  %v6804_v60 = vmul.f32 %v6674_v26, %v17320_v5 }
 0x82c   : > { %v8445_v50 = vpop.eup %8444  ;;  %8448 = vpow2.f32 %v5869_v36  ;;  %v15401_v51 = vadd.f32 1.0, %v4087_v8  ;;  %v7100_v7 = vadd.f32 %v7099_v10, %v14581_v25  ;;  %v6128_v34 = vsub.f32 0.0, %v6004_v13  ;;  %v6677_v10 = vpop.f32.mrf.mxu0  ;;  %v17321_v36 = vld [vmem:[#allocation116_spill] sm:$0xff] }
 0x82d   : > { %v5510_v55 = vmul.f32 %v5448_v23, %v15338_v49  ;;  %v5325_v11 = vadd.f32 1.4214138, %v5263_v16  ;;  %v4897_v53 = vmul.f32 %v8445_v50, %v15359_v24  ;;  %v15408_v9 = vmul.f32 %v6251_v35, %v15215_v29  ;;  %8039 = vmatmul.msk.f32.gmra.mxu1 %vm3326_vm6, %v6804_v60  ;;  %8101 = vmatmul.msk.f32.gmra.mxu2 %vm3326_vm6, %v6804_v60  ;;  %v15419_v26 = vpop.f32.mrf.mxu2 }
 0x82e   : > { %vm6067_vm5 = vcmp.ge.f32.partialorder %v15172_v18, 0.0  ;;  %v15412_v47 = vmul.f32 0.5, %v15312_v2  ;;  %v5698_v19 = vsub.f32 0.0, %v15342_v63  ;;  %8450 = vrcp.f32 %v15401_v51  ;;  %7476 = vst [vmem:[%s14607_s14 + $0xc0] sm:$0xff] %v7100_v7 }
 0x82f   : > { %v6005_v29 = vsub.f32 1.0, %v15398_v33  ;;  %v5572_v37 = vadd.f32 0.2548296, %v5510_v55  ;;  %v5387_v27 = vmul.f32 %v5325_v11, %v15365_v58  ;;  %v4898_v20 = vsub.f32 1.0, %v4897_v53  ;;  %v15431_v41 = vpop.f32.mrf.mxu1 }
 0x830   : > { %v4905_v4 = vand.u32 2147483647, %v15359_v24  ;;  %v4907_v0 = vand.u32 2147483648, %v15359_v24  ;;  %v15426_v12 = vmul.f32 0.5, %v15333_v42  ;;  %v15429_v52 = vmul.f32 %v3756_v17, %v17321_v36 }
 0x831   : > { %v8447_v35 = vpop.eup %8446  ;;  %v6190_v8 = vsel %vm6066_vm4, %v6004_v13, %v6128_v34  ;;  %v5449_v33 = vadd.f32 -0.28449672, %v5387_v27  ;;  %v4899_v23 = vmul.f32 %v8445_v50, %v4898_v20  ;;  %vm4902_vm8 = vweird.f32 %v8445_v50  ;;  %7992 = vmatmul.msk.f32.gmra.mxu0 %vm3326_vm6, %v6312_v22  ;;  %v3759_v34 = vpop.f32.mrf.mxu3 }
 0x832   : > { %v8449_v16 = vpop.eup %8448  ;;  %v5634_v5 = vmul.f32 %v5572_v37, %v15338_v49  ;;  %vm4901_vm11 = vweird.f32 %v15359_v24  ;;  %v5760_v60 = vmul.f32 %v5698_v19, %v15342_v63  ;;  %v15440_v17 = vmul.f32 0.70710677, %v15429_v52 }
 0x833   : > { %v6129_v7 = vsub.f32 0.0, %v6005_v29  ;;  %v5511_v55 = vmul.f32 %v5449_v33, %v15365_v58  ;;  %v4900_v3 = vadd.f32 %v8445_v50, %v4899_v23  ;;  %v5699_v13 = vsub.f32 0.0, %v15369_v45  ;;  %vm4903_vm7 = vmor %vm4901_vm11, %vm4902_vm8 }
 0x834   : > { %v8451_v11 = vpop.eup %8450  ;;  %v6252_v22 = vadd.f32 1.0, %v6190_v8  ;;  %v4908_v53 = vor.u32 1.1754944e-38, %v4907_v0  ;;  %v15445_v49 = vand.u32 2147483647, %v15440_v17  ;;  %v7303_v63 = vadd.f32 %v15371_v31, %v14619_v39 }
 0x835   : > { %v5573_v24 = vadd.f32 0.2548296, %v5511_v55  ;;  %v4904_v19 = vsel %vm4903_vm7, %v8445_v50, %v4900_v3  ;;  %vm4906_vm12 = vcmp.eq.f32.partialorder %v4905_v4, 8.507059e+37  ;;  %v4912_v37 = vmul.f32 %v8451_v11, %v15401_v51  ;;  %v15457_v0 = vpop.f32.mrf.mxu2 }
 0x836   : > { %v15450_v27 = vmul.f32 %v8447_v35, %v5634_v5  ;;  %v15452_v20 = vsel %vm4906_vm12, %v4908_v53, %v4904_v19  ;;  %v4922_v36 = vand.u32 2147483648, %v15401_v51  ;;  %v4088_v8 = vmul.f32 0.3275911, %v15445_v49  ;;  %7477 = vst [vmem:[%s14607_s14 + $0xc8] sm:$0xff] %v7303_v63  ;;  %v17322_v5 = vld [vmem:[#allocation62_spill] sm:$0xff]  ;;  %v6680_v53 = vpop.f32.mrf.mxu0 }
 0x837   : > { %v6191_v33 = vsel %vm6067_vm5, %v6005_v29, %v6129_v7  ;;  %v5140_v31 = vmul.f32 1.0614054, %v15452_v20  ;;  %v4913_v50 = vsub.f32 1.0, %v4912_v37  ;;  %v5761_v4 = vmul.f32 %v5699_v13, %v15369_v45  ;;  %v15469_v63 = vpop.f32.mrf.mxu1 }
 0x838   : > { %v5635_v35 = vmul.f32 %v5573_v24, %v15365_v58  ;;  %v15464_v23 = vadd.f32 1.0, %v4088_v8  ;;  %v6805_v55 = vmul.f32 %v6677_v10, %v17322_v5  ;;  %v7103_v3 = vadd.f32 %v15382_v44, %v14581_v25 }
 0x839   : > { %vm6068_vm14 = vcmp.ge.f32.partialorder %v15224_v28, 0.0  ;;  %v5202_v18 = vadd.f32 -1.4531521, %v5140_v31  ;;  %v4914_v29 = vmul.f32 %v8451_v11, %v4913_v50  ;;  %vm4917_vm0 = vweird.f32 %v8451_v11  ;;  %7993 = vmatmul.msk.f32.gmra.mxu0 %vm3326_vm6, %v15408_v9 }
 0x83a   : > { %v4920_v45 = vand.u32 2147483647, %v15401_v51  ;;  %v6314_v58 = vmul.f32 %v6252_v22, %v15269_v61  ;;  %v6006_v10 = vsub.f32 1.0, %v15450_v27  ;;  %v5871_v7 = vmul.f32 1.442695, %v5760_v60  ;;  %7478 = vst [vmem:[%s14607_s14 + $0xd0] sm:$0xff] %v7103_v3  ;;  %8040 = vmatmul.msk.f32.gmra.mxu1 %vm3326_vm6, %v6805_v55  ;;  %8102 = vmatmul.msk.f32.gmra.mxu2 %vm3326_vm6, %v6805_v55 }
 0x83b   : > { %8452 = vrcp.f32 %v15464_v23  ;;  %v6253_v44 = vadd.f32 1.0, %v6191_v33  ;;  %v5264_v13 = vmul.f32 %v5202_v18, %v15452_v20  ;;  %v4915_v24 = vadd.f32 %v8451_v11, %v4914_v29  ;;  %v17323_v60 = vld [vmem:[#allocation115_spill] sm:$0xff]  ;;  %v3762_v33 = vpop.f32.mrf.mxu3  ;;  %v17324_v3 = vld [vmem:[#allocation65_spill] sm:$0xff] }
 0x83c   : > { %vm4916_vm1 = vweird.f32 %v15401_v51  ;;  %v15483_v19 = vmul.f32 %v8449_v16, %v5635_v35  ;;  %v4923_v61 = vor.u32 1.1754944e-38, %v4922_v36  ;;  %v5873_v9 = vmul.f32 1.442695, %v5761_v4 }
 0x83d   : > { %vm4918_vm10 = vmor %vm4916_vm1, %vm4917_vm0  ;;  %v15487_v22 = vmul.f32 %v3759_v34, %v17323_v60  ;;  %v5326_v37 = vadd.f32 1.4214138, %v5264_v13  ;;  %vm4921_vm9 = vcmp.eq.f32.partialorder %v4920_v45, 8.507059e+37  ;;  %v5700_v8 = vsub.f32 0.0, %v15445_v49  ;;  %v15495_v16 = vpop.f32.mrf.mxu2 }
 0x83e   : > { %v4919_v27 = vsel %vm4918_vm10, %v8451_v11, %v4915_v24  ;;  %v6130_v31 = vsub.f32 0.0, %v6006_v10  ;;  %8454 = vpow2.f32 %v5871_v7  ;;  %v6315_v36 = vmul.f32 %v6253_v44, %v15379_v43 }
 0x83f   : > { %v15490_v50 = vsel %vm4921_vm9, %v4923_v61, %v4919_v27  ;;  %v15493_v51 = vmul.f32 0.70710677, %v15487_v22  ;;  %v5388_v34 = vmul.f32 %v5326_v37, %v15452_v20  ;;  %v7306_v4 = vadd.f32 %v15419_v26, %v14619_v39  ;;  %v15508_v43 = vpop.f32.mrf.mxu1  ;;  %v17325_v37 = vld [vmem:[#allocation114_spill] sm:$0xff] }
 0x840   : > { %v5141_v11 = vmul.f32 1.0614054, %v15490_v50  ;;  %v6007_v5 = vsub.f32 1.0, %v15483_v19  ;;  %vm6069_vm13 = vcmp.ge.f32.partialorder %v15250_v40, 0.0  ;;  %8456 = vpow2.f32 %v5873_v9  ;;  %v6683_v19 = vpop.f32.mrf.mxu0 }
 0x841   : > { %v8453_v35 = vpop.eup %8452  ;;  %v15505_v55 = vand.u32 2147483647, %v15493_v51  ;;  %v6806_v18 = vmul.f32 %v6680_v53, %v17324_v3  ;;  %v5450_v29 = vadd.f32 -0.28449672, %v5388_v34  ;;  %v5762_v44 = vmul.f32 %v5700_v8, %v15445_v49  ;;  %7994 = vmatmul.msk.f32.gmra.mxu0 %vm3326_vm6, %v6314_v58  ;;  %7479 = vst [vmem:[%s14607_s14 + $0xd8] sm:$0xff] %v7306_v4  ;;  %v17326_v3 = vld [vmem:[#allocation66_spill] sm:$0xff] }
 0x842   : > { %v5203_v45 = vadd.f32 -1.4531521, %v5141_v11  ;;  %v4927_v7 = vmul.f32 %v8453_v35, %v15464_v23  ;;  %v6192_v26 = vsel %vm6068_vm14, %v6006_v10, %v6130_v31  ;;  %v4935_v13 = vand.u32 2147483647, %v15464_v23 }
 0x843   : > { %v4089_v24 = vmul.f32 0.3275911, %v15505_v55  ;;  %v7106_v53 = vadd.f32 %v15431_v41, %v14581_v25  ;;  %8041 = vmatmul.msk.f32.gmra.mxu1 %vm3326_vm6, %v6806_v18  ;;  %8103 = vmatmul.msk.f32.gmra.mxu2 %vm3326_vm6, %v6806_v18  ;;  %v5512_v49 = vmul.f32 %v5450_v29, %v15452_v20  ;;  %v4937_v28 = vand.u32 2147483648, %v15464_v23 }
 0x844   : > { %v5265_v58 = vmul.f32 %v5203_v45, %v15490_v50  ;;  %v4928_v61 = vsub.f32 1.0, %v4927_v7  ;;  %v8455_v10 = vpop.eup %8454  ;;  %v6131_v9 = vsub.f32 0.0, %v6007_v5  ;;  %v15529_v41 = vmul.f32 %v3762_v33, %v17325_v37  ;;  %v3765_v7 = vpop.f32.mrf.mxu3  ;;  %v17327_v37 = vld [vmem:[#allocation113_spill] sm:$0xff] }
 0x845   : > { %v15525_v60 = vadd.f32 1.0, %v4089_v24  ;;  %7480 = vst [vmem:[%s14607_s14 + $0xe0] sm:$0xff] %v7106_v53  ;;  %v7309_v27 = vadd.f32 %v15457_v0, %v14619_v39  ;;  %v5574_v8 = vadd.f32 0.2548296, %v5512_v49  ;;  %vm4932_vm15 = vweird.f32 %v8453_v35  ;;  %v15537_v29 = vpop.f32.mrf.mxu2 }
 0x846   : > { %v5327_v31 = vadd.f32 1.4214138, %v5265_v58  ;;  %v4929_v34 = vmul.f32 %v8453_v35, %v4928_v61  ;;  %v8457_v11 = vpop.eup %8456  ;;  %v6254_v4 = vadd.f32 1.0, %v6192_v26  ;;  %vm4931_vm2 = vweird.f32 %v15464_v23 }
 0x847   : > { %8458 = vrcp.f32 %v15525_v60  ;;  %7481 = vst [vmem:[%s14607_s14 + $0xe8] sm:$0xff] %v7309_v27  ;;  %v6807_v18 = vmul.f32 %v6683_v19, %v17326_v3  ;;  %v5636_v33 = vmul.f32 %v5574_v8, %v15452_v20  ;;  %vm4936_vm3 = vcmp.eq.f32.partialorder %v4935_v13, 8.507059e+37  ;;  %vm4933_vm5 = vmor %vm4931_vm2, %vm4932_vm15  ;;  %v15547_v19 = vpop.f32.mrf.mxu1 }
 0x848   : > { %v5389_v45 = vmul.f32 %v5327_v31, %v15490_v50  ;;  %v4930_v0 = vadd.f32 %v8453_v35, %v4929_v34  ;;  %vm6070_vm4 = vcmp.ge.f32.partialorder %v15327_v56, 0.0  ;;  %v4938_v26 = vor.u32 1.1754944e-38, %v4937_v28  ;;  %v6686_v31 = vpop.f32.mrf.mxu0 }
 0x849   : > { %v5875_v23 = vmul.f32 1.442695, %v5762_v44  ;;  %v15543_v24 = vmul.f32 0.70710677, %v15529_v41  ;;  %v7109_v53 = vadd.f32 %v15469_v63, %v14581_v25  ;;  %v6193_v20 = vsel %vm6069_vm13, %v6007_v5, %v6131_v9  ;;  %7995 = vmatmul.msk.f32.gmra.mxu0 %vm3326_vm6, %v6315_v36 }
 0x84a   : > { %v5946_v49 = vmul.f32 %v8455_v10, %v5636_v33  ;;  %v5451_v13 = vadd.f32 -0.28449672, %v5389_v45  ;;  %v4934_v58 = vsel %vm4933_vm5, %v8453_v35, %v4930_v0  ;;  %v5701_v44 = vsub.f32 0.0, %v15505_v55 }
 0x84b   : > { %v15552_v61 = vsel %vm4936_vm3, %v4938_v26, %v4934_v58  ;;  %v4028_v28 = vand.u32 2147483647, %v15543_v24  ;;  %7482 = vst [vmem:[%s14607_s14 + $0xf0] sm:$0xff] %v7109_v53  ;;  %v15558_v27 = vmul.f32 %v3765_v7, %v17327_v37  ;;  %8042 = vmatmul.msk.f32.gmra.mxu1 %vm3326_vm6, %v6807_v18  ;;  %8104 = vmatmul.msk.f32.gmra.mxu2 %vm3326_vm6, %v6807_v18  ;;  %8460 = vpow2.f32 %v5875_v23 }
 0x84c   : > { %v6008_v40 = vsub.f32 1.0, %v5946_v49  ;;  %v5513_v63 = vmul.f32 %v5451_v13, %v15490_v50  ;;  %v5142_v36 = vmul.f32 1.0614054, %v15552_v61  ;;  %v7312_v35 = vadd.f32 %v15495_v16, %v14619_v39  ;;  %v3768_v56 = vpop.f32.mrf.mxu3 }
 0x84d   : > { %v8459_v5 = vpop.eup %8458  ;;  %v6316_v10 = vmul.f32 %v6254_v4, %v15391_v30  ;;  %v4090_v9 = vmul.f32 0.3275911, %v4028_v28  ;;  %v15568_v8 = vmul.f32 0.70710677, %v15558_v27  ;;  %v6255_v45 = vadd.f32 1.0, %v6193_v20  ;;  %v15578_v30 = vpop.f32.mrf.mxu2 }
 0x84e   : > { %v6132_v34 = vsub.f32 0.0, %v6008_v40  ;;  %v5575_v3 = vadd.f32 0.2548296, %v5513_v63  ;;  %v5204_v18 = vadd.f32 -1.4531521, %v5142_v36  ;;  %v4942_v33 = vmul.f32 %v8459_v5, %v15525_v60  ;;  %7483 = vst [vmem:[%s14607_s14 + $0xf8] sm:$0xff] %v7312_v35 }
 0x84f   : > { %v5763_v0 = vmul.f32 %v5701_v44, %v15505_v55  ;;  %v15573_v7 = vadd.f32 1.0, %v4090_v9  ;;  %v15576_v16 = vand.u32 2147483647, %v15568_v8  ;;  %v4950_v53 = vand.u32 2147483647, %v15525_v60  ;;  %v15585_v20 = vpop.f32.mrf.mxu1 }
 0x850   : > { %v5637_v4 = vmul.f32 %v5575_v3, %v15490_v50  ;;  %v5266_v26 = vmul.f32 %v5204_v18, %v15552_v61  ;;  %v4943_v23 = vsub.f32 1.0, %v4942_v33  ;;  %vm4947_vm8 = vweird.f32 %v8459_v5 }
 0x851   : > { %v4952_v49 = vand.u32 2147483648, %v15525_v60  ;;  %8462 = vrcp.f32 %v15573_v7  ;;  %v5702_v55 = vsub.f32 0.0, %v4028_v28  ;;  %v6194_v13 = vsel %vm6070_vm4, %v6008_v40, %v6132_v34  ;;  %7996 = vmatmul.msk.f32.gmra.mxu0 %vm3326_vm6, %v6316_v10  ;;  %v8461_v50 = vpop.eup %8460 }
 0x852   : > { %v5947_v58 = vmul.f32 %v8457_v11, %v5637_v4  ;;  %v5328_v44 = vadd.f32 1.4214138, %v5266_v26  ;;  %v4944_v37 = vmul.f32 %v8459_v5, %v4943_v23  ;;  %v6317_v63 = vmul.f32 %v6255_v45, %v15394_v14  ;;  %v17328_v45 = vld [vmem:[#allocation67_spill] sm:$0xff] }
 0x853   : > { %vm4946_vm11 = vweird.f32 %v15525_v60  ;;  %v5877_v36 = vmul.f32 1.442695, %v5763_v0  ;;  %v4091_v35 = vmul.f32 0.3275911, %v15576_v16  ;;  %vm4951_vm7 = vcmp.eq.f32.partialorder %v4950_v53, 8.507059e+37 }
 0x854   : > { %v6009_v9 = vsub.f32 1.0, %v5947_v58  ;;  %v5390_v3 = vmul.f32 %v5328_v44, %v15552_v61  ;;  %v4945_v18 = vadd.f32 %v8459_v5, %v4944_v37  ;;  %v6256_v40 = vadd.f32 1.0, %v6194_v13  ;;  %vm4948_vm12 = vmor %vm4946_vm11, %vm4947_vm8  ;;  %v6689_v13 = vpop.f32.mrf.mxu0 }
 0x855   : > { %v4953_v11 = vor.u32 1.1754944e-38, %v4952_v49  ;;  %v5764_v34 = vmul.f32 %v5702_v55, %v4028_v28  ;;  %v15595_v10 = vadd.f32 1.0, %v4091_v35  ;;  %v4965_v60 = vand.u32 2147483647, %v15573_v7 }
 0x856   : > { %v5452_v33 = vadd.f32 -0.28449672, %v5390_v3  ;;  %v4949_v14 = vsel %vm4948_vm12, %v8459_v5, %v4945_v18  ;;  %v6808_v0 = vmul.f32 %v6686_v31, %v17328_v45  ;;  %v6133_v26 = vsub.f32 0.0, %v6009_v9  ;;  %v15609_v31 = vpop.f32.mrf.mxu2 }
 0x857   : > { %v8463_v4 = vpop.eup %8462  ;;  %v15599_v23 = vsel %vm4951_vm7, %v4953_v11, %v4949_v14  ;;  %v4967_v53 = vand.u32 2147483648, %v15573_v7  ;;  %8464 = vrcp.f32 %v15595_v10  ;;  %vm6071_vm14 = vcmp.ge.f32.partialorder %v15354_v32, 0.0  ;;  %v15620_v18 = vpop.f32.mrf.mxu1  ;;  %v17331_v11 = vld [vmem:[#allocation112_spill] sm:$0xff] }
 0x858   : > { %v5514_v28 = vmul.f32 %v5452_v33, %v15552_v61  ;;  %v5143_v49 = vmul.f32 1.0614054, %v15599_v23  ;;  %v4957_v5 = vmul.f32 %v8463_v4, %v15573_v7  ;;  %8043 = vmatmul.msk.f32.gmra.mxu1 %vm3326_vm6, %v6808_v0  ;;  %8105 = vmatmul.msk.f32.gmra.mxu2 %vm3326_vm6, %v6808_v0  ;;  %v6318_v55 = vmul.f32 %v6256_v40, %v15412_v47 }
 0x859   : > { %8466 = vpow2.f32 %v5877_v36  ;;  %vm4961_vm0 = vweird.f32 %v15573_v7  ;;  %v15613_v58 = vmul.f32 1.442695, %v5764_v34  ;;  %vm15615_vm1 = vcmp.eq.f32.partialorder %v4965_v60, 8.507059e+37  ;;  %7997 = vmatmul.msk.f32.gmra.mxu0 %vm3326_vm6, %v6317_v63 }
 0x85a   : > { %v5576_v44 = vadd.f32 0.2548296, %v5514_v28  ;;  %v5205_v37 = vadd.f32 -1.4531521, %v5143_v49  ;;  %v4958_v35 = vsub.f32 1.0, %v4957_v5  ;;  %v6195_v47 = vsel %vm6071_vm14, %v6009_v9, %v6133_v26  ;;  %v17333_v9 = vld [vmem:[#allocation71_spill] sm:$0xff]  ;;  %v3771_v28 = vpop.f32.mrf.mxu3 }
 0x85b   : > { %v4968_v36 = vor.u32 1.1754944e-38, %v4967_v53  ;;  %v7112_v40 = vadd.f32 %v15508_v43, %v14581_v25  ;;  %v15627_v34 = vmul.f32 %v3768_v56, %v17331_v11  ;;  %vm4962_vm10 = vweird.f32 %v8463_v4 }
 0x85c   : > { %v5638_v33 = vmul.f32 %v5576_v44, %v15552_v61  ;;  %v5267_v14 = vmul.f32 %v5205_v37, %v15599_v23  ;;  %v4959_v60 = vmul.f32 %v8463_v4, %v4958_v35  ;;  %vm6072_vm9 = vcmp.ge.f32.partialorder %v15440_v17, 0.0  ;;  %vm4963_vm13 = vmor %vm4961_vm0, %vm4962_vm10 }
 0x85d   : > { %17332 = vst [vmem:[#allocation43_spill] sm:$0xff] %v15627_v34  ;;  %v8465_v45 = vpop.eup %8464  ;;  %v4980_v63 = vand.u32 2147483647, %v15595_v10  ;;  %v15635_v32 = vmul.f32 0.70710677, %v15627_v34  ;;  %v7315_v43 = vadd.f32 %v15537_v29, %v14619_v39  ;;  %v6809_v56 = vmul.f32 %v6689_v13, %v17333_v9 }
 0x85e   : > { %7484 = vst [vmem:[%s14607_s14 + $0x100] sm:$0xff] %v7112_v40  ;;  %v5948_v61 = vmul.f32 %v8461_v50, %v5638_v33  ;;  %v5329_v0 = vadd.f32 1.4214138, %v5267_v14  ;;  %v4960_v26 = vadd.f32 %v8463_v4, %v4959_v60  ;;  %v4972_v53 = vmul.f32 %v8465_v45, %v15595_v10  ;;  %v6692_v33 = vpop.f32.mrf.mxu0  ;;  %v15662_v9 = vpop.f32.mrf.mxu2 }
 0x85f   : > { %v8467_v49 = vpop.eup %8466  ;;  %v6257_v5 = vadd.f32 1.0, %v6195_v47  ;;  %v4982_v44 = vand.u32 2147483648, %v15595_v10  ;;  %v5703_v37 = vsub.f32 0.0, %v15576_v16  ;;  %v15647_v29 = vand.u32 2147483647, %v15635_v32  ;;  %7485 = vst [vmem:[%s14607_s14 + $0x108] sm:$0xff] %v7315_v43 }
 0x860   : > { %v6010_v50 = vsub.f32 1.0, %v5948_v61  ;;  %v5391_v13 = vmul.f32 %v5329_v0, %v15599_v23  ;;  %v4964_v35 = vsel %vm4963_vm13, %v8463_v4, %v4960_v26  ;;  %v4973_v40 = vsub.f32 1.0, %v4972_v53  ;;  %8044 = vmatmul.msk.f32.gmra.mxu1 %vm3326_vm6, %v6809_v56  ;;  %8106 = vmatmul.msk.f32.gmra.mxu2 %vm3326_vm6, %v6809_v56  ;;  %v15676_v26 = vpop.f32.mrf.mxu1  ;;  %v17336_v53 = vld [vmem:[#allocation111_spill] sm:$0xff] }
 0x861   : > { %v15655_v7 = vsel %vm15615_vm1, %v4968_v36, %v4964_v35  ;;  %vm4977_vm15 = vweird.f32 %v8465_v45  ;;  %v4092_v47 = vmul.f32 0.3275911, %v15647_v29  ;;  %v7115_v11 = vadd.f32 %v15547_v19, %v14581_v25  ;;  %7998 = vmatmul.msk.f32.gmra.mxu0 %vm3326_vm6, %v6318_v55 }
 0x862   : > { %v6134_v14 = vsub.f32 0.0, %v6010_v50  ;;  %v5453_v60 = vadd.f32 -0.28449672, %v5391_v13  ;;  %v5144_v4 = vmul.f32 1.0614054, %v15655_v7  ;;  %v4974_v43 = vmul.f32 %v8465_v45, %v4973_v40 }
 0x863   : > { %vm4976_vm2 = vweird.f32 %v15595_v10  ;;  %vm15665_vm3 = vcmp.eq.f32.partialorder %v4980_v63, 8.507059e+37  ;;  %v15669_v36 = vadd.f32 1.0, %v4092_v47  ;;  %7486 = vst [vmem:[%s14607_s14 + $0x110] sm:$0xff] %v7115_v11  ;;  %v7318_v19 = vadd.f32 %v15578_v30, %v14619_v39  ;;  %v17338_v11 = vld [vmem:[#allocation74_spill] sm:$0xff] }
 0x864   : > { %v5515_v56 = vmul.f32 %v5453_v60, %v15599_v23  ;;  %v5206_v61 = vadd.f32 -1.4531521, %v5144_v4  ;;  %v4975_v0 = vadd.f32 %v8465_v45, %v4974_v43  ;;  %v5765_v55 = vmul.f32 %v5703_v37, %v15576_v16  ;;  %vm4978_vm4 = vmor %vm4976_vm2, %vm4977_vm15 }
 0x865   : > { %v6319_v10 = vmul.f32 %v6257_v5, %v15426_v12  ;;  %v4983_v63 = vor.u32 1.1754944e-38, %v4982_v44  ;;  %8468 = vrcp.f32 %v15669_v36  ;;  %v15682_v13 = vmul.f32 %v3771_v28, %v17336_v53  ;;  %7487 = vst [vmem:[%s14607_s14 + $0x118] sm:$0xff] %v7318_v19  ;;  %v3774_v44 = vpop.f32.mrf.mxu3 }
 0x866   : > { %v6196_v30 = vsel %vm6072_vm9, %v6010_v50, %v6134_v14  ;;  %v5577_v35 = vadd.f32 0.2548296, %v5515_v56  ;;  %v5268_v40 = vmul.f32 %v5206_v61, %v15655_v7  ;;  %v4979_v16 = vsel %vm4978_vm4, %v8465_v45, %v4975_v0  ;;  %v17339_v56 = vld [vmem:[#allocation110_spill] sm:$0xff] }
 0x867   : > { %17337 = vst [vmem:[#allocation24_spill] sm:$0xff] %v15682_v13  ;;  %v3902_v37 = vmul.f32 0.5, %v15429_v52  ;;  %vm6073_vm5 = vcmp.ge.f32.partialorder %v15493_v51, 0.0  ;;  %v15692_v12 = vsel %vm15665_vm3, %v4983_v63, %v4979_v16  ;;  %8470 = vpow2.f32 %v15613_v58  ;;  %v15719_v63 = vpop.f32.mrf.mxu2 }
 0x868   : > { %v5639_v5 = vmul.f32 %v5577_v35, %v15599_v23  ;;  %v5330_v28 = vadd.f32 1.4214138, %v5268_v40  ;;  %v5145_v17 = vmul.f32 1.0614054, %v15692_v12  ;;  %v6258_v50 = vadd.f32 1.0, %v6196_v30 }
 0x869   : > { %v5881_v47 = vmul.f32 1.442695, %v5765_v55  ;;  %v15698_v45 = vmul.f32 0.70710677, %v15682_v13  ;;  %v6810_v14 = vmul.f32 %v6692_v33, %v17338_v11  ;;  %v7118_v23 = vadd.f32 %v15585_v20, %v14581_v25  ;;  %7999 = vmatmul.msk.f32.gmra.mxu0 %vm3326_vm6, %v6319_v10  ;;  %v6695_v20 = vpop.f32.mrf.mxu0 }
 0x86a   : > { %v5949_v60 = vmul.f32 %v8467_v49, %v5639_v5  ;;  %v5392_v4 = vmul.f32 %v5330_v28, %v15655_v7  ;;  %v5207_v43 = vadd.f32 -1.4531521, %v5145_v17  ;;  %v5704_v3 = vsub.f32 0.0, %v15647_v29 }
 0x86b   : > { %v8469_v58 = vpop.eup %8468  ;;  %v15707_v19 = vand.u32 2147483647, %v15698_v45  ;;  %v15710_v61 = vmul.f32 %v3774_v44, %v17339_v56  ;;  %8045 = vmatmul.msk.f32.gmra.mxu1 %vm3326_vm6, %v6810_v14  ;;  %8107 = vmatmul.msk.f32.gmra.mxu2 %vm3326_vm6, %v6810_v14  ;;  %v7321_v49 = vadd.f32 %v15609_v31, %v14619_v39  ;;  %7488 = vst [vmem:[%s14607_s14 + $0x120] sm:$0xff] %v7118_v23  ;;  %v4995_v30 = vand.u32 2147483647, %v15669_v36  ;;  %v15726_v44 = vpop.f32.mrf.mxu1 }
 0x86c   : > { %v6011_v33 = vsub.f32 1.0, %v5949_v60  ;;  %v5454_v0 = vadd.f32 -0.28449672, %v5392_v4  ;;  %v5269_v55 = vmul.f32 %v5207_v43, %v15692_v12  ;;  %v4987_v10 = vmul.f32 %v8469_v58, %v15669_v36 }
 0x86d   : > { %17340 = vst [vmem:[#allocation16_spill] sm:$0xff] %v15710_v61  ;;  %v6320_v53 = vmul.f32 %v6258_v50, %v3902_v37  ;;  %v4997_v35 = vand.u32 2147483648, %v15669_v36  ;;  %v4093_v40 = vmul.f32 0.3275911, %v15707_v19  ;;  %v8471_v16 = vpop.eup %8470  ;;  %vm4992_vm8 = vweird.f32 %v8469_v58  ;;  %v17341_v50 = vld [vmem:[#allocation77_spill] sm:$0xff] }
 0x86e   : > { %7489 = vst [vmem:[%s14607_s14 + $0x128] sm:$0xff] %v7321_v49  ;;  %v6135_v31 = vsub.f32 0.0, %v6011_v33  ;;  %v5516_v5 = vmul.f32 %v5454_v0, %v15655_v7  ;;  %v5331_v28 = vadd.f32 1.4214138, %v5269_v55  ;;  %v4988_v17 = vsub.f32 1.0, %v4987_v10 }
 0x86f   : > { %v15728_v11 = vadd.f32 1.0, %v4093_v40  ;;  %v15731_v37 = vmul.f32 0.70710677, %v15710_v61  ;;  %v6811_v14 = vmul.f32 %v6695_v20, %v17341_v50  ;;  %v3903_v56 = vmul.f32 0.5, %v15487_v22 }
 0x870   : > { %v6197_v60 = vsel %vm6073_vm5, %v6011_v33, %v6135_v31  ;;  %v5578_v4 = vadd.f32 0.2548296, %v5516_v5  ;;  %v5393_v43 = vmul.f32 %v5331_v28, %v15692_v12  ;;  %v4989_v23 = vmul.f32 %v8469_v58, %v4988_v17  ;;  %v3777_v17 = vpop.f32.mrf.mxu3 }
 0x871   : > { %vm4991_vm11 = vweird.f32 %v15669_v36  ;;  %8472 = vrcp.f32 %v15728_v11  ;;  %v6259_v49 = vadd.f32 1.0, %v6197_v60  ;;  %8000 = vmatmul.msk.f32.gmra.mxu0 %vm3326_vm6, %v6320_v53  ;;  %v4998_v51 = vor.u32 1.1754944e-38, %v4997_v35 }
 0x872   : > { %v5640_v0 = vmul.f32 %v5578_v4, %v15655_v7  ;;  %v5455_v55 = vadd.f32 -0.28449672, %v5393_v43  ;;  %v4990_v10 = vadd.f32 %v8469_v58, %v4989_v23  ;;  %8474 = vpow2.f32 %v5881_v47  ;;  %vm4993_vm7 = vmor %vm4991_vm11, %vm4992_vm8 }
 0x873   : > { %v5766_v20 = vmul.f32 %v5704_v3, %v15647_v29  ;;  %v15745_v33 = vand.u32 2147483647, %v15731_v37  ;;  %8046 = vmatmul.msk.f32.gmra.mxu1 %vm3326_vm6, %v6811_v14  ;;  %8108 = vmatmul.msk.f32.gmra.mxu2 %vm3326_vm6, %v6811_v14  ;;  %vm4996_vm12 = vcmp.eq.f32.partialorder %v4995_v30, 8.507059e+37  ;;  %v3904_v53 = vmul.f32 0.5, %v15529_v41  ;;  %v6698_v3 = vpop.f32.mrf.mxu0 }
 0x874   : > { %v5950_v36 = vmul.f32 %v8471_v16, %v5640_v0  ;;  %v5517_v7 = vmul.f32 %v5455_v55, %v15692_v12  ;;  %v4994_v40 = vsel %vm4993_vm7, %v8469_v58, %v4990_v10  ;;  %vm6074_vm14 = vcmp.ge.f32.partialorder %v15543_v24, 0.0  ;;  %v15756_v16 = vpop.f32.mrf.mxu2  ;;  %v17342_v10 = vld [vmem:[#allocation109_spill] sm:$0xff] }
 0x875   : > { %v15752_v47 = vsel %vm4996_vm12, %v4998_v51, %v4994_v40  ;;  %v4094_v29 = vmul.f32 0.3275911, %v15745_v33  ;;  %v6321_v35 = vmul.f32 %v6259_v49, %v3903_v56  ;;  %v15759_v30 = vmul.f32 0.5, %v15558_v27  ;;  %v15767_v49 = vpop.f32.mrf.mxu1 }
 0x876   : > { %v6012_v31 = vsub.f32 1.0, %v5950_v36  ;;  %v5579_v5 = vadd.f32 0.2548296, %v5517_v7  ;;  %v5146_v28 = vmul.f32 1.0614054, %v15752_v47  ;;  %v7121_v60 = vadd.f32 %v15620_v18, %v14581_v25 }
 0x877   : > { %v8473_v58 = vpop.eup %8472  ;;  %v5883_v50 = vmul.f32 1.442695, %v5766_v20  ;;  %v15761_v14 = vadd.f32 1.0, %v4094_v29  ;;  %vm6075_vm0 = vcmp.ge.f32.partialorder %v15568_v8, 0.0  ;;  %v5010_v55 = vand.u32 2147483647, %v15728_v11 }
 0x878   : > { %v6136_v4 = vsub.f32 0.0, %v6012_v31  ;;  %v5641_v43 = vmul.f32 %v5579_v5, %v15692_v12  ;;  %v5208_v23 = vadd.f32 -1.4531521, %v5146_v28  ;;  %v5002_v56 = vmul.f32 %v8473_v58, %v15728_v11  ;;  %v8475_v0 = vpop.eup %8474  ;;  %7490 = vst [vmem:[%s14607_s14 + $0x130] sm:$0xff] %v7121_v60 }
 0x879   : > { %8476 = vrcp.f32 %v15761_v14  ;;  %v15774_v51 = vmul.f32 %v3777_v17, %v17342_v10  ;;  %8001 = vmatmul.msk.f32.gmra.mxu0 %vm3326_vm6, %v6321_v35  ;;  %v5012_v40 = vand.u32 2147483648, %v15728_v11  ;;  %v5705_v29 = vsub.f32 0.0, %v15707_v19 }
 0x87a   : > { %v6198_v18 = vsel %vm6074_vm14, %v6012_v31, %v6136_v4  ;;  %v5951_v12 = vmul.f32 %v8475_v0, %v5641_v43  ;;  %v5270_v20 = vmul.f32 %v5208_v23, %v15752_v47  ;;  %v5003_v36 = vsub.f32 1.0, %v5002_v56  ;;  %v17345_v56 = vld [vmem:[#allocation80_spill] sm:$0xff] }
 0x87b   : > { %v6260_v7 = vadd.f32 1.0, %v6198_v18  ;;  %8478 = vpow2.f32 %v5883_v50  ;;  %vm5007_vm1 = vweird.f32 %v8473_v58  ;;  %vm5006_vm10 = vweird.f32 %v15728_v11 }
 0x87c   : > { %v6013_v5 = vsub.f32 1.0, %v5951_v12  ;;  %v5332_v28 = vadd.f32 1.4214138, %v5270_v20  ;;  %v5004_v60 = vmul.f32 %v8473_v58, %v5003_v36  ;;  %vm15783_vm9 = vcmp.eq.f32.partialorder %v5010_v55, 8.507059e+37  ;;  %vm5008_vm13 = vmor %vm5006_vm10, %vm5007_vm1  ;;  %v3780_v36 = vpop.f32.mrf.mxu3 }
 0x87d   : > { %v6322_v17 = vmul.f32 %v6260_v7, %v3904_v53  ;;  %v15788_v31 = vmul.f32 0.70710677, %v15774_v51  ;;  %v7324_v43 = vadd.f32 %v15662_v9, %v14619_v39  ;;  %v5013_v53 = vor.u32 1.1754944e-38, %v5012_v40  ;;  %v15803_v7 = vpop.f32.mrf.mxu2 }
 0x87e   : > { %v6137_v35 = vsub.f32 0.0, %v6013_v5  ;;  %v5394_v50 = vmul.f32 %v5332_v28, %v15752_v47  ;;  %v5005_v4 = vadd.f32 %v8473_v58, %v5004_v60  ;;  %v6812_v0 = vmul.f32 %v6698_v3, %v17345_v56  ;;  %v6701_v10 = vpop.f32.mrf.mxu0 }
 0x87f   : > { %v8477_v23 = vpop.eup %8476  ;;  %v15794_v11 = vand.u32 2147483647, %v15788_v31  ;;  %v7124_v55 = vadd.f32 %v15676_v26, %v14581_v25  ;;  %7491 = vst [vmem:[%s14607_s14 + $0x138] sm:$0xff] %v7324_v43  ;;  %v5767_v3 = vmul.f32 %v5705_v29, %v15707_v19  ;;  %v5025_v26 = vand.u32 2147483647, %v15761_v14 }
 0x880   : > { %v6199_v18 = vsel %vm6075_vm0, %v6013_v5, %v6137_v35  ;;  %v5456_v12 = vadd.f32 -0.28449672, %v5394_v50  ;;  %v5009_v20 = vsel %vm5008_vm13, %v8473_v58, %v5005_v4  ;;  %v5017_v9 = vmul.f32 %v8477_v23, %v15761_v14  ;;  %8047 = vmatmul.msk.f32.gmra.mxu1 %vm3326_vm6, %v6812_v0  ;;  %8109 = vmatmul.msk.f32.gmra.mxu2 %vm3326_vm6, %v6812_v0  ;;  %v15818_v35 = vpop.f32.mrf.mxu1  ;;  %v17346_v50 = vld [vmem:[#allocation108_spill] sm:$0xff] }
 0x881   : > { %v8479_v40 = vpop.eup %8478  ;;  %v15807_v28 = vsel %vm15783_vm9, %v5013_v53, %v5009_v20  ;;  %v4095_v8 = vmul.f32 0.3275911, %v15794_v11  ;;  %7492 = vst [vmem:[%s14607_s14 + $0x140] sm:$0xff] %v7124_v55  ;;  %v6261_v58 = vadd.f32 1.0, %v6199_v18  ;;  %8002 = vmatmul.msk.f32.gmra.mxu0 %vm3326_vm6, %v6322_v17  ;;  %v5027_v19 = vand.u32 2147483648, %v15761_v14 }
 0x882   : > { %v5518_v5 = vmul.f32 %v5456_v12, %v15752_v47  ;;  %v5147_v60 = vmul.f32 1.0614054, %v15807_v28  ;;  %v5018_v24 = vsub.f32 1.0, %v5017_v9  ;;  %v15824_v4 = vmul.f32 %v3780_v36, %v17346_v50 }
 0x883   : > { %v15821_v29 = vadd.f32 1.0, %v4095_v8  ;;  %v7327_v43 = vadd.f32 %v15719_v63, %v14619_v39  ;;  %vm5022_vm15 = vweird.f32 %v8477_v23  ;;  %v3906_v55 = vmul.f32 0.5, %v15627_v34 }
 0x884   : > { %v5580_v53 = vadd.f32 0.2548296, %v5518_v5  ;;  %v5209_v56 = vadd.f32 -1.4531521, %v5147_v60  ;;  %v5019_v0 = vmul.f32 %v8477_v23, %v5018_v24  ;;  %vm5021_vm2 = vweird.f32 %v15761_v14 }
 0x885   : > { %8480 = vrcp.f32 %v15821_v29  ;;  %7493 = vst [vmem:[%s14607_s14 + $0x148] sm:$0xff] %v7327_v43  ;;  %v6323_v17 = vmul.f32 %v6261_v58, %v15759_v30  ;;  %vm6076_vm3 = vcmp.ge.f32.partialorder %v15635_v32, 0.0  ;;  %v5885_v63 = vmul.f32 1.442695, %v5767_v3  ;;  %vm5023_vm4 = vmor %vm5021_vm2, %vm5022_vm15  ;;  %v15841_v30 = vpop.f32.mrf.mxu2  ;;  %v17347_v3 = vld [vmem:[#allocation83_spill] sm:$0xff] }
 0x886   : > { %v5642_v18 = vmul.f32 %v5580_v53, %v15752_v47  ;;  %v5271_v12 = vmul.f32 %v5209_v56, %v15807_v28  ;;  %v5020_v20 = vadd.f32 %v8477_v23, %v5019_v0  ;;  %v5028_v9 = vor.u32 1.1754944e-38, %v5027_v19  ;;  %v15839_v8 = vpop.f32.mrf.mxu0 }
 0x887   : > { %v15837_v36 = vmul.f32 0.70710677, %v15824_v4  ;;  %vm5026_vm5 = vcmp.eq.f32.partialorder %v5025_v26, 8.507059e+37  ;;  %v5706_v58 = vsub.f32 0.0, %v15745_v33  ;;  %v6813_v19 = vmul.f32 %v6701_v10, %v17347_v3 }
 0x888   : > { %v5952_v14 = vmul.f32 %v8479_v40, %v5642_v18  ;;  %v5333_v5 = vadd.f32 1.4214138, %v5271_v12  ;;  %v5024_v60 = vsel %vm5023_vm4, %v8477_v23, %v5020_v20  ;;  %v7127_v23 = vadd.f32 %v15726_v44, %v14581_v25  ;;  %v3783_v40 = vpop.f32.mrf.mxu3  ;;  %v15855_v26 = vpop.f32.mrf.mxu1 }
 0x889   : > { %v15843_v47 = vsel %vm5026_vm5, %v5028_v9, %v5024_v60  ;;  %v15847_v24 = vand.u32 2147483647, %v15837_v36  ;;  %8003 = vmatmul.msk.f32.gmra.mxu0 %vm3326_vm6, %v6323_v17  ;;  %v15858_v0 = vmul.f32 0.5, %v15682_v13  ;;  %v15861_v10 = vmul.f32 0.5, %v15710_v61  ;;  %8048 = vmatmul.msk.f32.gmra.mxu1 %vm3326_vm6, %v6813_v19  ;;  %v17348_v60 = vld [vmem:[#allocation107_spill] sm:$0xff] }
 0x88a   : > { %v6014_v50 = vsub.f32 1.0, %v5952_v14  ;;  %v5395_v43 = vmul.f32 %v5333_v5, %v15807_v28  ;;  %v5148_v53 = vmul.f32 1.0614054, %v15843_v47  ;;  %8110 = vmatmul.msk.f32.gmra.mxu2 %vm3326_vm6, %v6813_v19  ;;  %v7330_v44 = vadd.f32 %v15756_v16, %v14619_v39  ;;  %7494 = vst [vmem:[%s14607_s14 + $0x150] sm:$0xff] %v7127_v23 }
 0x88b   : > { %v8481_v56 = vpop.eup %8480  ;;  %v4096_v18 = vmul.f32 0.3275911, %v15847_v24  ;;  %8482 = vpow2.f32 %v5885_v63  ;;  %v5768_v14 = vmul.f32 %v5706_v58, %v15745_v33  ;;  %v15874_v3 = vmul.f32 %v3783_v40, %v17348_v60 }
 0x88c   : > { %v6138_v17 = vsub.f32 0.0, %v6014_v50  ;;  %v5457_v12 = vadd.f32 -0.28449672, %v5395_v43  ;;  %v5210_v20 = vadd.f32 -1.4531521, %v5148_v53  ;;  %v5032_v9 = vmul.f32 %v8481_v56, %v15821_v29  ;;  %7495 = vst [vmem:[%s14607_s14 + $0x158] sm:$0xff] %v7330_v44 }
 0x88d   : > { %v15871_v5 = vadd.f32 1.0, %v4096_v18  ;;  %v5040_v23 = vand.u32 2147483647, %v15821_v29  ;;  %v5042_v63 = vand.u32 2147483648, %v15821_v29  ;;  %vm5037_vm8 = vweird.f32 %v8481_v56  ;;  %v15886_v32 = vpop.f32.mrf.mxu2 }
 0x88e   : > { %v6200_v19 = vsel %vm6076_vm3, %v6014_v50, %v6138_v17  ;;  %v5519_v16 = vmul.f32 %v5457_v12, %v15807_v28  ;;  %v5272_v43 = vmul.f32 %v5210_v20, %v15843_v47  ;;  %v5033_v53 = vsub.f32 1.0, %v5032_v9  ;;  %v15884_v33 = vpop.f32.mrf.mxu0 }
 0x88f   : > { %v6262_v61 = vadd.f32 1.0, %v6200_v19  ;;  %8484 = vrcp.f32 %v15871_v5  ;;  %vm6077_vm11 = vcmp.ge.f32.partialorder %v15698_v45, 0.0  ;;  %v5887_v44 = vmul.f32 1.442695, %v5768_v14 }
 0x890   : > { %v5581_v58 = vadd.f32 0.2548296, %v5519_v16  ;;  %v5334_v40 = vadd.f32 1.4214138, %v5272_v43  ;;  %v5034_v18 = vmul.f32 %v8481_v56, %v5033_v53  ;;  %v5707_v17 = vsub.f32 0.0, %v15794_v11  ;;  %v15896_v19 = vpop.f32.mrf.mxu1 }
 0x891   : > { %v6324_v50 = vmul.f32 %v6262_v61, %v3906_v55  ;;  %v15891_v12 = vmul.f32 0.70710677, %v15874_v3  ;;  %vm5036_vm7 = vweird.f32 %v15821_v29  ;;  %v8483_v16 = vpop.eup %8482  ;;  %vm5041_vm14 = vcmp.eq.f32.partialorder %v5040_v23, 8.507059e+37 }
 0x892   : > { %v5643_v20 = vmul.f32 %v5581_v58, %v15807_v28  ;;  %v5396_v9 = vmul.f32 %v5334_v40, %v15843_v47  ;;  %v5035_v60 = vadd.f32 %v8481_v56, %v5034_v18  ;;  %vm5038_vm12 = vmor %vm5036_vm7, %vm5037_vm8  ;;  %v5043_v61 = vor.u32 1.1754944e-38, %v5042_v63  ;;  %v3786_v58 = vpop.f32.mrf.mxu3 }
 0x893   : > { %v15899_v55 = vand.u32 2147483647, %v15891_v12  ;;  %v6814_v14 = vmul.f32 %v15839_v8, %v14440_v62  ;;  %8004 = vmatmul.msk.f32.gmra.mxu0 %vm3326_vm6, %v6324_v50  ;;  %v7130_v29 = vadd.f32 %v15767_v49, %v14581_v25  ;;  %8486 = vpow2.f32 %v5887_v44 }
 0x894   : > { %v5953_v28 = vmul.f32 %v8483_v16, %v5643_v20  ;;  %v5458_v43 = vadd.f32 -0.28449672, %v5396_v9  ;;  %v5039_v53 = vsel %vm5038_vm12, %v8481_v56, %v5035_v60  ;;  %v5769_v63 = vmul.f32 %v5707_v17, %v15794_v11  ;;  %v17349_v11 = vld [vmem:[#allocation106_spill] sm:$0xff] }
 0x895   : > { %v8485_v40 = vpop.eup %8484  ;;  %v15906_v23 = vsel %vm5041_vm14, %v5043_v61, %v5039_v53  ;;  %v4097_v18 = vmul.f32 0.3275911, %v15899_v55  ;;  %8049 = vmatmul.msk.f32.gmra.mxu1 %vm3326_vm6, %v6814_v14  ;;  %8111 = vmatmul.msk.f32.gmra.mxu2 %vm3326_vm6, %v6814_v14  ;;  %7496 = vst [vmem:[%s14607_s14 + $0x160] sm:$0xff] %v7130_v29  ;;  %v5055_v50 = vand.u32 2147483647, %v15871_v5  ;;  %v5708_v44 = vsub.f32 0.0, %v15847_v24 }
 0x896   : > { %v6015_v62 = vsub.f32 1.0, %v5953_v28  ;;  %v5520_v8 = vmul.f32 %v5458_v43, %v15843_v47  ;;  %v5149_v56 = vmul.f32 1.0614054, %v15906_v23  ;;  %v5047_v49 = vmul.f32 %v8485_v40, %v15871_v5  ;;  %v15923_v9 = vpop.f32.mrf.mxu0  ;;  %v15925_v28 = vpop.f32.mrf.mxu2 }
 0x897   : > { %v15918_v20 = vadd.f32 1.0, %v4097_v18  ;;  %v15921_v17 = vmul.f32 %v3786_v58, %v17349_v11  ;;  %vm6078_vm0 = vcmp.ge.f32.partialorder %v15731_v37, 0.0  ;;  %v5889_v43 = vmul.f32 1.442695, %v5769_v63 }
 0x898   : > { %v6139_v60 = vsub.f32 0.0, %v6015_v62  ;;  %v5582_v16 = vadd.f32 0.2548296, %v5520_v8  ;;  %v5211_v61 = vadd.f32 -1.4531521, %v5149_v56  ;;  %v5048_v14 = vsub.f32 1.0, %v5047_v49  ;;  %v15934_v56 = vpop.f32.mrf.mxu1 }
 0x899   : > { %vm5052_vm1 = vweird.f32 %v8485_v40  ;;  %v5057_v53 = vand.u32 2147483648, %v15871_v5  ;;  %8488 = vrcp.f32 %v15918_v20  ;;  %v8487_v49 = vpop.eup %8486  ;;  %vm5051_vm10 = vweird.f32 %v15871_v5 }
 0x89a   : > { %v6201_v29 = vsel %vm6077_vm11, %v6015_v62, %v6139_v60  ;;  %v5644_v58 = vmul.f32 %v5582_v16, %v15843_v47  ;;  %v5273_v18 = vmul.f32 %v5211_v61, %v15906_v23  ;;  %v5049_v8 = vmul.f32 %v8485_v40, %v5048_v14  ;;  %vm5053_vm13 = vmor %vm5051_vm10, %vm5052_vm1 }
 0x89b   : > { %v6263_v11 = vadd.f32 1.0, %v6201_v29  ;;  %vm15937_vm9 = vcmp.eq.f32.partialorder %v5055_v50, 8.507059e+37  ;;  %v5770_v13 = vmul.f32 %v5708_v44, %v15847_v24  ;;  %v15943_v47 = vmul.f32 0.70710677, %v15921_v17 }
 0x89c   : > { %v5954_v34 = vmul.f32 %v8487_v49, %v5644_v58  ;;  %v5335_v45 = vadd.f32 1.4214138, %v5273_v18  ;;  %v5050_v62 = vadd.f32 %v8485_v40, %v5049_v8  ;;  %v5058_v16 = vor.u32 1.1754944e-38, %v5057_v53 }
 0x89d   : > { %v6325_v60 = vmul.f32 %v6263_v11, %v15858_v0  ;;  %v7333_v5 = vadd.f32 %v15803_v7, %v14619_v39  ;;  %v6815_v50 = vmul.f32 %v15884_v33, %v14595_v21  ;;  %v15953_v14 = vand.u32 2147483647, %v15943_v47 }
 0x89e   : > { %v6016_v61 = vsub.f32 1.0, %v5954_v34  ;;  %v5397_v24 = vmul.f32 %v5335_v45, %v15906_v23  ;;  %v5054_v44 = vsel %vm5053_vm13, %v8485_v40, %v5050_v62  ;;  %8490 = vpow2.f32 %v5889_v43  ;;  %v6713_v21 = vpop.f32.mrf.mxu0  ;;  %v7344_v58 = vpop.f32.mrf.mxu2 }
 0x89f   : > { %v8489_v29 = vpop.eup %8488  ;;  %v15957_v0 = vsel %vm15937_vm9, %v5058_v16, %v5054_v44  ;;  %v5891_v53 = vmul.f32 1.442695, %v5770_v13  ;;  %7497 = vst [vmem:[%s14607_s14 + $0x168] sm:$0xff] %v7333_v5  ;;  %v7133_v7 = vadd.f32 %v15818_v35, %v14581_v25  ;;  %8050 = vmatmul.msk.f32.gmra.mxu1 %vm3326_vm6, %v6815_v50  ;;  %8112 = vmatmul.msk.f32.gmra.mxu2 %vm3326_vm6, %v6815_v50  ;;  %v5070_v13 = vand.u32 2147483647, %v15918_v20 }
 0x8a0   : > { %v6140_v34 = vsub.f32 0.0, %v6016_v61  ;;  %v5459_v33 = vadd.f32 -0.28449672, %v5397_v24  ;;  %v5150_v40 = vmul.f32 1.0614054, %v15957_v0  ;;  %v5062_v43 = vmul.f32 %v8489_v29, %v15918_v20  ;;  %8005 = vmatmul.msk.f32.gmra.mxu0 %vm3326_vm6, %v6325_v60  ;;  %v7144_v62 = vpop.f32.mrf.mxu1 }
 0x8a1   : > { %v5072_v18 = vand.u32 2147483648, %v15918_v20  ;;  %v4098_v35 = vmul.f32 0.3275911, %v15953_v14  ;;  %7498 = vst [vmem:[%s14607_s14 + $0x170] sm:$0xff] %v7133_v7  ;;  %v7336_v8 = vadd.f32 %v15841_v30, %v14619_v39  ;;  %vm5067_vm15 = vweird.f32 %v8489_v29 }
 0x8a2   : > { %v6202_v49 = vsel %vm6078_vm0, %v6016_v61, %v6140_v34  ;;  %v5521_v11 = vmul.f32 %v5459_v33, %v15906_v23  ;;  %v5212_v63 = vadd.f32 -1.4531521, %v5150_v40  ;;  %v5063_v45 = vsub.f32 1.0, %v5062_v43 }
 0x8a3   : > { %v6264_v60 = vadd.f32 1.0, %v6202_v49  ;;  %v15976_v16 = vadd.f32 1.0, %v4098_v35  ;;  %7499 = vst [vmem:[%s14607_s14 + $0x178] sm:$0xff] %v7336_v8  ;;  %v6816_v5 = vmul.f32 %v15923_v9, %v14663_v57  ;;  %v7136_v37 = vadd.f32 %v15855_v26, %v14581_v25 }
 0x8a4   : > { %v5583_v50 = vadd.f32 0.2548296, %v5521_v11  ;;  %v5274_v30 = vmul.f32 %v5212_v63, %v15957_v0  ;;  %v5064_v24 = vmul.f32 %v8489_v29, %v5063_v45  ;;  %v8491_v61 = vpop.eup %8490  ;;  %vm5066_vm2 = vweird.f32 %v15918_v20 }
 0x8a5   : > { %v6326_v44 = vmul.f32 %v6264_v60, %v15861_v10  ;;  %8492 = vrcp.f32 %v15976_v16  ;;  %7500 = vst [vmem:[%s14607_s14 + $0x180] sm:$0xff] %v7136_v37  ;;  %vm5068_vm3 = vmor %vm5066_vm2, %vm5067_vm15  ;;  %v5073_v57 = vor.u32 1.1754944e-38, %v5072_v18  ;;  %v7339_v26 = vadd.f32 %v15886_v32, %v14619_v39 }
 0x8a6   : > { %v5645_v7 = vmul.f32 %v5583_v50, %v15906_v23  ;;  %v5336_v34 = vadd.f32 1.4214138, %v5274_v30  ;;  %v5065_v33 = vadd.f32 %v8489_v29, %v5064_v24  ;;  %8494 = vpow2.f32 %v5891_v53  ;;  %v6716_v10 = vpop.f32.mrf.mxu0  ;;  %v7347_v20 = vpop.f32.mrf.mxu2 }
 0x8a7   : > { %8051 = vmatmul.msk.f32.gmra.mxu1 %vm3326_vm6, %v6816_v5  ;;  %8113 = vmatmul.msk.f32.gmra.mxu2 %vm3326_vm6, %v6816_v5  ;;  %vm5071_vm4 = vcmp.eq.f32.partialorder %v5070_v13, 8.507059e+37  ;;  %v5709_v43 = vsub.f32 0.0, %v15899_v55  ;;  %7501 = vst [vmem:[%s14607_s14 + $0x188] sm:$0xff] %v7339_v26  ;;  %v7139_v18 = vadd.f32 %v15896_v19, %v14581_v25  ;;  %v7342_v32 = vadd.f32 %v15925_v28, %v14619_v39 }
 0x8a8   : > { %v5955_v9 = vmul.f32 %v8491_v61, %v5645_v7  ;;  %v5398_v23 = vmul.f32 %v5336_v34, %v15957_v0  ;;  %v5069_v40 = vsel %vm5068_vm3, %v8489_v29, %v5065_v33  ;;  %8006 = vmatmul.msk.f32.gmra.mxu0 %vm3326_vm6, %v6326_v44  ;;  %v6817_v13 = vmul.f32 %v6713_v21, %v17309_v38 }
 0x8a9   : > { %v15996_v53 = vsel %vm5071_vm4, %v5073_v57, %v5069_v40  ;;  %7502 = vst [vmem:[%s14607_s14 + $0x190] sm:$0xff] %v7139_v18  ;;  %v7142_v11 = vadd.f32 %v15934_v56, %v14581_v25  ;;  %v7345_v63 = vadd.f32 %v7344_v58, %v14619_v39  ;;  %v7145_v19 = vadd.f32 %v7144_v62, %v14581_v25 }
 0x8aa   : > { %v6017_v35 = vsub.f32 1.0, %v5955_v9  ;;  %v5460_v8 = vadd.f32 -0.28449672, %v5398_v23  ;;  %v5151_v29 = vmul.f32 1.0614054, %v15996_v53  ;;  %v7348_v45 = vadd.f32 %v7347_v20, %v14619_v39  ;;  %7503 = vst [vmem:[%s14607_s14 + $0x198] sm:$0xff] %v7342_v32  ;;  %v7147_v38 = vpop.f32.mrf.mxu1 }
 0x8ab   : > { %v8493_v49 = vpop.eup %8492  ;;  %vm6079_vm5 = vcmp.ge.f32.partialorder %v15788_v31, 0.0  ;;  %v5771_v56 = vmul.f32 %v5709_v43, %v15899_v55  ;;  %7504 = vst [vmem:[%s14607_s14 + $0x1a0] sm:$0xff] %v7142_v11  ;;  %v7148_v58 = vadd.f32 %v7147_v38, %v14581_v25  ;;  %v3909_v61 = vmul.f32 0.5, %v15774_v51 }
 0x8ac   : > { %v6141_v28 = vsub.f32 0.0, %v6017_v35  ;;  %v5522_v60 = vmul.f32 %v5460_v8, %v15957_v0  ;;  %v5213_v5 = vadd.f32 -1.4531521, %v5151_v29  ;;  %v5077_v50 = vmul.f32 %v8493_v49, %v15976_v16  ;;  %v8495_v21 = vpop.eup %8494  ;;  %7505 = vst [vmem:[%s14607_s14 + $0x1a8] sm:$0xff] %v7345_v63 }
 0x8ad   : > { %v5085_v7 = vand.u32 2147483647, %v15976_v16  ;;  %v5087_v31 = vand.u32 2147483648, %v15976_v16  ;;  %7506 = vst [vmem:[%s14607_s14 + $0x1b0] sm:$0xff] %v7145_v19  ;;  %vm5082_vm8 = vweird.f32 %v8493_v49  ;;  %v5893_v9 = vmul.f32 1.442695, %v5771_v56 }
 0x8ae   : > { %v6203_v62 = vsel %vm6079_vm5, %v6017_v35, %v6141_v28  ;;  %v5584_v30 = vadd.f32 0.2548296, %v5522_v60  ;;  %v5275_v24 = vmul.f32 %v5213_v5, %v15996_v53  ;;  %v5078_v37 = vsub.f32 1.0, %v5077_v50  ;;  %v6719_v55 = vpop.f32.mrf.mxu0  ;;  %7507 = vst [vmem:[%s14607_s14 + $0x1b8] sm:$0xff] %v7348_v45 }
 0x8af   : > { %v6265_v44 = vadd.f32 1.0, %v6203_v62  ;;  %8052 = vmatmul.msk.f32.gmra.mxu1 %vm3326_vm6, %v6817_v13  ;;  %8114 = vmatmul.msk.f32.gmra.mxu2 %vm3326_vm6, %v6817_v13  ;;  %7508 = vst [vmem:[%s14607_s14 + $0x1c0] sm:$0xff] %v7148_v58  ;;  %vm5081_vm11 = vweird.f32 %v15976_v16  ;;  %v5088_v18 = vor.u32 1.1754944e-38, %v5087_v31  ;;  %v6818_v32 = vmul.f32 %v6716_v10, %v14863_v15 }
 0x8b0   : > { %v5646_v34 = vmul.f32 %v5584_v30, %v15957_v0  ;;  %v5337_v33 = vadd.f32 1.4214138, %v5275_v24  ;;  %v5079_v57 = vmul.f32 %v8493_v49, %v5078_v37  ;;  %v7350_v43 = vpop.f32.mrf.mxu2  ;;  %vm5083_vm7 = vmor %vm5081_vm11, %vm5082_vm8  ;;  %vm5086_vm12 = vcmp.eq.f32.partialorder %v5085_v7, 8.507059e+37 }
 0x8b1   : > { %v6327_v26 = vmul.f32 %v6265_v44, %v3909_v61  ;;  %v7351_v0 = vadd.f32 %v7350_v43, %v14619_v39  ;;  %8496 = vpow2.f32 %v5893_v9  ;;  %v5710_v11 = vsub.f32 0.0, %v15953_v14 }
 0x8b2   : > { %v5956_v23 = vmul.f32 %v8495_v21, %v5646_v34  ;;  %v5399_v40 = vmul.f32 %v5337_v33, %v15996_v53  ;;  %v5080_v20 = vadd.f32 %v8493_v49, %v5079_v57  ;;  %vm6080_vm14 = vcmp.ge.f32.partialorder %v15837_v36, 0.0 }
 0x8b3   : > { %8007 = vmatmul.msk.f32.gmra.mxu0 %vm3326_vm6, %v6327_v26  ;;  %7509 = vst [vmem:[%s14607_s14 + $0x1c8] sm:$0xff] %v7351_v0  ;;  %v3910_v60 = vmul.f32 0.5, %v15824_v4  ;;  %v5772_v50 = vmul.f32 %v5710_v11, %v15953_v14  ;;  %v6819_v62 = vmul.f32 %v6719_v55, %v14952_v48  ;;  %vm6081_vm0 = vcmp.ge.f32.partialorder %v15891_v12, 0.0 }
 0x8b4   : > { %v6018_v35 = vsub.f32 1.0, %v5956_v23  ;;  %v5461_v8 = vadd.f32 -0.28449672, %v5399_v40  ;;  %v5084_v29 = vsel %vm5083_vm7, %v8493_v49, %v5080_v20  ;;  %v3911_v26 = vmul.f32 0.5, %v15874_v3 }
 0x8b5   : > { %v5089_v13 = vsel %vm5086_vm12, %v5088_v18, %v5084_v29  ;;  %v5895_v37 = vmul.f32 1.442695, %v5772_v50  ;;  %vm6082_vm1 = vcmp.ge.f32.partialorder %v15943_v47, 0.0 }
 0x8b6   : > { %v6142_v63 = vsub.f32 0.0, %v6018_v35  ;;  %v5523_v16 = vmul.f32 %v5461_v8, %v15996_v53  ;;  %v5152_v19 = vmul.f32 1.0614054, %v5089_v13  ;;  %v6722_v15 = vpop.f32.mrf.mxu0 }
 0x8b7   : > { %8053 = vmatmul.msk.f32.gmra.mxu1 %vm3326_vm6, %v6818_v32  ;;  %8115 = vmatmul.msk.f32.gmra.mxu2 %vm3326_vm6, %v6818_v32  ;;  %v7150_v28 = vpop.f32.mrf.mxu1  ;;  %v8497_v56 = vpop.eup %8496  ;;  %8498 = vpow2.f32 %v5895_v37  ;;  %v6820_v23 = vmul.f32 %v6722_v15, %v15058_v6 }
 0x8b8   : > { %v6204_v10 = vsel %vm6080_vm14, %v6018_v35, %v6142_v63  ;;  %v5585_v49 = vadd.f32 0.2548296, %v5523_v16  ;;  %v5214_v45 = vadd.f32 -1.4531521, %v5152_v19  ;;  %v7151_v38 = vadd.f32 %v7150_v28, %v14581_v25 }
 0x8b9   : > { %v6266_v5 = vadd.f32 1.0, %v6204_v10  ;;  %v3912_v19 = vmul.f32 0.5, %v15921_v17 }
 0x8ba   : > { %v5647_v21 = vmul.f32 %v5585_v49, %v15996_v53  ;;  %v5276_v36 = vmul.f32 %v5214_v45, %v5089_v13  ;;  %7510 = vst [vmem:[%s14607_s14 + $0x1d0] sm:$0xff] %v7151_v38 }
 0x8bb   : > { %v6328_v58 = vmul.f32 %v6266_v5, %v3910_v60 }
 0x8bc   : > { %v5957_v30 = vmul.f32 %v8497_v56, %v5647_v21  ;;  %v5338_v24 = vadd.f32 1.4214138, %v5276_v36 }
 0x8bd   : > { %8008 = vmatmul.msk.f32.gmra.mxu0 %vm3326_vm6, %v6328_v58  ;;  %v7353_v7 = vpop.f32.mrf.mxu2  ;;  %v8499_v32 = vpop.eup %8498 }
 0x8be   : > { %v6019_v61 = vsub.f32 1.0, %v5957_v30  ;;  %v5400_v44 = vmul.f32 %v5338_v24, %v5089_v13  ;;  %v6725_v14 = vpop.f32.mrf.mxu0  ;;  %v7354_v53 = vadd.f32 %v7353_v7, %v14619_v39 }
 0x8bf   : > { %8054 = vmatmul.msk.f32.gmra.mxu1 %vm3326_vm6, %v6819_v62  ;;  %8116 = vmatmul.msk.f32.gmra.mxu2 %vm3326_vm6, %v6819_v62 }
 0x8c0   : > { %v6143_v31 = vsub.f32 0.0, %v6019_v61  ;;  %v5462_v48 = vadd.f32 -0.28449672, %v5400_v44  ;;  %v7153_v55 = vpop.f32.mrf.mxu1  ;;  %7511 = vst [vmem:[%s14607_s14 + $0x1d8] sm:$0xff] %v7354_v53 }
 0x8c1   : > { %v7154_v34 = vadd.f32 %v7153_v55, %v14581_v25 }
 0x8c2   : > { %v6205_v33 = vsel %vm6081_vm0, %v6019_v61, %v6143_v31  ;;  %v5524_v57 = vmul.f32 %v5462_v48, %v5089_v13 }
 0x8c3   : > { %v6267_v9 = vadd.f32 1.0, %v6205_v33  ;;  %7512 = vst [vmem:[%s14607_s14 + $0x1e0] sm:$0xff] %v7154_v34 }
 0x8c4   : > { %v5586_v40 = vadd.f32 0.2548296, %v5524_v57 }
 0x8c5   : > { %v6329_v20 = vmul.f32 %v6267_v9, %v3911_v26 }
 0x8c6   : > { %v5648_v43 = vmul.f32 %v5586_v40, %v5089_v13  ;;  %v7356_v18 = vpop.f32.mrf.mxu2  ;;  %v6728_v12 = vpop.f32.mrf.mxu0  ;;  %v6821_v13 = vmul.f32 %v6725_v14, %v15131_v46 }
 0x8c7   : > { %8009 = vmatmul.msk.f32.gmra.mxu0 %vm3326_vm6, %v6329_v20  ;;  %8055 = vmatmul.msk.f32.gmra.mxu1 %vm3326_vm6, %v6820_v23  ;;  %v7357_v0 = vadd.f32 %v7356_v18, %v14619_v39  ;;  %v6822_v46 = vmul.f32 %v6728_v12, %v15154_v59 }
 0x8c8   : > { %v5958_v35 = vmul.f32 %v8499_v32, %v5648_v43  ;;  %8117 = vmatmul.msk.f32.gmra.mxu2 %vm3326_vm6, %v6820_v23  ;;  %v7156_v8 = vpop.f32.mrf.mxu1 }
 0x8c9   : > { %7513 = vst [vmem:[%s14607_s14 + $0x1e8] sm:$0xff] %v7357_v0  ;;  %v7157_v6 = vadd.f32 %v7156_v8, %v14581_v25  ;;  %v17352_v8 = vld [vmem:[#allocation43_spill] sm:$0xff] }
 0x8ca   : > { %v6020_v29 = vsub.f32 1.0, %v5958_v35 }
 0x8cb   : > { %7514 = vst [vmem:[%s14607_s14 + $0x1f0] sm:$0xff] %v7157_v6 }
 0x8cc   : > { %v6144_v11 = vsub.f32 0.0, %v6020_v29 }
 0x8ce   : > { %v6206_v63 = vsel %vm6082_vm1, %v6020_v29, %v6144_v11  ;;  %v7359_v16 = vpop.f32.mrf.mxu2  ;;  %v6731_v10 = vpop.f32.mrf.mxu0 }
 0x8cf   : > { %v6268_v15 = vadd.f32 1.0, %v6206_v63  ;;  %8056 = vmatmul.msk.f32.gmra.mxu1 %vm3326_vm6, %v6821_v13  ;;  %v7360_v49 = vadd.f32 %v7359_v16, %v14619_v39  ;;  %v6823_v5 = vmul.f32 %v6731_v10, %v15200_v1  ;;  %v17353_v16 = vld [vmem:[#allocation24_spill] sm:$0xff] }
 0x8d0   : > { %8118 = vmatmul.msk.f32.gmra.mxu2 %vm3326_vm6, %v6821_v13 }
 0x8d1   : > { %v6330_v45 = vmul.f32 %v6268_v15, %v3912_v19  ;;  %7515 = vst [vmem:[%s14607_s14 + $0x1f8] sm:$0xff] %v7360_v49 }
 0x8d3   : > { %8010 = vmatmul.msk.f32.gmra.mxu0 %vm3326_vm6, %v6330_v45 }
 0x8d5   : > { %v7159_v47 = vpop.f32.mrf.mxu1 }
 0x8d6   : > { %v7160_v28 = vadd.f32 %v7159_v47, %v14581_v25  ;;  %v6734_v60 = vpop.f32.mrf.mxu0  ;;  %v17354_v47 = vld [vmem:[#allocation16_spill] sm:$0xff] }
 0x8d7   : > { %8057 = vmatmul.msk.f32.gmra.mxu1 %vm3326_vm6, %v6822_v46  ;;  %v6824_v56 = vmul.f32 %v6734_v60, %v15239_v54 }
 0x8d8   : > { %8119 = vmatmul.msk.f32.gmra.mxu2 %vm3326_vm6, %v6822_v46  ;;  %7516 = vst [vmem:[%s14607_s14 + $0x200] sm:$0xff] %v7160_v28 }
 0x8db   : > { %v7362_v50 = vpop.f32.mrf.mxu2 }
 0x8dc   : > { %v7363_v38 = vadd.f32 %v7362_v50, %v14619_v39 }
 0x8dd   : > { %v7162_v21 = vpop.f32.mrf.mxu1 }
 0x8de   : > { %7517 = vst [vmem:[%s14607_s14 + $0x208] sm:$0xff] %v7363_v38  ;;  %v7163_v59 = vadd.f32 %v7162_v21, %v14581_v25  ;;  %v6737_v36 = vpop.f32.mrf.mxu0 }
 0x8df   : > { %8058 = vmatmul.msk.f32.gmra.mxu1 %vm3326_vm6, %v6823_v5  ;;  %v6825_v37 = vmul.f32 %v6737_v36, %v15312_v2 }
 0x8e0   : > { %8120 = vmatmul.msk.f32.gmra.mxu2 %vm3326_vm6, %v6823_v5  ;;  %7518 = vst [vmem:[%s14607_s14 + $0x210] sm:$0xff] %v7163_v59 }
 0x8e3   : > { %v7365_v58 = vpop.f32.mrf.mxu2 }
 0x8e4   : > { %v7366_v1 = vadd.f32 %v7365_v58, %v14619_v39 }
 0x8e6   : > { %7519 = vst [vmem:[%s14607_s14 + $0x218] sm:$0xff] %v7366_v1  ;;  %v6740_v62 = vpop.f32.mrf.mxu0 }
 0x8e7   : > { %8059 = vmatmul.msk.f32.gmra.mxu1 %vm3326_vm6, %v6824_v56  ;;  %v6826_v53 = vmul.f32 %v6740_v62, %v15333_v42 }
 0x8e8   : > { %8121 = vmatmul.msk.f32.gmra.mxu2 %vm3326_vm6, %v6824_v56  ;;  %v7165_v30 = vpop.f32.mrf.mxu1 }
 0x8e9   : > { %v7166_v24 = vadd.f32 %v7165_v30, %v14581_v25 }
 0x8eb   : > { %7520 = vst [vmem:[%s14607_s14 + $0x220] sm:$0xff] %v7166_v24 }
 0x8ee   : > { %v7368_v61 = vpop.f32.mrf.mxu2  ;;  %v6743_v44 = vpop.f32.mrf.mxu0 }
 0x8ef   : > { %8060 = vmatmul.msk.f32.gmra.mxu1 %vm3326_vm6, %v6825_v37  ;;  %v7369_v54 = vadd.f32 %v7368_v61, %v14619_v39  ;;  %v6827_v55 = vmul.f32 %v6743_v44, %v15429_v52 }
 0x8f0   : > { %8122 = vmatmul.msk.f32.gmra.mxu2 %vm3326_vm6, %v6825_v37  ;;  %v7168_v7 = vpop.f32.mrf.mxu1 }
 0x8f1   : > { %7521 = vst [vmem:[%s14607_s14 + $0x228] sm:$0xff] %v7369_v54  ;;  %v7169_v14 = vadd.f32 %v7168_v7, %v14581_v25 }
 0x8f3   : > { %7522 = vst [vmem:[%s14607_s14 + $0x230] sm:$0xff] %v7169_v14 }
 0x8f6   : > { %v7371_v31 = vpop.f32.mrf.mxu2  ;;  %v6746_v48 = vpop.f32.mrf.mxu0 }
 0x8f7   : > { %8061 = vmatmul.msk.f32.gmra.mxu1 %vm3326_vm6, %v6826_v53  ;;  %v7372_v2 = vadd.f32 %v7371_v31, %v14619_v39  ;;  %v6828_v57 = vmul.f32 %v6746_v48, %v15487_v22 }
 0x8f8   : > { %8123 = vmatmul.msk.f32.gmra.mxu2 %vm3326_vm6, %v6826_v53 }
 0x8f9   : > { %7523 = vst [vmem:[%s14607_s14 + $0x238] sm:$0xff] %v7372_v2 }
 0x8fd   : > { %v7171_v34 = vpop.f32.mrf.mxu1 }
 0x8fe   : > { %v7172_v33 = vadd.f32 %v7171_v34, %v14581_v25  ;;  %v6749_v42 = vpop.f32.mrf.mxu0 }
 0x8ff   : > { %8062 = vmatmul.msk.f32.gmra.mxu1 %vm3326_vm6, %v6827_v55  ;;  %v6829_v20 = vmul.f32 %v6749_v42, %v15529_v41 }
 0x900   : > { %8124 = vmatmul.msk.f32.gmra.mxu2 %vm3326_vm6, %v6827_v55  ;;  %7524 = vst [vmem:[%s14607_s14 + $0x240] sm:$0xff] %v7172_v33 }
 0x903   : > { %v7374_v26 = vpop.f32.mrf.mxu2 }
 0x904   : > { %v7375_v9 = vadd.f32 %v7374_v26, %v14619_v39 }
 0x906   : > { %7525 = vst [vmem:[%s14607_s14 + $0x248] sm:$0xff] %v7375_v9  ;;  %v7174_v52 = vpop.f32.mrf.mxu1  ;;  %v6752_v40 = vpop.f32.mrf.mxu0 }
 0x907   : > { %8063 = vmatmul.msk.f32.gmra.mxu1 %vm3326_vm6, %v6828_v57  ;;  %v7175_v23 = vadd.f32 %v7174_v52, %v14581_v25  ;;  %v6830_v32 = vmul.f32 %v6752_v40, %v15558_v27 }
 0x908   : > { %8125 = vmatmul.msk.f32.gmra.mxu2 %vm3326_vm6, %v6828_v57 }
 0x909   : > { %7526 = vst [vmem:[%s14607_s14 + $0x250] sm:$0xff] %v7175_v23 }
 0x90d   : > { %v7377_v43 = vpop.f32.mrf.mxu2 }
 0x90e   : > { %v7378_v22 = vadd.f32 %v7377_v43, %v14619_v39 }
 0x90f   : > { %8064 = vmatmul.msk.f32.gmra.mxu1 %vm3326_vm6, %v6829_v20 }
 0x910   : > { %8126 = vmatmul.msk.f32.gmra.mxu2 %vm3326_vm6, %v6829_v20  ;;  %7527 = vst [vmem:[%s14607_s14 + $0x258] sm:$0xff] %v7378_v22  ;;  %v6755_v0 = vpop.f32.mrf.mxu0 }
 0x911   : > { %v6831_v6 = vmul.f32 %v6755_v0, %v17352_v8 }
 0x912   : > { %v7177_v18 = vpop.f32.mrf.mxu1 }
 0x913   : > { %v7178_v12 = vadd.f32 %v7177_v18, %v14581_v25 }
 0x915   : > { %7528 = vst [vmem:[%s14607_s14 + $0x260] sm:$0xff] %v7178_v12 }
 0x917   : > { %8065 = vmatmul.msk.f32.gmra.mxu1 %vm3326_vm6, %v6830_v32 }
 0x918   : > { %8127 = vmatmul.msk.f32.gmra.mxu2 %vm3326_vm6, %v6830_v32  ;;  %v7380_v41 = vpop.f32.mrf.mxu2 }
 0x919   : > { %v7381_v35 = vadd.f32 %v7380_v41, %v14619_v39 }
 0x91b   : > { %7529 = vst [vmem:[%s14607_s14 + $0x268] sm:$0xff] %v7381_v35 }
 0x91c   : > { %v7180_v29 = vpop.f32.mrf.mxu1 }
 0x91d   : > { %v7181_v13 = vadd.f32 %v7180_v29, %v14581_v25  ;;  %v6758_v27 = vpop.f32.mrf.mxu0 }
 0x91e   : > { %v6832_v19 = vmul.f32 %v6758_v27, %v17353_v16 }
 0x91f   : > { %7530 = vst [vmem:[%s14607_s14 + $0x270] sm:$0xff] %v7181_v13  ;;  %8066 = vmatmul.msk.f32.gmra.mxu1 %vm3326_vm6, %v6831_v6 }
 0x920   : > { %8128 = vmatmul.msk.f32.gmra.mxu2 %vm3326_vm6, %v6831_v6 }
 0x922   : > { %v7383_v11 = vpop.f32.mrf.mxu2 }
 0x923   : > { %v7384_v63 = vadd.f32 %v7383_v11, %v14619_v39 }
 0x924   : > { %v7183_v15 = vpop.f32.mrf.mxu1 }
 0x925   : > { %7531 = vst [vmem:[%s14607_s14 + $0x278] sm:$0xff] %v7384_v63  ;;  %v7184_v10 = vadd.f32 %v7183_v15, %v14581_v25  ;;  %v6761_v49 = vpop.f32.mrf.mxu0 }
 0x926   : > { %v6833_v28 = vmul.f32 %v6761_v49, %v17354_v47 }
 0x927   : > { %7532 = vst [vmem:[%s14607_s14 + $0x280] sm:$0xff] %v7184_v10  ;;  %8067 = vmatmul.msk.f32.gmra.mxu1 %vm3326_vm6, %v6832_v19 }
 0x928   : > { %8129 = vmatmul.msk.f32.gmra.mxu2 %vm3326_vm6, %v6832_v19 }
 0x92a   : > { %v7386_v45 = vpop.f32.mrf.mxu2 }
 0x92b   : > { %v7387_v46 = vadd.f32 %v7386_v45, %v14619_v39 }
 0x92c   : > { %v7186_v60 = vpop.f32.mrf.mxu1 }
 0x92d   : > { %7533 = vst [vmem:[%s14607_s14 + $0x288] sm:$0xff] %v7387_v46  ;;  %v7187_v5 = vadd.f32 %v7186_v60, %v14581_v25 }
 0x92f   : > { %7534 = vst [vmem:[%s14607_s14 + $0x290] sm:$0xff] %v7187_v5  ;;  %8068 = vmatmul.msk.f32.gmra.mxu1 %vm3326_vm6, %v6833_v28 }
 0x930   : > { %8130 = vmatmul.msk.f32.gmra.mxu2 %vm3326_vm6, %v6833_v28  ;;  %v6764_v50 = vpop.f32.mrf.mxu0 }
 0x931   : > { %v6834_v59 = vmul.f32 %v6764_v50, %v15774_v51 }
 0x932   : > { %v7389_v38 = vpop.f32.mrf.mxu2 }
 0x933   : > { %v7390_v21 = vadd.f32 %v7389_v38, %v14619_v39 }
 0x934   : > { %v7189_v36 = vpop.f32.mrf.mxu1 }
 0x935   : > { %7535 = vst [vmem:[%s14607_s14 + $0x298] sm:$0xff] %v7390_v21  ;;  %v7190_v56 = vadd.f32 %v7189_v36, %v14581_v25 }
 0x937   : > { %7536 = vst [vmem:[%s14607_s14 + $0x2a0] sm:$0xff] %v7190_v56  ;;  %8069 = vmatmul.msk.f32.gmra.mxu1 %vm3326_vm6, %v6834_v59 }
 0x938   : > { %8131 = vmatmul.msk.f32.gmra.mxu2 %vm3326_vm6, %v6834_v59 }
 0x93a   : > { %v7392_v58 = vpop.f32.mrf.mxu2  ;;  %v6767_v1 = vpop.f32.mrf.mxu0 }
 0x93b   : > { %v7393_v62 = vadd.f32 %v7392_v58, %v14619_v39  ;;  %v6835_v30 = vmul.f32 %v6767_v1, %v15824_v4 }
 0x93c   : > { %v7192_v24 = vpop.f32.mrf.mxu1 }
 0x93d   : > { %7537 = vst [vmem:[%s14607_s14 + $0x2a8] sm:$0xff] %v7393_v62  ;;  %v7193_v51 = vadd.f32 %v7192_v24, %v14581_v25 }
 0x93f   : > { %7538 = vst [vmem:[%s14607_s14 + $0x2b0] sm:$0xff] %v7193_v51  ;;  %8070 = vmatmul.msk.f32.gmra.mxu1 %vm3326_vm6, %v6835_v30 }
 0x940   : > { %8132 = vmatmul.msk.f32.gmra.mxu2 %vm3326_vm6, %v6835_v30 }
 0x942   : > { %v7395_v37 = vpop.f32.mrf.mxu2 }
 0x943   : > { %v7396_v61 = vadd.f32 %v7395_v37, %v14619_v39 }
 0x944   : > { %v6770_v54 = vpop.f32.mrf.mxu0  ;;  %v7195_v44 = vpop.f32.mrf.mxu1 }
 0x945   : > { %7539 = vst [vmem:[%s14607_s14 + $0x2b8] sm:$0xff] %v7396_v61  ;;  %v6836_v7 = vmul.f32 %v6770_v54, %v15874_v3  ;;  %v7196_v4 = vadd.f32 %v7195_v44, %v14581_v25 }
 0x947   : > { %7540 = vst [vmem:[%s14607_s14 + $0x2c0] sm:$0xff] %v7196_v4  ;;  %8071 = vmatmul.msk.f32.gmra.mxu1 %vm3326_vm6, %v6836_v7 }
 0x948   : > { %8133 = vmatmul.msk.f32.gmra.mxu2 %vm3326_vm6, %v6836_v7 }
 0x94b   : > { %v7398_v14 = vpop.f32.mrf.mxu2 }
 0x94c   : > { %v7399_v53 = vadd.f32 %v7398_v14, %v14619_v39  ;;  %v7198_v31 = vpop.f32.mrf.mxu1 }
 0x94d   : > { %v7199_v2 = vadd.f32 %v7198_v31, %v14581_v25 }
 0x94e   : > { %7541 = vst [vmem:[%s14607_s14 + $0x2c8] sm:$0xff] %v7399_v53 }
 0x94f   : > { %7542 = vst [vmem:[%s14607_s14 + $0x2d0] sm:$0xff] %v7199_v2 }
 0x950   : > { %v6773_v3 = vpop.f32.mrf.mxu0 }
 0x951   : > { %v6837_v48 = vmul.f32 %v6773_v3, %v15921_v17 }
 0x953   : > { %8072 = vmatmul.msk.f32.gmra.mxu1 %vm3326_vm6, %v6837_v48  ;;  %8134 = vmatmul.msk.f32.gmra.mxu2 %vm3326_vm6, %v6837_v48  ;;  %v7401_v55 = vpop.f32.mrf.mxu2 }
 0x954   : > { %v7402_v34 = vadd.f32 %v7401_v55, %v14619_v39  ;;  %v7201_v33 = vpop.f32.mrf.mxu1 }
 0x955   : > { %v7202_v42 = vadd.f32 %v7201_v33, %v14581_v25 }
 0x956   : > { %7543 = vst [vmem:[%s14607_s14 + $0x2d8] sm:$0xff] %v7402_v34 }
 0x957   : > { %7544 = vst [vmem:[%s14607_s14 + $0x2e0] sm:$0xff] %v7202_v42 }
 0x95b   : > { %v7404_v57 = vpop.f32.mrf.mxu2 }
 0x95c   : > { %v7405_v26 = vadd.f32 %v7404_v57, %v14619_v39  ;;  %v7204_v17 = vpop.f32.mrf.mxu1 }
 0x95d   : > { %v7205_v9 = vadd.f32 %v7204_v17, %v14581_v25 }
 0x95e   : > { %7545 = vst [vmem:[%s14607_s14 + $0x2e8] sm:$0xff] %v7405_v26 }
 0x95f   : > { %7546 = vst [vmem:[%s14607_s14 + $0x2f0] sm:$0xff] %v7205_v9 }
 0x963   : > { %v7407_v52 = vpop.f32.mrf.mxu2 }
 0x964   : > { %v7408_v23 = vadd.f32 %v7407_v52, %v14619_v39  ;;  %v7207_v40 = vpop.f32.mrf.mxu1 }
 0x965   : > { %v7208_v20 = vadd.f32 %v7207_v40, %v14581_v25 }
 0x966   : > { %7547 = vst [vmem:[%s14607_s14 + $0x2f8] sm:$0xff] %v7408_v23 }
 0x967   : > { %7548 = vst [vmem:[%s14607_s14 + $0x300] sm:$0xff] %v7208_v20 }
 0x96b   : > { %v7410_v43 = vpop.f32.mrf.mxu2 }
 0x96c   : > { %v7411_v22 = vadd.f32 %v7410_v43, %v14619_v39  ;;  %v7210_v18 = vpop.f32.mrf.mxu1 }
 0x96d   : > { %v7211_v32 = vadd.f32 %v7210_v18, %v14581_v25 }
 0x96e   : > { %7549 = vst [vmem:[%s14607_s14 + $0x308] sm:$0xff] %v7411_v22 }
 0x96f   : > { %7550 = vst [vmem:[%s14607_s14 + $0x310] sm:$0xff] %v7211_v32 }
 0x973   : > { %v7413_v12 = vpop.f32.mrf.mxu2 }
 0x974   : > { %v7414_v0 = vadd.f32 %v7413_v12, %v14619_v39  ;;  %v7213_v41 = vpop.f32.mrf.mxu1 }
 0x975   : > { %v7214_v35 = vadd.f32 %v7213_v41, %v14581_v25 }
 0x976   : > { %7551 = vst [vmem:[%s14607_s14 + $0x318] sm:$0xff] %v7414_v0 }
 0x977   : > { %7552 = vst [vmem:[%s14607_s14 + $0x320] sm:$0xff] %v7214_v35 }
 0x97b   : > { %v7416_v8 = vpop.f32.mrf.mxu2 }
 0x97c   : > { %v7417_v6 = vadd.f32 %v7416_v8, %v14619_v39  ;;  %v7216_v29 = vpop.f32.mrf.mxu1 }
 0x97d   : > { %v7217_v13 = vadd.f32 %v7216_v29, %v14581_v25 }
 0x97e   : > { %7553 = vst [vmem:[%s14607_s14 + $0x328] sm:$0xff] %v7417_v6 }
 0x97f   : > { %7554 = vst [vmem:[%s14607_s14 + $0x330] sm:$0xff] %v7217_v13 }
 0x983   : > { %v7419_v27 = vpop.f32.mrf.mxu2 }
 0x984   : > { %v7420_v11 = vadd.f32 %v7419_v27, %v14619_v39  ;;  %v7219_v63 = vpop.f32.mrf.mxu1 }
 0x985   : > { %v7220_v16 = vadd.f32 %v7219_v63, %v14581_v25 }
 0x986   : > { %7555 = vst [vmem:[%s14607_s14 + $0x338] sm:$0xff] %v7420_v11 }
 0x987   : > { %7556 = vst [vmem:[%s14607_s14 + $0x340] sm:$0xff] %v7220_v16 }
 0x98b   : > { %v7422_v19 = vpop.f32.mrf.mxu2 }
 0x98c   : > { %v7423_v15 = vadd.f32 %v7422_v19, %v14619_v39  ;;  %v7222_v10 = vpop.f32.mrf.mxu1 }
 0x98d   : > { %v7223_v49 = vadd.f32 %v7222_v10, %v14581_v25 }
 0x98e   : > { %7557 = vst [vmem:[%s14607_s14 + $0x348] sm:$0xff] %v7423_v15 }
 0x98f   : > { %7558 = vst [vmem:[%s14607_s14 + $0x350] sm:$0xff] %v7223_v49 }
 0x993   : > { %v7425_v45 = vpop.f32.mrf.mxu2 }
 0x994   : > { %v7426_v46 = vadd.f32 %v7425_v45, %v14619_v39  ;;  %v7225_v47 = vpop.f32.mrf.mxu1 }
 0x995   : > { %v7226_v28 = vadd.f32 %v7225_v47, %v14581_v25 }
 0x996   : > { %7559 = vst [vmem:[%s14607_s14 + $0x358] sm:$0xff] %v7426_v46 }
 0x997   : > { %7560 = vst [vmem:[%s14607_s14 + $0x360] sm:$0xff] %v7226_v28 }
 0x99b   : > { %v7428_v60 = vpop.f32.mrf.mxu2 }
 0x99c   : > { %v7429_v5 = vadd.f32 %v7428_v60, %v14619_v39  ;;  %v7228_v50 = vpop.f32.mrf.mxu1 }
 0x99d   : > { %v7229_v38 = vadd.f32 %v7228_v50, %v14581_v25 }
 0x99e   : > { %7561 = vst [vmem:[%s14607_s14 + $0x368] sm:$0xff] %v7429_v5 }
 0x99f   : > { %7562 = vst [vmem:[%s14607_s14 + $0x370] sm:$0xff] %v7229_v38 }
 0x9a3   : > { %v7431_v21 = vpop.f32.mrf.mxu2 }
 0x9a4   : > { %v7432_v59 = vadd.f32 %v7431_v21, %v14619_v39  ;;  %v7231_v36 = vpop.f32.mrf.mxu1 }
 0x9a5   : > { %v7232_v56 = vadd.f32 %v7231_v36, %v14581_v25 }
 0x9a6   : > { %7563 = vst [vmem:[%s14607_s14 + $0x378] sm:$0xff] %v7432_v59 }
 0x9a7   : > { %7564 = vst [vmem:[%s14607_s14 + $0x380] sm:$0xff] %v7232_v56 }
 0x9ab   : > { %v7434_v58 = vpop.f32.mrf.mxu2 }
 0x9ac   : > { %v7435_v1 = vadd.f32 %v7434_v58, %v14619_v39  ;;  %v7234_v62 = vpop.f32.mrf.mxu1 }
 0x9ad   : > { %v7235_v30 = vadd.f32 %v7234_v62, %v14581_v25 }
 0x9ae   : > { %7565 = vst [vmem:[%s14607_s14 + $0x388] sm:$0xff] %v7435_v1 }
 0x9af   : > { %7566 = vst [vmem:[%s14607_s14 + $0x390] sm:$0xff] %v7235_v30 }
 0x9b3   : > { %v7437_v24 = vpop.f32.mrf.mxu2 }
 0x9b4   : > { %v7438_v51 = vadd.f32 %v7437_v24, %v14619_v39  ;;  %v7237_v37 = vpop.f32.mrf.mxu1 }
 0x9b5   : > { %v7238_v61 = vadd.f32 %v7237_v37, %v14581_v25 }
 0x9b6   : > { %7567 = vst [vmem:[%s14607_s14 + $0x398] sm:$0xff] %v7438_v51 }
 0x9b7   : > { %7568 = vst [vmem:[%s14607_s14 + $0x3a0] sm:$0xff] %v7238_v61 }
 0x9bb   : > { %v7440_v54 = vpop.f32.mrf.mxu2 }
 0x9bc   : > { %v7441_v44 = vadd.f32 %v7440_v54, %v14619_v39  ;;  %v7240_v7 = vpop.f32.mrf.mxu1 }
 0x9bd   : > { %v7241_v4 = vadd.f32 %v7240_v7, %v14581_v25 }
 0x9be   : > { %7569 = vst [vmem:[%s14607_s14 + $0x3a8] sm:$0xff] %v7441_v44 }
 0x9bf   : > { %7570 = vst [vmem:[%s14607_s14 + $0x3b0] sm:$0xff] %v7241_v4 }
 0x9c3   : > { %v7443_v14 = vpop.f32.mrf.mxu2 }
 0x9c4   : > { %v7444_v53 = vadd.f32 %v7443_v14, %v14619_v39  ;;  %v7243_v31 = vpop.f32.mrf.mxu1 }
 0x9c5   : > { %v7244_v2 = vadd.f32 %v7243_v31, %v14581_v25 }
 0x9c6   : > { %7571 = vst [vmem:[%s14607_s14 + $0x3b8] sm:$0xff] %v7444_v53 }
 0x9c7   : > { %7572 = vst [vmem:[%s14607_s14 + $0x3c0] sm:$0xff] %v7244_v2 }
 0x9cb   : > { %v7446_v3 = vpop.f32.mrf.mxu2 }
 0x9cc   : > { %v7447_v48 = vadd.f32 %v7446_v3, %v14619_v39 }
 0x9ce   : > { %7573 = vst [vmem:[%s14607_s14 + $0x3c8] sm:$0xff] %v7447_v48 }
 0x9d0   : > { %v7246_v55 = vpop.f32.mrf.mxu1 }
 0x9d1   : > { %v7247_v34 = vadd.f32 %v7246_v55, %v14581_v25 }
 0x9d3   : > { %7574 = vst [vmem:[%s14607_s14 + $0x3d0] sm:$0xff] %v7247_v34 }
 0x9d6   : > { %v7449_v33 = vpop.f32.mrf.mxu2 }
 0x9d7   : > { %v7450_v42 = vadd.f32 %v7449_v33, %v14619_v39 }
 0x9d9   : > { %7575 = vst [vmem:[%s14607_s14 + $0x3d8] sm:$0xff] %v7450_v42 }
 0x9da   : > { %8558 = shalt.err (!%p8555_p7)
}
 0x9db   : > { %s8603_s27 = smov 256   ;;  %s8604_s29 = smov 16  }
 0x9dc   : > { %8197 = dma.vmem_to_hbm [thread:$0]  (%p8701_p11), %s7591_s23, 15872, %s7593_s25, %s7577_s19, %s8603_s27, %s8603_s27, %s8604_s29  }
 0x9dd PF: > { %s7607_s11 = sand.u32 1, %s8585_s30   ;;  %p8204_p8 = pnand %p7668_p9, %p8705_p12 }
 0x9de   : > { %s7608_s16 = scalar_lea.sflag [#allocation4], %s7607_s11 }
 0x9df   : > { %p8205_p10 = pneg %p8204_p8 }
 0x9e1   : > { %8580 = dma.done.wait (%p8205_p10), %s7608_s16, 15872  }
 0x9e2   : > { %8582 = vsyncadd (%p8205_p10), %s7608_s16, 4294951424  ;;  %s17356_s12 = sld [smem:[#allocation9_spill]]  ;;  %s17359_s30 = smov %s8589_s10 }
 0x9e3   : > { %s17357_s18 = sld [smem:[#allocation8_spill]] }
 0x9e4   : > { %s17358_s11 = sld [smem:[#allocation10_spill]] }
 0x9e8   : > { %p22_p0 = scmp.ge.s32.totalorder %s17356_s12, 4  }
 0x9e9   : > { %s17360_s10 = smov %s17357_s18 }
 0x9ea   :  { %24 = sbr.rel (!%p22_p0) target bundleno = 5 (0x5), region = 101 }
 0x9ef   :  { %7614 = vsyncpa [#allocation3], 1 }
 0x9f0   :  { %7616 = vsyncpa [#allocation3 + $0x1], 1 }
 0x9f1   :  { %7617 = vsyncpa [#allocation4], 1 }
 0x9f2   :  { %7619 = vsyncpa [#allocation4 + $0x1], 1 }

</bundles_post_ra>
